<compile_context>
chip_gen: v7x
topology: tpu7x:2x2x1
jax: 0.10.0
libtpu: 0.0.40
codegen_flags: <defaults>
</compile_context>

<pallas_src>
import functools

import jax
import jax.numpy as jnp
from jax import lax
from jax.experimental import pallas as pl
from jax.experimental.pallas import tpu as pltpu


# ------------------------------- helpers ------------------------------------

def _round_up(x, m):
    return ((x + m - 1) // m) * m


def _row_tile(m, stream_bytes_per_row, budget_bytes=6 << 20):
    """Largest multiple-of-8 row tile whose double-buffered streaming tiles fit
    a conservative VMEM budget (safe under v5e's 16 MiB default scoped limit)."""
    per = 2 * max(stream_bytes_per_row, 1)            # double-buffered pipeline
    tm = max(8, min(1024, budget_bytes // per))
    tm = max(8, (tm // 8) * 8)
    return min(tm, _round_up(max(m, 1), 8))


# --------------------------- fused CNN layer ---------------------------------

def _conv_relu_pool_kernel(x_ref, w_ref, b_ref, o_ref, *, kh, kw):
    """conv(k, pad=k//2) + bias + ReLU + 2x2 maxpool for one batch element.

    x_ref: (1, H+2ph, W+2pw, Cin)  bf16, spatially pre-padded
    w_ref: (kh*kw*Cin, CoutP)      bf16, CoutP lane-padded to 128
    b_ref: (1, CoutP)              f32
    o_ref: (1, H//2, W//2, CoutP)  bf16
    Patch extraction is done in-kernel with shifted tap slices accumulated on
    the MXU, so the activation is read from HBM exactly once.
    """
    _, h2, w2, coutp = o_ref.shape
    hh, ww = 2 * h2, 2 * w2
    cin = x_ref.shape[-1]

    xv = x_ref[0]                                      # (Hpad, Wpad, Cin)
    wv = w_ref[...]                                    # (kh*kw*Cin, CoutP)

    acc = None
    for di in range(kh):
        for dj in range(kw):
            tap = xv[di:di + hh, dj:dj + ww, :].reshape(hh * ww, cin)
            wslab = wv[(di * kw + dj) * cin:(di * kw + dj + 1) * cin, :]
            part = jnp.dot(tap, wslab, preferred_element_type=jnp.float32)
            acc = part if acc is None else acc + part

    # 2x2 maxpool (pool commutes with per-channel bias and ReLU)
    y = jnp.max(acc.reshape(hh, w2, 2, coutp), axis=2)        # pool along W
    y = jnp.max(y.reshape(h2, 2, w2, coutp), axis=1)          # pool along H
    y = jnp.maximum(y + b_ref[...], 0.0)                      # bias + ReLU
    o_ref[0] = y.astype(o_ref.dtype)


def conv_relu_pool(x_nhwc, w_hwio, b):
    """Fused Conv2d(k, pad=k//2) + bias + ReLU + MaxPool2d(2) in ONE pallas_call."""
    n, h, wd, cin = x_nhwc.shape
    kh, kw, _, cout = w_hwio.shape
    ph, pw = kh // 2, kw // 2
    h2, w2 = h // 2, wd // 2
    coutp = _round_up(cout, 128)                       # lane-dense output stores

    xp = jnp.pad(x_nhwc.astype(jnp.bfloat16),
                 ((0, 0), (ph, ph), (pw, pw), (0, 0)))
    w_pad = jnp.pad(w_hwio, ((0, 0), (0, 0), (0, 0), (0, coutp - cout)))
    wmat = w_pad.reshape(kh * kw * cin, coutp).astype(jnp.bfloat16)
    bp = jnp.pad(b, ((0, coutp - cout),)).astype(jnp.float32).reshape(1, coutp)

    hpad, wpad = h + 2 * ph, wd + 2 * pw
    out = pl.pallas_call(
        functools.partial(_conv_relu_pool_kernel, kh=kh, kw=kw),
        out_shape=jax.ShapeDtypeStruct((n, h2, w2, coutp), jnp.bfloat16),
        grid=(n,),
        in_specs=[pl.BlockSpec((1, hpad, wpad, cin), lambda i: (i, 0, 0, 0)),
                  pl.BlockSpec((kh * kw * cin, coutp), lambda i: (0, 0)),
                  pl.BlockSpec((1, coutp), lambda i: (0, 0))],
        out_specs=pl.BlockSpec((1, h2, w2, coutp), lambda i: (i, 0, 0, 0)),
        compiler_params=pltpu.CompilerParams(dimension_semantics=("parallel",)),
    )(xp, wmat, bp)
    # TODO(synk): for large images add a pooled-row grid axis (overlapping
    # windows) so per-step VMEM stays bounded instead of whole-image.
    return out[..., :cout]


# ------------------ fused BiLSTM (input projection + recurrence) -------------

def _bilstm_kernel(xf_ref, xb_ref, wif_ref, wib_ref, whf_ref, whb_ref,
                   bf_ref, bb_ref, of_ref, ob_ref,
                   gf_scr, gb_scr, hf_scr, cf_scr, hb_scr, cb_scr,
                   *, t_real, t_chunk, t_pad, unroll):
    """One T-chunk of the bidirectional LSTM with the gate GEMM fused in.

    xf_ref/xb_ref : (tc, N, D)  bf16  fwd chunk i / bwd chunk nk-1-i of features
    wif/wib       : (D, 4Hp)    bf16  input->gate weights (gate blocks Hp-padded)
    whf/whb       : (Hp, 4Hp)   bf16  hidden->gate weights
    bf/bb         : (1, 4Hp)    f32   fused biases (b_ih + b_hh)
    of/ob         : (tc, N, Hp) bf16  per-direction hidden outputs (lane-dense)
    Gate layout per direction: [i, f, g, o], each block Hp wide.
    """
    i = pl.program_id(0)
    nk = t_pad // t_chunk
    tc, n, d = xf_ref.shape
    hp = of_ref.shape[-1]

    @pl.when(i == 0)
    def _():
        hf_scr[...] = jnp.zeros_like(hf_scr)
        cf_scr[...] = jnp.zeros_like(cf_scr)
        hb_scr[...] = jnp.zeros_like(hb_scr)
        cb_scr[...] = jnp.zeros_like(cb_scr)

    def project(x_ref, w_ref, b_ref, t_base):
        g = jnp.dot(x_ref[...].reshape(tc * n, d), w_ref[...],
                    preferred_element_type=jnp.float32) + b_ref[...]
        g = g.reshape(tc, n, 4 * hp)
        if t_real != t_pad:      # zero gates of padded steps -> state unchanged
            t_loc = lax.broadcasted_iota(jnp.int32, (tc, 1, 1), 0)
            g = jnp.where(t_loc + t_base < t_real, g, 0.0)
        return g

    # one lane-dense chunk GEMM per direction; gates stay in VMEM scratch
    gf_scr[...] = project(xf_ref, wif_ref, bf_ref, i * t_chunk)
    gb_scr[...] = project(xb_ref, wib_ref, bb_ref, (nk - 1 - i) * t_chunk)

    whf = whf_ref[...]
    whb = whb_ref[...]

    def cell(g, c_prev):
        i_g = jax.nn.sigmoid(g[:, 0 * hp:1 * hp])
        f_g = jax.nn.sigmoid(g[:, 1 * hp:2 * hp])
        g_g = jnp.tanh(g[:, 2 * hp:3 * hp])
        o_g = jax.nn.sigmoid(g[:, 3 * hp:4 * hp])
        c_new = f_g * c_prev + i_g * g_g
        return o_g * jnp.tanh(c_new), c_new

    def step(s, carry):
        sb = tc - 1 - s
        recf = jnp.dot(hf_scr[...].astype(jnp.bfloat16), whf,
                       preferred_element_type=jnp.float32)
        recb = jnp.dot(hb_scr[...].astype(jnp.bfloat16), whb,
                       preferred_element_type=jnp.float32)
        hf, cf = cell(gf_scr[s] + recf, cf_scr[...])
        hb, cb = cell(gb_scr[sb] + recb, cb_scr[...])
        hf_scr[...] = hf
        cf_scr[...] = cf
        hb_scr[...] = hb
        cb_scr[...] = cb
        of_ref[s] = hf.astype(of_ref.dtype)
        ob_ref[sb] = hb.astype(ob_ref.dtype)
        return carry

    lax.fori_loop(0, tc, step, 0, unroll=unroll)


def bilstm(feats_tnd, wih_f, whh_f, b_f, wih_b, whh_b, b_b, *,
           t_chunk=32, unroll=4):
    """Bidirectional LSTM over time-major features (T, N, D).

    Returns per-direction hidden sequences (T, N, Hp) in bf16 (Hp = H rounded
    up to 128 lanes; padded lanes are exactly zero by construction).
    """
    t, n, d = feats_tnd.shape
    h = whh_f.shape[0]
    hp = _round_up(h, 128)

    def pad_gate_cols(w):                              # (.., 4H) -> (.., 4Hp)
        r = w.shape[0]
        return jnp.pad(w.reshape(r, 4, h),
                       ((0, 0), (0, 0), (0, hp - h))).reshape(r, 4 * hp)

    def pad_dir(wih, whh, b):
        wih_p = pad_gate_cols(wih).astype(jnp.bfloat16)               # (D, 4Hp)
        whh_p = jnp.pad(pad_gate_cols(whh),
                        ((0, hp - h), (0, 0))).astype(jnp.bfloat16)   # (Hp, 4Hp)
        b_p = jnp.pad(b.reshape(4, h), ((0, 0), (0, hp - h))
                      ).reshape(1, 4 * hp).astype(jnp.float32)
        return wih_p, whh_p, b_p

    wif, whf, bf_ = pad_dir(wih_f, whh_f, b_f)
    wib, whb, bb_ = pad_dir(wih_b, whh_b, b_b)

    tc = min(t, t_chunk)
    nk = pl.cdiv(t, tc)
    tp = nk * tc
    x = feats_tnd.astype(jnp.bfloat16)
    if tp != t:
        x = jnp.pad(x, ((0, tp - t), (0, 0), (0, 0)))

    kern = functools.partial(_bilstm_kernel, t_real=t, t_chunk=tc, t_pad=tp,
                             unroll=unroll)
    out_f, out_b = pl.pallas_call(
        kern,
        out_shape=(jax.ShapeDtypeStruct((tp, n, hp), jnp.bfloat16),
                   jax.ShapeDtypeStruct((tp, n, hp), jnp.bfloat16)),
        grid=(nk,),
        in_specs=[pl.BlockSpec((tc, n, d), lambda i: (i, 0, 0)),
                  pl.BlockSpec((tc, n, d), lambda i: (nk - 1 - i, 0, 0)),
                  pl.BlockSpec((d, 4 * hp), lambda i: (0, 0)),
                  pl.BlockSpec((d, 4 * hp), lambda i: (0, 0)),
                  pl.BlockSpec((hp, 4 * hp), lambda i: (0, 0)),
                  pl.BlockSpec((hp, 4 * hp), lambda i: (0, 0)),
                  pl.BlockSpec((1, 4 * hp), lambda i: (0, 0)),
                  pl.BlockSpec((1, 4 * hp), lambda i: (0, 0))],
        out_specs=(pl.BlockSpec((tc, n, hp), lambda i: (i, 0, 0)),
                   pl.BlockSpec((tc, n, hp), lambda i: (nk - 1 - i, 0, 0))),
        scratch_shapes=[pltpu.VMEM((tc, n, 4 * hp), jnp.float32),
                        pltpu.VMEM((tc, n, 4 * hp), jnp.float32),
                        pltpu.VMEM((n, hp), jnp.float32),
                        pltpu.VMEM((n, hp), jnp.float32),
                        pltpu.VMEM((n, hp), jnp.float32),
                        pltpu.VMEM((n, hp), jnp.float32)],
        compiler_params=pltpu.CompilerParams(
            dimension_semantics=("arbitrary",)),
    )(x, x, wif, wib, whf, whb, bf_, bb_)
    # TODO(synk): on v7x split fwd/bwd across the two TensorCores (size-2
    # parallel axis / pl.core_map) instead of interleaving them on one core.
    return out_f[:t], out_b[:t]


# --------------------------- fused 1x1-conv head ------------------------------

def _head_kernel(xf_ref, xb_ref, w1f_ref, w1b_ref, b1_ref, w2_ref, b2_ref,
                 o_ref):
    h1 = (jnp.dot(xf_ref[...], w1f_ref[...], preferred_element_type=jnp.float32)
          + jnp.dot(xb_ref[...], w1b_ref[...],
                    preferred_element_type=jnp.float32)
          + b1_ref[...])
    h1 = jnp.maximum(h1, 0.0).astype(jnp.bfloat16)               # ReLU
    o_ref[...] = (jnp.dot(h1, w2_ref[...], preferred_element_type=jnp.float32)
                  + b2_ref[...]).astype(o_ref.dtype)


def head(xf_flat, xb_flat, w1f, w1b, b1, w2, b2):
    """Both 1x1-conv head layers fused: relu(xf@w1f + xb@w1b + b1) @ w2 + b2."""
    m, hp = xf_flat.shape
    mid = w1f.shape[1]
    ncp = w2.shape[1]
    stream_bytes = 2 * hp * 2 + ncp * 4               # bf16 inputs + f32 output
    tm = _row_tile(m, stream_bytes)
    mp = _round_up(m, tm)
    if mp != m:
        xf_flat = jnp.pad(xf_flat, ((0, mp - m), (0, 0)))
        xb_flat = jnp.pad(xb_flat, ((0, mp - m), (0, 0)))
    out = pl.pallas_call(
        _head_kernel,
        out_shape=jax.ShapeDtypeStruct((mp, ncp), jnp.float32),
        grid=(mp // tm,),
        in_specs=[pl.BlockSpec((tm, hp), lambda i: (i, 0)),
                  pl.BlockSpec((tm, hp), lambda i: (i, 0)),
                  pl.BlockSpec((hp, mid), lambda i: (0, 0)),
                  pl.BlockSpec((hp, mid), lambda i: (0, 0)),
                  pl.BlockSpec((1, mid), lambda i: (0, 0)),
                  pl.BlockSpec((mid, ncp), lambda i: (0, 0)),
                  pl.BlockSpec((1, ncp), lambda i: (0, 0))],
        out_specs=pl.BlockSpec((tm, ncp), lambda i: (i, 0)),
        compiler_params=pltpu.CompilerParams(dimension_semantics=("parallel",)),
    )(xf_flat, xb_flat, w1f, w1b, b1, w2, b2)
    return out[:m]


# ------------------------------ model wrapper ---------------------------------

@functools.partial(jax.jit, static_argnames=("max_text_len",))
def lstm_text_predictor_forward(x_nchw, params, max_text_len):
    # --- CNN: fused conv + bias + relu + 2x2 maxpool per layer (bf16) --------
    x = jnp.transpose(x_nchw, (0, 2, 3, 1)).astype(jnp.bfloat16)   # NCHW->NHWC
    for w, b in params["cnn"]:
        x = conv_relu_pool(x, w, b)
    n, fh, fw, cf = x.shape

    # torch: transpose(1,3) then flatten(start_dim=2) -> (N, W', H'*C');
    # the LSTM runs over W' -> time-major (T, N, D).
    feats = jnp.transpose(x, (0, 2, 1, 3)).reshape(n, fw, fh * cf)
    feats = jnp.transpose(feats, (1, 0, 2))                        # (T, N, D)
    t_len = fw

    # --- BiLSTM: gate GEMM fused into the T-chunked recurrence kernel --------
    wih_f, whh_f, b_f = params["lstm_fwd"]
    wih_b, whh_b, b_b = params["lstm_bwd"]
    h = whh_f.shape[0]
    hpad = _round_up(h, 128)
    seq_f, seq_b = bilstm(feats, wih_f, whh_f, b_f, wih_b, whh_b, b_b)

    # --- head: two fused 1x1 convs, lane-dense weights --------------------------
    ncls = params["w2"].shape[1]
    ncls_p = _round_up(ncls, 128)
    w1f = jnp.pad(params["w1"][:h], ((0, hpad - h), (0, 0))).astype(jnp.bfloat16)
    w1b = jnp.pad(params["w1"][h:], ((0, hpad - h), (0, 0))).astype(jnp.bfloat16)
    b1 = params["b1"].reshape(1, -1).astype(jnp.float32)
    w2 = jnp.pad(params["w2"], ((0, 0), (0, ncls_p - ncls))).astype(jnp.bfloat16)
    b2 = jnp.pad(params["b2"], ((0, ncls_p - ncls),)).reshape(1, ncls_p)
    b2 = b2.astype(jnp.float32)

    xf = seq_f.reshape(t_len * n, hpad)
    xb = seq_b.reshape(t_len * n, hpad)
    logits = head(xf, xb, w1f, w1b, b1, w2, b2)                    # (T*N, Cp)
    logits = logits[:, :ncls].reshape(t_len, n, ncls)
    out = jnp.transpose(logits, (1, 0, 2))                         # (N, T, C)
    return out[:, :max_text_len, :]


# -------------------------------- reference -----------------------------------

def reference_forward(x_nchw, params, max_text_len):
    x = jnp.transpose(x_nchw, (0, 2, 3, 1)).astype(jnp.float32)
    for w, b in params["cnn"]:
        x = lax.conv_general_dilated(
            x, w, (1, 1), "SAME",
            dimension_numbers=("NHWC", "HWIO", "NHWC")) + b
        x = jax.nn.relu(x)
        x = jnp.maximum(jnp.maximum(x[:, 0::2, 0::2, :], x[:, 0::2, 1::2, :]),
                        jnp.maximum(x[:, 1::2, 0::2, :], x[:, 1::2, 1::2, :]))
    n, fh, fw, cf = x.shape
    feats = jnp.transpose(x, (0, 2, 1, 3)).reshape(n, fw, fh * cf)
    x_tnd = jnp.transpose(feats, (1, 0, 2))
    t_len = fw

    def run_dir(wih, whh, b, reverse):
        hh = whh.shape[0]
        hcur = jnp.zeros((n, hh), jnp.float32)
        c = jnp.zeros((n, hh), jnp.float32)
        outs = [None] * t_len
        order = range(t_len - 1, -1, -1) if reverse else range(t_len)
        for t in order:
            g = x_tnd[t] @ wih + hcur @ whh + b                    # (n, 4H)
            i_g = jax.nn.sigmoid(g[:, 0:hh])
            f_g = jax.nn.sigmoid(g[:, hh:2 * hh])
            g_g = jnp.tanh(g[:, 2 * hh:3 * hh])
            o_g = jax.nn.sigmoid(g[:, 3 * hh:4 * hh])
            c = f_g * c + i_g * g_g
            hcur = o_g * jnp.tanh(c)
            outs[t] = hcur
        return jnp.stack(outs, axis=0)

    hf = run_dir(*params["lstm_fwd"], reverse=False)
    hb = run_dir(*params["lstm_bwd"], reverse=True)
    seq = jnp.transpose(jnp.concatenate([hf, hb], axis=-1), (1, 0, 2))
    flat = seq.reshape(n * fw, -1)
    h1 = jax.nn.relu(flat @ params["w1"] + params["b1"])
    out = (h1 @ params["w2"] + params["b2"]).reshape(n, fw, -1)
    return out[:, :max_text_len, :]


# --------------------------------- params -------------------------------------

def init_params(key, in_ch, conv_features, kernel_sizes, pooling,
                lstm_cells, class_count, image_height):
    keys = iter(jax.random.split(key, 16))
    cnn = []
    c = in_ch
    for f, k in zip(conv_features, kernel_sizes):
        w = jax.random.normal(next(keys), (k, k, c, f), jnp.float32) * 0.1
        b = jax.random.normal(next(keys), (f,), jnp.float32) * 0.1
        cnn.append((w, b))
        c = f
    feat_h = image_height
    for p in pooling:                                  # CNN.arith(image_height)
        feat_h = feat_h // p
    d = feat_h * conv_features[-1]
    h = lstm_cells

    def lstm_dir():
        wih = jax.random.normal(next(keys), (d, 4 * h), jnp.float32) * 0.1
        whh = jax.random.normal(next(keys), (h, 4 * h), jnp.float32) * 0.1
        b = jax.random.normal(next(keys), (4 * h,), jnp.float32) * 0.1
        return (wih, whh, b)                           # bias = b_ih + b_hh folded

    return {
        "cnn": cnn,
        "lstm_fwd": lstm_dir(),
        "lstm_bwd": lstm_dir(),
        "w1": jax.random.normal(next(keys), (2 * h, 512), jnp.float32) * 0.05,
        "b1": jax.random.normal(next(keys), (512,), jnp.float32) * 0.05,
        "w2": jax.random.normal(next(keys), (512, class_count), jnp.float32) * 0.05,
        "b2": jax.random.normal(next(keys), (class_count,), jnp.float32) * 0.05,
    }


# ----------------------------------- main --------------------------------------

if __name__ == "__main__":
    key = jax.random.PRNGKey(0)
    pkey, xkey = jax.random.split(key)

    batch, in_ch, image_height, image_width = 2, 3, 16, 16
    conv_features = (4, 8)
    kernel_sizes = (3, 3)
    pooling = (2, 2)
    lstm_cells = 32
    max_text_len = 3
    class_count = 10

    params = init_params(pkey, in_ch, conv_features, kernel_sizes, pooling,
                         lstm_cells, class_count, image_height)
    x = jax.random.normal(xkey, (batch, in_ch, image_height, image_width),
                          jnp.float32)

    out = lstm_text_predictor_forward(x, params, max_text_len=max_text_len)
    out = jax.block_until_ready(out)

    assert out.shape == (batch, max_text_len, class_count), out.shape
    assert bool(jnp.all(jnp.isfinite(out)))

    ref = jax.block_until_ready(reference_forward(x, params, max_text_len))
    err = float(jnp.max(jnp.abs(out - ref)))
    assert err < 5e-2, f"kernel/reference mismatch, max abs err = {err}"

    print("KERNEL_OK")
</pallas_src>

<mosaic_0001>
module attributes {stable_mosaic.version = 11 : i64} {
  func.func @_conv_relu_pool_kernel(%arg0: i32, %arg1: memref<1x18x18x3xbf16, #tpu.memory_space<vmem>>, %arg2: memref<27x128xbf16, #tpu.memory_space<vmem>>, %arg3: memref<1x128xf32, #tpu.memory_space<vmem>>, %arg4: memref<1x8x8x128xbf16, #tpu.memory_space<vmem>>) attributes {dimension_semantics = [#tpu.dimension_semantics<parallel>], iteration_bounds = array<i64: 2>, scalar_prefetch = 0 : i64, scratch_operands = 0 : i64, tpu.core_type = #tpu.core_type<tc>, window_params = [{transform_indices = @transform_0, window_bounds = array<i64: 1, 18, 18, 3>}, {pipeline_mode = #tpu.pipeline_mode<synchronous>, transform_indices = @transform_1, window_bounds = array<i64: 27, 128>}, {pipeline_mode = #tpu.pipeline_mode<synchronous>, transform_indices = @transform_2, window_bounds = array<i64: 1, 128>}, {transform_indices = @transform_3, window_bounds = array<i64: 1, 8, 8, 128>}]} {
    %c0 = arith.constant 0 : index
    %c0_0 = arith.constant 0 : index
    %c0_1 = arith.constant 0 : index
    %c0_2 = arith.constant 0 : index
    %0 = vector.load %arg1[%c0, %c0_0, %c0_1, %c0_2] : memref<1x18x18x3xbf16, #tpu.memory_space<vmem>>, vector<1x18x18x3xbf16>
    %1 = vector.shape_cast %0 : vector<1x18x18x3xbf16> to vector<18x18x3xbf16>
    %c0_3 = arith.constant 0 : index
    %c0_4 = arith.constant 0 : index
    %2 = vector.load %arg2[%c0_3, %c0_4] : memref<27x128xbf16, #tpu.memory_space<vmem>>, vector<27x128xbf16>
    %3 = vector.extract_strided_slice %1 {offsets = [0, 0, 0], sizes = [16, 16, 3], strides = [1, 1, 1]} : vector<18x18x3xbf16> to vector<16x16x3xbf16>
    %4 = vector.shape_cast %3 : vector<16x16x3xbf16> to vector<256x3xbf16>
    %5 = vector.extract_strided_slice %2 {offsets = [0, 0], sizes = [3, 128], strides = [1, 1]} : vector<27x128xbf16> to vector<3x128xbf16>
    %cst = arith.constant dense<0.000000e+00> : vector<256x128xf32>
    %6 = tpu.matmul %4, %5, %cst {dimension_numbers = #tpu.dot_dimension_numbers<[1], [0], [0], [1], [0, 0, 1, 1], [], []>} : vector<256x3xbf16>, vector<3x128xbf16>, vector<256x128xf32> -> vector<256x128xf32>
    %7 = vector.extract_strided_slice %1 {offsets = [0, 1, 0], sizes = [16, 16, 3], strides = [1, 1, 1]} : vector<18x18x3xbf16> to vector<16x16x3xbf16>
    %8 = vector.shape_cast %7 : vector<16x16x3xbf16> to vector<256x3xbf16>
    %9 = vector.extract_strided_slice %2 {offsets = [3, 0], sizes = [3, 128], strides = [1, 1]} : vector<27x128xbf16> to vector<3x128xbf16>
    %cst_5 = arith.constant dense<0.000000e+00> : vector<256x128xf32>
    %10 = tpu.matmul %8, %9, %cst_5 {dimension_numbers = #tpu.dot_dimension_numbers<[1], [0], [0], [1], [0, 0, 1, 1], [], []>} : vector<256x3xbf16>, vector<3x128xbf16>, vector<256x128xf32> -> vector<256x128xf32>
    %11 = arith.addf %6, %10 : vector<256x128xf32>
    %12 = vector.extract_strided_slice %1 {offsets = [0, 2, 0], sizes = [16, 16, 3], strides = [1, 1, 1]} : vector<18x18x3xbf16> to vector<16x16x3xbf16>
    %13 = vector.shape_cast %12 : vector<16x16x3xbf16> to vector<256x3xbf16>
    %14 = vector.extract_strided_slice %2 {offsets = [6, 0], sizes = [3, 128], strides = [1, 1]} : vector<27x128xbf16> to vector<3x128xbf16>
    %cst_6 = arith.constant dense<0.000000e+00> : vector<256x128xf32>
    %15 = tpu.matmul %13, %14, %cst_6 {dimension_numbers = #tpu.dot_dimension_numbers<[1], [0], [0], [1], [0, 0, 1, 1], [], []>} : vector<256x3xbf16>, vector<3x128xbf16>, vector<256x128xf32> -> vector<256x128xf32>
    %16 = arith.addf %11, %15 : vector<256x128xf32>
    %17 = vector.extract_strided_slice %1 {offsets = [1, 0, 0], sizes = [16, 16, 3], strides = [1, 1, 1]} : vector<18x18x3xbf16> to vector<16x16x3xbf16>
    %18 = vector.shape_cast %17 : vector<16x16x3xbf16> to vector<256x3xbf16>
    %19 = vector.extract_strided_slice %2 {offsets = [9, 0], sizes = [3, 128], strides = [1, 1]} : vector<27x128xbf16> to vector<3x128xbf16>
    %cst_7 = arith.constant dense<0.000000e+00> : vector<256x128xf32>
    %20 = tpu.matmul %18, %19, %cst_7 {dimension_numbers = #tpu.dot_dimension_numbers<[1], [0], [0], [1], [0, 0, 1, 1], [], []>} : vector<256x3xbf16>, vector<3x128xbf16>, vector<256x128xf32> -> vector<256x128xf32>
    %21 = arith.addf %16, %20 : vector<256x128xf32>
    %22 = vector.extract_strided_slice %1 {offsets = [1, 1, 0], sizes = [16, 16, 3], strides = [1, 1, 1]} : vector<18x18x3xbf16> to vector<16x16x3xbf16>
    %23 = vector.shape_cast %22 : vector<16x16x3xbf16> to vector<256x3xbf16>
    %24 = vector.extract_strided_slice %2 {offsets = [12, 0], sizes = [3, 128], strides = [1, 1]} : vector<27x128xbf16> to vector<3x128xbf16>
    %cst_8 = arith.constant dense<0.000000e+00> : vector<256x128xf32>
    %25 = tpu.matmul %23, %24, %cst_8 {dimension_numbers = #tpu.dot_dimension_numbers<[1], [0], [0], [1], [0, 0, 1, 1], [], []>} : vector<256x3xbf16>, vector<3x128xbf16>, vector<256x128xf32> -> vector<256x128xf32>
    %26 = arith.addf %21, %25 : vector<256x128xf32>
    %27 = vector.extract_strided_slice %1 {offsets = [1, 2, 0], sizes = [16, 16, 3], strides = [1, 1, 1]} : vector<18x18x3xbf16> to vector<16x16x3xbf16>
    %28 = vector.shape_cast %27 : vector<16x16x3xbf16> to vector<256x3xbf16>
    %29 = vector.extract_strided_slice %2 {offsets = [15, 0], sizes = [3, 128], strides = [1, 1]} : vector<27x128xbf16> to vector<3x128xbf16>
    %cst_9 = arith.constant dense<0.000000e+00> : vector<256x128xf32>
    %30 = tpu.matmul %28, %29, %cst_9 {dimension_numbers = #tpu.dot_dimension_numbers<[1], [0], [0], [1], [0, 0, 1, 1], [], []>} : vector<256x3xbf16>, vector<3x128xbf16>, vector<256x128xf32> -> vector<256x128xf32>
    %31 = arith.addf %26, %30 : vector<256x128xf32>
    %32 = vector.extract_strided_slice %1 {offsets = [2, 0, 0], sizes = [16, 16, 3], strides = [1, 1, 1]} : vector<18x18x3xbf16> to vector<16x16x3xbf16>
    %33 = vector.shape_cast %32 : vector<16x16x3xbf16> to vector<256x3xbf16>
    %34 = vector.extract_strided_slice %2 {offsets = [18, 0], sizes = [3, 128], strides = [1, 1]} : vector<27x128xbf16> to vector<3x128xbf16>
    %cst_10 = arith.constant dense<0.000000e+00> : vector<256x128xf32>
    %35 = tpu.matmul %33, %34, %cst_10 {dimension_numbers = #tpu.dot_dimension_numbers<[1], [0], [0], [1], [0, 0, 1, 1], [], []>} : vector<256x3xbf16>, vector<3x128xbf16>, vector<256x128xf32> -> vector<256x128xf32>
    %36 = arith.addf %31, %35 : vector<256x128xf32>
    %37 = vector.extract_strided_slice %1 {offsets = [2, 1, 0], sizes = [16, 16, 3], strides = [1, 1, 1]} : vector<18x18x3xbf16> to vector<16x16x3xbf16>
    %38 = vector.shape_cast %37 : vector<16x16x3xbf16> to vector<256x3xbf16>
    %39 = vector.extract_strided_slice %2 {offsets = [21, 0], sizes = [3, 128], strides = [1, 1]} : vector<27x128xbf16> to vector<3x128xbf16>
    %cst_11 = arith.constant dense<0.000000e+00> : vector<256x128xf32>
    %40 = tpu.matmul %38, %39, %cst_11 {dimension_numbers = #tpu.dot_dimension_numbers<[1], [0], [0], [1], [0, 0, 1, 1], [], []>} : vector<256x3xbf16>, vector<3x128xbf16>, vector<256x128xf32> -> vector<256x128xf32>
    %41 = arith.addf %36, %40 : vector<256x128xf32>
    %42 = vector.extract_strided_slice %1 {offsets = [2, 2, 0], sizes = [16, 16, 3], strides = [1, 1, 1]} : vector<18x18x3xbf16> to vector<16x16x3xbf16>
    %43 = vector.shape_cast %42 : vector<16x16x3xbf16> to vector<256x3xbf16>
    %44 = vector.extract_strided_slice %2 {offsets = [24, 0], sizes = [3, 128], strides = [1, 1]} : vector<27x128xbf16> to vector<3x128xbf16>
    %cst_12 = arith.constant dense<0.000000e+00> : vector<256x128xf32>
    %45 = tpu.matmul %43, %44, %cst_12 {dimension_numbers = #tpu.dot_dimension_numbers<[1], [0], [0], [1], [0, 0, 1, 1], [], []>} : vector<256x3xbf16>, vector<3x128xbf16>, vector<256x128xf32> -> vector<256x128xf32>
    %46 = arith.addf %41, %45 : vector<256x128xf32>
    %47 = vector.shape_cast %46 : vector<256x128xf32> to vector<16x8x2x128xf32>
    %cst_13 = arith.constant dense<0xFF800000> : vector<16x8x128xf32>
    %48 = vector.multi_reduction <maximumf>, %47, %cst_13 [2] : vector<16x8x2x128xf32> to vector<16x8x128xf32>
    %49 = vector.shape_cast %48 : vector<16x8x128xf32> to vector<8x2x8x128xf32>
    %cst_14 = arith.constant dense<0xFF800000> : vector<8x8x128xf32>
    %50 = vector.multi_reduction <maximumf>, %49, %cst_14 [1] : vector<8x2x8x128xf32> to vector<8x8x128xf32>
    %c0_15 = arith.constant 0 : index
    %c0_16 = arith.constant 0 : index
    %51 = vector.load %arg3[%c0_15, %c0_16] : memref<1x128xf32, #tpu.memory_space<vmem>>, vector<1x128xf32>
    %52 = vector.shape_cast %51 : vector<1x128xf32> to vector<1x1x128xf32>
    %53 = vector.broadcast %52 : vector<1x1x128xf32> to vector<8x8x128xf32>
    %54 = arith.addf %50, %53 : vector<8x8x128xf32>
    %cst_17 = arith.constant 0.000000e+00 : f32
    %55 = vector.broadcast %cst_17 : f32 to vector<8x8x128xf32>
    %56 = arith.maximumf %54, %55 : vector<8x8x128xf32>
    %57 = arith.truncf %56 : vector<8x8x128xf32> to vector<8x8x128xbf16>
    %c0_18 = arith.constant 0 : index
    %c0_19 = arith.constant 0 : index
    %c0_20 = arith.constant 0 : index
    %c0_21 = arith.constant 0 : index
    %58 = vector.load %arg4[%c0_18, %c0_19, %c0_20, %c0_21] : memref<1x8x8x128xbf16, #tpu.memory_space<vmem>>, vector<1x8x8x128xbf16>
    %59 = vector.shape_cast %58 : vector<1x8x8x128xbf16> to vector<8x8x128xbf16>
    %60 = vector.shape_cast %57 : vector<8x8x128xbf16> to vector<1x8x8x128xbf16>
    tpu.vector_store %arg4[%c0_18, %c0_19, %c0_20, %c0_21], %60 {strides = array<i32>} : memref<1x8x8x128xbf16, #tpu.memory_space<vmem>>, vector<1x8x8x128xbf16>,
    return
  }
  func.func @transform_0(%arg0: i32) -> (i32, i32, i32, i32) {
    %c0_i32 = arith.constant 0 : i32
    %c0_i32_0 = arith.constant 0 : i32
    %c0_i32_1 = arith.constant 0 : i32
    %c0_i32_2 = arith.constant 0 : i32
    return %arg0, %c0_i32, %c0_i32_0, %c0_i32_1 : i32, i32, i32, i32
  }
  func.func @transform_1(%arg0: i32) -> (i32, i32) {
    %c0_i32 = arith.constant 0 : i32
    %c0_i32_0 = arith.constant 0 : i32
    %c0_i32_1 = arith.constant 0 : i32
    return %c0_i32, %c0_i32_0 : i32, i32
  }
  func.func @transform_2(%arg0: i32) -> (i32, i32) {
    %c0_i32 = arith.constant 0 : i32
    %c0_i32_0 = arith.constant 0 : i32
    %c0_i32_1 = arith.constant 0 : i32
    return %c0_i32, %c0_i32_0 : i32, i32
  }
  func.func @transform_3(%arg0: i32) -> (i32, i32, i32, i32) {
    %c0_i32 = arith.constant 0 : i32
    %c0_i32_0 = arith.constant 0 : i32
    %c0_i32_1 = arith.constant 0 : i32
    %c0_i32_2 = arith.constant 0 : i32
    return %arg0, %c0_i32, %c0_i32_0, %c0_i32_1 : i32, i32, i32, i32
  }
}

module attributes {stable_mosaic.version = 11 : i64} {
  func.func @_conv_relu_pool_kernel(%arg0: i32, %arg1: memref<1x10x10x4xbf16, #tpu.memory_space<vmem>>, %arg2: memref<36x128xbf16, #tpu.memory_space<vmem>>, %arg3: memref<1x128xf32, #tpu.memory_space<vmem>>, %arg4: memref<1x4x4x128xbf16, #tpu.memory_space<vmem>>) attributes {dimension_semantics = [#tpu.dimension_semantics<parallel>], iteration_bounds = array<i64: 2>, scalar_prefetch = 0 : i64, scratch_operands = 0 : i64, tpu.core_type = #tpu.core_type<tc>, window_params = [{transform_indices = @transform_0, window_bounds = array<i64: 1, 10, 10, 4>}, {pipeline_mode = #tpu.pipeline_mode<synchronous>, transform_indices = @transform_1, window_bounds = array<i64: 36, 128>}, {pipeline_mode = #tpu.pipeline_mode<synchronous>, transform_indices = @transform_2, window_bounds = array<i64: 1, 128>}, {transform_indices = @transform_3, window_bounds = array<i64: 1, 4, 4, 128>}]} {
    %c0 = arith.constant 0 : index
    %c0_0 = arith.constant 0 : index
    %c0_1 = arith.constant 0 : index
    %c0_2 = arith.constant 0 : index
    %0 = vector.load %arg1[%c0, %c0_0, %c0_1, %c0_2] : memref<1x10x10x4xbf16, #tpu.memory_space<vmem>>, vector<1x10x10x4xbf16>
    %1 = vector.shape_cast %0 : vector<1x10x10x4xbf16> to vector<10x10x4xbf16>
    %c0_3 = arith.constant 0 : index
    %c0_4 = arith.constant 0 : index
    %2 = vector.load %arg2[%c0_3, %c0_4] : memref<36x128xbf16, #tpu.memory_space<vmem>>, vector<36x128xbf16>
    %3 = vector.extract_strided_slice %1 {offsets = [0, 0, 0], sizes = [8, 8, 4], strides = [1, 1, 1]} : vector<10x10x4xbf16> to vector<8x8x4xbf16>
    %4 = vector.shape_cast %3 : vector<8x8x4xbf16> to vector<64x4xbf16>
    %5 = vector.extract_strided_slice %2 {offsets = [0, 0], sizes = [4, 128], strides = [1, 1]} : vector<36x128xbf16> to vector<4x128xbf16>
    %cst = arith.constant dense<0.000000e+00> : vector<64x128xf32>
    %6 = tpu.matmul %4, %5, %cst {dimension_numbers = #tpu.dot_dimension_numbers<[1], [0], [0], [1], [0, 0, 1, 1], [], []>} : vector<64x4xbf16>, vector<4x128xbf16>, vector<64x128xf32> -> vector<64x128xf32>
    %7 = vector.extract_strided_slice %1 {offsets = [0, 1, 0], sizes = [8, 8, 4], strides = [1, 1, 1]} : vector<10x10x4xbf16> to vector<8x8x4xbf16>
    %8 = vector.shape_cast %7 : vector<8x8x4xbf16> to vector<64x4xbf16>
    %9 = vector.extract_strided_slice %2 {offsets = [4, 0], sizes = [4, 128], strides = [1, 1]} : vector<36x128xbf16> to vector<4x128xbf16>
    %cst_5 = arith.constant dense<0.000000e+00> : vector<64x128xf32>
    %10 = tpu.matmul %8, %9, %cst_5 {dimension_numbers = #tpu.dot_dimension_numbers<[1], [0], [0], [1], [0, 0, 1, 1], [], []>} : vector<64x4xbf16>, vector<4x128xbf16>, vector<64x128xf32> -> vector<64x128xf32>
    %11 = arith.addf %6, %10 : vector<64x128xf32>
    %12 = vector.extract_strided_slice %1 {offsets = [0, 2, 0], sizes = [8, 8, 4], strides = [1, 1, 1]} : vector<10x10x4xbf16> to vector<8x8x4xbf16>
    %13 = vector.shape_cast %12 : vector<8x8x4xbf16> to vector<64x4xbf16>
    %14 = vector.extract_strided_slice %2 {offsets = [8, 0], sizes = [4, 128], strides = [1, 1]} : vector<36x128xbf16> to vector<4x128xbf16>
    %cst_6 = arith.constant dense<0.000000e+00> : vector<64x128xf32>
    %15 = tpu.matmul %13, %14, %cst_6 {dimension_numbers = #tpu.dot_dimension_numbers<[1], [0], [0], [1], [0, 0, 1, 1], [], []>} : vector<64x4xbf16>, vector<4x128xbf16>, vector<64x128xf32> -> vector<64x128xf32>
    %16 = arith.addf %11, %15 : vector<64x128xf32>
    %17 = vector.extract_strided_slice %1 {offsets = [1, 0, 0], sizes = [8, 8, 4], strides = [1, 1, 1]} : vector<10x10x4xbf16> to vector<8x8x4xbf16>
    %18 = vector.shape_cast %17 : vector<8x8x4xbf16> to vector<64x4xbf16>
    %19 = vector.extract_strided_slice %2 {offsets = [12, 0], sizes = [4, 128], strides = [1, 1]} : vector<36x128xbf16> to vector<4x128xbf16>
    %cst_7 = arith.constant dense<0.000000e+00> : vector<64x128xf32>
    %20 = tpu.matmul %18, %19, %cst_7 {dimension_numbers = #tpu.dot_dimension_numbers<[1], [0], [0], [1], [0, 0, 1, 1], [], []>} : vector<64x4xbf16>, vector<4x128xbf16>, vector<64x128xf32> -> vector<64x128xf32>
    %21 = arith.addf %16, %20 : vector<64x128xf32>
    %22 = vector.extract_strided_slice %1 {offsets = [1, 1, 0], sizes = [8, 8, 4], strides = [1, 1, 1]} : vector<10x10x4xbf16> to vector<8x8x4xbf16>
    %23 = vector.shape_cast %22 : vector<8x8x4xbf16> to vector<64x4xbf16>
    %24 = vector.extract_strided_slice %2 {offsets = [16, 0], sizes = [4, 128], strides = [1, 1]} : vector<36x128xbf16> to vector<4x128xbf16>
    %cst_8 = arith.constant dense<0.000000e+00> : vector<64x128xf32>
    %25 = tpu.matmul %23, %24, %cst_8 {dimension_numbers = #tpu.dot_dimension_numbers<[1], [0], [0], [1], [0, 0, 1, 1], [], []>} : vector<64x4xbf16>, vector<4x128xbf16>, vector<64x128xf32> -> vector<64x128xf32>
    %26 = arith.addf %21, %25 : vector<64x128xf32>
    %27 = vector.extract_strided_slice %1 {offsets = [1, 2, 0], sizes = [8, 8, 4], strides = [1, 1, 1]} : vector<10x10x4xbf16> to vector<8x8x4xbf16>
    %28 = vector.shape_cast %27 : vector<8x8x4xbf16> to vector<64x4xbf16>
    %29 = vector.extract_strided_slice %2 {offsets = [20, 0], sizes = [4, 128], strides = [1, 1]} : vector<36x128xbf16> to vector<4x128xbf16>
    %cst_9 = arith.constant dense<0.000000e+00> : vector<64x128xf32>
    %30 = tpu.matmul %28, %29, %cst_9 {dimension_numbers = #tpu.dot_dimension_numbers<[1], [0], [0], [1], [0, 0, 1, 1], [], []>} : vector<64x4xbf16>, vector<4x128xbf16>, vector<64x128xf32> -> vector<64x128xf32>
    %31 = arith.addf %26, %30 : vector<64x128xf32>
    %32 = vector.extract_strided_slice %1 {offsets = [2, 0, 0], sizes = [8, 8, 4], strides = [1, 1, 1]} : vector<10x10x4xbf16> to vector<8x8x4xbf16>
    %33 = vector.shape_cast %32 : vector<8x8x4xbf16> to vector<64x4xbf16>
    %34 = vector.extract_strided_slice %2 {offsets = [24, 0], sizes = [4, 128], strides = [1, 1]} : vector<36x128xbf16> to vector<4x128xbf16>
    %cst_10 = arith.constant dense<0.000000e+00> : vector<64x128xf32>
    %35 = tpu.matmul %33, %34, %cst_10 {dimension_numbers = #tpu.dot_dimension_numbers<[1], [0], [0], [1], [0, 0, 1, 1], [], []>} : vector<64x4xbf16>, vector<4x128xbf16>, vector<64x128xf32> -> vector<64x128xf32>
    %36 = arith.addf %31, %35 : vector<64x128xf32>
    %37 = vector.extract_strided_slice %1 {offsets = [2, 1, 0], sizes = [8, 8, 4], strides = [1, 1, 1]} : vector<10x10x4xbf16> to vector<8x8x4xbf16>
    %38 = vector.shape_cast %37 : vector<8x8x4xbf16> to vector<64x4xbf16>
    %39 = vector.extract_strided_slice %2 {offsets = [28, 0], sizes = [4, 128], strides = [1, 1]} : vector<36x128xbf16> to vector<4x128xbf16>
    %cst_11 = arith.constant dense<0.000000e+00> : vector<64x128xf32>
    %40 = tpu.matmul %38, %39, %cst_11 {dimension_numbers = #tpu.dot_dimension_numbers<[1], [0], [0], [1], [0, 0, 1, 1], [], []>} : vector<64x4xbf16>, vector<4x128xbf16>, vector<64x128xf32> -> vector<64x128xf32>
    %41 = arith.addf %36, %40 : vector<64x128xf32>
    %42 = vector.extract_strided_slice %1 {offsets = [2, 2, 0], sizes = [8, 8, 4], strides = [1, 1, 1]} : vector<10x10x4xbf16> to vector<8x8x4xbf16>
    %43 = vector.shape_cast %42 : vector<8x8x4xbf16> to vector<64x4xbf16>
    %44 = vector.extract_strided_slice %2 {offsets = [32, 0], sizes = [4, 128], strides = [1, 1]} : vector<36x128xbf16> to vector<4x128xbf16>
    %cst_12 = arith.constant dense<0.000000e+00> : vector<64x128xf32>
    %45 = tpu.matmul %43, %44, %cst_12 {dimension_numbers = #tpu.dot_dimension_numbers<[1], [0], [0], [1], [0, 0, 1, 1], [], []>} : vector<64x4xbf16>, vector<4x128xbf16>, vector<64x128xf32> -> vector<64x128xf32>
    %46 = arith.addf %41, %45 : vector<64x128xf32>
    %47 = vector.shape_cast %46 : vector<64x128xf32> to vector<8x4x2x128xf32>
    %cst_13 = arith.constant dense<0xFF800000> : vector<8x4x128xf32>
    %48 = vector.multi_reduction <maximumf>, %47, %cst_13 [2] : vector<8x4x2x128xf32> to vector<8x4x128xf32>
    %49 = vector.shape_cast %48 : vector<8x4x128xf32> to vector<4x2x4x128xf32>
    %cst_14 = arith.constant dense<0xFF800000> : vector<4x4x128xf32>
    %50 = vector.multi_reduction <maximumf>, %49, %cst_14 [1] : vector<4x2x4x128xf32> to vector<4x4x128xf32>
    %c0_15 = arith.constant 0 : index
    %c0_16 = arith.constant 0 : index
    %51 = vector.load %arg3[%c0_15, %c0_16] : memref<1x128xf32, #tpu.memory_space<vmem>>, vector<1x128xf32>
    %52 = vector.shape_cast %51 : vector<1x128xf32> to vector<1x1x128xf32>
    %53 = vector.broadcast %52 : vector<1x1x128xf32> to vector<4x4x128xf32>
    %54 = arith.addf %50, %53 : vector<4x4x128xf32>
    %cst_17 = arith.constant 0.000000e+00 : f32
    %55 = vector.broadcast %cst_17 : f32 to vector<4x4x128xf32>
    %56 = arith.maximumf %54, %55 : vector<4x4x128xf32>
    %57 = arith.truncf %56 : vector<4x4x128xf32> to vector<4x4x128xbf16>
    %c0_18 = arith.constant 0 : index
    %c0_19 = arith.constant 0 : index
    %c0_20 = arith.constant 0 : index
    %c0_21 = arith.constant 0 : index
    %58 = vector.load %arg4[%c0_18, %c0_19, %c0_20, %c0_21] : memref<1x4x4x128xbf16, #tpu.memory_space<vmem>>, vector<1x4x4x128xbf16>
    %59 = vector.shape_cast %58 : vector<1x4x4x128xbf16> to vector<4x4x128xbf16>
    %60 = vector.shape_cast %57 : vector<4x4x128xbf16> to vector<1x4x4x128xbf16>
    tpu.vector_store %arg4[%c0_18, %c0_19, %c0_20, %c0_21], %60 {strides = array<i32>} : memref<1x4x4x128xbf16, #tpu.memory_space<vmem>>, vector<1x4x4x128xbf16>,
    return
  }
  func.func @transform_0(%arg0: i32) -> (i32, i32, i32, i32) {
    %c0_i32 = arith.constant 0 : i32
    %c0_i32_0 = arith.constant 0 : i32
    %c0_i32_1 = arith.constant 0 : i32
    %c0_i32_2 = arith.constant 0 : i32
    return %arg0, %c0_i32, %c0_i32_0, %c0_i32_1 : i32, i32, i32, i32
  }
  func.func @transform_1(%arg0: i32) -> (i32, i32) {
    %c0_i32 = arith.constant 0 : i32
    %c0_i32_0 = arith.constant 0 : i32
    %c0_i32_1 = arith.constant 0 : i32
    return %c0_i32, %c0_i32_0 : i32, i32
  }
  func.func @transform_2(%arg0: i32) -> (i32, i32) {
    %c0_i32 = arith.constant 0 : i32
    %c0_i32_0 = arith.constant 0 : i32
    %c0_i32_1 = arith.constant 0 : i32
    return %c0_i32, %c0_i32_0 : i32, i32
  }
  func.func @transform_3(%arg0: i32) -> (i32, i32, i32, i32) {
    %c0_i32 = arith.constant 0 : i32
    %c0_i32_0 = arith.constant 0 : i32
    %c0_i32_1 = arith.constant 0 : i32
    %c0_i32_2 = arith.constant 0 : i32
    return %arg0, %c0_i32, %c0_i32_0, %c0_i32_1 : i32, i32, i32, i32
  }
}

module attributes {stable_mosaic.version = 11 : i64} {
  func.func @_bilstm_kernel(%arg0: i32, %arg1: memref<4x2x32xbf16, #tpu.memory_space<vmem>>, %arg2: memref<4x2x32xbf16, #tpu.memory_space<vmem>>, %arg3: memref<32x512xbf16, #tpu.memory_space<vmem>>, %arg4: memref<32x512xbf16, #tpu.memory_space<vmem>>, %arg5: memref<128x512xbf16, #tpu.memory_space<vmem>>, %arg6: memref<128x512xbf16, #tpu.memory_space<vmem>>, %arg7: memref<1x512xf32, #tpu.memory_space<vmem>>, %arg8: memref<1x512xf32, #tpu.memory_space<vmem>>, %arg9: memref<4x2x128xbf16, #tpu.memory_space<vmem>>, %arg10: memref<4x2x128xbf16, #tpu.memory_space<vmem>>, %arg11: memref<4x2x512xf32, #tpu.memory_space<vmem>>, %arg12: memref<4x2x512xf32, #tpu.memory_space<vmem>>, %arg13: memref<2x128xf32, #tpu.memory_space<vmem>>, %arg14: memref<2x128xf32, #tpu.memory_space<vmem>>, %arg15: memref<2x128xf32, #tpu.memory_space<vmem>>, %arg16: memref<2x128xf32, #tpu.memory_space<vmem>>) attributes {dimension_semantics = [#tpu.dimension_semantics<arbitrary>], iteration_bounds = array<i64: 1>, scalar_prefetch = 0 : i64, scratch_operands = 6 : i64, tpu.core_type = #tpu.core_type<tc>, window_params = [{transform_indices = @transform_0, window_bounds = array<i64: 4, 2, 32>}, {transform_indices = @transform_1, window_bounds = array<i64: 4, 2, 32>}, {pipeline_mode = #tpu.pipeline_mode<synchronous>, transform_indices = @transform_2, window_bounds = array<i64: 32, 512>}, {pipeline_mode = #tpu.pipeline_mode<synchronous>, transform_indices = @transform_3, window_bounds = array<i64: 32, 512>}, {pipeline_mode = #tpu.pipeline_mode<synchronous>, transform_indices = @transform_4, window_bounds = array<i64: 128, 512>}, {pipeline_mode = #tpu.pipeline_mode<synchronous>, transform_indices = @transform_5, window_bounds = array<i64: 128, 512>}, {pipeline_mode = #tpu.pipeline_mode<synchronous>, transform_indices = @transform_6, window_bounds = array<i64: 1, 512>}, {pipeline_mode = #tpu.pipeline_mode<synchronous>, transform_indices = @transform_7, window_bounds = array<i64: 1, 512>}, {transform_indices = @transform_8, window_bounds = array<i64: 4, 2, 128>}, {transform_indices = @transform_9, window_bounds = array<i64: 4, 2, 128>}]} {
    %c0_i32 = arith.constant 0 : i32
    %0 = arith.cmpi eq, %arg0, %c0_i32 : i32
    %1 = arith.extui %0 : i1 to i32
    %c0_i32_0 = arith.constant 0 : i32
    %2 = arith.cmpi ne, %1, %c0_i32_0 : i32
    scf.if %2 {
      %cst_158 = arith.constant 0.000000e+00 : f32
      %347 = vector.broadcast %cst_158 : f32 to vector<2x128xf32>
      %c0_159 = arith.constant 0 : index
      %c0_160 = arith.constant 0 : index
      %348 = vector.load %arg13[%c0_159, %c0_160] : memref<2x128xf32, #tpu.memory_space<vmem>>, vector<2x128xf32>
      tpu.vector_store %arg13[%c0_159, %c0_160], %347 {strides = array<i32>} : memref<2x128xf32, #tpu.memory_space<vmem>>, vector<2x128xf32>,
      %cst_161 = arith.constant 0.000000e+00 : f32
      %349 = vector.broadcast %cst_161 : f32 to vector<2x128xf32>
      %c0_162 = arith.constant 0 : index
      %c0_163 = arith.constant 0 : index
      %350 = vector.load %arg14[%c0_162, %c0_163] : memref<2x128xf32, #tpu.memory_space<vmem>>, vector<2x128xf32>
      tpu.vector_store %arg14[%c0_162, %c0_163], %349 {strides = array<i32>} : memref<2x128xf32, #tpu.memory_space<vmem>>, vector<2x128xf32>,
      %cst_164 = arith.constant 0.000000e+00 : f32
      %351 = vector.broadcast %cst_164 : f32 to vector<2x128xf32>
      %c0_165 = arith.constant 0 : index
      %c0_166 = arith.constant 0 : index
      %352 = vector.load %arg15[%c0_165, %c0_166] : memref<2x128xf32, #tpu.memory_space<vmem>>, vector<2x128xf32>
      tpu.vector_store %arg15[%c0_165, %c0_166], %351 {strides = array<i32>} : memref<2x128xf32, #tpu.memory_space<vmem>>, vector<2x128xf32>,
      %cst_167 = arith.constant 0.000000e+00 : f32
      %353 = vector.broadcast %cst_167 : f32 to vector<2x128xf32>
      %c0_168 = arith.constant 0 : index
      %c0_169 = arith.constant 0 : index
      %354 = vector.load %arg16[%c0_168, %c0_169] : memref<2x128xf32, #tpu.memory_space<vmem>>, vector<2x128xf32>
      tpu.vector_store %arg16[%c0_168, %c0_169], %353 {strides = array<i32>} : memref<2x128xf32, #tpu.memory_space<vmem>>, vector<2x128xf32>,
    } else {
    }
    %c0 = arith.constant 0 : index
    %c0_1 = arith.constant 0 : index
    %c0_2 = arith.constant 0 : index
    %3 = vector.load %arg1[%c0, %c0_1, %c0_2] : memref<4x2x32xbf16, #tpu.memory_space<vmem>>, vector<4x2x32xbf16>
    %4 = vector.shape_cast %3 : vector<4x2x32xbf16> to vector<8x32xbf16>
    %c0_3 = arith.constant 0 : index
    %c0_4 = arith.constant 0 : index
    %5 = vector.load %arg3[%c0_3, %c0_4] : memref<32x512xbf16, #tpu.memory_space<vmem>>, vector<32x512xbf16>
    %cst = arith.constant dense<0.000000e+00> : vector<8x512xf32>
    %6 = tpu.matmul %4, %5, %cst {dimension_numbers = #tpu.dot_dimension_numbers<[1], [0], [0], [1], [0, 0, 1, 1], [], []>} : vector<8x32xbf16>, vector<32x512xbf16>, vector<8x512xf32> -> vector<8x512xf32>
    %c0_5 = arith.constant 0 : index
    %c0_6 = arith.constant 0 : index
    %7 = vector.load %arg7[%c0_5, %c0_6] : memref<1x512xf32, #tpu.memory_space<vmem>>, vector<1x512xf32>
    %8 = vector.broadcast %7 : vector<1x512xf32> to vector<8x512xf32>
    %9 = arith.addf %6, %8 : vector<8x512xf32>
    %10 = vector.shape_cast %9 : vector<8x512xf32> to vector<4x2x512xf32>
    %c0_7 = arith.constant 0 : index
    %c0_8 = arith.constant 0 : index
    %c0_9 = arith.constant 0 : index
    %11 = vector.load %arg11[%c0_7, %c0_8, %c0_9] : memref<4x2x512xf32, #tpu.memory_space<vmem>>, vector<4x2x512xf32>
    tpu.vector_store %arg11[%c0_7, %c0_8, %c0_9], %10 {strides = array<i32>} : memref<4x2x512xf32, #tpu.memory_space<vmem>>, vector<4x2x512xf32>,
    %c0_10 = arith.constant 0 : index
    %c0_11 = arith.constant 0 : index
    %c0_12 = arith.constant 0 : index
    %12 = vector.load %arg2[%c0_10, %c0_11, %c0_12] : memref<4x2x32xbf16, #tpu.memory_space<vmem>>, vector<4x2x32xbf16>
    %13 = vector.shape_cast %12 : vector<4x2x32xbf16> to vector<8x32xbf16>
    %c0_13 = arith.constant 0 : index
    %c0_14 = arith.constant 0 : index
    %14 = vector.load %arg4[%c0_13, %c0_14] : memref<32x512xbf16, #tpu.memory_space<vmem>>, vector<32x512xbf16>
    %cst_15 = arith.constant dense<0.000000e+00> : vector<8x512xf32>
    %15 = tpu.matmul %13, %14, %cst_15 {dimension_numbers = #tpu.dot_dimension_numbers<[1], [0], [0], [1], [0, 0, 1, 1], [], []>} : vector<8x32xbf16>, vector<32x512xbf16>, vector<8x512xf32> -> vector<8x512xf32>
    %c0_16 = arith.constant 0 : index
    %c0_17 = arith.constant 0 : index
    %16 = vector.load %arg8[%c0_16, %c0_17] : memref<1x512xf32, #tpu.memory_space<vmem>>, vector<1x512xf32>
    %17 = vector.broadcast %16 : vector<1x512xf32> to vector<8x512xf32>
    %18 = arith.addf %15, %17 : vector<8x512xf32>
    %19 = vector.shape_cast %18 : vector<8x512xf32> to vector<4x2x512xf32>
    %c0_18 = arith.constant 0 : index
    %c0_19 = arith.constant 0 : index
    %c0_20 = arith.constant 0 : index
    %20 = vector.load %arg12[%c0_18, %c0_19, %c0_20] : memref<4x2x512xf32, #tpu.memory_space<vmem>>, vector<4x2x512xf32>
    tpu.vector_store %arg12[%c0_18, %c0_19, %c0_20], %19 {strides = array<i32>} : memref<4x2x512xf32, #tpu.memory_space<vmem>>, vector<4x2x512xf32>,
    %c0_21 = arith.constant 0 : index
    %c0_22 = arith.constant 0 : index
    %21 = vector.load %arg5[%c0_21, %c0_22] : memref<128x512xbf16, #tpu.memory_space<vmem>>, vector<128x512xbf16>
    %c0_23 = arith.constant 0 : index
    %c0_24 = arith.constant 0 : index
    %22 = vector.load %arg6[%c0_23, %c0_24] : memref<128x512xbf16, #tpu.memory_space<vmem>>, vector<128x512xbf16>
    %c0_i32_25 = arith.constant 0 : i32
    %c3_i32 = arith.constant 3 : i32
    %23 = arith.subi %c3_i32, %c0_i32_25 : i32
    %c0_26 = arith.constant 0 : index
    %c0_27 = arith.constant 0 : index
    %24 = vector.load %arg13[%c0_26, %c0_27] : memref<2x128xf32, #tpu.memory_space<vmem>>, vector<2x128xf32>
    %25 = arith.truncf %24 : vector<2x128xf32> to vector<2x128xbf16>
    %cst_28 = arith.constant dense<0.000000e+00> : vector<2x512xf32>
    %26 = tpu.matmul %25, %21, %cst_28 {dimension_numbers = #tpu.dot_dimension_numbers<[1], [0], [0], [1], [0, 0, 1, 1], [], []>} : vector<2x128xbf16>, vector<128x512xbf16>, vector<2x512xf32> -> vector<2x512xf32>
    %c0_29 = arith.constant 0 : index
    %c0_30 = arith.constant 0 : index
    %27 = vector.load %arg15[%c0_29, %c0_30] : memref<2x128xf32, #tpu.memory_space<vmem>>, vector<2x128xf32>
    %28 = arith.truncf %27 : vector<2x128xf32> to vector<2x128xbf16>
    %cst_31 = arith.constant dense<0.000000e+00> : vector<2x512xf32>
    %29 = tpu.matmul %28, %22, %cst_31 {dimension_numbers = #tpu.dot_dimension_numbers<[1], [0], [0], [1], [0, 0, 1, 1], [], []>} : vector<2x128xbf16>, vector<128x512xbf16>, vector<2x512xf32> -> vector<2x512xf32>
    %30 = arith.index_cast %c0_i32_25 : i32 to index
    %c0_32 = arith.constant 0 : index
    %c0_33 = arith.constant 0 : index
    %31 = vector.load %arg11[%30, %c0_32, %c0_33] : memref<4x2x512xf32, #tpu.memory_space<vmem>>, vector<1x2x512xf32>
    %32 = vector.shape_cast %31 : vector<1x2x512xf32> to vector<2x512xf32>
    %33 = arith.addf %32, %26 : vector<2x512xf32>
    %c0_34 = arith.constant 0 : index
    %c0_35 = arith.constant 0 : index
    %34 = vector.load %arg14[%c0_34, %c0_35] : memref<2x128xf32, #tpu.memory_space<vmem>>, vector<2x128xf32>
    %35 = vector.extract_strided_slice %33 {offsets = [0, 0], sizes = [2, 128], strides = [1, 1]} : vector<2x512xf32> to vector<2x128xf32>
    %36 = arith.negf %35 : vector<2x128xf32>
    %37 = math.exp %36 : vector<2x128xf32>
    %cst_36 = arith.constant 1.000000e+00 : f32
    %38 = vector.broadcast %cst_36 : f32 to vector<2x128xf32>
    %39 = arith.addf %38, %37 : vector<2x128xf32>
    %40 = arith.divf %38, %39 : vector<2x128xf32>
    %41 = vector.extract_strided_slice %33 {offsets = [0, 128], sizes = [2, 128], strides = [1, 1]} : vector<2x512xf32> to vector<2x128xf32>
    %42 = arith.negf %41 : vector<2x128xf32>
    %43 = math.exp %42 : vector<2x128xf32>
    %cst_37 = arith.constant 1.000000e+00 : f32
    %44 = vector.broadcast %cst_37 : f32 to vector<2x128xf32>
    %45 = arith.addf %44, %43 : vector<2x128xf32>
    %46 = arith.divf %44, %45 : vector<2x128xf32>
    %47 = vector.extract_strided_slice %33 {offsets = [0, 256], sizes = [2, 128], strides = [1, 1]} : vector<2x512xf32> to vector<2x128xf32>
    %48 = math.tanh %47 : vector<2x128xf32>
    %49 = vector.extract_strided_slice %33 {offsets = [0, 384], sizes = [2, 128], strides = [1, 1]} : vector<2x512xf32> to vector<2x128xf32>
    %50 = arith.negf %49 : vector<2x128xf32>
    %51 = math.exp %50 : vector<2x128xf32>
    %cst_38 = arith.constant 1.000000e+00 : f32
    %52 = vector.broadcast %cst_38 : f32 to vector<2x128xf32>
    %53 = arith.addf %52, %51 : vector<2x128xf32>
    %54 = arith.divf %52, %53 : vector<2x128xf32>
    %55 = arith.mulf %46, %34 : vector<2x128xf32>
    %56 = arith.mulf %40, %48 : vector<2x128xf32>
    %57 = arith.addf %55, %56 : vector<2x128xf32>
    %58 = math.tanh %57 : vector<2x128xf32>
    %59 = arith.mulf %54, %58 : vector<2x128xf32>
    %60 = arith.index_cast %23 : i32 to index
    %c0_39 = arith.constant 0 : index
    %c0_40 = arith.constant 0 : index
    %61 = vector.load %arg12[%60, %c0_39, %c0_40] : memref<4x2x512xf32, #tpu.memory_space<vmem>>, vector<1x2x512xf32>
    %62 = vector.shape_cast %61 : vector<1x2x512xf32> to vector<2x512xf32>
    %63 = arith.addf %62, %29 : vector<2x512xf32>
    %c0_41 = arith.constant 0 : index
    %c0_42 = arith.constant 0 : index
    %64 = vector.load %arg16[%c0_41, %c0_42] : memref<2x128xf32, #tpu.memory_space<vmem>>, vector<2x128xf32>
    %65 = vector.extract_strided_slice %63 {offsets = [0, 0], sizes = [2, 128], strides = [1, 1]} : vector<2x512xf32> to vector<2x128xf32>
    %66 = arith.negf %65 : vector<2x128xf32>
    %67 = math.exp %66 : vector<2x128xf32>
    %cst_43 = arith.constant 1.000000e+00 : f32
    %68 = vector.broadcast %cst_43 : f32 to vector<2x128xf32>
    %69 = arith.addf %68, %67 : vector<2x128xf32>
    %70 = arith.divf %68, %69 : vector<2x128xf32>
    %71 = vector.extract_strided_slice %63 {offsets = [0, 128], sizes = [2, 128], strides = [1, 1]} : vector<2x512xf32> to vector<2x128xf32>
    %72 = arith.negf %71 : vector<2x128xf32>
    %73 = math.exp %72 : vector<2x128xf32>
    %cst_44 = arith.constant 1.000000e+00 : f32
    %74 = vector.broadcast %cst_44 : f32 to vector<2x128xf32>
    %75 = arith.addf %74, %73 : vector<2x128xf32>
    %76 = arith.divf %74, %75 : vector<2x128xf32>
    %77 = vector.extract_strided_slice %63 {offsets = [0, 256], sizes = [2, 128], strides = [1, 1]} : vector<2x512xf32> to vector<2x128xf32>
    %78 = math.tanh %77 : vector<2x128xf32>
    %79 = vector.extract_strided_slice %63 {offsets = [0, 384], sizes = [2, 128], strides = [1, 1]} : vector<2x512xf32> to vector<2x128xf32>
    %80 = arith.negf %79 : vector<2x128xf32>
    %81 = math.exp %80 : vector<2x128xf32>
    %cst_45 = arith.constant 1.000000e+00 : f32
    %82 = vector.broadcast %cst_45 : f32 to vector<2x128xf32>
    %83 = arith.addf %82, %81 : vector<2x128xf32>
    %84 = arith.divf %82, %83 : vector<2x128xf32>
    %85 = arith.mulf %76, %64 : vector<2x128xf32>
    %86 = arith.mulf %70, %78 : vector<2x128xf32>
    %87 = arith.addf %85, %86 : vector<2x128xf32>
    %88 = math.tanh %87 : vector<2x128xf32>
    %89 = arith.mulf %84, %88 : vector<2x128xf32>
    %c0_46 = arith.constant 0 : index
    %c0_47 = arith.constant 0 : index
    %90 = vector.load %arg13[%c0_46, %c0_47] : memref<2x128xf32, #tpu.memory_space<vmem>>, vector<2x128xf32>
    tpu.vector_store %arg13[%c0_46, %c0_47], %59 {strides = array<i32>} : memref<2x128xf32, #tpu.memory_space<vmem>>, vector<2x128xf32>,
    %c0_48 = arith.constant 0 : index
    %c0_49 = arith.constant 0 : index
    %91 = vector.load %arg14[%c0_48, %c0_49] : memref<2x128xf32, #tpu.memory_space<vmem>>, vector<2x128xf32>
    tpu.vector_store %arg14[%c0_48, %c0_49], %57 {strides = array<i32>} : memref<2x128xf32, #tpu.memory_space<vmem>>, vector<2x128xf32>,
    %c0_50 = arith.constant 0 : index
    %c0_51 = arith.constant 0 : index
    %92 = vector.load %arg15[%c0_50, %c0_51] : memref<2x128xf32, #tpu.memory_space<vmem>>, vector<2x128xf32>
    tpu.vector_store %arg15[%c0_50, %c0_51], %89 {strides = array<i32>} : memref<2x128xf32, #tpu.memory_space<vmem>>, vector<2x128xf32>,
    %c0_52 = arith.constant 0 : index
    %c0_53 = arith.constant 0 : index
    %93 = vector.load %arg16[%c0_52, %c0_53] : memref<2x128xf32, #tpu.memory_space<vmem>>, vector<2x128xf32>
    tpu.vector_store %arg16[%c0_52, %c0_53], %87 {strides = array<i32>} : memref<2x128xf32, #tpu.memory_space<vmem>>, vector<2x128xf32>,
    %94 = arith.truncf %59 : vector<2x128xf32> to vector<2x128xbf16>
    %95 = arith.index_cast %c0_i32_25 : i32 to index
    %c0_54 = arith.constant 0 : index
    %c0_55 = arith.constant 0 : index
    %96 = vector.load %arg9[%95, %c0_54, %c0_55] : memref<4x2x128xbf16, #tpu.memory_space<vmem>>, vector<1x2x128xbf16>
    %97 = vector.shape_cast %96 : vector<1x2x128xbf16> to vector<2x128xbf16>
    %98 = vector.shape_cast %94 : vector<2x128xbf16> to vector<1x2x128xbf16>
    tpu.vector_store %arg9[%95, %c0_54, %c0_55], %98 {strides = array<i32>} : memref<4x2x128xbf16, #tpu.memory_space<vmem>>, vector<1x2x128xbf16>,
    %99 = arith.truncf %89 : vector<2x128xf32> to vector<2x128xbf16>
    %100 = arith.index_cast %23 : i32 to index
    %c0_56 = arith.constant 0 : index
    %c0_57 = arith.constant 0 : index
    %101 = vector.load %arg10[%100, %c0_56, %c0_57] : memref<4x2x128xbf16, #tpu.memory_space<vmem>>, vector<1x2x128xbf16>
    %102 = vector.shape_cast %101 : vector<1x2x128xbf16> to vector<2x128xbf16>
    %103 = vector.shape_cast %99 : vector<2x128xbf16> to vector<1x2x128xbf16>
    tpu.vector_store %arg10[%100, %c0_56, %c0_57], %103 {strides = array<i32>} : memref<4x2x128xbf16, #tpu.memory_space<vmem>>, vector<1x2x128xbf16>,
    %c1_i32 = arith.constant 1 : i32
    %c3_i32_58 = arith.constant 3 : i32
    %104 = arith.subi %c3_i32_58, %c1_i32 : i32
    %c0_59 = arith.constant 0 : index
    %c0_60 = arith.constant 0 : index
    %105 = vector.load %arg13[%c0_59, %c0_60] : memref<2x128xf32, #tpu.memory_space<vmem>>, vector<2x128xf32>
    %106 = arith.truncf %105 : vector<2x128xf32> to vector<2x128xbf16>
    %cst_61 = arith.constant dense<0.000000e+00> : vector<2x512xf32>
    %107 = tpu.matmul %106, %21, %cst_61 {dimension_numbers = #tpu.dot_dimension_numbers<[1], [0], [0], [1], [0, 0, 1, 1], [], []>} : vector<2x128xbf16>, vector<128x512xbf16>, vector<2x512xf32> -> vector<2x512xf32>
    %c0_62 = arith.constant 0 : index
    %c0_63 = arith.constant 0 : index
    %108 = vector.load %arg15[%c0_62, %c0_63] : memref<2x128xf32, #tpu.memory_space<vmem>>, vector<2x128xf32>
    %109 = arith.truncf %108 : vector<2x128xf32> to vector<2x128xbf16>
    %cst_64 = arith.constant dense<0.000000e+00> : vector<2x512xf32>
    %110 = tpu.matmul %109, %22, %cst_64 {dimension_numbers = #tpu.dot_dimension_numbers<[1], [0], [0], [1], [0, 0, 1, 1], [], []>} : vector<2x128xbf16>, vector<128x512xbf16>, vector<2x512xf32> -> vector<2x512xf32>
    %111 = arith.index_cast %c1_i32 : i32 to index
    %c0_65 = arith.constant 0 : index
    %c0_66 = arith.constant 0 : index
    %112 = vector.load %arg11[%111, %c0_65, %c0_66] : memref<4x2x512xf32, #tpu.memory_space<vmem>>, vector<1x2x512xf32>
    %113 = vector.shape_cast %112 : vector<1x2x512xf32> to vector<2x512xf32>
    %114 = arith.addf %113, %107 : vector<2x512xf32>
    %c0_67 = arith.constant 0 : index
    %c0_68 = arith.constant 0 : index
    %115 = vector.load %arg14[%c0_67, %c0_68] : memref<2x128xf32, #tpu.memory_space<vmem>>, vector<2x128xf32>
    %116 = vector.extract_strided_slice %114 {offsets = [0, 0], sizes = [2, 128], strides = [1, 1]} : vector<2x512xf32> to vector<2x128xf32>
    %117 = arith.negf %116 : vector<2x128xf32>
    %118 = math.exp %117 : vector<2x128xf32>
    %cst_69 = arith.constant 1.000000e+00 : f32
    %119 = vector.broadcast %cst_69 : f32 to vector<2x128xf32>
    %120 = arith.addf %119, %118 : vector<2x128xf32>
    %121 = arith.divf %119, %120 : vector<2x128xf32>
    %122 = vector.extract_strided_slice %114 {offsets = [0, 128], sizes = [2, 128], strides = [1, 1]} : vector<2x512xf32> to vector<2x128xf32>
    %123 = arith.negf %122 : vector<2x128xf32>
    %124 = math.exp %123 : vector<2x128xf32>
    %cst_70 = arith.constant 1.000000e+00 : f32
    %125 = vector.broadcast %cst_70 : f32 to vector<2x128xf32>
    %126 = arith.addf %125, %124 : vector<2x128xf32>
    %127 = arith.divf %125, %126 : vector<2x128xf32>
    %128 = vector.extract_strided_slice %114 {offsets = [0, 256], sizes = [2, 128], strides = [1, 1]} : vector<2x512xf32> to vector<2x128xf32>
    %129 = math.tanh %128 : vector<2x128xf32>
    %130 = vector.extract_strided_slice %114 {offsets = [0, 384], sizes = [2, 128], strides = [1, 1]} : vector<2x512xf32> to vector<2x128xf32>
    %131 = arith.negf %130 : vector<2x128xf32>
    %132 = math.exp %131 : vector<2x128xf32>
    %cst_71 = arith.constant 1.000000e+00 : f32
    %133 = vector.broadcast %cst_71 : f32 to vector<2x128xf32>
    %134 = arith.addf %133, %132 : vector<2x128xf32>
    %135 = arith.divf %133, %134 : vector<2x128xf32>
    %136 = arith.mulf %127, %115 : vector<2x128xf32>
    %137 = arith.mulf %121, %129 : vector<2x128xf32>
    %138 = arith.addf %136, %137 : vector<2x128xf32>
    %139 = math.tanh %138 : vector<2x128xf32>
    %140 = arith.mulf %135, %139 : vector<2x128xf32>
    %141 = arith.index_cast %104 : i32 to index
    %c0_72 = arith.constant 0 : index
    %c0_73 = arith.constant 0 : index
    %142 = vector.load %arg12[%141, %c0_72, %c0_73] : memref<4x2x512xf32, #tpu.memory_space<vmem>>, vector<1x2x512xf32>
    %143 = vector.shape_cast %142 : vector<1x2x512xf32> to vector<2x512xf32>
    %144 = arith.addf %143, %110 : vector<2x512xf32>
    %c0_74 = arith.constant 0 : index
    %c0_75 = arith.constant 0 : index
    %145 = vector.load %arg16[%c0_74, %c0_75] : memref<2x128xf32, #tpu.memory_space<vmem>>, vector<2x128xf32>
    %146 = vector.extract_strided_slice %144 {offsets = [0, 0], sizes = [2, 128], strides = [1, 1]} : vector<2x512xf32> to vector<2x128xf32>
    %147 = arith.negf %146 : vector<2x128xf32>
    %148 = math.exp %147 : vector<2x128xf32>
    %cst_76 = arith.constant 1.000000e+00 : f32
    %149 = vector.broadcast %cst_76 : f32 to vector<2x128xf32>
    %150 = arith.addf %149, %148 : vector<2x128xf32>
    %151 = arith.divf %149, %150 : vector<2x128xf32>
    %152 = vector.extract_strided_slice %144 {offsets = [0, 128], sizes = [2, 128], strides = [1, 1]} : vector<2x512xf32> to vector<2x128xf32>
    %153 = arith.negf %152 : vector<2x128xf32>
    %154 = math.exp %153 : vector<2x128xf32>
    %cst_77 = arith.constant 1.000000e+00 : f32
    %155 = vector.broadcast %cst_77 : f32 to vector<2x128xf32>
    %156 = arith.addf %155, %154 : vector<2x128xf32>
    %157 = arith.divf %155, %156 : vector<2x128xf32>
    %158 = vector.extract_strided_slice %144 {offsets = [0, 256], sizes = [2, 128], strides = [1, 1]} : vector<2x512xf32> to vector<2x128xf32>
    %159 = math.tanh %158 : vector<2x128xf32>
    %160 = vector.extract_strided_slice %144 {offsets = [0, 384], sizes = [2, 128], strides = [1, 1]} : vector<2x512xf32> to vector<2x128xf32>
    %161 = arith.negf %160 : vector<2x128xf32>
    %162 = math.exp %161 : vector<2x128xf32>
    %cst_78 = arith.constant 1.000000e+00 : f32
    %163 = vector.broadcast %cst_78 : f32 to vector<2x128xf32>
    %164 = arith.addf %163, %162 : vector<2x128xf32>
    %165 = arith.divf %163, %164 : vector<2x128xf32>
    %166 = arith.mulf %157, %145 : vector<2x128xf32>
    %167 = arith.mulf %151, %159 : vector<2x128xf32>
    %168 = arith.addf %166, %167 : vector<2x128xf32>
    %169 = math.tanh %168 : vector<2x128xf32>
    %170 = arith.mulf %165, %169 : vector<2x128xf32>
    %c0_79 = arith.constant 0 : index
    %c0_80 = arith.constant 0 : index
    %171 = vector.load %arg13[%c0_79, %c0_80] : memref<2x128xf32, #tpu.memory_space<vmem>>, vector<2x128xf32>
    tpu.vector_store %arg13[%c0_79, %c0_80], %140 {strides = array<i32>} : memref<2x128xf32, #tpu.memory_space<vmem>>, vector<2x128xf32>,
    %c0_81 = arith.constant 0 : index
    %c0_82 = arith.constant 0 : index
    %172 = vector.load %arg14[%c0_81, %c0_82] : memref<2x128xf32, #tpu.memory_space<vmem>>, vector<2x128xf32>
    tpu.vector_store %arg14[%c0_81, %c0_82], %138 {strides = array<i32>} : memref<2x128xf32, #tpu.memory_space<vmem>>, vector<2x128xf32>,
    %c0_83 = arith.constant 0 : index
    %c0_84 = arith.constant 0 : index
    %173 = vector.load %arg15[%c0_83, %c0_84] : memref<2x128xf32, #tpu.memory_space<vmem>>, vector<2x128xf32>
    tpu.vector_store %arg15[%c0_83, %c0_84], %170 {strides = array<i32>} : memref<2x128xf32, #tpu.memory_space<vmem>>, vector<2x128xf32>,
    %c0_85 = arith.constant 0 : index
    %c0_86 = arith.constant 0 : index
    %174 = vector.load %arg16[%c0_85, %c0_86] : memref<2x128xf32, #tpu.memory_space<vmem>>, vector<2x128xf32>
    tpu.vector_store %arg16[%c0_85, %c0_86], %168 {strides = array<i32>} : memref<2x128xf32, #tpu.memory_space<vmem>>, vector<2x128xf32>,
    %175 = arith.truncf %140 : vector<2x128xf32> to vector<2x128xbf16>
    %176 = arith.index_cast %c1_i32 : i32 to index
    %c0_87 = arith.constant 0 : index
    %c0_88 = arith.constant 0 : index
    %177 = vector.load %arg9[%176, %c0_87, %c0_88] : memref<4x2x128xbf16, #tpu.memory_space<vmem>>, vector<1x2x128xbf16>
    %178 = vector.shape_cast %177 : vector<1x2x128xbf16> to vector<2x128xbf16>
    %179 = vector.shape_cast %175 : vector<2x128xbf16> to vector<1x2x128xbf16>
    tpu.vector_store %arg9[%176, %c0_87, %c0_88], %179 {strides = array<i32>} : memref<4x2x128xbf16, #tpu.memory_space<vmem>>, vector<1x2x128xbf16>,
    %180 = arith.truncf %170 : vector<2x128xf32> to vector<2x128xbf16>
    %181 = arith.index_cast %104 : i32 to index
    %c0_89 = arith.constant 0 : index
    %c0_90 = arith.constant 0 : index
    %182 = vector.load %arg10[%181, %c0_89, %c0_90] : memref<4x2x128xbf16, #tpu.memory_space<vmem>>, vector<1x2x128xbf16>
    %183 = vector.shape_cast %182 : vector<1x2x128xbf16> to vector<2x128xbf16>
    %184 = vector.shape_cast %180 : vector<2x128xbf16> to vector<1x2x128xbf16>
    tpu.vector_store %arg10[%181, %c0_89, %c0_90], %184 {strides = array<i32>} : memref<4x2x128xbf16, #tpu.memory_space<vmem>>, vector<1x2x128xbf16>,
    %c2_i32 = arith.constant 2 : i32
    %c3_i32_91 = arith.constant 3 : i32
    %185 = arith.subi %c3_i32_91, %c2_i32 : i32
    %c0_92 = arith.constant 0 : index
    %c0_93 = arith.constant 0 : index
    %186 = vector.load %arg13[%c0_92, %c0_93] : memref<2x128xf32, #tpu.memory_space<vmem>>, vector<2x128xf32>
    %187 = arith.truncf %186 : vector<2x128xf32> to vector<2x128xbf16>
    %cst_94 = arith.constant dense<0.000000e+00> : vector<2x512xf32>
    %188 = tpu.matmul %187, %21, %cst_94 {dimension_numbers = #tpu.dot_dimension_numbers<[1], [0], [0], [1], [0, 0, 1, 1], [], []>} : vector<2x128xbf16>, vector<128x512xbf16>, vector<2x512xf32> -> vector<2x512xf32>
    %c0_95 = arith.constant 0 : index
    %c0_96 = arith.constant 0 : index
    %189 = vector.load %arg15[%c0_95, %c0_96] : memref<2x128xf32, #tpu.memory_space<vmem>>, vector<2x128xf32>
    %190 = arith.truncf %189 : vector<2x128xf32> to vector<2x128xbf16>
    %cst_97 = arith.constant dense<0.000000e+00> : vector<2x512xf32>
    %191 = tpu.matmul %190, %22, %cst_97 {dimension_numbers = #tpu.dot_dimension_numbers<[1], [0], [0], [1], [0, 0, 1, 1], [], []>} : vector<2x128xbf16>, vector<128x512xbf16>, vector<2x512xf32> -> vector<2x512xf32>
    %192 = arith.index_cast %c2_i32 : i32 to index
    %c0_98 = arith.constant 0 : index
    %c0_99 = arith.constant 0 : index
    %193 = vector.load %arg11[%192, %c0_98, %c0_99] : memref<4x2x512xf32, #tpu.memory_space<vmem>>, vector<1x2x512xf32>
    %194 = vector.shape_cast %193 : vector<1x2x512xf32> to vector<2x512xf32>
    %195 = arith.addf %194, %188 : vector<2x512xf32>
    %c0_100 = arith.constant 0 : index
    %c0_101 = arith.constant 0 : index
    %196 = vector.load %arg14[%c0_100, %c0_101] : memref<2x128xf32, #tpu.memory_space<vmem>>, vector<2x128xf32>
    %197 = vector.extract_strided_slice %195 {offsets = [0, 0], sizes = [2, 128], strides = [1, 1]} : vector<2x512xf32> to vector<2x128xf32>
    %198 = arith.negf %197 : vector<2x128xf32>
    %199 = math.exp %198 : vector<2x128xf32>
    %cst_102 = arith.constant 1.000000e+00 : f32
    %200 = vector.broadcast %cst_102 : f32 to vector<2x128xf32>
    %201 = arith.addf %200, %199 : vector<2x128xf32>
    %202 = arith.divf %200, %201 : vector<2x128xf32>
    %203 = vector.extract_strided_slice %195 {offsets = [0, 128], sizes = [2, 128], strides = [1, 1]} : vector<2x512xf32> to vector<2x128xf32>
    %204 = arith.negf %203 : vector<2x128xf32>
    %205 = math.exp %204 : vector<2x128xf32>
    %cst_103 = arith.constant 1.000000e+00 : f32
    %206 = vector.broadcast %cst_103 : f32 to vector<2x128xf32>
    %207 = arith.addf %206, %205 : vector<2x128xf32>
    %208 = arith.divf %206, %207 : vector<2x128xf32>
    %209 = vector.extract_strided_slice %195 {offsets = [0, 256], sizes = [2, 128], strides = [1, 1]} : vector<2x512xf32> to vector<2x128xf32>
    %210 = math.tanh %209 : vector<2x128xf32>
    %211 = vector.extract_strided_slice %195 {offsets = [0, 384], sizes = [2, 128], strides = [1, 1]} : vector<2x512xf32> to vector<2x128xf32>
    %212 = arith.negf %211 : vector<2x128xf32>
    %213 = math.exp %212 : vector<2x128xf32>
    %cst_104 = arith.constant 1.000000e+00 : f32
    %214 = vector.broadcast %cst_104 : f32 to vector<2x128xf32>
    %215 = arith.addf %214, %213 : vector<2x128xf32>
    %216 = arith.divf %214, %215 : vector<2x128xf32>
    %217 = arith.mulf %208, %196 : vector<2x128xf32>
    %218 = arith.mulf %202, %210 : vector<2x128xf32>
    %219 = arith.addf %217, %218 : vector<2x128xf32>
    %220 = math.tanh %219 : vector<2x128xf32>
    %221 = arith.mulf %216, %220 : vector<2x128xf32>
    %222 = arith.index_cast %185 : i32 to index
    %c0_105 = arith.constant 0 : index
    %c0_106 = arith.constant 0 : index
    %223 = vector.load %arg12[%222, %c0_105, %c0_106] : memref<4x2x512xf32, #tpu.memory_space<vmem>>, vector<1x2x512xf32>
    %224 = vector.shape_cast %223 : vector<1x2x512xf32> to vector<2x512xf32>
    %225 = arith.addf %224, %191 : vector<2x512xf32>
    %c0_107 = arith.constant 0 : index
    %c0_108 = arith.constant 0 : index
    %226 = vector.load %arg16[%c0_107, %c0_108] : memref<2x128xf32, #tpu.memory_space<vmem>>, vector<2x128xf32>
    %227 = vector.extract_strided_slice %225 {offsets = [0, 0], sizes = [2, 128], strides = [1, 1]} : vector<2x512xf32> to vector<2x128xf32>
    %228 = arith.negf %227 : vector<2x128xf32>
    %229 = math.exp %228 : vector<2x128xf32>
    %cst_109 = arith.constant 1.000000e+00 : f32
    %230 = vector.broadcast %cst_109 : f32 to vector<2x128xf32>
    %231 = arith.addf %230, %229 : vector<2x128xf32>
    %232 = arith.divf %230, %231 : vector<2x128xf32>
    %233 = vector.extract_strided_slice %225 {offsets = [0, 128], sizes = [2, 128], strides = [1, 1]} : vector<2x512xf32> to vector<2x128xf32>
    %234 = arith.negf %233 : vector<2x128xf32>
    %235 = math.exp %234 : vector<2x128xf32>
    %cst_110 = arith.constant 1.000000e+00 : f32
    %236 = vector.broadcast %cst_110 : f32 to vector<2x128xf32>
    %237 = arith.addf %236, %235 : vector<2x128xf32>
    %238 = arith.divf %236, %237 : vector<2x128xf32>
    %239 = vector.extract_strided_slice %225 {offsets = [0, 256], sizes = [2, 128], strides = [1, 1]} : vector<2x512xf32> to vector<2x128xf32>
    %240 = math.tanh %239 : vector<2x128xf32>
    %241 = vector.extract_strided_slice %225 {offsets = [0, 384], sizes = [2, 128], strides = [1, 1]} : vector<2x512xf32> to vector<2x128xf32>
    %242 = arith.negf %241 : vector<2x128xf32>
    %243 = math.exp %242 : vector<2x128xf32>
    %cst_111 = arith.constant 1.000000e+00 : f32
    %244 = vector.broadcast %cst_111 : f32 to vector<2x128xf32>
    %245 = arith.addf %244, %243 : vector<2x128xf32>
    %246 = arith.divf %244, %245 : vector<2x128xf32>
    %247 = arith.mulf %238, %226 : vector<2x128xf32>
    %248 = arith.mulf %232, %240 : vector<2x128xf32>
    %249 = arith.addf %247, %248 : vector<2x128xf32>
    %250 = math.tanh %249 : vector<2x128xf32>
    %251 = arith.mulf %246, %250 : vector<2x128xf32>
    %c0_112 = arith.constant 0 : index
    %c0_113 = arith.constant 0 : index
    %252 = vector.load %arg13[%c0_112, %c0_113] : memref<2x128xf32, #tpu.memory_space<vmem>>, vector<2x128xf32>
    tpu.vector_store %arg13[%c0_112, %c0_113], %221 {strides = array<i32>} : memref<2x128xf32, #tpu.memory_space<vmem>>, vector<2x128xf32>,
    %c0_114 = arith.constant 0 : index
    %c0_115 = arith.constant 0 : index
    %253 = vector.load %arg14[%c0_114, %c0_115] : memref<2x128xf32, #tpu.memory_space<vmem>>, vector<2x128xf32>
    tpu.vector_store %arg14[%c0_114, %c0_115], %219 {strides = array<i32>} : memref<2x128xf32, #tpu.memory_space<vmem>>, vector<2x128xf32>,
    %c0_116 = arith.constant 0 : index
    %c0_117 = arith.constant 0 : index
    %254 = vector.load %arg15[%c0_116, %c0_117] : memref<2x128xf32, #tpu.memory_space<vmem>>, vector<2x128xf32>
    tpu.vector_store %arg15[%c0_116, %c0_117], %251 {strides = array<i32>} : memref<2x128xf32, #tpu.memory_space<vmem>>, vector<2x128xf32>,
    %c0_118 = arith.constant 0 : index
    %c0_119 = arith.constant 0 : index
    %255 = vector.load %arg16[%c0_118, %c0_119] : memref<2x128xf32, #tpu.memory_space<vmem>>, vector<2x128xf32>
    tpu.vector_store %arg16[%c0_118, %c0_119], %249 {strides = array<i32>} : memref<2x128xf32, #tpu.memory_space<vmem>>, vector<2x128xf32>,
    %256 = arith.truncf %221 : vector<2x128xf32> to vector<2x128xbf16>
    %257 = arith.index_cast %c2_i32 : i32 to index
    %c0_120 = arith.constant 0 : index
    %c0_121 = arith.constant 0 : index
    %258 = vector.load %arg9[%257, %c0_120, %c0_121] : memref<4x2x128xbf16, #tpu.memory_space<vmem>>, vector<1x2x128xbf16>
    %259 = vector.shape_cast %258 : vector<1x2x128xbf16> to vector<2x128xbf16>
    %260 = vector.shape_cast %256 : vector<2x128xbf16> to vector<1x2x128xbf16>
    tpu.vector_store %arg9[%257, %c0_120, %c0_121], %260 {strides = array<i32>} : memref<4x2x128xbf16, #tpu.memory_space<vmem>>, vector<1x2x128xbf16>,
    %261 = arith.truncf %251 : vector<2x128xf32> to vector<2x128xbf16>
    %262 = arith.index_cast %185 : i32 to index
    %c0_122 = arith.constant 0 : index
    %c0_123 = arith.constant 0 : index
    %263 = vector.load %arg10[%262, %c0_122, %c0_123] : memref<4x2x128xbf16, #tpu.memory_space<vmem>>, vector<1x2x128xbf16>
    %264 = vector.shape_cast %263 : vector<1x2x128xbf16> to vector<2x128xbf16>
    %265 = vector.shape_cast %261 : vector<2x128xbf16> to vector<1x2x128xbf16>
    tpu.vector_store %arg10[%262, %c0_122, %c0_123], %265 {strides = array<i32>} : memref<4x2x128xbf16, #tpu.memory_space<vmem>>, vector<1x2x128xbf16>,
    %c3_i32_124 = arith.constant 3 : i32
    %c3_i32_125 = arith.constant 3 : i32
    %266 = arith.subi %c3_i32_125, %c3_i32_124 : i32
    %c0_126 = arith.constant 0 : index
    %c0_127 = arith.constant 0 : index
    %267 = vector.load %arg13[%c0_126, %c0_127] : memref<2x128xf32, #tpu.memory_space<vmem>>, vector<2x128xf32>
    %268 = arith.truncf %267 : vector<2x128xf32> to vector<2x128xbf16>
    %cst_128 = arith.constant dense<0.000000e+00> : vector<2x512xf32>
    %269 = tpu.matmul %268, %21, %cst_128 {dimension_numbers = #tpu.dot_dimension_numbers<[1], [0], [0], [1], [0, 0, 1, 1], [], []>} : vector<2x128xbf16>, vector<128x512xbf16>, vector<2x512xf32> -> vector<2x512xf32>
    %c0_129 = arith.constant 0 : index
    %c0_130 = arith.constant 0 : index
    %270 = vector.load %arg15[%c0_129, %c0_130] : memref<2x128xf32, #tpu.memory_space<vmem>>, vector<2x128xf32>
    %271 = arith.truncf %270 : vector<2x128xf32> to vector<2x128xbf16>
    %cst_131 = arith.constant dense<0.000000e+00> : vector<2x512xf32>
    %272 = tpu.matmul %271, %22, %cst_131 {dimension_numbers = #tpu.dot_dimension_numbers<[1], [0], [0], [1], [0, 0, 1, 1], [], []>} : vector<2x128xbf16>, vector<128x512xbf16>, vector<2x512xf32> -> vector<2x512xf32>
    %273 = arith.index_cast %c3_i32_124 : i32 to index
    %c0_132 = arith.constant 0 : index
    %c0_133 = arith.constant 0 : index
    %274 = vector.load %arg11[%273, %c0_132, %c0_133] : memref<4x2x512xf32, #tpu.memory_space<vmem>>, vector<1x2x512xf32>
    %275 = vector.shape_cast %274 : vector<1x2x512xf32> to vector<2x512xf32>
    %276 = arith.addf %275, %269 : vector<2x512xf32>
    %c0_134 = arith.constant 0 : index
    %c0_135 = arith.constant 0 : index
    %277 = vector.load %arg14[%c0_134, %c0_135] : memref<2x128xf32, #tpu.memory_space<vmem>>, vector<2x128xf32>
    %278 = vector.extract_strided_slice %276 {offsets = [0, 0], sizes = [2, 128], strides = [1, 1]} : vector<2x512xf32> to vector<2x128xf32>
    %279 = arith.negf %278 : vector<2x128xf32>
    %280 = math.exp %279 : vector<2x128xf32>
    %cst_136 = arith.constant 1.000000e+00 : f32
    %281 = vector.broadcast %cst_136 : f32 to vector<2x128xf32>
    %282 = arith.addf %281, %280 : vector<2x128xf32>
    %283 = arith.divf %281, %282 : vector<2x128xf32>
    %284 = vector.extract_strided_slice %276 {offsets = [0, 128], sizes = [2, 128], strides = [1, 1]} : vector<2x512xf32> to vector<2x128xf32>
    %285 = arith.negf %284 : vector<2x128xf32>
    %286 = math.exp %285 : vector<2x128xf32>
    %cst_137 = arith.constant 1.000000e+00 : f32
    %287 = vector.broadcast %cst_137 : f32 to vector<2x128xf32>
    %288 = arith.addf %287, %286 : vector<2x128xf32>
    %289 = arith.divf %287, %288 : vector<2x128xf32>
    %290 = vector.extract_strided_slice %276 {offsets = [0, 256], sizes = [2, 128], strides = [1, 1]} : vector<2x512xf32> to vector<2x128xf32>
    %291 = math.tanh %290 : vector<2x128xf32>
    %292 = vector.extract_strided_slice %276 {offsets = [0, 384], sizes = [2, 128], strides = [1, 1]} : vector<2x512xf32> to vector<2x128xf32>
    %293 = arith.negf %292 : vector<2x128xf32>
    %294 = math.exp %293 : vector<2x128xf32>
    %cst_138 = arith.constant 1.000000e+00 : f32
    %295 = vector.broadcast %cst_138 : f32 to vector<2x128xf32>
    %296 = arith.addf %295, %294 : vector<2x128xf32>
    %297 = arith.divf %295, %296 : vector<2x128xf32>
    %298 = arith.mulf %289, %277 : vector<2x128xf32>
    %299 = arith.mulf %283, %291 : vector<2x128xf32>
    %300 = arith.addf %298, %299 : vector<2x128xf32>
    %301 = math.tanh %300 : vector<2x128xf32>
    %302 = arith.mulf %297, %301 : vector<2x128xf32>
    %303 = arith.index_cast %266 : i32 to index
    %c0_139 = arith.constant 0 : index
    %c0_140 = arith.constant 0 : index
    %304 = vector.load %arg12[%303, %c0_139, %c0_140] : memref<4x2x512xf32, #tpu.memory_space<vmem>>, vector<1x2x512xf32>
    %305 = vector.shape_cast %304 : vector<1x2x512xf32> to vector<2x512xf32>
    %306 = arith.addf %305, %272 : vector<2x512xf32>
    %c0_141 = arith.constant 0 : index
    %c0_142 = arith.constant 0 : index
    %307 = vector.load %arg16[%c0_141, %c0_142] : memref<2x128xf32, #tpu.memory_space<vmem>>, vector<2x128xf32>
    %308 = vector.extract_strided_slice %306 {offsets = [0, 0], sizes = [2, 128], strides = [1, 1]} : vector<2x512xf32> to vector<2x128xf32>
    %309 = arith.negf %308 : vector<2x128xf32>
    %310 = math.exp %309 : vector<2x128xf32>
    %cst_143 = arith.constant 1.000000e+00 : f32
    %311 = vector.broadcast %cst_143 : f32 to vector<2x128xf32>
    %312 = arith.addf %311, %310 : vector<2x128xf32>
    %313 = arith.divf %311, %312 : vector<2x128xf32>
    %314 = vector.extract_strided_slice %306 {offsets = [0, 128], sizes = [2, 128], strides = [1, 1]} : vector<2x512xf32> to vector<2x128xf32>
    %315 = arith.negf %314 : vector<2x128xf32>
    %316 = math.exp %315 : vector<2x128xf32>
    %cst_144 = arith.constant 1.000000e+00 : f32
    %317 = vector.broadcast %cst_144 : f32 to vector<2x128xf32>
    %318 = arith.addf %317, %316 : vector<2x128xf32>
    %319 = arith.divf %317, %318 : vector<2x128xf32>
    %320 = vector.extract_strided_slice %306 {offsets = [0, 256], sizes = [2, 128], strides = [1, 1]} : vector<2x512xf32> to vector<2x128xf32>
    %321 = math.tanh %320 : vector<2x128xf32>
    %322 = vector.extract_strided_slice %306 {offsets = [0, 384], sizes = [2, 128], strides = [1, 1]} : vector<2x512xf32> to vector<2x128xf32>
    %323 = arith.negf %322 : vector<2x128xf32>
    %324 = math.exp %323 : vector<2x128xf32>
    %cst_145 = arith.constant 1.000000e+00 : f32
    %325 = vector.broadcast %cst_145 : f32 to vector<2x128xf32>
    %326 = arith.addf %325, %324 : vector<2x128xf32>
    %327 = arith.divf %325, %326 : vector<2x128xf32>
    %328 = arith.mulf %319, %307 : vector<2x128xf32>
    %329 = arith.mulf %313, %321 : vector<2x128xf32>
    %330 = arith.addf %328, %329 : vector<2x128xf32>
    %331 = math.tanh %330 : vector<2x128xf32>
    %332 = arith.mulf %327, %331 : vector<2x128xf32>
    %c0_146 = arith.constant 0 : index
    %c0_147 = arith.constant 0 : index
    %333 = vector.load %arg13[%c0_146, %c0_147] : memref<2x128xf32, #tpu.memory_space<vmem>>, vector<2x128xf32>
    tpu.vector_store %arg13[%c0_146, %c0_147], %302 {strides = array<i32>} : memref<2x128xf32, #tpu.memory_space<vmem>>, vector<2x128xf32>,
    %c0_148 = arith.constant 0 : index
    %c0_149 = arith.constant 0 : index
    %334 = vector.load %arg14[%c0_148, %c0_149] : memref<2x128xf32, #tpu.memory_space<vmem>>, vector<2x128xf32>
    tpu.vector_store %arg14[%c0_148, %c0_149], %300 {strides = array<i32>} : memref<2x128xf32, #tpu.memory_space<vmem>>, vector<2x128xf32>,
    %c0_150 = arith.constant 0 : index
    %c0_151 = arith.constant 0 : index
    %335 = vector.load %arg15[%c0_150, %c0_151] : memref<2x128xf32, #tpu.memory_space<vmem>>, vector<2x128xf32>
    tpu.vector_store %arg15[%c0_150, %c0_151], %332 {strides = array<i32>} : memref<2x128xf32, #tpu.memory_space<vmem>>, vector<2x128xf32>,
    %c0_152 = arith.constant 0 : index
    %c0_153 = arith.constant 0 : index
    %336 = vector.load %arg16[%c0_152, %c0_153] : memref<2x128xf32, #tpu.memory_space<vmem>>, vector<2x128xf32>
    tpu.vector_store %arg16[%c0_152, %c0_153], %330 {strides = array<i32>} : memref<2x128xf32, #tpu.memory_space<vmem>>, vector<2x128xf32>,
    %337 = arith.truncf %302 : vector<2x128xf32> to vector<2x128xbf16>
    %338 = arith.index_cast %c3_i32_124 : i32 to index
    %c0_154 = arith.constant 0 : index
    %c0_155 = arith.constant 0 : index
    %339 = vector.load %arg9[%338, %c0_154, %c0_155] : memref<4x2x128xbf16, #tpu.memory_space<vmem>>, vector<1x2x128xbf16>
    %340 = vector.shape_cast %339 : vector<1x2x128xbf16> to vector<2x128xbf16>
    %341 = vector.shape_cast %337 : vector<2x128xbf16> to vector<1x2x128xbf16>
    tpu.vector_store %arg9[%338, %c0_154, %c0_155], %341 {strides = array<i32>} : memref<4x2x128xbf16, #tpu.memory_space<vmem>>, vector<1x2x128xbf16>,
    %342 = arith.truncf %332 : vector<2x128xf32> to vector<2x128xbf16>
    %343 = arith.index_cast %266 : i32 to index
    %c0_156 = arith.constant 0 : index
    %c0_157 = arith.constant 0 : index
    %344 = vector.load %arg10[%343, %c0_156, %c0_157] : memref<4x2x128xbf16, #tpu.memory_space<vmem>>, vector<1x2x128xbf16>
    %345 = vector.shape_cast %344 : vector<1x2x128xbf16> to vector<2x128xbf16>
    %346 = vector.shape_cast %342 : vector<2x128xbf16> to vector<1x2x128xbf16>
    tpu.vector_store %arg10[%343, %c0_156, %c0_157], %346 {strides = array<i32>} : memref<4x2x128xbf16, #tpu.memory_space<vmem>>, vector<1x2x128xbf16>,
    %c4_i32 = arith.constant 4 : i32
    return
  }
  func.func @transform_0(%arg0: i32) -> (i32, i32, i32) {
    %c0_i32 = arith.constant 0 : i32
    %c0_i32_0 = arith.constant 0 : i32
    %c0_i32_1 = arith.constant 0 : i32
    return %arg0, %c0_i32, %c0_i32_0 : i32, i32, i32
  }
  func.func @transform_1(%arg0: i32) -> (i32, i32, i32) {
    %c0_i32 = arith.constant 0 : i32
    %0 = arith.subi %c0_i32, %arg0 : i32
    %c0_i32_0 = arith.constant 0 : i32
    %c0_i32_1 = arith.constant 0 : i32
    %c0_i32_2 = arith.constant 0 : i32
    return %0, %c0_i32_0, %c0_i32_1 : i32, i32, i32
  }
  func.func @transform_2(%arg0: i32) -> (i32, i32) {
    %c0_i32 = arith.constant 0 : i32
    %c0_i32_0 = arith.constant 0 : i32
    %c0_i32_1 = arith.constant 0 : i32
    return %c0_i32, %c0_i32_0 : i32, i32
  }
  func.func @transform_3(%arg0: i32) -> (i32, i32) {
    %c0_i32 = arith.constant 0 : i32
    %c0_i32_0 = arith.constant 0 : i32
    %c0_i32_1 = arith.constant 0 : i32
    return %c0_i32, %c0_i32_0 : i32, i32
  }
  func.func @transform_4(%arg0: i32) -> (i32, i32) {
    %c0_i32 = arith.constant 0 : i32
    %c0_i32_0 = arith.constant 0 : i32
    %c0_i32_1 = arith.constant 0 : i32
    return %c0_i32, %c0_i32_0 : i32, i32
  }
  func.func @transform_5(%arg0: i32) -> (i32, i32) {
    %c0_i32 = arith.constant 0 : i32
    %c0_i32_0 = arith.constant 0 : i32
    %c0_i32_1 = arith.constant 0 : i32
    return %c0_i32, %c0_i32_0 : i32, i32
  }
  func.func @transform_6(%arg0: i32) -> (i32, i32) {
    %c0_i32 = arith.constant 0 : i32
    %c0_i32_0 = arith.constant 0 : i32
    %c0_i32_1 = arith.constant 0 : i32
    return %c0_i32, %c0_i32_0 : i32, i32
  }
  func.func @transform_7(%arg0: i32) -> (i32, i32) {
    %c0_i32 = arith.constant 0 : i32
    %c0_i32_0 = arith.constant 0 : i32
    %c0_i32_1 = arith.constant 0 : i32
    return %c0_i32, %c0_i32_0 : i32, i32
  }
  func.func @transform_8(%arg0: i32) -> (i32, i32, i32) {
    %c0_i32 = arith.constant 0 : i32
    %c0_i32_0 = arith.constant 0 : i32
    %c0_i32_1 = arith.constant 0 : i32
    return %arg0, %c0_i32, %c0_i32_0 : i32, i32, i32
  }
  func.func @transform_9(%arg0: i32) -> (i32, i32, i32) {
    %c0_i32 = arith.constant 0 : i32
    %0 = arith.subi %c0_i32, %arg0 : i32
    %c0_i32_0 = arith.constant 0 : i32
    %c0_i32_1 = arith.constant 0 : i32
    %c0_i32_2 = arith.constant 0 : i32
    return %0, %c0_i32_0, %c0_i32_1 : i32, i32, i32
  }
}

module attributes {stable_mosaic.version = 11 : i64} {
  func.func @_head_kernel(%arg0: i32, %arg1: memref<8x128xbf16, #tpu.memory_space<vmem>>, %arg2: memref<8x128xbf16, #tpu.memory_space<vmem>>, %arg3: memref<128x512xbf16, #tpu.memory_space<vmem>>, %arg4: memref<128x512xbf16, #tpu.memory_space<vmem>>, %arg5: memref<1x512xf32, #tpu.memory_space<vmem>>, %arg6: memref<512x128xbf16, #tpu.memory_space<vmem>>, %arg7: memref<1x128xf32, #tpu.memory_space<vmem>>, %arg8: memref<8x128xf32, #tpu.memory_space<vmem>>) attributes {dimension_semantics = [#tpu.dimension_semantics<parallel>], iteration_bounds = array<i64: 1>, scalar_prefetch = 0 : i64, scratch_operands = 0 : i64, tpu.core_type = #tpu.core_type<tc>, window_params = [{transform_indices = @transform_0, window_bounds = array<i64: 8, 128>}, {transform_indices = @transform_1, window_bounds = array<i64: 8, 128>}, {pipeline_mode = #tpu.pipeline_mode<synchronous>, transform_indices = @transform_2, window_bounds = array<i64: 128, 512>}, {pipeline_mode = #tpu.pipeline_mode<synchronous>, transform_indices = @transform_3, window_bounds = array<i64: 128, 512>}, {pipeline_mode = #tpu.pipeline_mode<synchronous>, transform_indices = @transform_4, window_bounds = array<i64: 1, 512>}, {pipeline_mode = #tpu.pipeline_mode<synchronous>, transform_indices = @transform_5, window_bounds = array<i64: 512, 128>}, {pipeline_mode = #tpu.pipeline_mode<synchronous>, transform_indices = @transform_6, window_bounds = array<i64: 1, 128>}, {transform_indices = @transform_7, window_bounds = array<i64: 8, 128>}]} {
    %c0 = arith.constant 0 : index
    %c0_0 = arith.constant 0 : index
    %0 = vector.load %arg1[%c0, %c0_0] : memref<8x128xbf16, #tpu.memory_space<vmem>>, vector<8x128xbf16>
    %c0_1 = arith.constant 0 : index
    %c0_2 = arith.constant 0 : index
    %1 = vector.load %arg3[%c0_1, %c0_2] : memref<128x512xbf16, #tpu.memory_space<vmem>>, vector<128x512xbf16>
    %cst = arith.constant dense<0.000000e+00> : vector<8x512xf32>
    %2 = tpu.matmul %0, %1, %cst {dimension_numbers = #tpu.dot_dimension_numbers<[1], [0], [0], [1], [0, 0, 1, 1], [], []>} : vector<8x128xbf16>, vector<128x512xbf16>, vector<8x512xf32> -> vector<8x512xf32>
    %c0_3 = arith.constant 0 : index
    %c0_4 = arith.constant 0 : index
    %3 = vector.load %arg2[%c0_3, %c0_4] : memref<8x128xbf16, #tpu.memory_space<vmem>>, vector<8x128xbf16>
    %c0_5 = arith.constant 0 : index
    %c0_6 = arith.constant 0 : index
    %4 = vector.load %arg4[%c0_5, %c0_6] : memref<128x512xbf16, #tpu.memory_space<vmem>>, vector<128x512xbf16>
    %cst_7 = arith.constant dense<0.000000e+00> : vector<8x512xf32>
    %5 = tpu.matmul %3, %4, %cst_7 {dimension_numbers = #tpu.dot_dimension_numbers<[1], [0], [0], [1], [0, 0, 1, 1], [], []>} : vector<8x128xbf16>, vector<128x512xbf16>, vector<8x512xf32> -> vector<8x512xf32>
    %6 = arith.addf %2, %5 : vector<8x512xf32>
    %c0_8 = arith.constant 0 : index
    %c0_9 = arith.constant 0 : index
    %7 = vector.load %arg5[%c0_8, %c0_9] : memref<1x512xf32, #tpu.memory_space<vmem>>, vector<1x512xf32>
    %8 = vector.broadcast %7 : vector<1x512xf32> to vector<8x512xf32>
    %9 = arith.addf %6, %8 : vector<8x512xf32>
    %cst_10 = arith.constant 0.000000e+00 : f32
    %10 = vector.broadcast %cst_10 : f32 to vector<8x512xf32>
    %11 = arith.maximumf %9, %10 : vector<8x512xf32>
    %12 = arith.truncf %11 : vector<8x512xf32> to vector<8x512xbf16>
    %c0_11 = arith.constant 0 : index
    %c0_12 = arith.constant 0 : index
    %13 = vector.load %arg6[%c0_11, %c0_12] : memref<512x128xbf16, #tpu.memory_space<vmem>>, vector<512x128xbf16>
    %cst_13 = arith.constant dense<0.000000e+00> : vector<8x128xf32>
    %14 = tpu.matmul %12, %13, %cst_13 {dimension_numbers = #tpu.dot_dimension_numbers<[1], [0], [0], [1], [0, 0, 1, 1], [], []>} : vector<8x512xbf16>, vector<512x128xbf16>, vector<8x128xf32> -> vector<8x128xf32>
    %c0_14 = arith.constant 0 : index
    %c0_15 = arith.constant 0 : index
    %15 = vector.load %arg7[%c0_14, %c0_15] : memref<1x128xf32, #tpu.memory_space<vmem>>, vector<1x128xf32>
    %16 = vector.broadcast %15 : vector<1x128xf32> to vector<8x128xf32>
    %17 = arith.addf %14, %16 : vector<8x128xf32>
    %c0_16 = arith.constant 0 : index
    %c0_17 = arith.constant 0 : index
    %18 = vector.load %arg8[%c0_16, %c0_17] : memref<8x128xf32, #tpu.memory_space<vmem>>, vector<8x128xf32>
    tpu.vector_store %arg8[%c0_16, %c0_17], %17 {strides = array<i32>} : memref<8x128xf32, #tpu.memory_space<vmem>>, vector<8x128xf32>,
    return
  }
  func.func @transform_0(%arg0: i32) -> (i32, i32) {
    %c0_i32 = arith.constant 0 : i32
    %c0_i32_0 = arith.constant 0 : i32
    return %arg0, %c0_i32 : i32, i32
  }
  func.func @transform_1(%arg0: i32) -> (i32, i32) {
    %c0_i32 = arith.constant 0 : i32
    %c0_i32_0 = arith.constant 0 : i32
    return %arg0, %c0_i32 : i32, i32
  }
  func.func @transform_2(%arg0: i32) -> (i32, i32) {
    %c0_i32 = arith.constant 0 : i32
    %c0_i32_0 = arith.constant 0 : i32
    %c0_i32_1 = arith.constant 0 : i32
    return %c0_i32, %c0_i32_0 : i32, i32
  }
  func.func @transform_3(%arg0: i32) -> (i32, i32) {
    %c0_i32 = arith.constant 0 : i32
    %c0_i32_0 = arith.constant 0 : i32
    %c0_i32_1 = arith.constant 0 : i32
    return %c0_i32, %c0_i32_0 : i32, i32
  }
  func.func @transform_4(%arg0: i32) -> (i32, i32) {
    %c0_i32 = arith.constant 0 : i32
    %c0_i32_0 = arith.constant 0 : i32
    %c0_i32_1 = arith.constant 0 : i32
    return %c0_i32, %c0_i32_0 : i32, i32
  }
  func.func @transform_5(%arg0: i32) -> (i32, i32) {
    %c0_i32 = arith.constant 0 : i32
    %c0_i32_0 = arith.constant 0 : i32
    %c0_i32_1 = arith.constant 0 : i32
    return %c0_i32, %c0_i32_0 : i32, i32
  }
  func.func @transform_6(%arg0: i32) -> (i32, i32) {
    %c0_i32 = arith.constant 0 : i32
    %c0_i32_0 = arith.constant 0 : i32
    %c0_i32_1 = arith.constant 0 : i32
    return %c0_i32, %c0_i32_0 : i32, i32
  }
  func.func @transform_7(%arg0: i32) -> (i32, i32) {
    %c0_i32 = arith.constant 0 : i32
    %c0_i32_0 = arith.constant 0 : i32
    return %arg0, %c0_i32 : i32, i32
  }
}

</mosaic_0001>

<bundles_post_ra>
// kernel: lstm_text_predictor_forward.5
= control target key start
LH: loop header
LB: loop body
LE: loop exit
PB: predicated region body
PF: predicated region fallthrough
CT: control target
= control target key end

     0   :  { %s2432_s12 = smov 0   ;;  %s2972_s0 = inlined_call_operand.vmem [shape: bf16[2,10,10,4], index: 0, kind: input, shape index: {}]   ;;  %s2973_s1 = inlined_call_operand.vmem [shape: bf16[36,128], index: 1, kind: input, shape index: {}]   ;;  %s2974_s2 = inlined_call_operand.vmem [shape: f32[1,128], index: 2, kind: input, shape index: {}]   ;;  %s2975_s3 = inlined_call_operand.vmem [shape: bf16[2,4,4,128], index: 3, kind: output, shape index: {}]  }
   0x1 LB: > { %s2076_s13 = sadd.s32 4294967295, %s2409_s12   ;;  %p2080_p0 = scmp.ge.s32.totalorder %s2409_s12, 1  ;;  %s2409_s12 = sphi %s2432_s12, %s13_s12  }
   0x2   : > { %p137_p1 = scmp.lt.s32.totalorder %s2409_s12, 3 }
   0x4   : > { %p138_p2 = pnand %p2080_p0, %p137_p1 }
   0x5   : > { %v192_v0 = vld [vmem:[%s2973_s1] sm:$0xf] (!%p138_p2)  ;;  %vm341_vm0 = vcmask (!%p138_p2), 1041408   ;;  %v2446_v1 = vld [vmem:[%s2973_s1 + $0x8] sm:$0xf] (!%p138_p2)  ;;  %p161_p3 = scmp.lt.s32.totalorder (!%p138_p2), %s2076_s13, 1 }
   0x6   : > { %141 = sbr.rel (%p138_p2) target bundleno = 426 (0x1aa), region = 32  ;;  %v2088_v2 = vcombine.low (!%p138_p2), %v192_v0, %v192_v0  ;;  %2374 = vmatprep.subr.msk.bf16.mxu0 (!%p138_p2), %vm341_vm0, %v2446_v1  ;;  %v2139_v3 = vcombine.low (!%p138_p2), %v2446_v1, %v2446_v1  ;;  %v2454_v4 = vsel (!%p138_p2), %vm341_vm0, %v2446_v1, 0  ;;  %vm197_vm1 = vsmask.f32 (!%p138_p2), 3328 }
   0x7   : > { %2255 = vmatpush3.bf16.msra.mxu0 (!%p138_p2), %v2454_v4  ;;  %vm198_vm2 = vsmask.f32 (!%p138_p2), 7440  ;;  %vm328_vm3 = vcmask (!%p138_p2), 31744   ;;  %v2491_v19 = vsel (!%p138_p2), %vm341_vm0, %v192_v0, 0  ;;  %vm518_vm5 = vcmask (!%p138_p2), 1042432  }
   0x8   : > { %v327_v5 = vrot.slane (!%p138_p2), %v2088_v2, 2  ;;  %v871_v6 = vrot.slane (!%p138_p2), %v2139_v3, 2  ;;  %vm2510_vm4 = vmor (!%p138_p2), %vm197_vm1, %vm198_vm2  ;;  %vm519_vm6 = vcmask (!%p138_p2), 1046532   ;;  %vm1955_vm8 = vcmask (!%p138_p2), 1041409  }
   0x9   : > { %vm2581_vm7 = vmor (!%p138_p2), %vm518_vm5, %vm519_vm6  ;;  %vm1958_vm9 = vcmask (!%p138_p2), 1042434   ;;  %vm1961_vm10 = vcmask (!%p138_p2), 1043459  }
   0xa   : > { %2370 = vmatprep.subr.msk.bf16.mxu1 (!%p138_p2), %vm341_vm0, %v327_v5  ;;  %v343_v7 = vsel (!%p138_p2), %vm341_vm0, %v327_v5, 0  ;;  %2376 = vmatprep.subr.msk.bf16.mxu0 (!%p138_p2), %vm341_vm0, %v871_v6  ;;  %v2494_v20 = vsel (!%p138_p2), %vm341_vm0, %v871_v6, 0 }
   0xb   : > { %2215 = vmatpush3.bf16.msra.mxu1 (!%p138_p2), %v343_v7 }
   0xc   : > { %2371 = vmatprep.subr.msk.bf16.mxu1 (!%p138_p2), %vm341_vm0, %v192_v0 }
   0xd   : > { %s2981_s13 = smov (!%p161_p3, %s2076_s13), 1 }
   0xe   : > { %s2380_s18 = smul.u32 80, %s2981_s13  ;;  %s2168_s30 = sshll.u32 %s2981_s13, 3 }
   0xf   : > { %s2875_s6 = scalar_lea.vmem %s2975_s3, %s2168_s30 }
  0x10   : > { %s2466_s21 = scalar_lea.vmem %s2972_s0, %s2380_s18 }
  0x11   : > { %v2469_v8 = vld [vmem:[%s2466_s21] sm:$0xf]  ;;  %v2472_v9 = vld [vmem:[%s2466_s21 + $0x4] sm:$0x1]  ;;  %v2475_v10 = vld [vmem:[%s2466_s21 + $0x8] sm:$0xf] }
  0x12   : > { %v2479_v11 = vld [vmem:[%s2466_s21 + $0xc] sm:$0x1]  ;;  %v201_v12 = vshrl.u32 %v2469_v8, 16  ;;  %v204_v13 = vshll.u32 %v2469_v8, 16  ;;  %v210_v14 = vshll.u32 %v2472_v9, 16  ;;  %v215_v15 = vshrl.u32 %v2475_v10, 16 }
  0x13   : > { %v218_v16 = vshll.u32 %v2475_v10, 16  ;;  %v224_v17 = vshll.u32 %v2479_v11, 16  ;;  %v2488_v18 = vld [vmem:[%s2466_s21 + $0x10] sm:$0xf]  ;;  %v527_v24 = vrot.slane %v2479_v11, 5  ;;  %v2093_v11 = vcombine.low %v2469_v8, %v2475_v10 }
  0x14   : > { %v203_v21 = vrot.slane %v201_v12, 4  ;;  %v206_v22 = vrot.slane %v204_v13, 5  ;;  %v217_v23 = vrot.slane %v215_v15, 4  ;;  %v2498_v25 = vld [vmem:[%s2466_s21 + $0x14] sm:$0x1]  ;;  %v212_v26 = vrot.slane %v210_v14, 5 }
  0x15   : > { %v220_v27 = vrot.slane %v218_v16, 5  ;;  %v2501_v28 = vld [vmem:[%s2466_s21 + $0x18] sm:$0xf]  ;;  %v2504_v29 = vld [vmem:[%s2466_s21 + $0x1c] sm:$0x1]  ;;  %v226_v31 = vrot.slane %v224_v17, 5 }
  0x16   : > { %v207_v30 = vor.u32 %v206_v22, %v203_v21  ;;  %v229_v32 = vshrl.u32 %v2488_v18, 16  ;;  %v232_v33 = vshll.u32 %v2488_v18, 16  ;;  %v2515_v36 = vld [vmem:[%s2466_s21 + $0x20] sm:$0xf]  ;;  %v238_v37 = vshll.u32 %v2498_v25, 16 }
  0x17   : > { %v221_v35 = vor.u32 %v220_v27, %v217_v23  ;;  %v243_v38 = vshrl.u32 %v2501_v28, 16  ;;  %v246_v39 = vshll.u32 %v2501_v28, 16  ;;  %v2521_v41 = vld [vmem:[%s2466_s21 + $0x24] sm:$0x1]  ;;  %v252_v44 = vshll.u32 %v2504_v29, 16 }
  0x18   : > { %v208_v40 = vrot.slane %v207_v30, 4  ;;  %v231_v42 = vrot.slane %v229_v32, 4  ;;  %v234_v43 = vrot.slane %v232_v33, 5  ;;  %v240_v46 = vrot.slane %v238_v37, 5  ;;  %v2532_v57 = vld [vmem:[%s2466_s21 + $0x28] sm:$0xf] }
  0x19   : > { %v222_v45 = vrot.slane %v221_v35, 4  ;;  %v245_v47 = vrot.slane %v243_v38, 4  ;;  %v248_v48 = vrot.slane %v246_v39, 5  ;;  %v254_v51 = vrot.slane %v252_v44, 5  ;;  %v2536_v62 = vld [vmem:[%s2466_s21 + $0x2c] sm:$0x1] }
  0x1a   : > { %v213_v49 = vsel %vm2510_vm4, %v208_v40, %v212_v26  ;;  %v235_v50 = vor.u32 %v234_v43, %v231_v42  ;;  %v257_v52 = vshrl.u32 %v2515_v36, 16  ;;  %v260_v55 = vshll.u32 %v2515_v36, 16  ;;  %v2540_v5 = vld [vmem:[%s2466_s21 + $0x30] sm:$0xf]  ;;  %v2549_v14 = vld [vmem:[%s2466_s21 + $0x34] sm:$0x1] }
  0x1b   : > { %v227_v53 = vsel %vm2510_vm4, %v222_v45, %v226_v31  ;;  %v249_v54 = vor.u32 %v248_v48, %v245_v47  ;;  %v266_v56 = vshll.u32 %v2521_v41, 16  ;;  %v531_v61 = vrot.slane %v2498_v25, 5  ;;  %v2555_v22 = vld [vmem:[%s2466_s21 + $0x38] sm:$0xf]  ;;  %v2560_v27 = vld [vmem:[%s2466_s21 + $0x3c] sm:$0x1] }
  0x1c   : > { %v2084_v58 = vcombine.low %v213_v49, %v227_v53  ;;  %v236_v59 = vrot.slane %v235_v50, 4  ;;  %v259_v60 = vrot.slane %v257_v52, 4  ;;  %v262_v0 = vrot.slane %v260_v55, 5  ;;  %v2569_v37 = vld [vmem:[%s2973_s1 + $0x4] sm:$0xf] }
  0x1d   : > { %v250_v63 = vrot.slane %v249_v54, 4  ;;  %v268_v2 = vrot.slane %v266_v56, 5  ;;  %v535_v3 = vrot.slane %v2504_v29, 5  ;;  %v539_v7 = vrot.slane %v2521_v41, 5  ;;  %v195_v55 = vld [vmem:[%s2973_s1 + $0xc] sm:$0xf] }
  0x1e   : > { %2216 = vmatprep.mubr.msk.bf16.mxu1 %vm328_vm3, %v2084_v58  ;;  %v241_v6 = vsel %vm2510_vm4, %v236_v59, %v240_v46  ;;  %v271_v12 = vshrl.u32 %v2532_v57, 16  ;;  %v274_v13 = vshll.u32 %v2532_v57, 16  ;;  %v263_v16 = vor.u32 %v262_v0, %v259_v60 }
  0x1f   : > { %v255_v15 = vsel %vm2510_vm4, %v250_v63, %v254_v51  ;;  %v2126_v17 = vcombine.low %v227_v53, %v241_v6  ;;  %v280_v21 = vshll.u32 %v2536_v62, 16  ;;  %v285_v30 = vshrl.u32 %v2540_v5, 16  ;;  %v196_v51 = vld [vmem:[%s2973_s1 + $0x10] sm:$0x3] }
  0x20   : > { %v2557_v23 = vcombine.low %v241_v6, %v255_v15  ;;  %v273_v25 = vrot.slane %v271_v12, 4  ;;  %v276_v26 = vrot.slane %v274_v13, 5  ;;  %v264_v31 = vrot.slane %v263_v16, 4 }
  0x21   : > { %2256 = vmatprep.mubr.msk.bf16.mxu0 %vm328_vm3, %v2126_v17  ;;  %v282_v32 = vrot.slane %v280_v21, 5  ;;  %v288_v33 = vshll.u32 %v2540_v5, 16  ;;  %v294_v35 = vshll.u32 %v2549_v14, 16  ;;  %v287_v39 = vrot.slane %v285_v30, 4 }
  0x22   : > { %2217 = vmatmul.mubr.msk.bf16.vlgmr.msra.gmra.mrb[0].mxu1 %vm328_vm3, %v2557_v23  ;;  %v277_v38 = vor.u32 %v276_v26, %v273_v25  ;;  %v299_v40 = vshrl.u32 %v2555_v22, 16  ;;  %v302_v42 = vshll.u32 %v2555_v22, 16  ;;  %v269_v43 = vsel %vm2510_vm4, %v264_v31, %v268_v2  ;;  %v2646_v31 = vld [vmem:[%s2466_s21 + $0x40] sm:$0xf] }
  0x23   : > { %2225 = vmatpush3.bf16.msra.mxu1 %v2491_v19  ;;  %v290_v44 = vrot.slane %v288_v33, 5  ;;  %v296_v45 = vrot.slane %v294_v35, 5  ;;  %v308_v46 = vshll.u32 %v2560_v27, 16  ;;  %v2127_v47 = vcombine.low %v255_v15, %v269_v43 }
  0x24   : > { %v278_v48 = vrot.slane %v277_v38, 4  ;;  %v301_v49 = vrot.slane %v299_v40, 4  ;;  %v304_v50 = vrot.slane %v302_v42, 5  ;;  %2372 = vmatprep.subr.msk.bf16.mxu1 %vm341_vm0, %v2569_v37  ;;  %v2102_v19 = vrot.slane %v2475_v10, 9 }
  0x25   : > { %v291_v52 = vor.u32 %v290_v44, %v287_v39  ;;  %v310_v53 = vrot.slane %v308_v46, 5  ;;  %v2103_v54 = vrot.slane %v2488_v18, 9  ;;  %2257 = vmatmul.mubr.msk.bf16.vlgmr.msra.gmra.mrb[0].mxu0 %vm328_vm3, %v2127_v47  ;;  %v2104_v59 = vrot.slane %v2501_v28, 9 }
  0x26   : > { %v2595_v56 = vsel %vm2510_vm4, %v278_v48, %v282_v32  ;;  %v305_v58 = vor.u32 %v304_v50, %v301_v49  ;;  %v2105_v60 = vrot.slane %v2515_v36, 9  ;;  %2265 = vmatpush3.bf16.msra.mxu0 %v2494_v20  ;;  %v528_v2 = vsel %vm2581_vm7, %v2102_v19, %v527_v24  ;;  %v2649_v32 = vld [vmem:[%s2466_s21 + $0x44] sm:$0x1]  ;;  %v190_v49 = vld [vmem:[%s2466_s21 + $0x48] sm:$0xf] }
  0x27   : > { %v2601_v63 = vcombine.low %v269_v43, %v2595_v56  ;;  %v292_v0 = vrot.slane %v291_v52, 4  ;;  %v532_v6 = vsel %vm2581_vm7, %v2103_v54, %v531_v61  ;;  %2377 = vmatprep.subr.msk.bf16.mxu0 %vm341_vm0, %v195_v55  ;;  %v2106_v24 = vrot.slane %v2532_v57, 9  ;;  %v191_v50 = vld [vmem:[%s2466_s21 + $0x4c] sm:$0x1] }
  0x28   : > { %v306_v12 = vrot.slane %v305_v58, 4  ;;  %v2135_v13 = vcombine.low %v528_v2, %v532_v6  ;;  %v543_v15 = vrot.slane %v2536_v62, 5  ;;  %v2107_v16 = vrot.slane %v2540_v5, 9 }
  0x29   : > { %2220 = vmatprep.mubr.msk.bf16.mxu1 %vm328_vm3, %v2601_v63  ;;  %v2614_v20 = vsel %vm2510_vm4, %v292_v0, %v296_v45  ;;  %v547_v17 = vrot.slane %v2549_v14, 5  ;;  %v536_v25 = vsel %vm2581_vm7, %v2104_v59, %v535_v3  ;;  %v540_v26 = vsel %vm2581_vm7, %v2105_v60, %v539_v7 }
  0x2a   : > { %v2621_v61 = vsel %vm2510_vm4, %v306_v12, %v310_v53  ;;  %2266 = vmatprep.mubr.msk.bf16.mxu0 %vm328_vm3, %v2135_v13  ;;  %v2150_v30 = vcombine.low %v195_v55, %v195_v55  ;;  %v544_v62 = vsel %vm2581_vm7, %v2106_v24, %v543_v15  ;;  %v2136_v29 = vcombine.low %v536_v25, %v540_v26 }
  0x2b   : > { %v2629_v21 = vcombine.low %v2614_v20, %v2621_v61  ;;  %v2643_v14 = vsel %vm2581_vm7, %v2107_v16, %v547_v17  ;;  %v2121_v41 = vcombine.low %v2569_v37, %v2569_v37  ;;  %v2108_v3 = vrot.slane %v2555_v22, 9 }
  0x2c   : > { %v2137_v7 = vcombine.low %v544_v62, %v2643_v14  ;;  %v551_v33 = vrot.slane %v2560_v27, 5  ;;  %v2134_v35 = vrot.slane %v2646_v31, 9  ;;  %v861_v38 = vrot.slane %v2649_v32, 5 }
  0x2d   : > { %2221 = vmatmul.mubr.msk.bf16.gmra.mrb[4].mxu1 %vm328_vm3, %v2629_v21  ;;  %v1061_v39 = vrot.slane %v2150_v30, 2  ;;  %v967_v40 = vsel %vm341_vm0, %v195_v55, 0  ;;  %v2094_v42 = vcombine.low %v2488_v18, %v2501_v28  ;;  %v662_v43 = vrot.slane %v2121_v41, 2 }
  0x2e   : > { %2226 = vmatprep.mubr.msk.bf16.mxu1 %vm328_vm3, %v2093_v11  ;;  %v578_v44 = vsel %vm341_vm0, %v2569_v37, 0  ;;  %v2095_v27 = vcombine.low %v2515_v36, %v2532_v57  ;;  %v523_v45 = vrot.slane %v2472_v9, 5  ;;  %v552_v46 = vsel %vm2581_vm7, %v2108_v3, %v551_v33 }
  0x2f   : > { %v2675_v47 = vsel %vm2581_vm7, %v2134_v35, %v861_v38  ;;  %v2101_v48 = vrot.slane %v2469_v8, 9  ;;  %v2155_v37 = vrot.slane %v190_v49, 9  ;;  %v1144_v52 = vrot.slane %v191_v50, 5 }
  0x30   : > { %v2138_v9 = vcombine.low %v552_v46, %v2675_v47  ;;  %v2096_v19 = vcombine.low %v2540_v5, %v2555_v22  ;;  %v1066_v55 = vsel %vm341_vm0, %v1061_v39, 0  ;;  %v2110_v58 = vcombine.low %v532_v6, %v536_v25 }
  0x31   : > { %2267 = vmatmul.mubr.msk.bf16.vlgmr.msra.gmra.mrb[0].mxu0 %vm328_vm3, %v2136_v29  ;;  %v2686_v53 = vsel %vm2581_vm7, %v2155_v37, %v1144_v52  ;;  %v524_v8 = vsel %vm2581_vm7, %v2101_v48, %v523_v45  ;;  %v676_v59 = vsel %vm341_vm0, %v662_v43, 0  ;;  %v2111_v60 = vcombine.low %v540_v26, %v544_v62 }
  0x32   : > { %2275 = vmatpush3.bf16.msra.mxu0 %v967_v40  ;;  %2270 = vmatprep.mubr.msk.bf16.mxu0 %vm328_vm3, %v2137_v7  ;;  %v2109_v54 = vcombine.low %v524_v8, %v528_v2  ;;  %v1043_v0 = vshrl.u32 %v190_v49, 16  ;;  %v1046_v2 = vshll.u32 %v190_v49, 16  ;;  %v752_v12 = vshrl.u32 %v2646_v31, 16 }
  0x33   : > { %2378 = vmatprep.subr.msk.bf16.mxu0 %vm341_vm0, %v1061_v39  ;;  %v755_v13 = vshll.u32 %v2646_v31, 16  ;;  %v2144_v6 = vcombine.low %v2646_v31, %v190_v49  ;;  %v2112_v17 = vcombine.low %v2643_v14, %v552_v46  ;;  %v2117_v25 = vcombine.low %v2475_v10, %v2488_v18 }
  0x34   : > { %v754_v11 = vrot.slane %v752_v12, 4  ;;  %v1045_v15 = vrot.slane %v1043_v0, 4  ;;  %v1048_v16 = vrot.slane %v1046_v2, 5  ;;  %v761_v30 = vshll.u32 %v2649_v32, 16 }
  0x35   : > { %2227 = vmatmul.mubr.msk.bf16.vlgmr.msra.gmra.mrb[0].mxu1 %vm328_vm3, %v2094_v42  ;;  %v757_v24 = vrot.slane %v755_v13, 5  ;;  %v1052_v29 = vshll.u32 %v191_v50, 16  ;;  %v1152_v7 = vsel %vm341_vm0, %v196_v51, 0  ;;  %v2118_v10 = vcombine.low %v2501_v28, %v2515_v36 }
  0x36   : > { %2235 = vmatpush3.bf16.msra.mxu1 %v578_v44  ;;  %2230 = vmatprep.mubr.msk.bf16.mxu1 %vm328_vm3, %v2095_v27  ;;  %v1049_v62 = vor.u32 %v1048_v16, %v1045_v15  ;;  %v763_v41 = vrot.slane %v761_v30, 5  ;;  %v2119_v18 = vcombine.low %v2532_v57, %v2540_v5  ;;  %v2120_v36 = vcombine.low %v2555_v22, %v2646_v31 }
  0x37   : > { %2373 = vmatprep.subr.msk.bf16.mxu1 %vm341_vm0, %v662_v43  ;;  %v758_v26 = vor.u32 %v757_v24, %v754_v11  ;;  %v1054_v3 = vrot.slane %v1052_v29, 5  ;;  %v2128_v57 = vcombine.low %v2595_v56, %v2614_v20  ;;  %v2156_v34 = vcombine.low %v2675_v47, %v2686_v53 }
  0x38   : > { %v1050_v14 = vrot.slane %v1049_v62, 4  ;;  %v2411_v20 = vmov 1983009808   ;;  %v1239_v31 = vlaneseq }
  0x39   : > { %2271 = vmatmul.mubr.msk.bf16.gmra.mrb[4].mxu0 %vm328_vm3, %v2138_v9 }
  0x3a   : > { %2276 = vmatprep.mubr.msk.bf16.mxu0 %vm328_vm3, %v2094_v42  ;;  %v1055_v32 = vsel %vm2510_vm4, %v1050_v14, %v1054_v3  ;;  %v1240_v35 = vshrl.u32 %v1239_v31, 7 }
  0x3d   : > { %2231 = vmatmul.mubr.msk.bf16.gmra.mrb[4].mxu1 %vm328_vm3, %v2096_v19 }
  0x3e   : > { %2236 = vmatprep.mubr.msk.bf16.mxu1 %vm328_vm3, %v2109_v54 }
  0x41   : > { %2277 = vmatmul.mubr.msk.bf16.vlgmr.msra.gmra.mrb[0].mxu0 %vm328_vm3, %v2095_v27 }
  0x42   : > { %2285 = vmatpush3.bf16.msra.mxu0 %v1066_v55  ;;  %2280 = vmatprep.mubr.msk.bf16.mxu0 %vm328_vm3, %v2096_v19 }
  0x43   : > { %2379 = vmatprep.subr.msk.bf16.mxu0 %vm341_vm0, %v196_v51 }
  0x45   : > { %2237 = vmatmul.mubr.msk.bf16.vlgmr.msra.gmra.mrb[0].mxu1 %vm328_vm3, %v2110_v58 }
  0x46   : > { %2245 = vmatpush3.bf16.msra.mxu1 %v676_v59  ;;  %2240 = vmatprep.mubr.msk.bf16.mxu1 %vm328_vm3, %v2111_v60 }
  0x47   : > { %2375 = vmatprep.subr.msk.bf16.mxu1 %vm341_vm0, %v2446_v1  ;;  %v759_v1 = vrot.slane %v758_v26, 4 }
  0x49   : > { %2281 = vmatmul.mubr.msk.bf16.gmra.mrb[4].mxu0 %vm328_vm3, %v2144_v6 }
  0x4a   : > { %2286 = vmatprep.mubr.msk.bf16.mxu0 %vm328_vm3, %v2557_v23  ;;  %v764_v23 = vsel %vm2510_vm4, %v759_v1, %v763_v41 }
  0x4b   : > { %v2149_v28 = vcombine.low %v764_v23, %v1055_v32 }
  0x4d   : > { %2241 = vmatmul.mubr.msk.bf16.gmra.mrb[4].mxu1 %vm328_vm3, %v2112_v17 }
  0x4e   : > { %2246 = vmatprep.mubr.msk.bf16.mxu1 %vm328_vm3, %v2117_v25 }
  0x51   : > { %2287 = vmatmul.mubr.msk.bf16.vlgmr.msra.gmra.mrb[0].mxu0 %vm328_vm3, %v2601_v63 }
  0x52   : > { %2295 = vmatpush3.bf16.msra.mxu0 %v1152_v7  ;;  %2290 = vmatprep.mubr.msk.bf16.mxu0 %vm328_vm3, %v2629_v21  ;;  %v1237_v21 = vunpack.c.l.s4 %v2411_v20 }
  0x54   : > { %v1238_v33 = vunpack.c.0.s8 %v1237_v21 }
  0x55   : > { %2247 = vmatmul.mubr.msk.bf16.vlgmr.msra.gmra.mrb[0].mxu1 %vm328_vm3, %v2118_v10 }
  0x56   : > { %2305 = vmatpush3.bf16.msra.mxu1 %v2454_v4  ;;  %2250 = vmatprep.mubr.msk.bf16.mxu1 %vm328_vm3, %v2119_v18  ;;  %v2129_v4 = vcombine.low %v2621_v61, %v764_v23  ;;  %v2752_v38 = vsub.s32 %v1238_v33, %v1240_v35 }
  0x59   : > { %2291 = vmatmul.mubr.msk.bf16.gmra.mrb[4].mxu0 %vm328_vm3, %v2149_v28 }
  0x5a   : > { %2296 = vmatprep.mubr.msk.bf16.mxu0 %vm328_vm3, %v2110_v58 }
  0x5d   : > { %2251 = vmatmul.mubr.msk.bf16.gmra.mrb[4].mxu1 %vm328_vm3, %v2120_v36 }
  0x5e   : > { %2260 = vmatprep.mubr.msk.bf16.mxu1 %vm328_vm3, %v2128_v57 }
  0x61   : > { %2297 = vmatmul.mubr.msk.bf16.vlgmr.msra.gmra.mrb[0].mxu0 %vm328_vm3, %v2111_v60 }
  0x62   : > { %2300 = vmatprep.mubr.msk.bf16.mxu0 %vm328_vm3, %v2112_v17 }
  0x69   : > { %2261 = vmatmul.mubr.msk.bf16.vlgmr.msra.gmra.mrb[4].mxu1 %vm328_vm3, %v2129_v4  ;;  %2301 = vmatmul.mubr.msk.bf16.gmra.mrb[4].mxu0 %vm328_vm3, %v2156_v34 }
 0x128   : > { %v2248_v5 = vpop.f32.mrb[0].mxu1 }
 0x129   : > { %v712_v22 = vpop.f32.mrb[1].mxu1 }
 0x12a   : > { %v2249_v56 = vpop.f32.mrb[2].mxu1 }
 0x12b   : > { %v715_v63 = vpop.f32.mrb[3].mxu1 }
 0x134   : > { %v2298_v39 = vpop.f32.mrb[0].mxu0 }
 0x135   : > { %v2306_v61 = vadd.f32 %v2298_v39, %v2248_v5  ;;  %v1188_v40 = vpop.f32.mrb[1].mxu0 }
 0x136   : > { %v2307_v42 = vadd.f32 %v1188_v40, %v712_v22  ;;  %v2299_v43 = vpop.f32.mrb[2].mxu0 }
 0x137   : > { %v1269_v44 = vcombine.high %v2306_v61, %v2306_v61  ;;  %v1276_v27 = vrot.slane %v2306_v61, %v2752_v38  ;;  %v2755_v45 = vadd.f32 %v2299_v43, %v2249_v56  ;;  %v1191_v46 = vpop.f32.mrb[3].mxu0 }
 0x138   : > { %v1235_v47 = vcombine.high %v2307_v42, %v2307_v42  ;;  %v1242_v48 = vrot.slane %v2307_v42, %v2752_v38  ;;  %v2758_v49 = vadd.f32 %v1191_v46, %v715_v63 }
 0x139   : > { %v1283_v50 = vrot.slane %v1269_v44, %v2752_v38  ;;  %v1284_v37 = vcombine.high %v1276_v27, %v1276_v27  ;;  %v1459_v52 = vsel %vm341_vm0, %v1276_v27, -inf  ;;  %v1286_v9 = vcombine.high %v2755_v45, %v2755_v45 }
 0x13a   : > { %v1460_v53 = vrot.slane %v1459_v52, 4  ;;  %v1249_v8 = vrot.slane %v1235_v47, %v2752_v38  ;;  %v1250_v19 = vcombine.high %v1242_v48, %v1242_v48  ;;  %v1403_v54 = vsel %vm341_vm0, %v1242_v48, -inf }
 0x13b   : > { %v1285_v55 = vcombine.high %v1283_v50, %v1283_v50  ;;  %v1466_v58 = vsel %vm341_vm0, %v1284_v37, -inf  ;;  %v1473_v51 = vsel %vm341_vm0, %v1283_v50, -inf  ;;  %v1404_v59 = vrot.slane %v1403_v54, 4 }
 0x13c   : > { %v2768_v60 = vpop.f32.mrb[4].mxu1  ;;  %v1461_v0 = vmax.f32 %v1459_v52, %v1460_v53  ;;  %v1467_v2 = vrot.slane %v1466_v58, 4  ;;  %v1474_v12 = vrot.slane %v1473_v51, 4  ;;  %v1251_v13 = vcombine.high %v1249_v8, %v1249_v8  ;;  %v2770_v6 = vpop.f32.mrb[4].mxu0 }
 0x13d   : > { %v2772_v11 = vpop.f32.mrb[5].mxu1  ;;  %v1480_v24 = vsel %vm341_vm0, %v1285_v55, -inf  ;;  %v1405_v15 = vmax.f32 %v1403_v54, %v1404_v59  ;;  %v1410_v16 = vsel %vm341_vm0, %v1250_v19, -inf  ;;  %v1417_v17 = vsel %vm341_vm0, %v1249_v8, -inf  ;;  %v2777_v25 = vpop.f32.mrb[5].mxu0 }
 0x13e   : > { %v2779_v26 = vpop.f32.mrb[6].mxu1  ;;  %v1462_v30 = vrot.slane %v1461_v0, 2  ;;  %v1468_v62 = vmax.f32 %v1466_v58, %v1467_v2  ;;  %v1475_v29 = vmax.f32 %v1473_v51, %v1474_v12  ;;  %v1481_v1 = vrot.slane %v1480_v24, 4  ;;  %v2781_v41 = vpop.f32.mrb[6].mxu0 }
 0x13f   : > { %v2783_v14 = vpop.f32.mrb[7].mxu1  ;;  %v1406_v3 = vrot.slane %v1405_v15, 2  ;;  %v1411_v7 = vrot.slane %v1410_v16, 4  ;;  %v1418_v10 = vrot.slane %v1417_v17, 4  ;;  %v1424_v18 = vsel %vm341_vm0, %v1251_v13, -inf  ;;  %v2786_v23 = vpop.f32.mrb[7].mxu0 }
 0x140   : > { %v1463_v32 = vmax.f32 %v1461_v0, %v1462_v30  ;;  %v1469_v28 = vrot.slane %v1468_v62, 2  ;;  %v1476_v36 = vrot.slane %v1475_v29, 2  ;;  %v1482_v57 = vmax.f32 %v1480_v24, %v1481_v1 }
 0x141   : > { %v1407_v4 = vmax.f32 %v1405_v15, %v1406_v3  ;;  %v1412_v34 = vmax.f32 %v1410_v16, %v1411_v7  ;;  %v1419_v5 = vmax.f32 %v1417_v17, %v1418_v10  ;;  %v1425_v22 = vrot.slane %v1424_v18, 4 }
 0x142   : > { %v1464_v56 = vrot.slane %v1463_v32, 1  ;;  %v1470_v63 = vmax.f32 %v1468_v62, %v1469_v28  ;;  %v1477_v20 = vmax.f32 %v1475_v29, %v1476_v36  ;;  %v1483_v21 = vrot.slane %v1482_v57, 2 }
 0x143   : > { %v1408_v31 = vrot.slane %v1407_v4, 1  ;;  %v1413_v33 = vrot.slane %v1412_v34, 2  ;;  %v1420_v35 = vrot.slane %v1419_v5, 2  ;;  %v1426_v39 = vmax.f32 %v1424_v18, %v1425_v22 }
 0x144   : > { %v2788_v61 = vmax.f32 %v1463_v32, %v1464_v56  ;;  %v1471_v40 = vrot.slane %v1470_v63, 1  ;;  %v1478_v42 = vrot.slane %v1477_v20, 1  ;;  %v1484_v43 = vmax.f32 %v1482_v57, %v1483_v21 }
 0x145   : > { %v2790_v44 = vmax.f32 %v1407_v4, %v1408_v31  ;;  %v1414_v27 = vmax.f32 %v1412_v34, %v1413_v33  ;;  %v1421_v46 = vmax.f32 %v1419_v5, %v1420_v35  ;;  %v1427_v47 = vrot.slane %v1426_v39, 2 }
 0x146   : > { %v2792_v48 = vmax.f32 %v1470_v63, %v1471_v40  ;;  %v2794_v50 = vmax.f32 %v1477_v20, %v1478_v42  ;;  %v1485_v37 = vrot.slane %v1484_v43, 1  ;;  %v1293_v52 = vrot.slane %v2755_v45, %v2752_v38 }
 0x147   : > { %v1415_v53 = vrot.slane %v1414_v27, 1  ;;  %v1422_v8 = vrot.slane %v1421_v46, 1  ;;  %v1428_v19 = vmax.f32 %v1426_v39, %v1427_v47  ;;  %v1300_v54 = vrot.slane %v1286_v9, %v2752_v38 }
 0x148   : > { %v2802_v55 = vmax.f32 %v1484_v43, %v1485_v37  ;;  %v1301_v58 = vcombine.high %v1293_v52, %v1293_v52  ;;  %v1487_v51 = vsel %vm341_vm0, %v1293_v52, -inf  ;;  %v1252_v59 = vcombine.high %v2758_v49, %v2758_v49 }
 0x149   : > { %v2807_v0 = vmax.f32 %v1414_v27, %v1415_v53  ;;  %v2809_v2 = vmax.f32 %v1421_v46, %v1422_v8  ;;  %v1429_v12 = vrot.slane %v1428_v19, 1  ;;  %v1302_v13 = vcombine.high %v1300_v54, %v1300_v54 }
 0x14a   : > { %v1488_v24 = vrot.slane %v1487_v51, 4  ;;  %v1494_v15 = vsel %vm341_vm0, %v1301_v58, -inf  ;;  %v1501_v45 = vsel %vm341_vm0, %v1300_v54, -inf  ;;  %v1259_v9 = vrot.slane %v2758_v49, %v2752_v38 }
 0x14b   : > { %v2815_v16 = vmax.f32 %v1428_v19, %v1429_v12  ;;  %v1495_v17 = vrot.slane %v1494_v15, 4  ;;  %v1502_v30 = vrot.slane %v1501_v45, 4  ;;  %v1508_v62 = vsel %vm341_vm0, %v1302_v13, -inf }
 0x14c   : > { %v1489_v29 = vmax.f32 %v1487_v51, %v1488_v24  ;;  %v1509_v1 = vrot.slane %v1508_v62, 4  ;;  %v1266_v3 = vrot.slane %v1252_v59, %v2752_v38  ;;  %v1267_v7 = vcombine.high %v1259_v9, %v1259_v9  ;;  %v2830_v51 = vld [vmem:[%s2974_s2] ss:$0 sm:$0xff] }
 0x14d   : > { %v1496_v10 = vmax.f32 %v1494_v15, %v1495_v17  ;;  %v1503_v18 = vmax.f32 %v1501_v45, %v1502_v30  ;;  %v1431_v32 = vsel %vm341_vm0, %v1259_v9, -inf  ;;  %v2822_v28 = vadd.f32 %v2770_v6, %v2768_v60 }
 0x14e   : > { %v1490_v49 = vrot.slane %v1489_v29, 2  ;;  %v1510_v36 = vmax.f32 %v1508_v62, %v1509_v1  ;;  %v1268_v57 = vcombine.high %v1266_v3, %v1266_v3  ;;  %v1432_v4 = vrot.slane %v1431_v32, 4 }
 0x14f   : > { %v1497_v34 = vrot.slane %v1496_v10, 2  ;;  %v1504_v5 = vrot.slane %v1503_v18, 2  ;;  %v1438_v22 = vsel %vm341_vm0, %v1267_v7, -inf  ;;  %v1445_v56 = vsel %vm341_vm0, %v1266_v3, -inf }
 0x150   : > { %v1491_v63 = vmax.f32 %v1489_v29, %v1490_v49  ;;  %v1511_v20 = vrot.slane %v1510_v36, 2  ;;  %v1433_v21 = vmax.f32 %v1431_v32, %v1432_v4  ;;  %v1439_v31 = vrot.slane %v1438_v22, 4 }
 0x151   : > { %v1498_v33 = vmax.f32 %v1496_v10, %v1497_v34  ;;  %v1505_v35 = vmax.f32 %v1503_v18, %v1504_v5  ;;  %v1446_v39 = vrot.slane %v1445_v56, 4  ;;  %v1452_v60 = vsel %vm341_vm0, %v1268_v57, -inf }
 0x152   : > { %v1492_v6 = vrot.slane %v1491_v63, 1  ;;  %v1512_v40 = vmax.f32 %v1510_v36, %v1511_v20  ;;  %v1434_v42 = vrot.slane %v1433_v21, 2  ;;  %v1440_v43 = vmax.f32 %v1438_v22, %v1439_v31 }
 0x153   : > { %v1499_v27 = vrot.slane %v1498_v33, 1  ;;  %v1506_v46 = vrot.slane %v1505_v35, 1  ;;  %v1447_v47 = vmax.f32 %v1445_v56, %v1446_v39  ;;  %v1453_v37 = vrot.slane %v1452_v60, 4 }
 0x154   : > { %v1493_v52 = vmax.f32 %v1491_v63, %v1492_v6  ;;  %v1513_v53 = vrot.slane %v1512_v40, 1  ;;  %v1435_v8 = vmax.f32 %v1433_v21, %v1434_v42  ;;  %v1441_v19 = vrot.slane %v1440_v43, 2 }
 0x155   : > { %v1500_v54 = vmax.f32 %v1498_v33, %v1499_v27  ;;  %v1507_v58 = vmax.f32 %v1505_v35, %v1506_v46  ;;  %v1448_v59 = vrot.slane %v1447_v47, 2  ;;  %v1454_v12 = vmax.f32 %v1452_v60, %v1453_v37 }
 0x156   : > { %v1514_v13 = vmax.f32 %v1512_v40, %v1513_v53  ;;  %v1631_v24 = vmax.f32 %v2788_v61, %v1493_v52  ;;  %v1436_v15 = vrot.slane %v1435_v8, 1  ;;  %v1442_v45 = vmax.f32 %v1440_v43, %v1441_v19 }
 0x157   : > { %v1632_v9 = vmax.f32 %v2792_v48, %v1500_v54  ;;  %v1633_v17 = vmax.f32 %v2794_v50, %v1507_v58  ;;  %v1449_v30 = vmax.f32 %v1447_v47, %v1448_v59  ;;  %v1455_v62 = vrot.slane %v1454_v12, 2 }
 0x158   : > { %v1634_v29 = vmax.f32 %v2802_v55, %v1514_v13  ;;  %v1654_v1 = vadd.f32 %v2830_v51, %v1631_v24  ;;  %v1437_v3 = vmax.f32 %v1435_v8, %v1436_v15  ;;  %v1443_v7 = vrot.slane %v1442_v45, 1 }
 0x159   : > { %v1655_v10 = vadd.f32 %v2830_v51, %v1632_v9  ;;  %v1656_v18 = vadd.f32 %v2830_v51, %v1633_v17  ;;  %v1450_v32 = vrot.slane %v1449_v30, 1  ;;  %v1456_v61 = vmax.f32 %v1454_v12, %v1455_v62 }
 0x15a   : > { %v1657_v49 = vadd.f32 %v2830_v51, %v1634_v29  ;;  %v1670_v36 = vmax.f32 %v1654_v1, 0.0  ;;  %v1444_v48 = vmax.f32 %v1442_v45, %v1443_v7  ;;  %v1627_v50 = vmax.f32 %v2790_v44, %v1437_v3 }
 0x15b   : > { %v1671_v57 = vmax.f32 %v1655_v10, 0.0  ;;  %v1672_v4 = vmax.f32 %v1656_v18, 0.0  ;;  %v1451_v34 = vmax.f32 %v1449_v30, %v1450_v32  ;;  %v1457_v55 = vrot.slane %v1456_v61, 1 }
 0x15c   : > { %v1673_v5 = vmax.f32 %v1657_v49, 0.0  ;;  %v1686_v22 = vpack.c.bf16 %v1670_v36, %v1670_v36  ;;  %v1628_v56 = vmax.f32 %v2807_v0, %v1444_v48  ;;  %v1650_v63 = vadd.f32 %v2830_v51, %v1627_v50 }
 0x15d   : > { %v1687_v20 = vpack.c.bf16 %v1671_v57, %v1671_v57  ;;  %v1688_v21 = vpack.c.bf16 %v1672_v4, %v1672_v4  ;;  %v1458_v31 = vmax.f32 %v1456_v61, %v1457_v55  ;;  %v1629_v33 = vmax.f32 %v2809_v2, %v1451_v34 }
 0x15e   : > { %v1689_v35 = vpack.c.bf16 %v1673_v5, %v1673_v5  ;;  %v1748_v44 = vrot.slane %v1686_v22, %v2752_v38  ;;  %v1651_v39 = vadd.f32 %v2830_v51, %v1628_v56  ;;  %v1666_v60 = vmax.f32 %v1650_v63, 0.0 }
 0x15f   : > { %v1755_v6 = vrot.slane %v1687_v20, %v2752_v38  ;;  %v1762_v40 = vrot.slane %v1688_v21, %v2752_v38  ;;  %v1630_v0 = vmax.f32 %v2815_v16, %v1458_v31  ;;  %v1652_v42 = vadd.f32 %v2830_v51, %v1629_v33 }
 0x160   : > { %v1769_v43 = vrot.slane %v1689_v35, %v2752_v38  ;;  %v1860_v27 = vrot.slane %v1748_v44, %v2752_v38  ;;  %v1667_v2 = vmax.f32 %v1651_v39, 0.0  ;;  %v1682_v46 = vpack.c.bf16 %v1666_v60, %v1666_v60 }
 0x161   : > { %v1867_v47 = vrot.slane %v1755_v6, %v2752_v38  ;;  %v1874_v37 = vrot.slane %v1762_v40, %v2752_v38  ;;  %v1653_v52 = vadd.f32 %v2830_v51, %v1630_v0  ;;  %v1668_v53 = vmax.f32 %v1652_v42, 0.0 }
 0x162   : > { %v1881_v8 = vrot.slane %v1769_v43, %v2752_v38  ;;  %v1942_v19 = vunpack.c.l.b16 %v1860_v27  ;;  %v1683_v16 = vpack.c.bf16 %v1667_v2, %v1667_v2  ;;  %v1720_v54 = vrot.slane %v1682_v46, %v2752_v38 }
 0x163   : > { %v1943_v58 = vunpack.c.l.b16 %v1867_v47  ;;  %v1944_v59 = vunpack.c.l.b16 %v1874_v37  ;;  %v1669_v12 = vmax.f32 %v1653_v52, 0.0  ;;  %v1684_v13 = vpack.c.bf16 %v1668_v53, %v1668_v53 }
 0x164   : > { %v1945_v24 = vunpack.c.l.b16 %v1881_v8  ;;  %v1727_v15 = vrot.slane %v1683_v16, %v2752_v38  ;;  %v1832_v45 = vrot.slane %v1720_v54, %v2752_v38  ;;  %v1337_v9 = vcombine.high %v2822_v28, %v2822_v28 }
 0x165   : > { %v1963_v17 = vrot.slane %v1943_v58, 7  ;;  %v1965_v30 = vrot.slane %v1944_v59, 6  ;;  %v1685_v62 = vpack.c.bf16 %v1669_v12, %v1669_v12  ;;  %v1734_v29 = vrot.slane %v1684_v13, %v2752_v38 }
 0x166   : > { %v1967_v1 = vrot.slane %v1945_v24, 5  ;;  %v1839_v3 = vrot.slane %v1727_v15, %v2752_v38  ;;  %v1938_v7 = vunpack.c.l.b16 %v1832_v45  ;;  %v1344_v10 = vrot.slane %v2822_v28, %v2752_v38 }
 0x167   : > { %v1964_v18 = vsel %vm1955_vm8, %v1963_v17, %v1942_v19  ;;  %v1741_v32 = vrot.slane %v1685_v62, %v2752_v38  ;;  %v1846_v61 = vrot.slane %v1734_v29, %v2752_v38  ;;  %v1351_v49 = vrot.slane %v1337_v9, %v2752_v38 }
 0x168   : > { %v1966_v36 = vsel %vm1958_vm9, %v1965_v30, %v1964_v18  ;;  %v1939_v48 = vunpack.c.l.b16 %v1839_v3  ;;  %v1352_v50 = vcombine.high %v1344_v10, %v1344_v10  ;;  %v1571_v57 = vsel %vm341_vm0, %v1344_v10, -inf }
 0x169   : > { %v1968_v28 = vsel %vm1961_vm10, %v1967_v1, %v1966_v36  ;;  %v1853_v4 = vrot.slane %v1741_v32, %v2752_v38  ;;  %v1940_v34 = vunpack.c.l.b16 %v1846_v61  ;;  %v1353_v55 = vcombine.high %v1351_v49, %v1351_v49 }
 0x16a   : > { %v1982_v5 = vpack.c.b16 %v1968_v28, %v1968_v28  ;;  %v1954_v22 = vrot.slane %v1939_v48, 7  ;;  %v1572_v56 = vrot.slane %v1571_v57, 4  ;;  %v1578_v63 = vsel %vm341_vm0, %v1352_v50, -inf }
 0x16b   : > { %v1941_v20 = vunpack.c.l.b16 %v1853_v4  ;;  %v1957_v21 = vrot.slane %v1940_v34, 6  ;;  %v1579_v31 = vrot.slane %v1578_v63, 4  ;;  %v1585_v33 = vsel %vm341_vm0, %v1351_v49, -inf }
 0x16c   : > { %2163 = vst.sshfl [vmem:[%s2875_s6 + $0x2] sm:$0x3 pattern:$0x76325410] %v1982_v5  ;;  %v1956_v35 = vsel %vm1955_vm8, %v1954_v22, %v1938_v7  ;;  %v1573_v44 = vmax.f32 %v1571_v57, %v1572_v56  ;;  %v1586_v39 = vrot.slane %v1585_v33, 4  ;;  %v1592_v60 = vsel %vm341_vm0, %v1353_v55, -inf }
 0x16d   : > { %v1959_v6 = vsel %vm1958_vm9, %v1957_v21, %v1956_v35  ;;  %v1960_v40 = vrot.slane %v1941_v20, 5  ;;  %v1580_v0 = vmax.f32 %v1578_v63, %v1579_v31  ;;  %v1593_v42 = vrot.slane %v1592_v60, 4 }
 0x16e   : > { %v1574_v43 = vrot.slane %v1573_v44, 2  ;;  %v1587_v27 = vmax.f32 %v1585_v33, %v1586_v39  ;;  %v2311_v2 = vadd.f32 %v2777_v25, %v2772_v11  ;;  %v2312_v46 = vadd.f32 %v2781_v41, %v2779_v26 }
 0x16f   : > { %v1962_v47 = vsel %vm1961_vm10, %v1960_v40, %v1959_v6  ;;  %v1581_v37 = vrot.slane %v1580_v0, 2  ;;  %v1594_v52 = vmax.f32 %v1592_v60, %v1593_v42  ;;  %v2892_v53 = vadd.f32 %v2786_v23, %v2783_v14 }
 0x170   : > { %v1981_v8 = vpack.c.b16 %v1962_v47, %v1962_v47  ;;  %v1575_v19 = vmax.f32 %v1573_v44, %v1574_v43  ;;  %v1588_v16 = vrot.slane %v1587_v27, 2  ;;  %v1303_v54 = vcombine.high %v2311_v2, %v2311_v2 }
 0x171   : > { %v1582_v58 = vmax.f32 %v1580_v0, %v1581_v37  ;;  %v1595_v59 = vrot.slane %v1594_v52, 2  ;;  %v1310_v12 = vrot.slane %v2311_v2, %v2752_v38  ;;  %v1354_v11 = vcombine.high %v2312_v46, %v2312_v46 }
 0x172   : > { %2162 = vst.sshfl [vmem:[%s2875_s6] sm:$0x3 pattern:$0x76325410] %v1981_v8  ;;  %v1576_v25 = vrot.slane %v1575_v19, 1  ;;  %v1589_v26 = vmax.f32 %v1587_v27, %v1588_v16  ;;  %v1317_v41 = vrot.slane %v1303_v54, %v2752_v38  ;;  %v1361_v13 = vrot.slane %v2312_v46, %v2752_v38 }
 0x173   : > { %v1583_v24 = vrot.slane %v1582_v58, 1  ;;  %v1596_v15 = vmax.f32 %v1594_v52, %v1595_v59  ;;  %v1318_v14 = vcombine.high %v1310_v12, %v1310_v12  ;;  %v1515_v23 = vsel %vm341_vm0, %v1310_v12, -inf }
 0x174   : > { %v1590_v45 = vrot.slane %v1589_v26, 1  ;;  %v1319_v9 = vcombine.high %v1317_v41, %v1317_v41  ;;  %v1516_v17 = vrot.slane %v1515_v23, 4  ;;  %v2899_v30 = vmax.f32 %v1575_v19, %v1576_v25 }
 0x175   : > { %v2901_v62 = vmax.f32 %v1582_v58, %v1583_v24  ;;  %v1522_v29 = vsel %vm341_vm0, %v1318_v14, -inf  ;;  %v1529_v1 = vsel %vm341_vm0, %v1317_v41, -inf  ;;  %v1597_v3 = vrot.slane %v1596_v15, 1 }
 0x176   : > { %v1517_v7 = vmax.f32 %v1515_v23, %v1516_v17  ;;  %v1523_v10 = vrot.slane %v1522_v29, 4  ;;  %v1530_v18 = vrot.slane %v1529_v1, 4  ;;  %v2905_v32 = vmax.f32 %v1589_v26, %v1590_v45 }
 0x177   : > { %v1536_v61 = vsel %vm341_vm0, %v1319_v9, -inf  ;;  %v1368_v49 = vrot.slane %v1354_v11, %v2752_v38  ;;  %v1369_v36 = vcombine.high %v1361_v13, %v1361_v13  ;;  %v1599_v34 = vsel %vm341_vm0, %v1361_v13, -inf }
 0x178   : > { %v1518_v48 = vrot.slane %v1517_v7, 2  ;;  %v1524_v50 = vmax.f32 %v1522_v29, %v1523_v10  ;;  %v1531_v57 = vmax.f32 %v1529_v1, %v1530_v18  ;;  %v1537_v28 = vrot.slane %v1536_v61, 4 }
 0x179   : > { %v1370_v4 = vcombine.high %v1368_v49, %v1368_v49  ;;  %v1606_v55 = vsel %vm341_vm0, %v1369_v36, -inf  ;;  %v1613_v5 = vsel %vm341_vm0, %v1368_v49, -inf  ;;  %v1600_v21 = vrot.slane %v1599_v34, 4 }
 0x17a   : > { %v1519_v22 = vmax.f32 %v1517_v7, %v1518_v48  ;;  %v1525_v56 = vrot.slane %v1524_v50, 2  ;;  %v1532_v63 = vrot.slane %v1531_v57, 2  ;;  %v1538_v20 = vmax.f32 %v1536_v61, %v1537_v28 }
 0x17b   : > { %v1607_v31 = vrot.slane %v1606_v55, 4  ;;  %v1614_v33 = vrot.slane %v1613_v5, 4  ;;  %v1620_v35 = vsel %vm341_vm0, %v1370_v4, -inf  ;;  %v1601_v40 = vmax.f32 %v1599_v34, %v1600_v21 }
 0x17c   : > { %v1520_v44 = vrot.slane %v1519_v22, 1  ;;  %v1526_v39 = vmax.f32 %v1524_v50, %v1525_v56  ;;  %v1533_v60 = vmax.f32 %v1531_v57, %v1532_v63  ;;  %v1539_v6 = vrot.slane %v1538_v20, 2 }
 0x17d   : > { %v1608_v0 = vmax.f32 %v1606_v55, %v1607_v31  ;;  %v1615_v42 = vmax.f32 %v1613_v5, %v1614_v33  ;;  %v1621_v43 = vrot.slane %v1620_v35, 4  ;;  %v1598_v27 = vmax.f32 %v1596_v15, %v1597_v3 }
 0x17e   : > { %v1527_v2 = vrot.slane %v1526_v39, 1  ;;  %v1534_v46 = vrot.slane %v1533_v60, 1  ;;  %v1540_v47 = vmax.f32 %v1538_v20, %v1539_v6  ;;  %v1602_v37 = vrot.slane %v1601_v40, 2 }
 0x17f   : > { %v1609_v52 = vrot.slane %v1608_v0, 2  ;;  %v1616_v8 = vrot.slane %v1615_v42, 2  ;;  %v1622_v19 = vmax.f32 %v1620_v35, %v1621_v43  ;;  %v2913_v16 = vmax.f32 %v1519_v22, %v1520_v44 }
 0x180   : > { %v2915_v54 = vmax.f32 %v1526_v39, %v1527_v2  ;;  %v1541_v58 = vrot.slane %v1540_v47, 1  ;;  %v1320_v59 = vcombine.high %v2892_v53, %v2892_v53  ;;  %v1603_v12 = vmax.f32 %v1601_v40, %v1602_v37 }
 0x181   : > { %v1610_v11 = vmax.f32 %v1608_v0, %v1609_v52  ;;  %v1617_v25 = vmax.f32 %v1615_v42, %v1616_v8  ;;  %v1623_v26 = vrot.slane %v1622_v19, 2  ;;  %v2919_v41 = vmax.f32 %v1533_v60, %v1534_v46 }
 0x182   : > { %v2921_v13 = vmax.f32 %v1540_v47, %v1541_v58  ;;  %v1327_v24 = vrot.slane %v2892_v53, %v2752_v38  ;;  %v1334_v15 = vrot.slane %v1320_v59, %v2752_v38  ;;  %v1604_v14 = vrot.slane %v1603_v12, 1 }
 0x183   : > { %v1611_v23 = vrot.slane %v1610_v11, 1  ;;  %v1618_v45 = vrot.slane %v1617_v25, 1  ;;  %v1624_v9 = vmax.f32 %v1622_v19, %v1623_v26 }
 0x184   : > { %v1335_v17 = vcombine.high %v1327_v24, %v1327_v24  ;;  %v1336_v29 = vcombine.high %v1334_v15, %v1334_v15  ;;  %v1543_v1 = vsel %vm341_vm0, %v1327_v24, -inf  ;;  %v1557_v3 = vsel %vm341_vm0, %v1334_v15, -inf }
 0x185   : > { %v1605_v7 = vmax.f32 %v1603_v12, %v1604_v14  ;;  %v1612_v10 = vmax.f32 %v1610_v11, %v1611_v23  ;;  %v1619_v18 = vmax.f32 %v1617_v25, %v1618_v45  ;;  %v1625_v61 = vrot.slane %v1624_v9, 1 }
 0x186   : > { %v1544_v49 = vrot.slane %v1543_v1, 4  ;;  %v1550_v36 = vsel %vm341_vm0, %v1335_v17, -inf  ;;  %v1558_v53 = vrot.slane %v1557_v3, 4  ;;  %v1564_v48 = vsel %vm341_vm0, %v1336_v29, -inf }
 0x187   : > { %v1626_v50 = vmax.f32 %v1624_v9, %v1625_v61  ;;  %v1639_v57 = vmax.f32 %v2899_v30, %v1605_v7  ;;  %v1640_v28 = vmax.f32 %v2901_v62, %v1612_v10  ;;  %v1641_v4 = vmax.f32 %v2905_v32, %v1619_v18 }
 0x188   : > { %v1545_v34 = vmax.f32 %v1543_v1, %v1544_v49  ;;  %v1551_v55 = vrot.slane %v1550_v36, 4  ;;  %v1559_v5 = vmax.f32 %v1557_v3, %v1558_v53  ;;  %v1565_v22 = vrot.slane %v1564_v48, 4 }
 0x189   : > { %v1642_v56 = vmax.f32 %v1598_v27, %v1626_v50  ;;  %v1662_v63 = vadd.f32 %v2830_v51, %v1639_v57  ;;  %v1663_v20 = vadd.f32 %v2830_v51, %v1640_v28  ;;  %v1664_v21 = vadd.f32 %v2830_v51, %v1641_v4 }
 0x18a   : > { %v1546_v31 = vrot.slane %v1545_v34, 2  ;;  %v1552_v33 = vmax.f32 %v1550_v36, %v1551_v55  ;;  %v1560_v35 = vrot.slane %v1559_v5, 2  ;;  %v1566_v44 = vmax.f32 %v1564_v48, %v1565_v22 }
 0x18b   : > { %v1665_v30 = vadd.f32 %v2830_v51, %v1642_v56  ;;  %v1678_v62 = vmax.f32 %v1662_v63, 0.0  ;;  %v1679_v39 = vmax.f32 %v1663_v20, 0.0  ;;  %v1680_v32 = vmax.f32 %v1664_v21, 0.0 }
 0x18c   : > { %v1547_v60 = vmax.f32 %v1545_v34, %v1546_v31  ;;  %v1553_v6 = vrot.slane %v1552_v33, 2  ;;  %v1561_v40 = vmax.f32 %v1559_v5, %v1560_v35  ;;  %v1567_v0 = vrot.slane %v1566_v44, 2 }
 0x18d   : > { %v1681_v42 = vmax.f32 %v1665_v30, 0.0  ;;  %v1694_v43 = vpack.c.bf16 %v1678_v62, %v1678_v62  ;;  %v1695_v27 = vpack.c.bf16 %v1679_v39, %v1679_v39  ;;  %v1696_v2 = vpack.c.bf16 %v1680_v32, %v1680_v32 }
 0x18e   : > { %v1548_v46 = vrot.slane %v1547_v60, 1  ;;  %v1554_v47 = vmax.f32 %v1552_v33, %v1553_v6  ;;  %v1562_v37 = vrot.slane %v1561_v40, 1  ;;  %v1568_v52 = vmax.f32 %v1566_v44, %v1567_v0 }
 0x18f   : > { %v1697_v8 = vpack.c.bf16 %v1681_v42, %v1681_v42  ;;  %v1804_v19 = vrot.slane %v1694_v43, %v2752_v38  ;;  %v1811_v58 = vrot.slane %v1695_v27, %v2752_v38  ;;  %v1818_v59 = vrot.slane %v1696_v2, %v2752_v38 }
 0x190   : > { %v1549_v12 = vmax.f32 %v1547_v60, %v1548_v46  ;;  %v1555_v11 = vrot.slane %v1554_v47, 1  ;;  %v1563_v25 = vmax.f32 %v1561_v40, %v1562_v37  ;;  %v1569_v26 = vrot.slane %v1568_v52, 1 }
 0x191   : > { %v1825_v24 = vrot.slane %v1697_v8, %v2752_v38  ;;  %v1916_v15 = vrot.slane %v1804_v19, %v2752_v38  ;;  %v1923_v14 = vrot.slane %v1811_v58, %v2752_v38  ;;  %v1930_v23 = vrot.slane %v1818_v59, %v2752_v38 }
 0x192   : > { %v1556_v45 = vmax.f32 %v1554_v47, %v1555_v11  ;;  %v1570_v9 = vmax.f32 %v1568_v52, %v1569_v26  ;;  %v1635_v17 = vmax.f32 %v2913_v16, %v1549_v12  ;;  %v1637_v29 = vmax.f32 %v2919_v41, %v1563_v25 }
 0x193   : > { %v1937_v1 = vrot.slane %v1825_v24, %v2752_v38  ;;  %v1951_v3 = vunpack.c.l.b16 %v1923_v14  ;;  %v1952_v7 = vunpack.c.l.b16 %v1930_v23  ;;  %v1950_v36 = vunpack.c.l.b16 %v1916_v15 }
 0x194   : > { %v1636_v10 = vmax.f32 %v2915_v54, %v1556_v45  ;;  %v1638_v18 = vmax.f32 %v2921_v13, %v1570_v9  ;;  %v1658_v61 = vadd.f32 %v2830_v51, %v1635_v17  ;;  %v1660_v49 = vadd.f32 %v2830_v51, %v1637_v29 }
 0x195   : > { %v1953_v53 = vunpack.c.l.b16 %v1937_v1  ;;  %v1975_v48 = vrot.slane %v1951_v3, 7  ;;  %v1977_v50 = vrot.slane %v1952_v7, 6 }
 0x196   : > { %v1659_v16 = vadd.f32 %v2830_v51, %v1636_v10  ;;  %v1661_v41 = vadd.f32 %v2830_v51, %v1638_v18  ;;  %v1674_v57 = vmax.f32 %v1658_v61, 0.0  ;;  %v1676_v28 = vmax.f32 %v1660_v49, 0.0 }
 0x197   : > { %v1976_v4 = vsel %vm1955_vm8, %v1975_v48, %v1950_v36  ;;  %v1979_v54 = vrot.slane %v1953_v53, 5 }
 0x198   : > { %v1978_v13 = vsel %vm1958_vm9, %v1977_v50, %v1976_v4  ;;  %v1675_v34 = vmax.f32 %v1659_v16, 0.0  ;;  %v1677_v55 = vmax.f32 %v1661_v41, 0.0  ;;  %v1690_v5 = vpack.c.bf16 %v1674_v57, %v1674_v57 }
 0x199   : > { %v1980_v22 = vsel %vm1961_vm10, %v1979_v54, %v1978_v13  ;;  %v1692_v56 = vpack.c.bf16 %v1676_v28, %v1676_v28 }
 0x19a   : > { %v1984_v63 = vpack.c.b16 %v1980_v22, %v1980_v22  ;;  %v1691_v20 = vpack.c.bf16 %v1675_v34, %v1675_v34  ;;  %v1693_v21 = vpack.c.bf16 %v1677_v55, %v1677_v55  ;;  %v1776_v31 = vrot.slane %v1690_v5, %v2752_v38 }
 0x19b   : > { %v1790_v51 = vrot.slane %v1692_v56, %v2752_v38 }
 0x19c   : > { %2165 = vst.sshfl [vmem:[%s2875_s6 + $0x6] sm:$0x3 pattern:$0x76325410] %v1984_v63  ;;  %v1783_v33 = vrot.slane %v1691_v20, %v2752_v38  ;;  %v1797_v35 = vrot.slane %v1693_v21, %v2752_v38  ;;  %v1888_v30 = vrot.slane %v1776_v31, %v2752_v38 }
 0x19d   : > { %v1902_v44 = vrot.slane %v1790_v51, %v2752_v38 }
 0x19e   : > { %v1895_v62 = vrot.slane %v1783_v33, %v2752_v38  ;;  %v1909_v39 = vrot.slane %v1797_v35, %v2752_v38  ;;  %v1946_v0 = vunpack.c.l.b16 %v1888_v30 }
 0x19f   : > { %v1948_v32 = vunpack.c.l.b16 %v1902_v44 }
 0x1a0   : > { %v1947_v60 = vunpack.c.l.b16 %v1895_v62  ;;  %v1949_v6 = vunpack.c.l.b16 %v1909_v39 }
 0x1a1   : > { %v1971_v40 = vrot.slane %v1948_v32, 6 }
 0x1a2   : > { %v1969_v42 = vrot.slane %v1947_v60, 7  ;;  %v1973_v43 = vrot.slane %v1949_v6, 5 }
 0x1a4   : > { %v1970_v27 = vsel %vm1955_vm8, %v1969_v42, %v1946_v0 }
 0x1a5   : > { %v1972_v2 = vsel %vm1958_vm9, %v1971_v40, %v1970_v27 }
 0x1a6   : > { %v1974_v46 = vsel %vm1961_vm10, %v1973_v43, %v1972_v2 }
 0x1a7   : > { %v1983_v47 = vpack.c.b16 %v1974_v46, %v1974_v46 }
 0x1a9   : > { %2164 = vst.sshfl [vmem:[%s2875_s6 + $0x4] sm:$0x3 pattern:$0x76325410] %v1983_v47 }
 0x1aa PF: > { %s13_s12 = sadd.s32 1, %s2409_s12  }
 0x1ab   : > { %p10_p4 = scmp.ge.s32.totalorder %s13_s12, 4  }
 0x1ad   :  { %12 = sbr.rel (!%p10_p4) target bundleno = 1 (0x1), region = 62 }

// kernel: lstm_text_predictor_forward.7
= control target key start
LH: loop header
LB: loop body
LE: loop exit
PB: predicated region body
PF: predicated region fallthrough
CT: control target
= control target key end

     0   :  { %v1229_v1 = vmov 0   ;;  %s1577_s3 = inlined_call_operand.vmem [shape: bf16[128,512], index: 3, kind: input, shape index: {}]   ;;  %s1578_s2 = inlined_call_operand.vmem [shape: bf16[128,512], index: 2, kind: input, shape index: {}]   ;;  %s1579_s1 = inlined_call_operand.vmem [shape: bf16[8,128], index: 1, kind: input, shape index: {}]   ;;  %s1580_s0 = inlined_call_operand.vmem [shape: bf16[8,128], index: 0, kind: input, shape index: {}]   ;;  %s1581_s5 = inlined_call_operand.vmem [shape: bf16[512,128], index: 5, kind: input, shape index: {}]   ;;  %s1582_s4 = inlined_call_operand.vmem [shape: f32[1,512], index: 4, kind: input, shape index: {}]   ;;  %s1583_s6 = inlined_call_operand.vmem [shape: f32[1,128], index: 6, kind: input, shape index: {}]   ;;  %s1584_s7 = inlined_call_operand.vmem [shape: f32[8,128], index: 7, kind: output, shape index: {}]  }
   0x1   :  { %v1101_v0 = vld [vmem:[%s1577_s3 + $0x4] ss:$16 sps:$4 sm:$0xff]   ;;  %285 = vmatprep.mubr.bf16.mxu0 %v1229_v1  ;;  %326 = vmatprep.mubr.bf16.mxu1 %v1229_v1  ;;  %v1103_v2 = vld [vmem:[%s1577_s3 + $0xc] ss:$16 sps:$4 sm:$0xff]   ;;  %v1105_v3 = vld [vmem:[%s1577_s3] ss:$16 sps:$4 sm:$0xff]  }
   0x2   :  { %253 = vmatprep.subr.bf16.mxu0 %v1101_v0  ;;  %v1106_v4 = vld [vmem:[%s1577_s3 + $0x8] ss:$16 sps:$4 sm:$0xff]   ;;  %294 = vmatprep.subr.bf16.mxu1 %v1103_v2  ;;  %v1107_v5 = vld [vmem:[%s1577_s3 + $0x24] ss:$16 sps:$4 sm:$0xff]   ;;  %v1109_v6 = vld [vmem:[%s1577_s3 + $0x2c] ss:$16 sps:$4 sm:$0xff]  }
   0x3   :  { %254 = vmatpush1.bf16.msra.mxu0 %v1105_v3  ;;  %295 = vmatpush1.bf16.msra.mxu1 %v1106_v4  ;;  %v1111_v7 = vld [vmem:[%s1577_s3 + $0x20] ss:$16 sps:$4 sm:$0xff]   ;;  %v1112_v8 = vld [vmem:[%s1577_s3 + $0x28] ss:$16 sps:$4 sm:$0xff]   ;;  %v1113_v9 = vld [vmem:[%s1577_s3 + $0x44] ss:$16 sps:$4 sm:$0xff]  }
   0x4   :  { %255 = vmatprep.subr.bf16.mxu0 %v1107_v5  ;;  %296 = vmatprep.subr.bf16.mxu1 %v1109_v6  ;;  %v1115_v10 = vld [vmem:[%s1577_s3 + $0x4c] ss:$16 sps:$4 sm:$0xff]   ;;  %v1117_v11 = vld [vmem:[%s1577_s3 + $0x40] ss:$16 sps:$4 sm:$0xff]   ;;  %v1118_v12 = vld [vmem:[%s1577_s3 + $0x48] ss:$16 sps:$4 sm:$0xff]  }
   0x5   :  { %v1119_v13 = vld [vmem:[%s1577_s3 + $0x64] ss:$16 sps:$4 sm:$0xff]   ;;  %v1121_v14 = vld [vmem:[%s1577_s3 + $0x6c] ss:$16 sps:$4 sm:$0xff]   ;;  %v1123_v15 = vld [vmem:[%s1577_s3 + $0x60] ss:$16 sps:$4 sm:$0xff]  }
   0x6   :  { %v1124_v16 = vld [vmem:[%s1577_s3 + $0x68] ss:$16 sps:$4 sm:$0xff]   ;;  %v1125_v17 = vld [vmem:[%s1577_s3 + $0x84] ss:$16 sps:$4 sm:$0xff]   ;;  %v1127_v18 = vld [vmem:[%s1577_s3 + $0x8c] ss:$16 sps:$4 sm:$0xff]  }
   0x7   :  { %256 = vmatpush1.bf16.msra.mxu0 %v1111_v7  ;;  %297 = vmatpush1.bf16.msra.mxu1 %v1112_v8  ;;  %v1129_v19 = vld [vmem:[%s1577_s3 + $0x80] ss:$16 sps:$4 sm:$0xff]   ;;  %v1130_v20 = vld [vmem:[%s1577_s3 + $0x88] ss:$16 sps:$4 sm:$0xff]   ;;  %v1131_v21 = vld [vmem:[%s1577_s3 + $0xa4] ss:$16 sps:$4 sm:$0xff]  }
   0x8   :  { %257 = vmatprep.subr.bf16.mxu0 %v1113_v9  ;;  %298 = vmatprep.subr.bf16.mxu1 %v1115_v10  ;;  %v1133_v22 = vld [vmem:[%s1577_s3 + $0xac] ss:$16 sps:$4 sm:$0xff]   ;;  %v1135_v23 = vld [vmem:[%s1577_s3 + $0xa0] ss:$16 sps:$4 sm:$0xff]   ;;  %v1136_v24 = vld [vmem:[%s1577_s3 + $0xa8] ss:$16 sps:$4 sm:$0xff]  }
   0x9   :  { %v1137_v25 = vld [vmem:[%s1577_s3 + $0xc4] ss:$16 sps:$4 sm:$0xff]   ;;  %v1139_v26 = vld [vmem:[%s1577_s3 + $0xcc] ss:$16 sps:$4 sm:$0xff]   ;;  %v1141_v27 = vld [vmem:[%s1577_s3 + $0xc0] ss:$16 sps:$4 sm:$0xff]  }
   0xa   :  { %v1142_v28 = vld [vmem:[%s1577_s3 + $0xc8] ss:$16 sps:$4 sm:$0xff]   ;;  %v1143_v29 = vld [vmem:[%s1577_s3 + $0xe4] ss:$16 sps:$4 sm:$0xff]   ;;  %v1145_v30 = vld [vmem:[%s1577_s3 + $0xec] ss:$16 sps:$4 sm:$0xff]  }
   0xb   :  { %258 = vmatpush1.bf16.msra.mxu0 %v1117_v11  ;;  %299 = vmatpush1.bf16.msra.mxu1 %v1118_v12  ;;  %v1147_v31 = vld [vmem:[%s1577_s3 + $0xe0] ss:$16 sps:$4 sm:$0xff]   ;;  %v1148_v32 = vld [vmem:[%s1577_s3 + $0xe8] ss:$16 sps:$4 sm:$0xff]   ;;  %v1151_v33 = vld [vmem:[%s1578_s2 + $0x4] ss:$16 sps:$4 sm:$0xff]  }
   0xc   :  { %259 = vmatprep.subr.bf16.mxu0 %v1119_v13  ;;  %300 = vmatprep.subr.bf16.mxu1 %v1121_v14  ;;  %v1154_v34 = vld [vmem:[%s1578_s2 + $0xc] ss:$16 sps:$4 sm:$0xff]   ;;  %v60_v35 = vld [vmem:[%s1579_s1] sm:$0xf]  ;;  %v1152_v37 = vld [vmem:[%s1578_s2 + $0x8] ss:$16 sps:$4 sm:$0xff]  }
   0xd   :  { %v1149_v36 = vld [vmem:[%s1578_s2] ss:$16 sps:$4 sm:$0xff]   ;;  %v1157_v38 = vld [vmem:[%s1578_s2 + $0x24] ss:$16 sps:$4 sm:$0xff]   ;;  %v1160_v39 = vld [vmem:[%s1578_s2 + $0x2c] ss:$16 sps:$4 sm:$0xff]  }
   0xe   :  { %v1155_v40 = vld [vmem:[%s1578_s2 + $0x20] ss:$16 sps:$4 sm:$0xff]   ;;  %v1158_v41 = vld [vmem:[%s1578_s2 + $0x28] ss:$16 sps:$4 sm:$0xff]   ;;  %v1163_v42 = vld [vmem:[%s1578_s2 + $0x44] ss:$16 sps:$4 sm:$0xff]  }
   0xf   :  { %260 = vmatpush1.bf16.msra.mxu0 %v1123_v15  ;;  %301 = vmatpush1.bf16.msra.mxu1 %v1124_v16  ;;  %v1166_v43 = vld [vmem:[%s1578_s2 + $0x4c] ss:$16 sps:$4 sm:$0xff]   ;;  %v1161_v44 = vld [vmem:[%s1578_s2 + $0x40] ss:$16 sps:$4 sm:$0xff]   ;;  %v1164_v45 = vld [vmem:[%s1578_s2 + $0x48] ss:$16 sps:$4 sm:$0xff]  }
  0x10   :  { %261 = vmatprep.subr.bf16.mxu0 %v1125_v17  ;;  %302 = vmatprep.subr.bf16.mxu1 %v1127_v18  ;;  %v1169_v46 = vld [vmem:[%s1578_s2 + $0x64] ss:$16 sps:$4 sm:$0xff]   ;;  %v1172_v47 = vld [vmem:[%s1578_s2 + $0x6c] ss:$16 sps:$4 sm:$0xff]   ;;  %v1167_v48 = vld [vmem:[%s1578_s2 + $0x60] ss:$16 sps:$4 sm:$0xff]  }
  0x11   :  { %v1170_v49 = vld [vmem:[%s1578_s2 + $0x68] ss:$16 sps:$4 sm:$0xff]   ;;  %v1175_v50 = vld [vmem:[%s1578_s2 + $0x84] ss:$16 sps:$4 sm:$0xff]   ;;  %v1178_v51 = vld [vmem:[%s1578_s2 + $0x8c] ss:$16 sps:$4 sm:$0xff]  }
  0x12   :  { %v1173_v52 = vld [vmem:[%s1578_s2 + $0x80] ss:$16 sps:$4 sm:$0xff]   ;;  %v1176_v53 = vld [vmem:[%s1578_s2 + $0x88] ss:$16 sps:$4 sm:$0xff]   ;;  %v1181_v54 = vld [vmem:[%s1578_s2 + $0xa4] ss:$16 sps:$4 sm:$0xff]  }
  0x13   :  { %262 = vmatpush1.bf16.msra.mxu0 %v1129_v19  ;;  %303 = vmatpush1.bf16.msra.mxu1 %v1130_v20  ;;  %v1184_v55 = vld [vmem:[%s1578_s2 + $0xac] ss:$16 sps:$4 sm:$0xff]   ;;  %v1179_v56 = vld [vmem:[%s1578_s2 + $0xa0] ss:$16 sps:$4 sm:$0xff]   ;;  %v1182_v57 = vld [vmem:[%s1578_s2 + $0xa8] ss:$16 sps:$4 sm:$0xff]  }
  0x14   :  { %263 = vmatprep.subr.bf16.mxu0 %v1131_v21  ;;  %304 = vmatprep.subr.bf16.mxu1 %v1133_v22  ;;  %v1187_v58 = vld [vmem:[%s1578_s2 + $0xc4] ss:$16 sps:$4 sm:$0xff]   ;;  %v1190_v59 = vld [vmem:[%s1578_s2 + $0xcc] ss:$16 sps:$4 sm:$0xff]   ;;  %v1185_v60 = vld [vmem:[%s1578_s2 + $0xc0] ss:$16 sps:$4 sm:$0xff]  }
  0x15   :  { %v1188_v61 = vld [vmem:[%s1578_s2 + $0xc8] ss:$16 sps:$4 sm:$0xff]   ;;  %v1193_v62 = vld [vmem:[%s1578_s2 + $0xe4] ss:$16 sps:$4 sm:$0xff]   ;;  %v1196_v63 = vld [vmem:[%s1578_s2 + $0xec] ss:$16 sps:$4 sm:$0xff]  }
  0x16   :  { %v1191_v0 = vld [vmem:[%s1578_s2 + $0xe0] ss:$16 sps:$4 sm:$0xff]   ;;  %v1201_v7 = vld [vmem:[%s1581_s5 + $0x48] sm:$0xff]   ;;  %v1209_v15 = vld [vmem:[%s1581_s5 + $0x58] sm:$0xff]  }
  0x17   :  { %264 = vmatpush1.bf16.msra.mxu0 %v1135_v23  ;;  %305 = vmatpush1.bf16.msra.mxu1 %v1136_v24  ;;  %v27_v2 = vld [vmem:[%s1580_s0] sm:$0xf]  ;;  %v1202_v8 = vld [vmem:[%s1581_s5 + $0xc8] sm:$0xff]   ;;  %v1205_v11 = vld [vmem:[%s1581_s5 + $0x50] sm:$0xff]  }
  0x18   :  { %265 = vmatprep.subr.bf16.mxu0 %v1137_v25  ;;  %306 = vmatprep.subr.bf16.mxu1 %v1139_v26  ;;  %v1197_v3 = vld [vmem:[%s1581_s5 + $0x40] sm:$0xff]   ;;  %v1203_v9 = vld [vmem:[%s1581_s5 + $0x8] sm:$0xff]   ;;  %v1206_v12 = vld [vmem:[%s1581_s5 + $0xd0] sm:$0xff]  }
  0x19   :  { %v1198_v4 = vld [vmem:[%s1581_s5 + $0xc0] sm:$0xff]   ;;  %v1204_v10 = vld [vmem:[%s1581_s5 + $0x88] sm:$0xff]   ;;  %v1207_v13 = vld [vmem:[%s1581_s5 + $0x10] sm:$0xff]  }
  0x1a   :  { %v1199_v5 = vld [vmem:[%s1581_s5] sm:$0xff]   ;;  %v1208_v14 = vld [vmem:[%s1581_s5 + $0x90] sm:$0xff]   ;;  %v1210_v16 = vld [vmem:[%s1581_s5 + $0xd8] sm:$0xff]  }
  0x1b   :  { %266 = vmatpush1.bf16.msra.mxu0 %v1141_v27  ;;  %307 = vmatpush1.bf16.msra.mxu1 %v1142_v28  ;;  %v1200_v6 = vld [vmem:[%s1581_s5 + $0x80] sm:$0xff]   ;;  %v1211_v17 = vld [vmem:[%s1581_s5 + $0x18] sm:$0xff]   ;;  %v1217_v23 = vld [vmem:[%s1581_s5 + $0x68] sm:$0xff]  }
  0x1c   :  { %267 = vmatprep.subr.bf16.mxu0 %v1143_v29  ;;  %308 = vmatprep.subr.bf16.mxu1 %v1145_v30  ;;  %v1212_v18 = vld [vmem:[%s1581_s5 + $0x98] sm:$0xff]   ;;  %v1213_v19 = vld [vmem:[%s1581_s5 + $0x60] sm:$0xff]   ;;  %v1218_v24 = vld [vmem:[%s1581_s5 + $0xe8] sm:$0xff]  }
  0x1d   :  { %v1214_v20 = vld [vmem:[%s1581_s5 + $0xe0] sm:$0xff]   ;;  %v1219_v25 = vld [vmem:[%s1581_s5 + $0x28] sm:$0xff]   ;;  %v1221_v27 = vld [vmem:[%s1581_s5 + $0x70] sm:$0xff]  }
  0x1e   :  { %v1215_v21 = vld [vmem:[%s1581_s5 + $0x20] sm:$0xff]   ;;  %v1220_v26 = vld [vmem:[%s1581_s5 + $0xa8] sm:$0xff]   ;;  %v1222_v28 = vld [vmem:[%s1581_s5 + $0xf0] sm:$0xff]  }
  0x1f   :  { %268 = vmatpush1.bf16.msra.mxu0 %v1147_v31  ;;  %309 = vmatpush1.bf16.msra.mxu1 %v1148_v32  ;;  %v1216_v22 = vld [vmem:[%s1581_s5 + $0xa0] sm:$0xff]   ;;  %v1223_v29 = vld [vmem:[%s1581_s5 + $0x30] sm:$0xff]   ;;  %v1225_v31 = vld [vmem:[%s1581_s5 + $0x78] sm:$0xff]  }
  0x20   :  { %495 = vmatprep.subr.bf16.mxu0 %v1151_v33  ;;  %536 = vmatprep.subr.bf16.mxu1 %v1154_v34  ;;  %v1224_v30 = vld [vmem:[%s1581_s5 + $0xb0] sm:$0xff]   ;;  %v1226_v32 = vld [vmem:[%s1581_s5 + $0xf8] sm:$0xff]  }
  0x21   :  { %v1227_v33 = vld [vmem:[%s1581_s5 + $0x38] sm:$0xff]  }
  0x22   :  { %286 = vmatmul.mubr.bf16.vlgmr.msra.gmra.mrb[0].mxu0 %v60_v35  ;;  %327 = vmatmul.mubr.bf16.vlgmr.msra.gmra.mrb[0].mxu1 %v60_v35  ;;  %v1228_v34 = vld [vmem:[%s1581_s5 + $0xb8] sm:$0xff]  }
  0x23   :  { %496 = vmatpush1.bf16.msra.mxu0 %v1149_v36  ;;  %537 = vmatpush1.bf16.msra.mxu1 %v1152_v37 }
  0x24   :  { %497 = vmatprep.subr.bf16.mxu0 %v1157_v38  ;;  %538 = vmatprep.subr.bf16.mxu1 %v1160_v39 }
  0x25   :  { %527 = vmatprep.mubr.bf16.mxu0 %v1229_v1  ;;  %568 = vmatprep.mubr.bf16.mxu1 %v1229_v1  ;;  %v1194_v1 = vld [vmem:[%s1578_s2 + $0xe8] ss:$16 sps:$4 sm:$0xff]  }
  0x27   :  { %498 = vmatpush1.bf16.msra.mxu0 %v1155_v40  ;;  %539 = vmatpush1.bf16.msra.mxu1 %v1158_v41 }
  0x28   :  { %499 = vmatprep.subr.bf16.mxu0 %v1163_v42  ;;  %540 = vmatprep.subr.bf16.mxu1 %v1166_v43  ;;  %v579_v43 = vlaneseq }
  0x2b   :  { %500 = vmatpush1.bf16.msra.mxu0 %v1161_v44  ;;  %541 = vmatpush1.bf16.msra.mxu1 %v1164_v45  ;;  %v580_v44 = vshrl.u32 %v579_v43, 7 }
  0x2c   :  { %501 = vmatprep.subr.bf16.mxu0 %v1169_v46  ;;  %542 = vmatprep.subr.bf16.mxu1 %v1172_v47  ;;  %v577_v47 = vld [vmem:[%s1582_s4] sm:$0xf] }
  0x2d   :  { %v581_v45 = vsub.s32 0, %v580_v44  ;;  %v589_v46 = vsub.s32 2, %v580_v44 }
  0x2f   :  { %502 = vmatpush1.bf16.msra.mxu0 %v1167_v48  ;;  %543 = vmatpush1.bf16.msra.mxu1 %v1170_v49  ;;  %v585_v48 = vsub.s32 1, %v580_v44  ;;  %v593_v49 = vsub.s32 3, %v580_v44 }
  0x30   :  { %503 = vmatprep.subr.bf16.mxu0 %v1175_v50  ;;  %544 = vmatprep.subr.bf16.mxu1 %v1178_v51  ;;  %v582_v50 = vrot.slane %v577_v47, %v581_v45  ;;  %v590_v51 = vrot.slane %v577_v47, %v589_v46 }
  0x33   :  { %504 = vmatpush1.bf16.msra.mxu0 %v1173_v52  ;;  %545 = vmatpush1.bf16.msra.mxu1 %v1176_v53 }
  0x34   :  { %505 = vmatprep.subr.bf16.mxu0 %v1181_v54  ;;  %546 = vmatprep.subr.bf16.mxu1 %v1184_v55  ;;  %v586_v54 = vrot.slane %v577_v47, %v585_v48  ;;  %v594_v55 = vrot.slane %v577_v47, %v593_v49 }
  0x37   :  { %506 = vmatpush1.bf16.msra.mxu0 %v1179_v56  ;;  %547 = vmatpush1.bf16.msra.mxu1 %v1182_v57 }
  0x38   :  { %507 = vmatprep.subr.bf16.mxu0 %v1187_v58  ;;  %548 = vmatprep.subr.bf16.mxu1 %v1190_v59 }
  0x3b   :  { %508 = vmatpush1.bf16.msra.mxu0 %v1185_v60  ;;  %549 = vmatpush1.bf16.msra.mxu1 %v1188_v61 }
  0x3c   :  { %509 = vmatprep.subr.bf16.mxu0 %v1193_v62  ;;  %550 = vmatprep.subr.bf16.mxu1 %v1196_v63 }
  0x3f   :  { %510 = vmatpush1.bf16.msra.mxu0 %v1191_v0  ;;  %551 = vmatpush1.bf16.msra.mxu1 %v1194_v1 }
  0x40   :  { %1056 = vmatprep.subr.bf16.mxu0 %v1197_v3  ;;  %1078 = vmatprep.subr.bf16.mxu1 %v1198_v4 }
  0x42   :  { %528 = vmatmul.mubr.bf16.vlgmr.msra.gmra.mrb[4].mxu0 %v27_v2  ;;  %569 = vmatmul.mubr.bf16.vlgmr.msra.gmra.mrb[4].mxu1 %v27_v2 }
  0x43   :  { %1057 = vmatpush3.bf16.msra.mxu0 %v1199_v5  ;;  %1079 = vmatpush3.bf16.msra.mxu1 %v1200_v6 }
  0x44   :  { %1058 = vmatprep.subr.bf16.mxu0 %v1201_v7  ;;  %1080 = vmatprep.subr.bf16.mxu1 %v1202_v8 }
  0x47   :  { %1059 = vmatpush3.bf16.msra.mxu0 %v1203_v9  ;;  %1081 = vmatpush3.bf16.msra.mxu1 %v1204_v10 }
  0x48   :  { %1060 = vmatprep.subr.bf16.mxu0 %v1205_v11  ;;  %1082 = vmatprep.subr.bf16.mxu1 %v1206_v12 }
  0x4b   :  { %1061 = vmatpush3.bf16.msra.mxu0 %v1207_v13  ;;  %1083 = vmatpush3.bf16.msra.mxu1 %v1208_v14 }
  0x4c   :  { %1062 = vmatprep.subr.bf16.mxu0 %v1209_v15  ;;  %1084 = vmatprep.subr.bf16.mxu1 %v1210_v16  ;;  %v1023_v16 = vld [vmem:[%s1583_s6] ss:$0 sm:$0xff] }
  0x4f   :  { %1063 = vmatpush3.bf16.msra.mxu0 %v1211_v17  ;;  %1085 = vmatpush3.bf16.msra.mxu1 %v1212_v18 }
  0x50   :  { %1064 = vmatprep.subr.bf16.mxu0 %v1213_v19  ;;  %1086 = vmatprep.subr.bf16.mxu1 %v1214_v20 }
  0x53   :  { %1065 = vmatpush3.bf16.msra.mxu0 %v1215_v21  ;;  %1087 = vmatpush3.bf16.msra.mxu1 %v1216_v22 }
  0x54   :  { %1066 = vmatprep.subr.bf16.mxu0 %v1217_v23  ;;  %1088 = vmatprep.subr.bf16.mxu1 %v1218_v24 }
  0x57   :  { %1067 = vmatpush3.bf16.msra.mxu0 %v1219_v25  ;;  %1089 = vmatpush3.bf16.msra.mxu1 %v1220_v26 }
  0x58   :  { %1068 = vmatprep.subr.bf16.mxu0 %v1221_v27  ;;  %1090 = vmatprep.subr.bf16.mxu1 %v1222_v28 }
  0x5b   :  { %1069 = vmatpush3.bf16.msra.mxu0 %v1223_v29  ;;  %1091 = vmatpush3.bf16.msra.mxu1 %v1224_v30 }
  0x5c   :  { %1070 = vmatprep.subr.bf16.mxu0 %v1225_v31  ;;  %1092 = vmatprep.subr.bf16.mxu1 %v1226_v32 }
  0x5f   :  { %1071 = vmatpush3.bf16.msra.mxu0 %v1227_v33  ;;  %1093 = vmatpush3.bf16.msra.mxu1 %v1228_v34 }
  0xf5   :  { %v287_v35 = vpop.f32.mrb[0].mxu0  ;;  %v328_v36 = vpop.f32.mrb[0].mxu1 }
  0xf6   :  { %v289_v37 = vpop.f32.mrb[1].mxu0  ;;  %v330_v38 = vpop.f32.mrb[1].mxu1 }
  0xf7   :  { %v291_v39 = vpop.f32.mrb[2].mxu0  ;;  %v332_v40 = vpop.f32.mrb[2].mxu1 }
  0xf8   :  { %v292_v41 = vpop.f32.mrb[3].mxu0  ;;  %v333_v42 = vpop.f32.mrb[3].mxu1 }
 0x115   :  { %v529_v52 = vpop.f32.mrb[4].mxu0  ;;  %v570_v53 = vpop.f32.mrb[4].mxu1 }
 0x116   :  { %v530_v56 = vadd.f32 %v529_v52, %v287_v35  ;;  %v571_v57 = vadd.f32 %v570_v53, %v328_v36  ;;  %v531_v58 = vpop.f32.mrb[5].mxu0  ;;  %v572_v59 = vpop.f32.mrb[5].mxu1 }
 0x117   :  { %v532_v60 = vadd.f32 %v531_v58, %v289_v37  ;;  %v573_v61 = vadd.f32 %v572_v59, %v330_v38  ;;  %v533_v62 = vpop.f32.mrb[6].mxu0  ;;  %v574_v63 = vpop.f32.mrb[6].mxu1 }
 0x118   :  { %v599_v0 = vadd.f32 %v582_v50, %v530_v56  ;;  %v601_v1 = vadd.f32 %v590_v51, %v571_v57  ;;  %v534_v2 = vpop.f32.mrb[7].mxu0  ;;  %v575_v3 = vpop.f32.mrb[7].mxu1 }
 0x119   :  { %v600_v4 = vadd.f32 %v586_v54, %v532_v60  ;;  %v602_v5 = vadd.f32 %v594_v55, %v573_v61 }
 0x11a   :  { %v603_v6 = vmax.f32 %v599_v0, 0.0  ;;  %v605_v7 = vmax.f32 %v601_v1, 0.0 }
 0x11b   :  { %v604_v8 = vmax.f32 %v600_v4, 0.0  ;;  %v606_v9 = vmax.f32 %v602_v5, 0.0 }
 0x11c   :  { %v607_v12 = vpack.c.bf16 %v603_v6, %v603_v6  ;;  %v609_v13 = vpack.c.bf16 %v605_v7, %v605_v7 }
 0x11d   :  { %v608_v10 = vpack.c.bf16 %v604_v8, %v604_v8  ;;  %v610_v11 = vpack.c.bf16 %v606_v9, %v606_v9 }
 0x11f   :  { %906 = vmatprep.mubr.bf16.mxu0 %v608_v10  ;;  %946 = vmatprep.mubr.bf16.mxu1 %v610_v11 }
 0x120   :  { %907 = vmatmul.mubr.bf16.vlgmr.msra.gmra.mrb[8].mxu0 %v607_v12  ;;  %947 = vmatmul.mubr.bf16.vlgmr.msra.gmra.mrb[8].mxu1 %v609_v13 }
 0x1f3   :  { %v1072_v14 = vpop.f32.mrb[8].mxu0  ;;  %v1094_v15 = vpop.f32.mrb[8].mxu1 }
 0x1f4   :  { %v1073_v17 = vpop.f32.mrb[9].mxu0  ;;  %v1095_v18 = vpop.f32.mrb[9].mxu1 }
 0x1f5   :  { %v1074_v19 = vadd.f32 %v1073_v17, %v1072_v14  ;;  %v1096_v20 = vadd.f32 %v1095_v18, %v1094_v15  ;;  %v1075_v21 = vpop.f32.mrb[10].mxu0  ;;  %v1097_v22 = vpop.f32.mrb[10].mxu1 }
 0x1f6   :  { %v1076_v23 = vpop.f32.mrb[11].mxu0  ;;  %v1098_v24 = vpop.f32.mrb[11].mxu1 }
 0x1f7   :  { %v909_v25 = vadd.f32 %v1074_v19, %v1023_v16 }
 0x1f9   :  { %v949_v26 = vadd.f32 %v1096_v20, %v909_v25 }
 0x1fb   :  { %954 = vst [vmem:[%s1584_s7] sm:$0xff] %v949_v26 }

// kernel: lstm_text_predictor_forward.4
= control target key start
LH: loop header
LB: loop body
LE: loop exit
PB: predicated region body
PF: predicated region fallthrough
CT: control target
= control target key end

     0   :  { %s6386_s12 = smov 0   ;;  %s8120_s0 = inlined_call_operand.vmem [shape: bf16[2,18,18,3], index: 0, kind: input, shape index: {}]   ;;  %s8121_s1 = inlined_call_operand.vmem [shape: bf16[27,128], index: 1, kind: input, shape index: {}]   ;;  %s8122_s2 = inlined_call_operand.vmem [shape: f32[1,128], index: 2, kind: input, shape index: {}]   ;;  %s8123_s3 = inlined_call_operand.vmem [shape: bf16[2,8,8,128], index: 3, kind: output, shape index: {}]  }
   0x1 LB: > { %s5239_s13 = sadd.s32 4294967295, %s6362_s12   ;;  %p5243_p0 = scmp.ge.s32.totalorder %s6362_s12, 1  ;;  %s6362_s12 = sphi %s6386_s12, %s13_s12  }
   0x2   : > { %p137_p1 = scmp.lt.s32.totalorder %s6362_s12, 3 }
   0x4   : > { %p138_p2 = pnand %p5243_p0, %p137_p1 }
   0x6   : > { %141 = sbr.rel (%p138_p2) target bundleno = 887 (0x377), region = 32 }
   0xd   : > { %v226_v0 = vld [vmem:[%s8121_s1] sm:$0xf]  ;;  %vm725_vm0 = vcmask 1040384   ;;  %vm726_vm1 = vcmask 1041408   ;;  %p161_p3 = scmp.lt.s32.totalorder %s5239_s13, 1  ;;  %v6364_v2 = vmov 65535  }
   0xe   : > { %v5263_v1 = vcombine.low %v226_v0, %v226_v0  ;;  %v727_v3 = vsel %vm725_vm0, 4294967295, %v6364_v2  ;;  %v227_v4 = vld [vmem:[%s8121_s1 + $0x4] sm:$0xf]  ;;  %v228_v6 = vld [vmem:[%s8121_s1 + $0x8] sm:$0xf]  ;;  %vm676_vm4 = vcmask 23552  }
   0xf   : > { %v6400_v5 = vcombine.low %v227_v4, %v227_v4  ;;  %s8210_s13 = smov (!%p161_p3, %s5239_s13), 1  ;;  %v5344_v7 = vcombine.low %v226_v0, %v227_v4  ;;  %v6408_v10 = vsel %vm726_vm1, %v727_v3, 0  ;;  %v5398_v11 = vcombine.low %v227_v4, %v228_v6 }
  0x10   : > { %v669_v8 = vshrl.u32 %v5263_v1, 16  ;;  %v672_v9 = vshll.u32 %v5263_v1, 16  ;;  %s6317_s20 = smul.u32 216, %s8210_s13  ;;  %v6412_v13 = vcombine.low %v228_v6, %v228_v6  ;;  %vm230_vm2 = vsmask.f32 3328  ;;  %s5535_s28 = sshll.u32 %s8210_s13, 5 }
  0x11   : > { %v1851_v12 = vrot.slane %v6400_v5, 2  ;;  %vm231_vm3 = vsmask.f32 7440  ;;  %v2066_v17 = vshrl.u32 %v5398_v11, 16  ;;  %v2069_v18 = vshll.u32 %v5398_v11, 16  ;;  %s7497_s4 = scalar_lea.vmem %s8123_s3, %s5535_s28 }
  0x12   : > { %v671_v14 = vrot.slane %v669_v8, 1  ;;  %v674_v15 = vrot.slane %v672_v9, 2  ;;  %s6420_s23 = scalar_lea.vmem %s8120_s0, %s6317_s20  ;;  %v2278_v19 = vrot.slane %v6412_v13, 1  ;;  %v6431_v24 = vand.u32 %v6408_v10, %v226_v0  ;;  %vm6461_vm5 = vmor %vm230_vm2, %vm231_vm3 }
  0x13   : > { %v6415_v16 = vand.u32 %v1851_v12, %v6408_v10  ;;  %v6424_v21 = vld [vmem:[%s6420_s23] sm:$0xf]  ;;  %v6427_v22 = vld [vmem:[%s6420_s23 + $0x4] sm:$0xf]  ;;  %v174_v23 = vld [vmem:[%s6420_s23 + $0x8] sm:$0x1] }
  0x14   : > { %v675_v20 = vor.u32 %v674_v15, %v671_v14  ;;  %v234_v25 = vshrl.u32 %v6424_v21, 16  ;;  %v237_v26 = vshll.u32 %v6424_v21, 16  ;;  %v243_v27 = vshll.u32 %v6427_v22, 16  ;;  %v6439_v29 = vld [vmem:[%s6420_s23 + $0xc] sm:$0xf] }
  0x15   : > { %8158 = vst [vmem:[#allocation2_spill] sm:$0xff] %v6415_v16  ;;  %5889 = vmatprep.subr.bf16.mxu0 %v6415_v16  ;;  %v247_v28 = vshrl.u32 %v6427_v22, 16  ;;  %v253_v31 = vshll.u32 %v174_v23, 16  ;;  %v6444_v32 = vld [vmem:[%s6420_s23 + $0x10] sm:$0xf]  ;;  %v6450_v34 = vand.u32 %v2278_v19, %v6408_v10  ;;  %v6452_v35 = vrot.slane %v5344_v7, 3 }
  0x16   : > { %v730_v30 = vand.u32 %v6408_v10, %v675_v20  ;;  %5890 = vmatpush3.bf16.msra.mxu0 %v6415_v16  ;;  %v6447_v33 = vld [vmem:[%s6420_s23 + $0x14] sm:$0x1]  ;;  %v236_v36 = vrot.slane %v234_v25, 4  ;;  %v239_v37 = vrot.slane %v237_v26, 5  ;;  %v245_v38 = vrot.slane %v243_v27, 5 }
  0x17   : > { %v249_v39 = vrot.slane %v247_v28, 4  ;;  %v255_v40 = vrot.slane %v253_v31, 5  ;;  %v258_v41 = vshrl.u32 %v6439_v29, 16  ;;  %v261_v42 = vshll.u32 %v6439_v29, 16  ;;  %v6471_v53 = vld [vmem:[%s6420_s23 + $0x18] sm:$0xf] }
  0x18   : > { %5753 = vmatprep.subr.bf16.mxu1 %v730_v30  ;;  %v267_v43 = vshll.u32 %v6444_v32, 16  ;;  %v240_v44 = vor.u32 %v239_v37, %v236_v36  ;;  %v271_v46 = vshrl.u32 %v6444_v32, 16  ;;  %v277_v47 = vshll.u32 %v6447_v33, 16  ;;  %v6475_v62 = vld [vmem:[%s6420_s23 + $0x1c] sm:$0xf] }
  0x19   : > { %5754 = vmatpush3.bf16.msra.mxu1 %v730_v30  ;;  %v250_v45 = vor.u32 %v249_v39, %v245_v38  ;;  %v260_v49 = vrot.slane %v258_v41, 4  ;;  %v263_v50 = vrot.slane %v261_v42, 5  ;;  %v6468_v52 = vcombine.low %v6439_v29, %v6444_v32  ;;  %v6482_v2 = vld [vmem:[%s6420_s23 + $0x20] sm:$0x1]  ;;  %v6489_v15 = vld [vmem:[%s6420_s23 + $0x24] sm:$0xf] }
  0x1a   : > { %5787 = vmatprep.subr.bf16.mxu1 %v6431_v24  ;;  %v269_v51 = vrot.slane %v267_v43, 5  ;;  %v241_v54 = vrot.slane %v240_v44, 4  ;;  %v273_v56 = vrot.slane %v271_v46, 4  ;;  %v279_v57 = vrot.slane %v277_v47, 5  ;;  %v6497_v23 = vld [vmem:[%s6420_s23 + $0x28] sm:$0xf] }
  0x1b   : > { %v251_v55 = vrot.slane %v250_v45, 4  ;;  %v264_v58 = vor.u32 %v263_v50, %v260_v49  ;;  %v1216_v59 = vrot.slane %v6447_v33, 5  ;;  %v2068_v60 = vrot.slane %v2066_v17, 3  ;;  %v6500_v25 = vld [vmem:[%s6420_s23 + $0x2c] sm:$0x1] }
  0x1c   : > { %v2071_v61 = vrot.slane %v2069_v18, 4  ;;  %v246_v63 = vsel %vm6461_vm5, %v241_v54, %v245_v38  ;;  %v274_v1 = vor.u32 %v273_v56, %v269_v51  ;;  %v282_v3 = vshrl.u32 %v6471_v53, 16  ;;  %v6506_v31 = vld [vmem:[%s6420_s23 + $0x30] sm:$0xf]  ;;  %v6517_v47 = vld [vmem:[%s6420_s23 + $0x34] sm:$0xf] }
  0x1d   : > { %v256_v0 = vsel %vm6461_vm5, %v251_v55, %v255_v40  ;;  %v265_v6 = vrot.slane %v264_v58, 4  ;;  %v285_v8 = vshll.u32 %v6471_v53, 16  ;;  %v291_v12 = vshll.u32 %v6475_v62, 16  ;;  %v6522_v56 = vld [vmem:[%s6420_s23 + $0x38] sm:$0x1] }
  0x1e   : > { %v5247_v4 = vcombine.low %v246_v63, %v256_v0  ;;  %v2072_v7 = vor.u32 %v2071_v61, %v2068_v60  ;;  %v275_v9 = vrot.slane %v274_v1, 4  ;;  %v284_v11 = vrot.slane %v282_v3, 4  ;;  %v6527_v63 = vld [vmem:[%s6420_s23 + $0x3c] sm:$0xf]  ;;  %v6687_v33 = vld [vmem:[%s6420_s23 + $0x80] sm:$0x1] }
  0x1f   : > { %v295_v14 = vshrl.u32 %v6475_v62, 16  ;;  %v270_v17 = vsel %vm6461_vm5, %v265_v6, %v269_v51  ;;  %v287_v19 = vrot.slane %v285_v8, 5  ;;  %v301_v20 = vshll.u32 %v6482_v2, 16 }
  0x20   : > { %5755 = vmatprep.mubr.msk.bf16.mxu1 %vm676_vm4, %v5247_v4  ;;  %v2077_v18 = vand.u32 %v2072_v7, %v6408_v10  ;;  %v280_v26 = vsel %vm6461_vm5, %v275_v9, %v279_v57  ;;  %v293_v27 = vrot.slane %v291_v12, 5  ;;  %v1220_v30 = vrot.slane %v6475_v62, 5  ;;  %v6538_v9 = vld [vmem:[%s6420_s23 + $0x40] sm:$0xf] }
  0x21   : > { %v297_v28 = vrot.slane %v295_v14, 4  ;;  %v5248_v36 = vcombine.low %v270_v17, %v280_v26  ;;  %v288_v37 = vor.u32 %v287_v19, %v284_v11  ;;  %v303_v38 = vrot.slane %v301_v20, 5 }
  0x22   : > { %5923 = vmatprep.subr.bf16.mxu0 %v2077_v18  ;;  %v306_v41 = vshrl.u32 %v6489_v15, 16  ;;  %v309_v42 = vshll.u32 %v6489_v15, 16  ;;  %v315_v43 = vshll.u32 %v6497_v23, 16  ;;  %v319_v45 = vshrl.u32 %v6497_v23, 16 }
  0x23   : > { %v298_v40 = vor.u32 %v297_v28, %v293_v27  ;;  %5891 = vmatprep.mubr.msk.bf16.mxu0 %vm676_vm4, %v5248_v36  ;;  %5756 = vmatmul.mubr.msk.bf16.vlgmr.msra.gmra.mrb[0].mxu1 %vm676_vm4, %v5248_v36  ;;  %v289_v44 = vrot.slane %v288_v37, 4  ;;  %v325_v46 = vshll.u32 %v6500_v25, 16  ;;  %v330_v49 = vshrl.u32 %v6506_v31, 16 }
  0x24   : > { %5788 = vmatpush3.bf16.msra.mxu1 %v6431_v24  ;;  %v308_v51 = vrot.slane %v306_v41, 4  ;;  %v311_v54 = vrot.slane %v309_v42, 5  ;;  %v317_v55 = vrot.slane %v315_v43, 5  ;;  %v321_v58 = vrot.slane %v319_v45, 4  ;;  %v6553_v41 = vld [vmem:[%s6420_s23 + $0x48] sm:$0xf] }
  0x25   : > { %v299_v50 = vrot.slane %v298_v40, 4  ;;  %v294_v57 = vsel %vm6461_vm5, %v289_v44, %v293_v27  ;;  %v327_v60 = vrot.slane %v325_v46, 5  ;;  %v332_v61 = vrot.slane %v330_v49, 4  ;;  %v6546_v27 = vld [vmem:[%s6420_s23 + $0x44] sm:$0x1]  ;;  %8162 = vst [vmem:[#allocation4_spill] sm:$0xff] %v6553_v41 }
  0x26   : > { %v312_v1 = vor.u32 %v311_v54, %v308_v51  ;;  %v333_v24 = vshll.u32 %v6506_v31, 16  ;;  %v339_v3 = vshll.u32 %v6517_v47, 16  ;;  %v322_v6 = vor.u32 %v321_v58, %v317_v55  ;;  %v6559_v46 = vld [vmem:[%s6420_s23 + $0x4c] sm:$0xf]  ;;  %v6566_v58 = vld [vmem:[%s6420_s23 + $0x50] sm:$0x1] }
  0x27   : > { %v304_v0 = vsel %vm6461_vm5, %v299_v50, %v303_v38  ;;  %v343_v7 = vshrl.u32 %v6517_v47, 16  ;;  %v349_v8 = vshll.u32 %v6522_v56, 16  ;;  %v354_v17 = vshrl.u32 %v6527_v63, 16  ;;  %8163 = vst [vmem:[#allocation5_spill] sm:$0xff] %v6559_v46 }
  0x28   : > { %v6533_v4 = vcombine.low %v294_v57, %v304_v0  ;;  %v313_v11 = vrot.slane %v312_v1, 4  ;;  %v335_v12 = vrot.slane %v333_v24, 5  ;;  %v341_v14 = vrot.slane %v339_v3, 5  ;;  %v6578_v3 = vld [vmem:[%s6420_s23 + $0x54] sm:$0xf] }
  0x29   : > { %v323_v19 = vrot.slane %v322_v6, 4  ;;  %v345_v20 = vrot.slane %v343_v7, 4  ;;  %v351_v26 = vrot.slane %v349_v8, 5  ;;  %v357_v28 = vshll.u32 %v6527_v63, 16  ;;  %8165 = vst [vmem:[#allocation7_spill] sm:$0xff] %v6578_v3 }
  0x2a   : > { %8161 = vst [vmem:[#allocation3_spill] sm:$0xff] %v6533_v4  ;;  %5892 = vmatmul.mubr.msk.bf16.vlgmr.msra.gmra.mrb[0].mxu0 %vm676_vm4, %v6533_v4  ;;  %5759 = vmatprep.mubr.msk.bf16.mxu1 %vm676_vm4, %v6533_v4  ;;  %v318_v36 = vsel %vm6461_vm5, %v313_v11, %v317_v55  ;;  %v336_v37 = vor.u32 %v335_v12, %v332_v61  ;;  %v356_v38 = vrot.slane %v354_v17, 4  ;;  %v363_v40 = vshll.u32 %v6538_v9, 16  ;;  %v6583_v12 = vld [vmem:[%s6420_s23 + $0x58] sm:$0xf] }
  0x2b   : > { %5924 = vmatpush3.bf16.msra.mxu0 %v2077_v18  ;;  %v328_v42 = vsel %vm6461_vm5, %v323_v19, %v327_v60  ;;  %v346_v43 = vor.u32 %v345_v20, %v341_v14  ;;  %v359_v44 = vrot.slane %v357_v28, 5  ;;  %v367_v45 = vshrl.u32 %v6538_v9, 16  ;;  %8166 = vst [vmem:[#allocation8_spill] sm:$0xff] %v6583_v12 }
  0x2c   : > { %5957 = vmatprep.subr.bf16.mxu0 %v6450_v34  ;;  %v6562_v18 = vcombine.low %v318_v36, %v328_v42  ;;  %v337_v49 = vrot.slane %v336_v37, 4  ;;  %v365_v50 = vrot.slane %v363_v40, 5  ;;  %v373_v51 = vshll.u32 %v6546_v27, 16  ;;  %v6592_v37 = vld [vmem:[%s6420_s23 + $0x5c] sm:$0x1] }
  0x2d   : > { %v347_v54 = vrot.slane %v346_v43, 4  ;;  %v360_v55 = vor.u32 %v359_v44, %v356_v38  ;;  %v369_v57 = vrot.slane %v367_v45, 4  ;;  %v378_v60 = vshrl.u32 %v6553_v41, 16  ;;  %v6602_v45 = vld [vmem:[%s6420_s23 + $0x60] sm:$0xf] }
  0x2e   : > { %8164 = vst [vmem:[#allocation6_spill] sm:$0xff] %v6562_v18  ;;  %5895 = vmatprep.mubr.msk.bf16.mxu0 %vm676_vm4, %v6562_v18  ;;  %5760 = vmatmul.mubr.msk.bf16.gmra.mrb[4].mxu1 %vm676_vm4, %v6562_v18  ;;  %v342_v61 = vsel %vm6461_vm5, %v337_v49, %v341_v14  ;;  %v375_v0 = vrot.slane %v373_v51, 5  ;;  %v381_v1 = vshll.u32 %v6553_v41, 16  ;;  %v387_v24 = vshll.u32 %v6559_v46, 16  ;;  %v6779_v18 = vld [vmem:[%s6420_s23 + $0x9c] sm:$0xf] }
  0x2f   : > { %v352_v6 = vsel %vm6461_vm5, %v347_v54, %v351_v26  ;;  %v361_v7 = vrot.slane %v360_v55, 4  ;;  %v370_v8 = vor.u32 %v369_v57, %v365_v50  ;;  %v380_v11 = vrot.slane %v378_v60, 4 }
  0x30   : > { %vm1201_vm6 = vcmask 1042432   ;;  %vm1202_vm7 = vcmask 1046532   ;;  %v6585_v14 = vcombine.low %v342_v61, %v352_v6  ;;  %v383_v17 = vrot.slane %v381_v1, 5  ;;  %v6610_v1 = vld [vmem:[%s6420_s23 + $0x64] sm:$0xf] }
  0x31   : > { %v389_v19 = vrot.slane %v387_v24, 5  ;;  %v391_v20 = vshrl.u32 %v6559_v46, 16  ;;  %v366_v28 = vsel %vm6461_vm5, %v361_v7, %v365_v50  ;;  %v371_v36 = vrot.slane %v370_v8, 4  ;;  %vm6638_vm8 = vmor %vm1201_vm6, %vm1202_vm7 }
  0x32   : > { %8167 = vst [vmem:[#allocation9_spill] sm:$0xff] %v6585_v14  ;;  %v397_v26 = vshll.u32 %v6566_v58, 16  ;;  %v402_v38 = vshrl.u32 %v6578_v3, 16  ;;  %5896 = vmatmul.mubr.msk.bf16.gmra.mrb[4].mxu0 %vm676_vm4, %v6585_v14  ;;  %5763 = vmatprep.mubr.msk.bf16.mxu1 %vm676_vm4, %v6585_v14  ;;  %v384_v40 = vor.u32 %v383_v17, %v380_v11  ;;  %v405_v43 = vshll.u32 %v6578_v3, 16 }
  0x33   : > { %v393_v42 = vrot.slane %v391_v20, 4  ;;  %v411_v44 = vshll.u32 %v6583_v12, 16  ;;  %v376_v49 = vsel %vm6461_vm5, %v371_v36, %v375_v0  ;;  %v415_v54 = vshrl.u32 %v6583_v12, 16  ;;  %v6621_v20 = vld [vmem:[%s6420_s23 + $0x68] sm:$0x1] }
  0x34   : > { %v399_v50 = vrot.slane %v397_v26, 5  ;;  %v404_v51 = vrot.slane %v402_v38, 4  ;;  %v6607_v55 = vcombine.low %v366_v28, %v376_v49  ;;  %v385_v57 = vrot.slane %v384_v40, 4 }
  0x35   : > { %v394_v60 = vor.u32 %v393_v42, %v389_v19  ;;  %v407_v61 = vrot.slane %v405_v43, 5  ;;  %v413_v24 = vrot.slane %v411_v44, 5  ;;  %v417_v6 = vrot.slane %v415_v54, 4 }
  0x36   : > { %8168 = vst [vmem:[#allocation10_spill] sm:$0xff] %v6607_v55  ;;  %v421_v7 = vshll.u32 %v6592_v37, 16  ;;  %v426_v8 = vshrl.u32 %v6602_v45, 16  ;;  %5899 = vmatprep.mubr.msk.bf16.mxu0 %vm676_vm4, %v6607_v55  ;;  %5764 = vmatmul.mubr.msk.bf16.gmra.mrb[8].mxu1 %vm676_vm4, %v6607_v55  ;;  %v390_v0 = vsel %vm6461_vm5, %v385_v57, %v389_v19  ;;  %v429_v28 = vshll.u32 %v6602_v45, 16  ;;  %v6629_v19 = vld [vmem:[%s6420_s23 + $0x6c] sm:$0xf] }
  0x37   : > { %v395_v11 = vrot.slane %v394_v60, 4  ;;  %v408_v17 = vor.u32 %v407_v61, %v404_v51  ;;  %v418_v36 = vor.u32 %v417_v6, %v413_v24  ;;  %v435_v40 = vshll.u32 %v6610_v1, 16 }
  0x38   : > { %v423_v26 = vrot.slane %v421_v7, 5  ;;  %v428_v38 = vrot.slane %v426_v8, 4  ;;  %v431_v44 = vrot.slane %v429_v28, 5  ;;  %v439_v49 = vshrl.u32 %v6610_v1, 16 }
  0x39   : > { %v400_v42 = vsel %vm6461_vm5, %v395_v11, %v399_v50  ;;  %v409_v43 = vrot.slane %v408_v17, 4  ;;  %v419_v54 = vrot.slane %v418_v36, 4  ;;  %v437_v57 = vrot.slane %v435_v40, 5  ;;  %v6657_v40 = vld [vmem:[%s6420_s23 + $0x74] sm:$0x1] }
  0x3a   : > { %v6631_v51 = vcombine.low %v390_v0, %v400_v42  ;;  %v445_v60 = vshll.u32 %v6621_v20, 16  ;;  %v432_v6 = vor.u32 %v431_v44, %v428_v38  ;;  %v441_v7 = vrot.slane %v439_v49, 4  ;;  %v6644_v0 = vld [vmem:[%s6420_s23 + $0x70] sm:$0xf] }
  0x3b   : > { %v414_v61 = vsel %vm6461_vm5, %v409_v43, %v413_v24  ;;  %v5313_v8 = vrot.slane %v6439_v29, 9  ;;  %v424_v24 = vsel %vm6461_vm5, %v419_v54, %v423_v26  ;;  %v1213_v17 = vrot.slane %v6444_v32, 5 }
  0x3c   : > { %8169 = vst [vmem:[#allocation11_spill] sm:$0xff] %v6631_v51  ;;  %5900 = vmatmul.mubr.msk.bf16.gmra.mrb[8].mxu0 %vm676_vm4, %v6631_v51  ;;  %5767 = vmatprep.mubr.msk.bf16.mxu1 %vm676_vm4, %v6631_v51  ;;  %v447_v11 = vrot.slane %v445_v60, 5  ;;  %v450_v28 = vshrl.u32 %v6629_v19, 16  ;;  %v6654_v36 = vcombine.low %v414_v61, %v424_v24  ;;  %v433_v38 = vrot.slane %v432_v6, 4 }
  0x3d   : > { %v442_v29 = vor.u32 %v441_v7, %v437_v57  ;;  %v453_v42 = vshll.u32 %v6629_v19, 16  ;;  %v1214_v43 = vsel %vm6638_vm8, %v5313_v8, %v1213_v17  ;;  %v1215_v44 = vrot.slane %v1213_v17, 4  ;;  %v6677_v17 = vld [vmem:[%s6420_s23 + $0x78] sm:$0xf] }
  0x3e   : > { %8172 = vst [vmem:[#allocation12_spill] sm:$0xff] %v6654_v36  ;;  %v452_v49 = vrot.slane %v450_v28, 4  ;;  %v459_v26 = vshll.u32 %v6644_v0, 16  ;;  %5903 = vmatprep.mubr.msk.bf16.mxu0 %vm676_vm4, %v6654_v36  ;;  %5768 = vmatmul.mubr.msk.bf16.gmra.mrb[12].mxu1 %vm676_vm4, %v6654_v36  ;;  %v438_v32 = vsel %vm6461_vm5, %v433_v38, %v437_v57  ;;  %v463_v61 = vshrl.u32 %v6644_v0, 16  ;;  %v6720_v36 = vld [vmem:[%s6420_s23 + $0x88] sm:$0xf] }
  0x3f   : > { %v443_v54 = vrot.slane %v442_v29, 4  ;;  %v455_v60 = vrot.slane %v453_v42, 5  ;;  %v1217_v6 = vsel %vm6638_vm8, %v1215_v44, %v1216_v59  ;;  %v469_v8 = vshll.u32 %v6657_v40, 16  ;;  %v6684_v42 = vld [vmem:[%s6420_s23 + $0x7c] sm:$0xf] }
  0x40   : > { %v461_v7 = vrot.slane %v459_v26, 5  ;;  %v5314_v24 = vrot.slane %v6471_v53, 9  ;;  %v6681_v57 = vcombine.low %v1214_v43, %v1217_v6  ;;  %v465_v29 = vrot.slane %v463_v61, 4 }
  0x41   : > { %v448_v28 = vsel %vm6461_vm5, %v443_v54, %v447_v11  ;;  %v456_v38 = vor.u32 %v455_v60, %v452_v49  ;;  %v471_v59 = vrot.slane %v469_v8, 5  ;;  %v1222_v26 = vrot.slane %v1220_v30, 4 }
  0x42   : > { %8173 = vst [vmem:[#allocation13_spill] sm:$0xff] %v6681_v57  ;;  %v6689_v39 = vcombine.low %v438_v32, %v448_v28  ;;  %v1221_v44 = vsel %vm6638_vm8, %v5314_v24, %v1220_v30  ;;  %v466_v43 = vor.u32 %v465_v29, %v461_v7  ;;  %v474_v49 = vshrl.u32 %v6677_v17, 16 }
  0x43   : > { %v457_v11 = vrot.slane %v456_v38, 4  ;;  %v477_v54 = vshll.u32 %v6677_v17, 16  ;;  %v8175_v32 = vrot.slane %v6482_v2, 5  ;;  %v483_v30 = vshll.u32 %v6684_v42, 16  ;;  %v6717_v38 = vld [vmem:[%s6420_s23 + $0x84] sm:$0xf] }
  0x44   : > { %8174 = vst [vmem:[#allocation14_spill] sm:$0xff] %v6689_v39  ;;  %5904 = vmatmul.mubr.msk.bf16.gmra.mrb[12].mxu0 %vm676_vm4, %v6689_v39  ;;  %5771 = vmatprep.mubr.msk.bf16.mxu1 %vm676_vm4, %v6689_v39  ;;  %v487_v61 = vshrl.u32 %v6684_v42, 16  ;;  %v493_v6 = vshll.u32 %v6687_v33, 16  ;;  %v467_v24 = vrot.slane %v466_v43, 4  ;;  %v476_v2 = vrot.slane %v474_v49, 4 }
  0x45   : > { %v1224_v60 = vsel %vm6638_vm8, %v1222_v26, %v8175_v32  ;;  %5925 = vmatprep.mubr.msk.bf16.mxu0 %vm676_vm4, %v6681_v57  ;;  %v462_v8 = vsel %vm6461_vm5, %v457_v11, %v461_v7  ;;  %v479_v29 = vrot.slane %v477_v54, 5  ;;  %v485_v26 = vrot.slane %v483_v30, 5  ;;  %v6730_v54 = vld [vmem:[%s6420_s23 + $0x8c] sm:$0x1]  ;;  %v6855_v57 = vld [vmem:[%s6420_s23 + $0xb8] sm:$0xf] }
  0x46   : > { %v6714_v28 = vcombine.low %v1221_v44, %v1224_v60  ;;  %v489_v32 = vrot.slane %v487_v61, 4  ;;  %v495_v39 = vrot.slane %v493_v6, 5  ;;  %v472_v51 = vsel %vm6461_vm5, %v467_v24, %v471_v59 }
  0x47   : > { %v5315_v55 = vrot.slane %v6489_v15, 9  ;;  %v1227_v7 = vrot.slane %v6497_v23, 5  ;;  %v1230_v11 = vrot.slane %v6500_v25, 5  ;;  %v6727_v44 = vcombine.low %v462_v8, %v472_v51 }
  0x48   : > { %8176 = vst [vmem:[#allocation15_spill] sm:$0xff] %v6714_v28  ;;  %v480_v43 = vor.u32 %v479_v29, %v476_v2  ;;  %v490_v49 = vor.u32 %v489_v32, %v485_v26  ;;  %v498_v60 = vshrl.u32 %v6717_v38, 16  ;;  %v501_v59 = vshll.u32 %v6717_v38, 16 }
  0x49   : > { %8177 = vst [vmem:[#allocation16_spill] sm:$0xff] %v6727_v44  ;;  %v1228_v30 = vsel %vm6638_vm8, %v5315_v55, %v1227_v7  ;;  %v1229_v61 = vrot.slane %v1227_v7, 4  ;;  %v507_v6 = vshll.u32 %v6720_v36, 16  ;;  %5772 = vmatmul.mubr.msk.bf16.gmra.mrb[16].mxu1 %vm676_vm4, %v6727_v44  ;;  %v511_v24 = vshrl.u32 %v6720_v36, 16  ;;  %v6744_v7 = vld [vmem:[%s6420_s23 + $0x90] sm:$0xf] }
  0x4a   : > { %v481_v25 = vrot.slane %v480_v43, 4  ;;  %v491_v51 = vrot.slane %v490_v49, 4  ;;  %v500_v8 = vrot.slane %v498_v60, 4  ;;  %v503_v29 = vrot.slane %v501_v59, 5 }
  0x4b   : > { %v1231_v2 = vsel %vm6638_vm8, %v1229_v61, %v1230_v11  ;;  %v509_v32 = vrot.slane %v507_v6, 5  ;;  %v517_v55 = vshll.u32 %v6730_v54, 16  ;;  %v513_v60 = vrot.slane %v511_v24, 4  ;;  %v6755_v11 = vld [vmem:[%s6420_s23 + $0x94] sm:$0xf] }
  0x4c   : > { %5926 = vmatmul.mubr.msk.bf16.vlgmr.msra.gmra.mrb[0].mxu0 %vm676_vm4, %v6714_v28  ;;  %v486_v44 = vsel %vm6461_vm5, %v481_v25, %v485_v26  ;;  %v496_v43 = vsel %vm6461_vm5, %v491_v51, %v495_v39  ;;  %v6752_v49 = vcombine.low %v1228_v30, %v1231_v2  ;;  %v504_v59 = vor.u32 %v503_v29, %v500_v8 }
  0x4d   : > { %5958 = vmatpush3.bf16.msra.mxu0 %v6450_v34  ;;  %v6758_v61 = vcombine.low %v486_v44, %v496_v43  ;;  %v519_v6 = vrot.slane %v517_v55, 5  ;;  %v5316_v14 = vrot.slane %v6506_v31, 9  ;;  %v514_v26 = vor.u32 %v513_v60, %v509_v32  ;;  %v6769_v44 = vld [vmem:[%s6420_s23 + $0x98] sm:$0x1] }
  0x4e   : > { %8178 = vst [vmem:[#allocation17_spill] sm:$0xff] %v6752_v49  ;;  %5929 = vmatprep.mubr.msk.bf16.mxu0 %vm676_vm4, %v6752_v49  ;;  %v1234_v39 = vrot.slane %v6517_v47, 5  ;;  %v1237_v30 = vrot.slane %v6522_v56, 5  ;;  %v522_v25 = vshrl.u32 %v6744_v7, 16  ;;  %v505_v34 = vrot.slane %v504_v59, 4 }
  0x4f   : > { %8179 = vst [vmem:[#allocation18_spill] sm:$0xff] %v6758_v61  ;;  %5775 = vmatprep.mubr.msk.bf16.mxu1 %vm676_vm4, %v6758_v61  ;;  %v525_v51 = vshll.u32 %v6744_v7, 16  ;;  %v531_v8 = vshll.u32 %v6755_v11, 16  ;;  %v535_v24 = vshrl.u32 %v6755_v11, 16  ;;  %v515_v2 = vrot.slane %v514_v26, 4 }
  0x50   : > { %v1235_v56 = vsel %vm6638_vm8, %v5316_v14, %v1234_v39  ;;  %v1236_v29 = vrot.slane %v1234_v39, 4  ;;  %v524_v55 = vrot.slane %v522_v25, 4  ;;  %v510_v43 = vsel %vm6461_vm5, %v505_v34, %v509_v32  ;;  %v6788_v39 = vld [vmem:[%s6420_s23 + $0xa0] sm:$0xf] }
  0x51   : > { %v527_v60 = vrot.slane %v525_v51, 5  ;;  %v533_v59 = vrot.slane %v531_v8, 5  ;;  %v537_v61 = vrot.slane %v535_v24, 4  ;;  %v520_v4 = vsel %vm6461_vm5, %v515_v2, %v519_v6 }
  0x52   : > { %v1238_v49 = vsel %vm6638_vm8, %v1236_v29, %v1237_v30  ;;  %v541_v26 = vshll.u32 %v6769_v44, 16  ;;  %v5317_v14 = vrot.slane %v6527_v63, 9  ;;  %v6790_v25 = vcombine.low %v510_v43, %v520_v4 }
  0x53   : > { %v6792_v32 = vcombine.low %v1235_v56, %v1238_v49  ;;  %v528_v34 = vor.u32 %v527_v60, %v524_v55  ;;  %v538_v51 = vor.u32 %v537_v61, %v533_v59  ;;  %v1241_v24 = vrot.slane %v6538_v9, 5  ;;  %v6802_v49 = vld [vmem:[%s6420_s23 + $0xa4] sm:$0x1] }
  0x54   : > { %8180 = vst [vmem:[#allocation19_spill] sm:$0xff] %v6790_v25  ;;  %v543_v8 = vrot.slane %v541_v26, 5  ;;  %v1244_v6 = vrot.slane %v6546_v27, 5  ;;  %v546_v30 = vshrl.u32 %v6779_v18, 16  ;;  %5776 = vmatmul.mubr.msk.bf16.gmra.mrb[20].mxu1 %vm676_vm4, %v6790_v25  ;;  %v549_v61 = vshll.u32 %v6779_v18, 16 }
  0x55   : > { %8181 = vst [vmem:[#allocation20_spill] sm:$0xff] %v6792_v32  ;;  %5930 = vmatmul.mubr.msk.bf16.gmra.mrb[4].mxu0 %vm676_vm4, %v6792_v32  ;;  %v529_v4 = vrot.slane %v528_v34, 4  ;;  %v539_v2 = vrot.slane %v538_v51, 4  ;;  %v555_v56 = vshll.u32 %v6788_v39, 16  ;;  %v1242_v27 = vsel %vm6638_vm8, %v5317_v14, %v1241_v24  ;;  %v6814_v25 = vld [vmem:[%s6420_s23 + $0xa8] sm:$0xf] }
  0x56   : > { %v1243_v29 = vrot.slane %v1241_v24, 4  ;;  %v548_v55 = vrot.slane %v546_v30, 4  ;;  %v559_v43 = vshrl.u32 %v6788_v39, 16  ;;  %v551_v34 = vrot.slane %v549_v61, 5 }
  0x57   : > { %v534_v60 = vsel %vm6461_vm5, %v529_v4, %v533_v59  ;;  %v544_v26 = vsel %vm6461_vm5, %v539_v2, %v543_v8  ;;  %v557_v51 = vrot.slane %v555_v56, 5  ;;  %v565_v30 = vshll.u32 %v6802_v49, 16  ;;  %v6826_v4 = vld [vmem:[%s6420_s23 + $0xac] sm:$0xf] }
  0x58   : > { %v6816_v32 = vcombine.low %v534_v60, %v544_v26  ;;  %v1245_v14 = vsel %vm6638_vm8, %v1243_v29, %v1244_v6  ;;  %v561_v24 = vrot.slane %v559_v43, 4  ;;  %v552_v28 = vor.u32 %v551_v34, %v548_v55  ;;  %v6832_v6 = vld [vmem:[%s6420_s23 + $0xb0] sm:$0x1] }
  0x59   : > { %v6821_v16 = vcombine.low %v1242_v27, %v1245_v14  ;;  %v5318_v59 = vrot.slane %v6553_v41, 9  ;;  %v1248_v8 = vrot.slane %v6559_v46, 5  ;;  %v567_v61 = vrot.slane %v565_v30, 5 }
  0x5a   : > { %8182 = vst [vmem:[#allocation21_spill] sm:$0xff] %v6816_v32  ;;  %5779 = vmatprep.mubr.msk.bf16.mxu1 %vm676_vm4, %v6816_v32  ;;  %v562_v2 = vor.u32 %v561_v24, %v557_v51  ;;  %v1251_v56 = vrot.slane %v6566_v58, 5  ;;  %v570_v27 = vshrl.u32 %v6814_v25, 16  ;;  %v553_v29 = vrot.slane %v552_v28, 4 }
  0x5b   : > { %8183 = vst [vmem:[#allocation22_spill] sm:$0xff] %v6821_v16  ;;  %5933 = vmatprep.mubr.msk.bf16.mxu0 %vm676_vm4, %v6821_v16  ;;  %v1249_v55 = vsel %vm6638_vm8, %v5318_v59, %v1248_v8  ;;  %v1250_v43 = vrot.slane %v1248_v8, 4  ;;  %v573_v60 = vshll.u32 %v6814_v25, 16  ;;  %v579_v58 = vshll.u32 %v6826_v4, 16  ;;  %v6848_v59 = vld [vmem:[%s6420_s23 + $0xb4] sm:$0xf] }
  0x5c   : > { %v563_v26 = vrot.slane %v562_v2, 4  ;;  %v572_v34 = vrot.slane %v570_v27, 4  ;;  %v583_v14 = vshrl.u32 %v6826_v4, 16  ;;  %v558_v24 = vsel %vm6461_vm5, %v553_v29, %v557_v51 }
  0x5d   : > { %v1252_v30 = vsel %vm6638_vm8, %v1250_v43, %v1251_v56  ;;  %v575_v28 = vrot.slane %v573_v60, 5  ;;  %v589_v32 = vshll.u32 %v6832_v6, 16  ;;  %v581_v27 = vrot.slane %v579_v58, 5  ;;  %v6868_v58 = vld [vmem:[%s6420_s23 + $0xbc] sm:$0x1] }
  0x5e   : > { %v568_v8 = vsel %vm6461_vm5, %v563_v26, %v567_v61  ;;  %v6852_v2 = vcombine.low %v1249_v55, %v1252_v30  ;;  %v585_v16 = vrot.slane %v583_v14, 4  ;;  %v5319_v56 = vrot.slane %v6578_v3, 9 }
  0x5f   : > { %v6857_v41 = vcombine.low %v558_v24, %v568_v8  ;;  %v576_v51 = vor.u32 %v575_v28, %v572_v34  ;;  %v591_v29 = vrot.slane %v589_v32, 5  ;;  %v1255_v60 = vrot.slane %v6583_v12, 5 }
  0x60   : > { %8184 = vst [vmem:[#allocation23_spill] sm:$0xff] %v6852_v2  ;;  %5934 = vmatmul.mubr.msk.bf16.gmra.mrb[8].mxu0 %vm676_vm4, %v6852_v2  ;;  %v586_v43 = vor.u32 %v585_v16, %v581_v27  ;;  %v1258_v61 = vrot.slane %v6592_v37, 5  ;;  %v594_v55 = vshrl.u32 %v6848_v59, 16  ;;  %v597_v32 = vshll.u32 %v6848_v59, 16 }
  0x61   : > { %8185 = vst [vmem:[#allocation24_spill] sm:$0xff] %v6857_v41  ;;  %5780 = vmatmul.mubr.msk.bf16.gmra.mrb[24].mxu1 %vm676_vm4, %v6857_v41  ;;  %v577_v26 = vrot.slane %v576_v51, 4  ;;  %v603_v34 = vshll.u32 %v6855_v57, 16  ;;  %v607_v14 = vshrl.u32 %v6855_v57, 16  ;;  %v1256_v16 = vsel %vm6638_vm8, %v5319_v56, %v1255_v60 }
  0x62   : > { %v587_v24 = vrot.slane %v586_v43, 4  ;;  %v1257_v30 = vrot.slane %v1255_v60, 4  ;;  %v596_v37 = vrot.slane %v594_v55, 4  ;;  %v599_v8 = vrot.slane %v597_v32, 5 }
  0x63   : > { %v582_v28 = vsel %vm6461_vm5, %v577_v26, %v581_v27  ;;  %v605_v41 = vrot.slane %v603_v34, 5  ;;  %v609_v51 = vrot.slane %v607_v14, 4  ;;  %v613_v12 = vshll.u32 %v6868_v58, 16 }
  0x64   : > { %v592_v2 = vsel %vm6461_vm5, %v587_v24, %v591_v29  ;;  %v1259_v3 = vsel %vm6638_vm8, %v1257_v30, %v1258_v61  ;;  %v5320_v43 = vrot.slane %v6602_v45, 9  ;;  %v600_v60 = vor.u32 %v599_v8, %v596_v37 }
  0x65   : > { %v6883_v46 = vcombine.low %v582_v28, %v592_v2  ;;  %v6885_v56 = vcombine.low %v1256_v16, %v1259_v3  ;;  %v610_v55 = vor.u32 %v609_v51, %v605_v41  ;;  %v615_v27 = vrot.slane %v613_v12, 5 }
  0x66   : > { %v1262_v26 = vrot.slane %v6610_v1, 5  ;;  %v1265_v32 = vrot.slane %v6621_v20, 5  ;;  %v5280_v29 = vcombine.low %v6424_v21, %v6427_v22  ;;  %v601_v2 = vrot.slane %v600_v60, 4 }
  0x67   : > { %5783 = vmatprep.mubr.msk.bf16.mxu1 %vm676_vm4, %v6883_v46  ;;  %5937 = vmatprep.mubr.msk.bf16.mxu0 %vm676_vm4, %v6885_v56  ;;  %v611_v61 = vrot.slane %v610_v55, 4  ;;  %v1417_v3 = vand.u32 %v6452_v35, %v6408_v10  ;;  %v5321_v12 = vrot.slane %v6629_v19, 9  ;;  %v1269_v14 = vrot.slane %v6644_v0, 5 }
  0x68   : > { %v1263_v34 = vsel %vm6638_vm8, %v5320_v43, %v1262_v26  ;;  %v1264_v20 = vrot.slane %v1262_v26, 4  ;;  %v1272_v21 = vrot.slane %v6657_v40, 5  ;;  %v606_v22 = vsel %vm6461_vm5, %v601_v2, %v605_v41 }
  0x69   : > { %v616_v24 = vsel %vm6461_vm5, %v611_v61, %v615_v27  ;;  %5821 = vmatprep.subr.bf16.mxu1 %v1417_v3  ;;  %v5322_v16 = vrot.slane %v6677_v17, 9  ;;  %v1276_v35 = vrot.slane %v6684_v42, 5  ;;  %v1270_v28 = vsel %vm6638_vm8, %v5321_v12, %v1269_v14 }
  0x6a   : > { %v6908_v30 = vcombine.low %v606_v22, %v616_v24  ;;  %v1266_v37 = vsel %vm6638_vm8, %v1264_v20, %v1265_v32  ;;  %v1271_v40 = vrot.slane %v1269_v14, 4  ;;  %v1279_v51 = vrot.slane %v6687_v33, 5 }
  0x6b   : > { %v6914_v8 = vcombine.low %v1263_v34, %v1266_v37  ;;  %v1278_v41 = vrot.slane %v1276_v35, 4  ;;  %v5323_v60 = vrot.slane %v6717_v38, 9  ;;  %v1283_v55 = vrot.slane %v6720_v36, 5 }
  0x6c   : > { %5784 = vmatmul.mubr.msk.bf16.gmra.mrb[28].mxu1 %vm676_vm4, %v6908_v30  ;;  %v1273_v43 = vsel %vm6638_vm8, %v1271_v40, %v1272_v21  ;;  %v1286_v26 = vrot.slane %v6730_v54, 5  ;;  %v1277_v33 = vsel %vm6638_vm8, %v5322_v16, %v1276_v35  ;;  %v1290_v12 = vrot.slane %v6755_v11, 5 }
  0x6d   : > { %5938 = vmatmul.mubr.msk.bf16.gmra.mrb[12].mxu0 %vm676_vm4, %v6914_v8  ;;  %5789 = vmatprep.mubr.msk.bf16.mxu1 %vm676_vm4, %v5280_v29  ;;  %v6926_v27 = vcombine.low %v1270_v28, %v1273_v43  ;;  %v1280_v32 = vsel %vm6638_vm8, %v1278_v41, %v1279_v51  ;;  %v1285_v2 = vrot.slane %v1283_v55, 4  ;;  %v1284_v61 = vsel %vm6638_vm8, %v5323_v60, %v1283_v55 }
  0x6e   : > { %v1297_v54 = vrot.slane %v6788_v39, 5  ;;  %v6941_v34 = vcombine.low %v1277_v33, %v1280_v32  ;;  %v5324_v20 = vrot.slane %v6744_v7, 9  ;;  %v1292_v14 = vrot.slane %v1290_v12, 4 }
  0x6f   : > { %5941 = vmatprep.mubr.msk.bf16.mxu0 %vm676_vm4, %v6926_v27  ;;  %v1287_v29 = vsel %vm6638_vm8, %v1285_v2, %v1286_v26  ;;  %v1293_v21 = vrot.slane %v6769_v44, 5  ;;  %v6947_v22 = vcombine.low %v6471_v53, %v6475_v62  ;;  %v5325_v16 = vrot.slane %v6779_v18, 9 }
  0x70   : > { %v6949_v24 = vcombine.low %v1284_v61, %v1287_v29  ;;  %v1299_v35 = vrot.slane %v1297_v54, 4  ;;  %v1300_v37 = vrot.slane %v6802_v49, 5  ;;  %v1304_v28 = vrot.slane %v6826_v4, 5 }
  0x71   : > { %v2506_v40 = vshrl.u32 %v6412_v13, 16  ;;  %v1291_v53 = vsel %vm6638_vm8, %v5324_v20, %v1290_v12  ;;  %v1294_v62 = vsel %vm6638_vm8, %v1292_v14, %v1293_v21  ;;  %v6969_v44 = vcombine.low %v6489_v15, %v6497_v23  ;;  %v8186_v20 = vld [vmem:[#allocation5_spill] sm:$0xff]  ;;  %v8187_v14 = vld [vmem:[#allocation4_spill] sm:$0xff] }
  0x72   : > { %v6973_v49 = vcombine.low %v6506_v31, %v6517_v47  ;;  %v1298_v41 = vsel %vm6638_vm8, %v5325_v16, %v1297_v54  ;;  %v1301_v51 = vsel %vm6638_vm8, %v1299_v35, %v1300_v37  ;;  %v1307_v43 = vrot.slane %v6832_v6, 5 }
  0x73   : > { %v1311_v60 = vrot.slane %v6855_v57, 5  ;;  %v6982_v55 = vcombine.low %v1291_v53, %v1294_v62  ;;  %v1306_v15 = vrot.slane %v1304_v28, 4  ;;  %v5327_v23 = vrot.slane %v6848_v59, 9 }
  0x74   : > { %5790 = vmatmul.mubr.msk.bf16.vlgmr.msra.gmra.mrb[0].mxu1 %vm676_vm4, %v6468_v52  ;;  %v2508_v31 = vrot.slane %v2506_v40, 2  ;;  %v2509_v47 = vshll.u32 %v6412_v13, 16  ;;  %v6988_v26 = vcombine.low %v6629_v19, %v6644_v0  ;;  %v6992_v33 = vcombine.low %v6677_v17, %v6684_v42  ;;  %v7014_v17 = vld [vmem:[%s6420_s23 + $0xc4] sm:$0xf] }
  0x75   : > { %5822 = vmatpush3.bf16.msra.mxu1 %v1417_v3  ;;  %5942 = vmatmul.mubr.msk.bf16.gmra.mrb[16].mxu0 %vm676_vm4, %v6941_v34  ;;  %v5326_v3 = vrot.slane %v6814_v25, 9  ;;  %v6996_v6 = vcombine.low %v6717_v38, %v6720_v36  ;;  %v6998_v32 = vcombine.low %v1298_v41, %v1301_v51  ;;  %v7002_v2 = vcombine.low %v6744_v7, %v6755_v11 }
  0x76   : > { %5793 = vmatprep.mubr.msk.bf16.mxu1 %vm676_vm4, %v6947_v22  ;;  %5945 = vmatprep.mubr.msk.bf16.mxu0 %vm676_vm4, %v6949_v24  ;;  %v7006_v13 = vcombine.low %v6779_v18, %v6788_v39  ;;  %v7010_v19 = vcombine.low %v6814_v25, %v6826_v4  ;;  %v1313_v0 = vrot.slane %v1311_v60, 4  ;;  %v1314_v36 = vrot.slane %v6868_v58, 5  ;;  %v7033_v39 = vld [vmem:[%s6420_s23 + $0xc0] sm:$0xf]  ;;  %v222_v4 = vld [vmem:[%s6420_s23 + $0xc8] sm:$0x1] }
  0x77   : > { %v2511_v42 = vrot.slane %v2509_v47, 3  ;;  %v7018_v38 = vcombine.low %v6848_v59, %v6855_v57  ;;  %v1619_v18 = vshrl.u32 %v6400_v5, 16  ;;  %v1621_v7 = vshll.u32 %v6400_v5, 16 }
  0x78   : > { %v1305_v11 = vsel %vm6638_vm8, %v5326_v3, %v1304_v28  ;;  %v1308_v57 = vsel %vm6638_vm8, %v1306_v15, %v1307_v43  ;;  %v2054_v5 = vrot.slane %v7014_v17, 5  ;;  %v7041_v58 = vcombine.low %v6527_v63, %v6538_v9 }
  0x79   : > { %v2512_v25 = vor.u32 %v2511_v42, %v2508_v31  ;;  %v1623_v59 = vrot.slane %v1621_v7, 1  ;;  %v1312_v61 = vsel %vm6638_vm8, %v5327_v23, %v1311_v60  ;;  %v1315_v12 = vsel %vm6638_vm8, %v1313_v0, %v1314_v36  ;;  %v8189_v7 = vld [vmem:[#allocation7_spill] sm:$0xff] }
  0x7a   : > { %v7048_v54 = vcombine.low %v1305_v11, %v1308_v57  ;;  %v7052_v21 = vcombine.low %v8187_v14, %v8186_v20  ;;  %v5396_v16 = vrot.slane %v7033_v39, 9  ;;  %v2057_v37 = vrot.slane %v222_v4, 5  ;;  %v6352_v20 = vld [vmem:[%s6420_s23 + $0x8] sm:$0x1]  ;;  %v6353_v14 = vld [vmem:[%s6420_s23] sm:$0xf] }
  0x7b   : > { %v2517_v29 = vand.u32 %v2512_v25, %v6408_v10  ;;  %v1624_v35 = vor.u32 %v1623_v59, %v1619_v18  ;;  %v1825_v63 = vshrl.u32 %v7033_v39, 16  ;;  %v1828_v9 = vshll.u32 %v7033_v39, 16  ;;  %v8188_v18 = vld [vmem:[#allocation8_spill] sm:$0xff] }
  0x7c   : > { %5794 = vmatmul.mubr.msk.bf16.gmra.mrb[4].mxu1 %vm676_vm4, %v6969_v44  ;;  %v1834_v28 = vshll.u32 %v7014_v17, 16  ;;  %v7058_v40 = vcombine.low %v1312_v61, %v1315_v12  ;;  %v2056_v53 = vrot.slane %v2054_v5, 4  ;;  %v1838_v3 = vshrl.u32 %v7014_v17, 16 }
  0x7d   : > { %5946 = vmatmul.mubr.msk.bf16.gmra.mrb[20].mxu0 %vm676_vm4, %v6982_v55  ;;  %5797 = vmatprep.mubr.msk.bf16.mxu1 %vm676_vm4, %v6973_v49  ;;  %v1629_v62 = vand.u32 %v1624_v35, %v6408_v10  ;;  %v1827_v41 = vrot.slane %v1825_v63, 4  ;;  %v1830_v51 = vrot.slane %v1828_v9, 5  ;;  %v1844_v23 = vshll.u32 %v222_v4, 16 }
  0x7e   : > { %5949 = vmatprep.mubr.msk.bf16.mxu0 %vm676_vm4, %v6998_v32  ;;  %5991 = vmatprep.subr.bf16.mxu0 %v2517_v29  ;;  %v1836_v43 = vrot.slane %v1834_v28, 5  ;;  %v1840_v60 = vrot.slane %v1838_v3, 4  ;;  %v2055_v31 = vsel %vm6638_vm8, %v5396_v16, %v2054_v5  ;;  %v2058_v47 = vsel %vm6638_vm8, %v2056_v53, %v2057_v37  ;;  %v8190_v28 = vld [vmem:[#allocation13_spill] sm:$0xff]  ;;  %v8191_v53 = vld [vmem:[#allocation15_spill] sm:$0xff]  ;;  %v8192_v3 = vld [vmem:[#allocation2_spill] sm:$0xff] }
  0x7f   : > { %5855 = vmatprep.subr.bf16.mxu1 %v1629_v62  ;;  %v1831_v15 = vor.u32 %v1830_v51, %v1827_v41  ;;  %v1846_v42 = vrot.slane %v1844_v23, 5  ;;  %v7076_v11 = vcombine.low %v8189_v7, %v8188_v18  ;;  %v7078_v25 = vcombine.low %v2055_v31, %v2058_v47  ;;  %v8193_v41 = vld [vmem:[#allocation17_spill] sm:$0xff]  ;;  %v8194_v51 = vld [vmem:[#allocation20_spill] sm:$0xff]  ;;  %v8198_v31 = vld [vmem:[#allocation6_spill] sm:$0xff] }
  0x80   : > { %v1841_v0 = vor.u32 %v1840_v60, %v1836_v43  ;;  %v7082_v4 = vcombine.low %v6602_v45, %v6610_v1  ;;  %v229_v45 = vld [vmem:[%s8121_s1 + $0xc] sm:$0x3]  ;;  %v5312_v16 = vrot.slane %v6353_v14, 9  ;;  %v7173_v23 = vld [vmem:[%s6420_s23 + $0xd0] sm:$0xf]  ;;  %v8199_v47 = vld [vmem:[#allocation9_spill] sm:$0xff] }
  0x81   : > { %v1832_v36 = vrot.slane %v1831_v15, 4  ;;  %v2727_v1 = vand.u32 %v6408_v10, %v229_v45  ;;  %v6351_v10 = vld [vmem:[%s6420_s23 + $0x4] sm:$0xf]  ;;  %v8196_v60 = vld [vmem:[#allocation23_spill] sm:$0xff]  ;;  %v8204_v7 = vld [vmem:[#allocation16_spill] sm:$0xff]  ;;  %v2715_v48 = vrot.slane %v7173_v23, 5 }
  0x82   : > { %v1842_v57 = vrot.slane %v1841_v0, 4  ;;  %v1206_v12 = vrot.slane %v6351_v10, 5  ;;  %v7170_v15 = vld [vmem:[%s6420_s23 + $0xcc] sm:$0xf]  ;;  %v8200_v0 = vld [vmem:[#allocation10_spill] sm:$0xff]  ;;  %v2488_v10 = vshll.u32 %v7173_v23, 16 }
  0x83   : > { %v1837_v5 = vsel %vm6461_vm5, %v1832_v36, %v1836_v43  ;;  %v8195_v43 = vld [vmem:[#allocation22_spill] sm:$0xff]  ;;  %v8201_v36 = vld [vmem:[#allocation11_spill] sm:$0xff]  ;;  %v2482_v45 = vshll.u32 %v7170_v15, 16  ;;  %v225_v14 = vld [vmem:[%s6420_s23 + $0xd4] sm:$0x1]  ;;  %vm5042_vm9 = vcmask 1041409  }
  0x84   : > { %5798 = vmatmul.mubr.msk.bf16.gmra.mrb[8].mxu1 %vm676_vm4, %v7041_v58  ;;  %v1847_v59 = vsel %vm6461_vm5, %v1842_v57, %v1846_v42  ;;  %v1208_v35 = vrot.slane %v1206_v12, 4  ;;  %v1207_v37 = vsel %vm6638_vm8, %v5312_v16, %v1206_v12  ;;  %v8202_v42 = vld [vmem:[#allocation12_spill] sm:$0xff]  ;;  %v8203_v18 = vld [vmem:[#allocation14_spill] sm:$0xff]  ;;  %vm5045_vm10 = vcmask 1042434  }
  0x85   : > { %5950 = vmatmul.mubr.msk.bf16.gmra.mrb[24].mxu0 %vm676_vm4, %v7048_v54  ;;  %5801 = vmatprep.mubr.msk.bf16.mxu1 %vm676_vm4, %v7052_v21  ;;  %v7088_v61 = vcombine.low %v1837_v5, %v1847_v59  ;;  %v8205_v57 = vld [vmem:[#allocation18_spill] sm:$0xff]  ;;  %v8206_v5 = vld [vmem:[#allocation19_spill] sm:$0xff]  ;;  %v2479_v59 = vshrl.u32 %v7170_v15, 16  ;;  %v2484_v12 = vrot.slane %v2482_v45, 5  ;;  %v8208_v16 = vld [vmem:[#allocation24_spill] sm:$0xff]  ;;  %vm5048_vm11 = vcmask 1043459  }
  0x86   : > { %5953 = vmatprep.mubr.msk.bf16.mxu0 %vm676_vm4, %v7058_v40  ;;  %vm5051_vm12 = vcmask 1044484   ;;  %vm5054_vm13 = vcmask 1045509   ;;  %vm5057_vm14 = vcmask 1046534   ;;  %vm5060_vm15 = vcmask 1047559  }
  0x8c   : > { %5802 = vmatmul.mubr.msk.bf16.gmra.mrb[12].mxu1 %vm676_vm4, %v7076_v11 }
  0x8d   : > { %5954 = vmatmul.mubr.msk.bf16.gmra.mrb[28].mxu0 %vm676_vm4, %v7078_v25  ;;  %5805 = vmatprep.mubr.msk.bf16.mxu1 %vm676_vm4, %v7082_v4 }
  0x8e   : > { %5959 = vmatprep.mubr.msk.bf16.mxu0 %vm676_vm4, %v6947_v22 }
  0x94   : > { %5806 = vmatmul.mubr.msk.bf16.gmra.mrb[16].mxu1 %vm676_vm4, %v6988_v26 }
  0x95   : > { %5960 = vmatmul.mubr.msk.bf16.vlgmr.msra.gmra.mrb[0].mxu0 %vm676_vm4, %v6969_v44  ;;  %5809 = vmatprep.mubr.msk.bf16.mxu1 %vm676_vm4, %v6992_v33 }
  0x96   : > { %5992 = vmatpush3.bf16.msra.mxu0 %v2517_v29  ;;  %5963 = vmatprep.mubr.msk.bf16.mxu0 %vm676_vm4, %v6973_v49  ;;  %v1209_v29 = vrot.slane %v6352_v20, 5  ;;  %v2490_v20 = vrot.slane %v2488_v10, 5 }
  0x97   : > { %6025 = vmatprep.subr.bf16.mxu0 %v2727_v1 }
  0x98   : > { %v1210_v63 = vsel %vm6638_vm8, %v1208_v35, %v1209_v29 }
  0x99   : > { %v5328_v9 = vcombine.low %v1207_v37, %v1210_v63  ;;  %v2498_v37 = vshll.u32 %v225_v14, 16 }
  0x9c   : > { %5810 = vmatmul.mubr.msk.bf16.gmra.mrb[20].mxu1 %vm676_vm4, %v6996_v6 }
  0x9d   : > { %5964 = vmatmul.mubr.msk.bf16.gmra.mrb[4].mxu0 %vm676_vm4, %v7041_v58  ;;  %5813 = vmatprep.mubr.msk.bf16.mxu1 %vm676_vm4, %v7002_v2 }
  0x9e   : > { %5967 = vmatprep.mubr.msk.bf16.mxu0 %vm676_vm4, %v7052_v21 }
  0xa4   : > { %5814 = vmatmul.mubr.msk.bf16.gmra.mrb[24].mxu1 %vm676_vm4, %v7006_v13 }
  0xa5   : > { %5968 = vmatmul.mubr.msk.bf16.gmra.mrb[8].mxu0 %vm676_vm4, %v7076_v11  ;;  %5817 = vmatprep.mubr.msk.bf16.mxu1 %vm676_vm4, %v7010_v19 }
  0xa6   : > { %5971 = vmatprep.mubr.msk.bf16.mxu0 %vm676_vm4, %v7082_v4 }
  0xac   : > { %5818 = vmatmul.mubr.msk.bf16.gmra.mrb[28].mxu1 %vm676_vm4, %v7018_v38 }
  0xad   : > { %5972 = vmatmul.mubr.msk.bf16.gmra.mrb[12].mxu0 %vm676_vm4, %v6988_v26  ;;  %5823 = vmatprep.mubr.msk.bf16.mxu1 %vm676_vm4, %v5328_v9 }
  0xae   : > { %5975 = vmatprep.mubr.msk.bf16.mxu0 %vm676_vm4, %v6992_v33 }
  0xb4   : > { %5824 = vmatmul.mubr.msk.bf16.vlgmr.msra.gmra.mrb[0].mxu1 %vm676_vm4, %v8190_v28  ;;  %v2500_v28 = vrot.slane %v2498_v37, 5 }
  0xb5   : > { %5856 = vmatpush3.bf16.msra.mxu1 %v1629_v62  ;;  %5976 = vmatmul.mubr.msk.bf16.gmra.mrb[16].mxu0 %vm676_vm4, %v6996_v6  ;;  %v7159_v62 = vcombine.low %v7033_v39, %v7014_v17  ;;  %v5415_v17 = vcombine.low %v7170_v15, %v7173_v23  ;;  %v8197_v39 = vld [vmem:[#allocation3_spill] sm:$0xff] }
  0xb6   : > { %5827 = vmatprep.mubr.msk.bf16.mxu1 %vm676_vm4, %v8191_v53  ;;  %5979 = vmatprep.mubr.msk.bf16.mxu0 %vm676_vm4, %v7002_v2 }
  0xb7   : > { %6059 = vmatprep.subr.bf16.mxu1 %v8192_v3 }
  0xbc   : > { %5828 = vmatmul.mubr.msk.bf16.gmra.mrb[4].mxu1 %vm676_vm4, %v8193_v41 }
  0xbd   : > { %5980 = vmatmul.mubr.msk.bf16.gmra.mrb[20].mxu0 %vm676_vm4, %v7006_v13  ;;  %5831 = vmatprep.mubr.msk.bf16.mxu1 %vm676_vm4, %v8194_v51 }
  0xbe   : > { %5983 = vmatprep.mubr.msk.bf16.mxu0 %vm676_vm4, %v7010_v19 }
  0xc4   : > { %5832 = vmatmul.mubr.msk.bf16.gmra.mrb[8].mxu1 %vm676_vm4, %v8195_v43 }
  0xc5   : > { %5984 = vmatmul.mubr.msk.bf16.gmra.mrb[24].mxu0 %vm676_vm4, %v7018_v38  ;;  %5835 = vmatprep.mubr.msk.bf16.mxu1 %vm676_vm4, %v8196_v60 }
  0xc6   : > { %5987 = vmatprep.mubr.msk.bf16.mxu0 %vm676_vm4, %v7159_v62 }
  0xcc   : > { %5836 = vmatmul.mubr.msk.bf16.gmra.mrb[12].mxu1 %vm676_vm4, %v6885_v56 }
  0xcd   : > { %5988 = vmatmul.mubr.msk.bf16.gmra.mrb[28].mxu0 %vm676_vm4, %v5415_v17  ;;  %5839 = vmatprep.mubr.msk.bf16.mxu1 %vm676_vm4, %v6914_v8 }
  0xce   : > { %5993 = vmatprep.mubr.msk.bf16.mxu0 %vm676_vm4, %v8197_v39 }
  0xd4   : > { %5840 = vmatmul.mubr.msk.bf16.gmra.mrb[16].mxu1 %vm676_vm4, %v6926_v27 }
  0xd5   : > { %5994 = vmatmul.mubr.msk.bf16.vlgmr.msra.gmra.mrb[0].mxu0 %vm676_vm4, %v8198_v31  ;;  %5843 = vmatprep.mubr.msk.bf16.mxu1 %vm676_vm4, %v6941_v34 }
  0xd6   : > { %6026 = vmatpush3.bf16.msra.mxu0 %v2727_v1  ;;  %5997 = vmatprep.mubr.msk.bf16.mxu0 %vm676_vm4, %v8199_v47  ;;  %v2492_v1 = vshrl.u32 %v7173_v23, 16 }
  0xd8   : > { %v2494_v29 = vrot.slane %v2492_v1, 4 }
  0xda   : > { %v2495_v35 = vor.u32 %v2494_v29, %v2490_v20 }
  0xdc   : > { %5844 = vmatmul.mubr.msk.bf16.gmra.mrb[20].mxu1 %vm676_vm4, %v6949_v24  ;;  %v2496_v9 = vrot.slane %v2495_v35, 4 }
  0xdd   : > { %5998 = vmatmul.mubr.msk.bf16.gmra.mrb[4].mxu0 %vm676_vm4, %v8200_v0  ;;  %5847 = vmatprep.mubr.msk.bf16.mxu1 %vm676_vm4, %v6982_v55 }
  0xde   : > { %6001 = vmatprep.mubr.msk.bf16.mxu0 %vm676_vm4, %v8201_v36 }
  0xe4   : > { %5848 = vmatmul.mubr.msk.bf16.gmra.mrb[24].mxu1 %vm676_vm4, %v6998_v32 }
  0xe5   : > { %6002 = vmatmul.mubr.msk.bf16.gmra.mrb[8].mxu0 %vm676_vm4, %v8202_v42  ;;  %5851 = vmatprep.mubr.msk.bf16.mxu1 %vm676_vm4, %v7048_v54 }
  0xe6   : > { %6005 = vmatprep.mubr.msk.bf16.mxu0 %vm676_vm4, %v8203_v18 }
  0xec   : > { %5852 = vmatmul.mubr.msk.bf16.gmra.mrb[28].mxu1 %vm676_vm4, %v7058_v40 }
  0xed   : > { %6006 = vmatmul.mubr.msk.bf16.gmra.mrb[12].mxu0 %vm676_vm4, %v8204_v7  ;;  %5857 = vmatprep.mubr.msk.bf16.mxu1 %vm676_vm4, %v6468_v52  ;;  %v8207_v52 = vld [vmem:[#allocation21_spill] sm:$0xff] }
  0xee   : > { %6009 = vmatprep.mubr.msk.bf16.mxu0 %vm676_vm4, %v8205_v57 }
  0xf4   : > { %5858 = vmatmul.mubr.msk.bf16.vlgmr.msra.gmra.mrb[0].mxu1 %vm676_vm4, %v6947_v22  ;;  %v2481_v22 = vrot.slane %v2479_v59, 4 }
  0xf5   : > { %6060 = vmatpush3.bf16.msra.mxu1 %v8192_v3  ;;  %6010 = vmatmul.mubr.msk.bf16.gmra.mrb[16].mxu0 %vm676_vm4, %v8206_v5 }
  0xf6   : > { %5861 = vmatprep.mubr.msk.bf16.mxu1 %vm676_vm4, %v6969_v44  ;;  %6013 = vmatprep.mubr.msk.bf16.mxu0 %vm676_vm4, %v8207_v52  ;;  %v2485_v44 = vor.u32 %v2484_v12, %v2481_v22 }
  0xf8   : > { %v2486_v63 = vrot.slane %v2485_v44, 4 }
  0xfc   : > { %5862 = vmatmul.mubr.msk.bf16.gmra.mrb[4].mxu1 %vm676_vm4, %v6973_v49  ;;  %v2491_v49 = vsel %vm6461_vm5, %v2486_v63, %v2490_v20 }
  0xfd   : > { %6014 = vmatmul.mubr.msk.bf16.gmra.mrb[20].mxu0 %vm676_vm4, %v8208_v16  ;;  %5865 = vmatprep.mubr.msk.bf16.mxu1 %vm676_vm4, %v7041_v58  ;;  %v2501_v58 = vsel %vm6461_vm5, %v2496_v9, %v2500_v28 }
  0xfe   : > { %6017 = vmatprep.mubr.msk.bf16.mxu0 %vm676_vm4, %v6883_v46  ;;  %v5433_v3 = vcombine.low %v2491_v49, %v2501_v58 }
 0x104   : > { %5866 = vmatmul.mubr.msk.bf16.gmra.mrb[8].mxu1 %vm676_vm4, %v7052_v21 }
 0x105   : > { %6018 = vmatmul.mubr.msk.bf16.gmra.mrb[24].mxu0 %vm676_vm4, %v6908_v30  ;;  %5869 = vmatprep.mubr.msk.bf16.mxu1 %vm676_vm4, %v7076_v11 }
 0x106   : > { %6021 = vmatprep.mubr.msk.bf16.mxu0 %vm676_vm4, %v7088_v61 }
 0x10c   : > { %5870 = vmatmul.mubr.msk.bf16.gmra.mrb[12].mxu1 %vm676_vm4, %v7082_v4 }
 0x10d   : > { %6022 = vmatmul.mubr.msk.bf16.gmra.mrb[28].mxu0 %vm676_vm4, %v5433_v3  ;;  %5873 = vmatprep.mubr.msk.bf16.mxu1 %vm676_vm4, %v6988_v26 }
 0x10e   : > { %6027 = vmatprep.mubr.msk.bf16.mxu0 %vm676_vm4, %v8191_v53 }
 0x114   : > { %5874 = vmatmul.mubr.msk.bf16.gmra.mrb[16].mxu1 %vm676_vm4, %v6992_v33 }
 0x115   : > { %6028 = vmatmul.mubr.msk.bf16.vlgmr.msra.gmra.mrb[0].mxu0 %vm676_vm4, %v8193_v41  ;;  %5877 = vmatprep.mubr.msk.bf16.mxu1 %vm676_vm4, %v6996_v6 }
 0x116   : > { %6031 = vmatprep.mubr.msk.bf16.mxu0 %vm676_vm4, %v8194_v51 }
 0x11c   : > { %5878 = vmatmul.mubr.msk.bf16.gmra.mrb[20].mxu1 %vm676_vm4, %v7002_v2 }
 0x11d   : > { %6032 = vmatmul.mubr.msk.bf16.gmra.mrb[4].mxu0 %vm676_vm4, %v8195_v43  ;;  %5881 = vmatprep.mubr.msk.bf16.mxu1 %vm676_vm4, %v7006_v13 }
 0x11e   : > { %6035 = vmatprep.mubr.msk.bf16.mxu0 %vm676_vm4, %v8196_v60 }
 0x124   : > { %5882 = vmatmul.mubr.msk.bf16.gmra.mrb[24].mxu1 %vm676_vm4, %v7010_v19 }
 0x125   : > { %6036 = vmatmul.mubr.msk.bf16.gmra.mrb[8].mxu0 %vm676_vm4, %v6885_v56  ;;  %5885 = vmatprep.mubr.msk.bf16.mxu1 %vm676_vm4, %v7018_v38  ;;  %v5450_v56 = vrot.slane %v7170_v15, 9 }
 0x126   : > { %6039 = vmatprep.mubr.msk.bf16.mxu0 %vm676_vm4, %v6914_v8  ;;  %v2717_v8 = vrot.slane %v2715_v48, 4 }
 0x12c   : > { %5886 = vmatmul.mubr.msk.bf16.gmra.mrb[28].mxu1 %vm676_vm4, %v7159_v62 }
 0x12d   : > { %6040 = vmatmul.mubr.msk.bf16.gmra.mrb[12].mxu0 %vm676_vm4, %v6926_v27  ;;  %5907 = vmatprep.mubr.msk.bf16.mxu1 %vm676_vm4, %v8204_v7  ;;  %v2718_v27 = vrot.slane %v225_v14, 5 }
 0x12e   : > { %6043 = vmatprep.mubr.msk.bf16.mxu0 %vm676_vm4, %v6941_v34  ;;  %v2716_v34 = vsel %vm6638_vm8, %v5450_v56, %v2715_v48 }
 0x134   : > { %5908 = vmatmul.mubr.msk.bf16.vlgmr.msra.gmra.mrb[16].mxu1 %vm676_vm4, %v8205_v57 }
 0x135   : > { %6044 = vmatmul.mubr.msk.bf16.gmra.mrb[16].mxu0 %vm676_vm4, %v6949_v24  ;;  %5911 = vmatprep.mubr.msk.bf16.mxu1 %vm676_vm4, %v8206_v5  ;;  %v2719_v24 = vsel %vm6638_vm8, %v2717_v8, %v2718_v27 }
 0x136   : > { %6047 = vmatprep.mubr.msk.bf16.mxu0 %vm676_vm4, %v6982_v55  ;;  %v5451_v55 = vcombine.low %v2716_v34, %v2719_v24 }
 0x13c   : > { %5912 = vmatmul.mubr.msk.bf16.gmra.mrb[20].mxu1 %vm676_vm4, %v8207_v52 }
 0x13d   : > { %6048 = vmatmul.mubr.msk.bf16.gmra.mrb[20].mxu0 %vm676_vm4, %v6998_v32  ;;  %5915 = vmatprep.mubr.msk.bf16.mxu1 %vm676_vm4, %v8208_v16 }
 0x13e   : > { %6051 = vmatprep.mubr.msk.bf16.mxu0 %vm676_vm4, %v7048_v54 }
 0x144   : > { %5916 = vmatmul.mubr.msk.bf16.gmra.mrb[24].mxu1 %vm676_vm4, %v6883_v46 }
 0x145   : > { %6052 = vmatmul.mubr.msk.bf16.gmra.mrb[24].mxu0 %vm676_vm4, %v7058_v40  ;;  %5919 = vmatprep.mubr.msk.bf16.mxu1 %vm676_vm4, %v6908_v30  ;;  %v6365_v40 = vmov 1983009808  }
 0x146   : > { %6055 = vmatprep.mubr.msk.bf16.mxu0 %vm676_vm4, %v7078_v25  ;;  %v2956_v11 = vunpack.c.l.s4 %v6365_v40  ;;  %v2958_v25 = vlaneseq }
 0x148   : > { %v2957_v41 = vunpack.c.0.s8 %v2956_v11  ;;  %v2959_v51 = vshrl.u32 %v2958_v25, 7 }
 0x14a   : > { %v7346_v62 = vsub.s32 %v2957_v41, %v2959_v51 }
 0x14c   : > { %5920 = vmatmul.mubr.msk.bf16.gmra.mrb[28].mxu1 %vm676_vm4, %v7088_v61 }
 0x14d   : > { %6056 = vmatmul.mubr.msk.bf16.gmra.mrb[28].mxu0 %vm676_vm4, %v5451_v55 }
 0x1c7   : > { %v5859_v46 = vpop.f32.mrb[0].mxu1 }
 0x1c8   : > { %v1665_v26 = vpop.f32.mrb[1].mxu1 }
 0x1c9   : > { %v5860_v33 = vpop.f32.mrb[2].mxu1 }
 0x1ca   : > { %v1668_v6 = vpop.f32.mrb[3].mxu1 }
 0x1cf   : > { %v7322_v30 = vpop.f32.mrb[4].mxu1 }
 0x1d0   : > { %v7324_v32 = vpop.f32.mrb[5].mxu1 }
 0x1d1   : > { %v7326_v2 = vpop.f32.mrb[6].mxu1 }
 0x1d2   : > { %v7328_v13 = vpop.f32.mrb[7].mxu1 }
 0x1d7   : > { %v7330_v50 = vpop.f32.mrb[8].mxu1 }
 0x1d8   : > { %v7332_v19 = vpop.f32.mrb[9].mxu1 }
 0x1d9   : > { %v7334_v38 = vpop.f32.mrb[10].mxu1 }
 0x1da   : > { %v7336_v54 = vpop.f32.mrb[11].mxu1 }
 0x1df   : > { %v7338_v21 = vpop.f32.mrb[12].mxu1 }
 0x1e0   : > { %v7340_v4 = vpop.f32.mrb[13].mxu1 }
 0x1e1   : > { %v7342_v61 = vpop.f32.mrb[14].mxu1 }
 0x1e2   : > { %v7344_v53 = vpop.f32.mrb[15].mxu1 }
 0x1e8   : > { %v6029_v43 = vpop.f32.mrb[0].mxu0 }
 0x1e9   : > { %v6061_v60 = vadd.f32 %v6029_v43, %v5859_v46  ;;  %v2763_v15 = vpop.f32.mrb[1].mxu0 }
 0x1ea   : > { %v6062_v23 = vadd.f32 %v2763_v15, %v1665_v26  ;;  %v6030_v17 = vpop.f32.mrb[2].mxu0 }
 0x1eb   : > { %v2988_v39 = vcombine.high %v6061_v60, %v6061_v60  ;;  %v2995_v31 = vrot.slane %v6061_v60, %v7346_v62  ;;  %v7349_v47 = vadd.f32 %v6030_v17, %v5860_v33  ;;  %v2766_v0 = vpop.f32.mrb[3].mxu0 }
 0x1ec   : > { %v2954_v36 = vcombine.high %v6062_v23, %v6062_v23  ;;  %v2961_v42 = vrot.slane %v6062_v23, %v7346_v62  ;;  %v7352_v18 = vadd.f32 %v2766_v0, %v1668_v6 }
 0x1ed   : > { %v3002_v7 = vrot.slane %v2988_v39, %v7346_v62  ;;  %v3003_v57 = vcombine.high %v2995_v31, %v2995_v31  ;;  %v3682_v5 = vsel %vm726_vm1, %v2995_v31, -inf  ;;  %v3005_v59 = vcombine.high %v7349_v47, %v7349_v47 }
 0x1ee   : > { %v3683_v45 = vrot.slane %v3682_v5, 4  ;;  %v2968_v1 = vrot.slane %v2954_v36, %v7346_v62  ;;  %v2969_v52 = vcombine.high %v2961_v42, %v2961_v42  ;;  %v3626_v10 = vsel %vm726_vm1, %v2961_v42, -inf }
 0x1ef   : > { %v3004_v22 = vcombine.high %v3002_v7, %v3002_v7  ;;  %v3689_v12 = vsel %vm726_vm1, %v3003_v57, -inf  ;;  %v3696_v20 = vsel %vm726_vm1, %v3002_v7, -inf  ;;  %v3627_v29 = vrot.slane %v3626_v10, 4 }
 0x1f0   : > { %v3684_v14 = vmax.f32 %v3682_v5, %v3683_v45  ;;  %v3690_v16 = vrot.slane %v3689_v12, 4  ;;  %v3697_v44 = vrot.slane %v3696_v20, 4  ;;  %v2970_v35 = vcombine.high %v2968_v1, %v2968_v1  ;;  %v7362_v37 = vpop.f32.mrb[4].mxu0 }
 0x1f1   : > { %v3703_v63 = vsel %vm726_vm1, %v3004_v22, -inf  ;;  %v3628_v9 = vmax.f32 %v3626_v10, %v3627_v29  ;;  %v3633_v28 = vsel %vm726_vm1, %v2969_v52, -inf  ;;  %v3640_v49 = vsel %vm726_vm1, %v2968_v1, -inf  ;;  %v7367_v58 = vpop.f32.mrb[5].mxu0 }
 0x1f2   : > { %v3685_v3 = vrot.slane %v3684_v14, 2  ;;  %v3691_v48 = vmax.f32 %v3689_v12, %v3690_v16  ;;  %v3698_v56 = vmax.f32 %v3696_v20, %v3697_v44  ;;  %v3704_v8 = vrot.slane %v3703_v63, 4  ;;  %v7369_v27 = vpop.f32.mrb[6].mxu0  ;;  %v7381_v16 = vld [vmem:[%s8122_s2] ss:$0 sm:$0xff] }
 0x1f3   : > { %v3629_v34 = vrot.slane %v3628_v9, 2  ;;  %v3634_v24 = vrot.slane %v3633_v28, 4  ;;  %v3641_v55 = vrot.slane %v3640_v49, 4  ;;  %v3647_v46 = vsel %vm726_vm1, %v2970_v35, -inf  ;;  %v7372_v26 = vpop.f32.mrb[7].mxu0 }
 0x1f4   : > { %v3686_v33 = vmax.f32 %v3684_v14, %v3685_v3  ;;  %v3692_v6 = vrot.slane %v3691_v48, 2  ;;  %v3699_v40 = vrot.slane %v3698_v56, 2  ;;  %v3705_v11 = vmax.f32 %v3703_v63, %v3704_v8 }
 0x1f5   : > { %v3630_v25 = vmax.f32 %v3628_v9, %v3629_v34  ;;  %v3635_v41 = vmax.f32 %v3633_v28, %v3634_v24  ;;  %v3642_v51 = vmax.f32 %v3640_v49, %v3641_v55  ;;  %v3648_v43 = vrot.slane %v3647_v46, 4 }
 0x1f6   : > { %v3687_v60 = vrot.slane %v3686_v33, 1  ;;  %v3693_v15 = vmax.f32 %v3691_v48, %v3692_v6  ;;  %v3700_v23 = vmax.f32 %v3698_v56, %v3699_v40  ;;  %v3706_v17 = vrot.slane %v3705_v11, 2 }
 0x1f7   : > { %v3631_v39 = vrot.slane %v3630_v25, 1  ;;  %v3636_v31 = vrot.slane %v3635_v41, 2  ;;  %v3643_v0 = vrot.slane %v3642_v51, 2  ;;  %v3649_v36 = vmax.f32 %v3647_v46, %v3648_v43 }
 0x1f8   : > { %v3688_v42 = vmax.f32 %v3686_v33, %v3687_v60  ;;  %v3694_v7 = vrot.slane %v3693_v15, 1  ;;  %v3701_v57 = vrot.slane %v3700_v23, 1  ;;  %v3707_v5 = vmax.f32 %v3705_v11, %v3706_v17  ;;  %v7374_v45 = vpop.f32.mrb[8].mxu0 }
 0x1f9   : > { %v3632_v1 = vmax.f32 %v3630_v25, %v3631_v39  ;;  %v3637_v52 = vmax.f32 %v3635_v41, %v3636_v31  ;;  %v3644_v10 = vmax.f32 %v3642_v51, %v3643_v0  ;;  %v3650_v22 = vrot.slane %v3649_v36, 2  ;;  %v7376_v12 = vpop.f32.mrb[9].mxu0 }
 0x1fa   : > { %v3695_v20 = vmax.f32 %v3693_v15, %v3694_v7  ;;  %v3702_v29 = vmax.f32 %v3700_v23, %v3701_v57  ;;  %v3708_v14 = vrot.slane %v3707_v5, 1  ;;  %v3012_v44 = vrot.slane %v7349_v47, %v7346_v62  ;;  %v7385_v35 = vpop.f32.mrb[10].mxu0 }
 0x1fb   : > { %v3638_v63 = vrot.slane %v3637_v52, 1  ;;  %v3645_v9 = vrot.slane %v3644_v10, 1  ;;  %v3651_v28 = vmax.f32 %v3649_v36, %v3650_v22  ;;  %v4522_v49 = vmax.f32 %v3632_v1, %v3688_v42  ;;  %v7387_v3 = vpop.f32.mrb[11].mxu0 }
 0x1fc   : > { %v3709_v48 = vmax.f32 %v3707_v5, %v3708_v14  ;;  %v3019_v56 = vrot.slane %v3005_v59, %v7346_v62  ;;  %v3020_v8 = vcombine.high %v3012_v44, %v3012_v44  ;;  %v3710_v34 = vsel %vm726_vm1, %v3012_v44, -inf }
 0x1fd   : > { %v3639_v24 = vmax.f32 %v3637_v52, %v3638_v63  ;;  %v3646_v55 = vmax.f32 %v3644_v10, %v3645_v9  ;;  %v3652_v46 = vrot.slane %v3651_v28, 1  ;;  %v4593_v33 = vadd.f32 %v7381_v16, %v4522_v49 }
 0x1fe   : > { %v3021_v6 = vcombine.high %v3019_v56, %v3019_v56  ;;  %v3711_v40 = vrot.slane %v3710_v34, 4  ;;  %v3717_v11 = vsel %vm726_vm1, %v3020_v8, -inf  ;;  %v3724_v25 = vsel %vm726_vm1, %v3019_v56, -inf }
 0x1ff   : > { %v3653_v41 = vmax.f32 %v3651_v28, %v3652_v46  ;;  %v4523_v51 = vmax.f32 %v3639_v24, %v3695_v20  ;;  %v4524_v43 = vmax.f32 %v3646_v55, %v3702_v29  ;;  %v4657_v60 = vmax.f32 %v4593_v33, 0.0 }
 0x200   : > { %v3712_v47 = vmax.f32 %v3710_v34, %v3711_v40  ;;  %v3718_v59 = vrot.slane %v3717_v11, 4  ;;  %v3725_v15 = vrot.slane %v3724_v25, 4  ;;  %v3731_v23 = vsel %vm726_vm1, %v3021_v6, -inf  ;;  %v7398_v17 = vpop.f32.mrb[12].mxu0 }
 0x201   : > { %v4525_v39 = vmax.f32 %v3653_v41, %v3709_v48  ;;  %v4594_v31 = vadd.f32 %v7381_v16, %v4523_v51  ;;  %v4595_v0 = vadd.f32 %v7381_v16, %v4524_v43  ;;  %v5536_v36 = vpack.c.bf16 %v4657_v60, %v4657_v60  ;;  %v7402_v42 = vpop.f32.mrb[13].mxu0 }
 0x202   : > { %v3713_v7 = vrot.slane %v3712_v47, 2  ;;  %v3719_v57 = vmax.f32 %v3717_v11, %v3718_v59  ;;  %v3726_v5 = vmax.f32 %v3724_v25, %v3725_v15  ;;  %v3732_v1 = vrot.slane %v3731_v23, 4  ;;  %v7404_v52 = vpop.f32.mrb[14].mxu0 }
 0x203   : > { %v4596_v10 = vadd.f32 %v7381_v16, %v4525_v39  ;;  %v4658_v22 = vmax.f32 %v4594_v31, 0.0  ;;  %v4659_v20 = vmax.f32 %v4595_v0, 0.0  ;;  %v4977_v29 = vunpack.c.l.b16 %v5536_v36  ;;  %v7409_v46 = vpop.f32.mrb[15].mxu0 }
 0x204   : > { %v3714_v14 = vmax.f32 %v3712_v47, %v3713_v7  ;;  %v3720_v44 = vrot.slane %v3719_v57, 2  ;;  %v3727_v63 = vrot.slane %v3726_v5, 2  ;;  %v3733_v9 = vmax.f32 %v3731_v23, %v3732_v1 }
 0x205   : > { %v4660_v28 = vmax.f32 %v4596_v10, 0.0  ;;  %v5537_v49 = vpack.c.bf16 %v4658_v22, %v4658_v22  ;;  %v5538_v48 = vpack.c.bf16 %v4659_v20, %v4659_v20  ;;  %v2971_v56 = vcombine.high %v7352_v18, %v7352_v18 }
 0x206   : > { %v3715_v8 = vrot.slane %v3714_v14, 1  ;;  %v3721_v34 = vmax.f32 %v3719_v57, %v3720_v44  ;;  %v3728_v24 = vmax.f32 %v3726_v5, %v3727_v63  ;;  %v3734_v55 = vrot.slane %v3733_v9, 2 }
 0x207   : > { %v5539_v33 = vpack.c.bf16 %v4660_v28, %v4660_v28  ;;  %v4978_v6 = vunpack.c.l.b16 %v5537_v49  ;;  %v4979_v40 = vunpack.c.l.b16 %v5538_v48  ;;  %v2978_v11 = vrot.slane %v7352_v18, %v7346_v62 }
 0x208   : > { %v7413_v25 = vmax.f32 %v3714_v14, %v3715_v8  ;;  %v3722_v41 = vrot.slane %v3721_v34, 1  ;;  %v3729_v51 = vrot.slane %v3728_v24, 1  ;;  %v3735_v43 = vmax.f32 %v3733_v9, %v3734_v55 }
 0x209   : > { %v4980_v60 = vunpack.c.l.b16 %v5539_v33  ;;  %v5041_v47 = vrot.slane %v4978_v6, 7  ;;  %v5044_v59 = vrot.slane %v4979_v40, 6  ;;  %v2985_v15 = vrot.slane %v2971_v56, %v7346_v62 }
 0x20a   : > { %v7416_v23 = vmax.f32 %v3721_v34, %v3722_v41  ;;  %v7418_v39 = vmax.f32 %v3728_v24, %v3729_v51  ;;  %v3736_v31 = vrot.slane %v3735_v43, 1  ;;  %v2986_v0 = vcombine.high %v2978_v11, %v2978_v11 }
 0x20b   : > { %v5043_v36 = vsel %vm5042_vm9, %v5041_v47, %v4977_v29  ;;  %v5047_v7 = vrot.slane %v4980_v60, 5  ;;  %v2987_v18 = vcombine.high %v2985_v15, %v2985_v15  ;;  %v3654_v57 = vsel %vm726_vm1, %v2978_v11, -inf }
 0x20c   : > { %v5046_v5 = vsel %vm5045_vm10, %v5044_v59, %v5043_v36  ;;  %v7423_v1 = vmax.f32 %v3735_v43, %v3736_v31  ;;  %v3655_v10 = vrot.slane %v3654_v57, 4  ;;  %v3661_v22 = vsel %vm726_vm1, %v2986_v0, -inf }
 0x20d   : > { %v3662_v20 = vrot.slane %v3661_v22, 4  ;;  %v3668_v14 = vsel %vm726_vm1, %v2985_v15, -inf  ;;  %v3675_v44 = vsel %vm726_vm1, %v2987_v18, -inf  ;;  %v7429_v63 = vsel %vm5048_vm11, %v5047_v7, %v5046_v5 }
 0x20e   : > { %v3656_v29 = vmax.f32 %v3654_v57, %v3655_v10  ;;  %v3669_v9 = vrot.slane %v3668_v14, 4  ;;  %v3676_v28 = vrot.slane %v3675_v44, 4  ;;  %v6065_v49 = vadd.f32 %v7362_v37, %v7322_v30 }
 0x20f   : > { %v3663_v48 = vmax.f32 %v3661_v22, %v3662_v20  ;;  %v6066_v56 = vadd.f32 %v7367_v58, %v7324_v32  ;;  %v7437_v8 = vadd.f32 %v7369_v27, %v7326_v2  ;;  %v7441_v34 = vadd.f32 %v7372_v26, %v7328_v13 }
 0x210   : > { %v3657_v24 = vrot.slane %v3656_v29, 2  ;;  %v3670_v55 = vmax.f32 %v3668_v14, %v3669_v9  ;;  %v3677_v33 = vmax.f32 %v3675_v44, %v3676_v28  ;;  %v3056_v6 = vcombine.high %v6065_v49, %v6065_v49 }
 0x211   : > { %v3664_v40 = vrot.slane %v3663_v48, 2  ;;  %v3063_v11 = vrot.slane %v6065_v49, %v7346_v62  ;;  %v3022_v30 = vcombine.high %v6066_v56, %v6066_v56  ;;  %v7445_v37 = vrot.slane %v6066_v56, %v7346_v62 }
 0x212   : > { %v3658_v32 = vmax.f32 %v3656_v29, %v3657_v24  ;;  %v3671_v58 = vrot.slane %v3670_v55, 2  ;;  %v3678_v41 = vrot.slane %v3677_v33, 2  ;;  %v3070_v2 = vrot.slane %v3056_v6, %v7346_v62 }
 0x213   : > { %v3665_v27 = vmax.f32 %v3663_v48, %v3664_v40  ;;  %v3071_v51 = vcombine.high %v3063_v11, %v3063_v11  ;;  %v3794_v13 = vsel %vm726_vm1, %v3063_v11, -inf  ;;  %v7450_v26 = vrot.slane %v3022_v30, %v7346_v62 }
 0x214   : > { %v3659_v43 = vrot.slane %v3658_v32, 1  ;;  %v3672_v60 = vmax.f32 %v3670_v55, %v3671_v58  ;;  %v3679_v47 = vmax.f32 %v3677_v33, %v3678_v41  ;;  %v3072_v59 = vcombine.high %v3070_v2, %v3070_v2  ;;  %v7461_v58 = vpop.f32.mrb[16].mxu1 }
 0x215   : > { %v3666_v15 = vrot.slane %v3665_v27, 1  ;;  %v3795_v31 = vrot.slane %v3794_v13, 4  ;;  %v3801_v0 = vsel %vm726_vm1, %v3071_v51, -inf  ;;  %v3808_v36 = vsel %vm726_vm1, %v3070_v2, -inf }
 0x216   : > { %v3660_v7 = vmax.f32 %v3658_v32, %v3659_v43  ;;  %v3673_v18 = vrot.slane %v3672_v60, 1  ;;  %v3680_v57 = vrot.slane %v3679_v47, 1  ;;  %v3802_v5 = vrot.slane %v3801_v0, 4 }
 0x217   : > { %v3667_v10 = vmax.f32 %v3665_v27, %v3666_v15  ;;  %v3796_v22 = vmax.f32 %v3794_v13, %v3795_v31  ;;  %v3809_v20 = vrot.slane %v3808_v36, 4  ;;  %v3815_v14 = vsel %vm726_vm1, %v3072_v59, -inf  ;;  %v7467_v27 = vpop.f32.mrb[17].mxu1 }
 0x218   : > { %v3674_v44 = vmax.f32 %v3672_v60, %v3673_v18  ;;  %v3681_v29 = vmax.f32 %v3679_v47, %v3680_v57  ;;  %v4526_v9 = vmax.f32 %v3660_v7, %v7413_v25  ;;  %v3803_v28 = vmax.f32 %v3801_v0, %v3802_v5 }
 0x219   : > { %v4527_v49 = vmax.f32 %v3667_v10, %v7416_v23  ;;  %v3797_v48 = vrot.slane %v3796_v22, 2  ;;  %v3810_v56 = vmax.f32 %v3808_v36, %v3809_v20  ;;  %v3816_v24 = vrot.slane %v3815_v14, 4  ;;  %v7463_v23 = vpop.f32.mrb[16].mxu0 }
 0x21a   : > { %v4528_v55 = vmax.f32 %v3674_v44, %v7418_v39  ;;  %v4529_v33 = vmax.f32 %v3681_v29, %v7423_v1  ;;  %v4597_v6 = vadd.f32 %v7381_v16, %v4526_v9  ;;  %v3804_v40 = vrot.slane %v3803_v28, 2  ;;  %v7469_v51 = vpop.f32.mrb[17].mxu0 }
 0x21b   : > { %v4598_v11 = vadd.f32 %v7381_v16, %v4527_v49  ;;  %v3798_v30 = vmax.f32 %v3796_v22, %v3797_v48  ;;  %v3811_v25 = vrot.slane %v3810_v56, 2  ;;  %v3817_v32 = vmax.f32 %v3815_v14, %v3816_v24 }
 0x21c   : > { %v4599_v41 = vadd.f32 %v7381_v16, %v4528_v55  ;;  %v4600_v39 = vadd.f32 %v7381_v16, %v4529_v33  ;;  %v4661_v2 = vmax.f32 %v4597_v6, 0.0  ;;  %v3805_v1 = vmax.f32 %v3803_v28, %v3804_v40 }
 0x21d   : > { %v4662_v13 = vmax.f32 %v4598_v11, 0.0  ;;  %v3799_v43 = vrot.slane %v3798_v30, 1  ;;  %v3812_v60 = vmax.f32 %v3810_v56, %v3811_v25  ;;  %v3818_v47 = vrot.slane %v3817_v32, 2 }
 0x21e   : > { %v4663_v59 = vmax.f32 %v4599_v41, 0.0  ;;  %v4664_v15 = vmax.f32 %v4600_v39, 0.0  ;;  %v5540_v31 = vpack.c.bf16 %v4661_v2, %v4661_v2  ;;  %v3806_v0 = vrot.slane %v3805_v1, 1 }
 0x21f   : > { %v5541_v36 = vpack.c.bf16 %v4662_v13, %v4662_v13  ;;  %v7471_v7 = vmax.f32 %v3798_v30, %v3799_v43  ;;  %v3813_v18 = vrot.slane %v3812_v60, 1  ;;  %v3819_v57 = vmax.f32 %v3817_v32, %v3818_v47 }
 0x220   : > { %v5542_v5 = vpack.c.bf16 %v4663_v59, %v4663_v59  ;;  %v5543_v10 = vpack.c.bf16 %v4664_v15, %v4664_v15  ;;  %v4981_v22 = vunpack.c.l.b16 %v5540_v31  ;;  %v7473_v20 = vmax.f32 %v3805_v1, %v3806_v0 }
 0x221   : > { %v4982_v14 = vunpack.c.l.b16 %v5541_v36  ;;  %v7475_v44 = vmax.f32 %v3812_v60, %v3813_v18  ;;  %v3820_v29 = vrot.slane %v3819_v57, 1  ;;  %v3037_v9 = vcombine.high %v7445_v37, %v7445_v37 }
 0x222   : > { %v4983_v28 = vunpack.c.l.b16 %v5542_v5  ;;  %v4984_v49 = vunpack.c.l.b16 %v5543_v10  ;;  %v5050_v48 = vrot.slane %v4981_v22, 4  ;;  %v3038_v56 = vcombine.high %v7450_v26, %v7450_v26 }
 0x223   : > { %v5053_v24 = vrot.slane %v4982_v14, 3  ;;  %v7481_v55 = vmax.f32 %v3819_v57, %v3820_v29  ;;  %v3738_v33 = vsel %vm726_vm1, %v7445_v37, -inf  ;;  %v3745_v6 = vsel %vm726_vm1, %v3037_v9, -inf }
 0x224   : > { %v5052_v40 = vsel %vm5051_vm12, %v5050_v48, %v7429_v63  ;;  %v5056_v11 = vrot.slane %v4983_v28, 2  ;;  %v5059_v30 = vrot.slane %v4984_v49, 1  ;;  %v3739_v25 = vrot.slane %v3738_v33, 4 }
 0x225   : > { %v5055_v32 = vsel %vm5054_vm13, %v5053_v24, %v5052_v40  ;;  %v3746_v41 = vrot.slane %v3745_v6, 4  ;;  %v3752_v39 = vsel %vm726_vm1, %v7450_v26, -inf  ;;  %v3759_v2 = vsel %vm726_vm1, %v3038_v56, -inf }
 0x226   : > { %v5058_v1 = vsel %vm5057_vm14, %v5056_v11, %v5055_v32  ;;  %v3740_v37 = vmax.f32 %v3738_v33, %v3739_v25  ;;  %v3753_v13 = vrot.slane %v3752_v39, 4  ;;  %v3760_v43 = vrot.slane %v3759_v2, 4 }
 0x227   : > { %v5061_v63 = vsel %vm5060_vm15, %v5059_v30, %v5058_v1  ;;  %v3747_v60 = vmax.f32 %v3745_v6, %v3746_v41  ;;  %v3073_v47 = vcombine.high %v7437_v8, %v7437_v8  ;;  %v3080_v26 = vrot.slane %v7437_v8, %v7346_v62  ;;  %v7512_v1 = vpop.f32.mrb[18].mxu0 }
 0x228   : > { %v5160_v59 = vpack.c.b16 %v5061_v63, %v5061_v63  ;;  %v3741_v15 = vrot.slane %v3740_v37, 2  ;;  %v3754_v31 = vmax.f32 %v3752_v39, %v3753_v13  ;;  %v3761_v0 = vmax.f32 %v3759_v2, %v3760_v43  ;;  %v7510_v2 = vpop.f32.mrb[18].mxu1 }
 0x229   : > { %v3748_v36 = vrot.slane %v3747_v60, 2  ;;  %v3087_v18 = vrot.slane %v3073_v47, %v7346_v62  ;;  %v3088_v57 = vcombine.high %v3080_v26, %v3080_v26  ;;  %v3822_v5 = vsel %vm726_vm1, %v3080_v26, -inf }
 0x22a   : > { %5176 = vst [vmem:[%s7497_s4] sm:$0xf] %v5160_v59  ;;  %v3742_v10 = vmax.f32 %v3740_v37, %v3741_v15  ;;  %v3755_v22 = vrot.slane %v3754_v31, 2  ;;  %v3762_v14 = vrot.slane %v3761_v0, 2  ;;  %v3823_v29 = vrot.slane %v3822_v5, 4 }
 0x22b   : > { %v3749_v9 = vmax.f32 %v3747_v60, %v3748_v36  ;;  %v3089_v28 = vcombine.high %v3087_v18, %v3087_v18  ;;  %v3829_v49 = vsel %vm726_vm1, %v3088_v57, -inf  ;;  %v3836_v8 = vsel %vm726_vm1, %v3087_v18, -inf }
 0x22c   : > { %v3743_v48 = vrot.slane %v3742_v10, 1  ;;  %v3756_v56 = vmax.f32 %v3754_v31, %v3755_v22  ;;  %v3763_v24 = vmax.f32 %v3761_v0, %v3762_v14  ;;  %v3824_v33 = vmax.f32 %v3822_v5, %v3823_v29 }
 0x22d   : > { %v3750_v6 = vrot.slane %v3749_v9, 1  ;;  %v3830_v40 = vrot.slane %v3829_v49, 4  ;;  %v3837_v11 = vrot.slane %v3836_v8, 4  ;;  %v3843_v30 = vsel %vm726_vm1, %v3089_v28, -inf }
 0x22e   : > { %v3744_v25 = vmax.f32 %v3742_v10, %v3743_v48  ;;  %v3757_v32 = vrot.slane %v3756_v56, 1  ;;  %v3764_v41 = vrot.slane %v3763_v24, 1  ;;  %v3825_v39 = vrot.slane %v3824_v33, 2 }
 0x22f   : > { %v3751_v37 = vmax.f32 %v3749_v9, %v3750_v6  ;;  %v3831_v13 = vmax.f32 %v3829_v49, %v3830_v40  ;;  %v3838_v43 = vmax.f32 %v3836_v8, %v3837_v11  ;;  %v3844_v63 = vrot.slane %v3843_v30, 4  ;;  %v7526_v40 = vpop.f32.mrb[19].mxu1  ;;  %v7528_v11 = vpop.f32.mrb[19].mxu0 }
 0x230   : > { %v3758_v60 = vmax.f32 %v3756_v56, %v3757_v32  ;;  %v3765_v47 = vmax.f32 %v3763_v24, %v3764_v41  ;;  %v4530_v26 = vmax.f32 %v3744_v25, %v7471_v7  ;;  %v3826_v59 = vmax.f32 %v3824_v33, %v3825_v39 }
 0x231   : > { %v4531_v15 = vmax.f32 %v3751_v37, %v7473_v20  ;;  %v3832_v31 = vrot.slane %v3831_v13, 2  ;;  %v3839_v0 = vrot.slane %v3838_v43, 2  ;;  %v3845_v36 = vmax.f32 %v3843_v30, %v3844_v63 }
 0x232   : > { %v4532_v18 = vmax.f32 %v3758_v60, %v7475_v44  ;;  %v4533_v57 = vmax.f32 %v3765_v47, %v7481_v55  ;;  %v4601_v5 = vadd.f32 %v7381_v16, %v4530_v26  ;;  %v3827_v10 = vrot.slane %v3826_v59, 1 }
 0x233   : > { %v4602_v22 = vadd.f32 %v7381_v16, %v4531_v15  ;;  %v3833_v14 = vmax.f32 %v3831_v13, %v3832_v31  ;;  %v3840_v29 = vmax.f32 %v3838_v43, %v3839_v0  ;;  %v3846_v9 = vrot.slane %v3845_v36, 2 }
 0x234   : > { %v4603_v7 = vadd.f32 %v7381_v16, %v4532_v18  ;;  %v4604_v28 = vadd.f32 %v7381_v16, %v4533_v57  ;;  %v4665_v20 = vmax.f32 %v4601_v5, 0.0  ;;  %v7522_v49 = vmax.f32 %v3826_v59, %v3827_v10 }
 0x235   : > { %v4666_v8 = vmax.f32 %v4602_v22, 0.0  ;;  %v3834_v48 = vrot.slane %v3833_v14, 1  ;;  %v3841_v44 = vrot.slane %v3840_v29, 1  ;;  %v3847_v56 = vmax.f32 %v3845_v36, %v3846_v9 }
 0x236   : > { %v4667_v55 = vmax.f32 %v4603_v7, 0.0  ;;  %v4668_v24 = vmax.f32 %v4604_v28, 0.0  ;;  %v5544_v33 = vpack.c.bf16 %v4665_v20, %v4665_v20  ;;  %v3039_v6 = vcombine.high %v7441_v34, %v7441_v34 }
 0x237   : > { %v5545_v30 = vpack.c.bf16 %v4666_v8, %v4666_v8  ;;  %v7530_v25 = vmax.f32 %v3833_v14, %v3834_v48  ;;  %v7532_v32 = vmax.f32 %v3840_v29, %v3841_v44  ;;  %v3848_v41 = vrot.slane %v3847_v56, 1 }
 0x238   : > { %v5546_v39 = vpack.c.bf16 %v4667_v55, %v4667_v55  ;;  %v5547_v37 = vpack.c.bf16 %v4668_v24, %v4668_v24  ;;  %v4985_v13 = vunpack.c.l.b16 %v5544_v33  ;;  %v3046_v43 = vrot.slane %v7441_v34, %v7346_v62 }
 0x239   : > { %v4986_v63 = vunpack.c.l.b16 %v5545_v30  ;;  %v7536_v60 = vmax.f32 %v3847_v56, %v3848_v41  ;;  %v3053_v47 = vrot.slane %v3039_v6, %v7346_v62  ;;  %v6069_v26 = vadd.f32 %v7374_v45, %v7330_v50 }
 0x23a   : > { %v4987_v59 = vunpack.c.l.b16 %v5546_v39  ;;  %v4988_v15 = vunpack.c.l.b16 %v5547_v37  ;;  %v3054_v31 = vcombine.high %v3046_v43, %v3046_v43  ;;  %v3766_v0 = vsel %vm726_vm1, %v3046_v43, -inf }
 0x23b   : > { %v5062_v36 = vrot.slane %v4986_v63, 7  ;;  %v3055_v18 = vcombine.high %v3053_v47, %v3053_v47  ;;  %v3767_v57 = vrot.slane %v3766_v0, 4  ;;  %v3780_v5 = vsel %vm726_vm1, %v3053_v47, -inf }
 0x23c   : > { %v5064_v10 = vrot.slane %v4987_v59, 6  ;;  %v5066_v34 = vrot.slane %v4988_v15, 5  ;;  %v3773_v22 = vsel %vm726_vm1, %v3054_v31, -inf  ;;  %v3781_v14 = vrot.slane %v3780_v5, 4 }
 0x23d   : > { %v5063_v29 = vsel %vm5042_vm9, %v5062_v36, %v4985_v13  ;;  %v3768_v9 = vmax.f32 %v3766_v0, %v3767_v57  ;;  %v3774_v7 = vrot.slane %v3773_v22, 4  ;;  %v3787_v50 = vsel %vm726_vm1, %v3055_v18, -inf }
 0x23e   : > { %v5065_v45 = vsel %vm5045_vm10, %v5064_v10, %v5063_v29  ;;  %v3782_v28 = vmax.f32 %v3780_v5, %v3781_v14  ;;  %v3788_v20 = vrot.slane %v3787_v50, 4  ;;  %v3124_v8 = vcombine.high %v6069_v26, %v6069_v26 }
 0x23f   : > { %v3769_v48 = vrot.slane %v3768_v9, 2  ;;  %v3775_v44 = vmax.f32 %v3773_v22, %v3774_v7  ;;  %v7548_v56 = vsel %vm5048_vm11, %v5066_v34, %v5065_v45  ;;  %v3131_v55 = vrot.slane %v6069_v26, %v7346_v62 }
 0x240   : > { %v3783_v24 = vrot.slane %v3782_v28, 2  ;;  %v3789_v33 = vmax.f32 %v3787_v50, %v3788_v20  ;;  %v3138_v6 = vrot.slane %v3124_v8, %v7346_v62  ;;  %v7554_v30 = vadd.f32 %v7376_v12, %v7332_v19 }
 0x241   : > { %v3770_v41 = vmax.f32 %v3768_v9, %v3769_v48  ;;  %v3776_v39 = vrot.slane %v3775_v44, 2  ;;  %v3139_v37 = vcombine.high %v3131_v55, %v3131_v55  ;;  %v3906_v13 = vsel %vm726_vm1, %v3131_v55, -inf }
 0x242   : > { %v3784_v43 = vmax.f32 %v3782_v28, %v3783_v24  ;;  %v3790_v63 = vrot.slane %v3789_v33, 2  ;;  %v3140_v47 = vcombine.high %v3138_v6, %v3138_v6  ;;  %v3907_v59 = vrot.slane %v3906_v13, 4 }
 0x243   : > { %v3771_v15 = vrot.slane %v3770_v41, 1  ;;  %v3777_v31 = vmax.f32 %v3775_v44, %v3776_v39  ;;  %v3913_v26 = vsel %vm726_vm1, %v3139_v37, -inf  ;;  %v3920_v0 = vsel %vm726_vm1, %v3138_v6, -inf }
 0x244   : > { %v3785_v36 = vrot.slane %v3784_v43, 1  ;;  %v3791_v18 = vmax.f32 %v3789_v33, %v3790_v63  ;;  %v3908_v57 = vmax.f32 %v3906_v13, %v3907_v59  ;;  %v3914_v19 = vrot.slane %v3913_v26, 4 }
 0x245   : > { %v3772_v12 = vmax.f32 %v3770_v41, %v3771_v15  ;;  %v3778_v5 = vrot.slane %v3777_v31, 1  ;;  %v3921_v10 = vrot.slane %v3920_v0, 4  ;;  %v3927_v34 = vsel %vm726_vm1, %v3140_v47, -inf }
 0x246   : > { %v3786_v22 = vmax.f32 %v3784_v43, %v3785_v36  ;;  %v3792_v14 = vrot.slane %v3791_v18, 1  ;;  %v3909_v29 = vrot.slane %v3908_v57, 2  ;;  %v3915_v9 = vmax.f32 %v3913_v26, %v3914_v19  ;;  %v7572_v26 = vpop.f32.mrb[20].mxu0 }
 0x247   : > { %v3779_v7 = vmax.f32 %v3777_v31, %v3778_v5  ;;  %v4534_v50 = vmax.f32 %v3772_v12, %v7522_v49  ;;  %v3922_v45 = vmax.f32 %v3920_v0, %v3921_v10  ;;  %v3928_v28 = vrot.slane %v3927_v34, 4  ;;  %v7570_v31 = vpop.f32.mrb[20].mxu1  ;;  %v7576_v19 = vpop.f32.mrb[21].mxu0 }
 0x248   : > { %v3793_v20 = vmax.f32 %v3791_v18, %v3792_v14  ;;  %v4536_v8 = vmax.f32 %v3786_v22, %v7532_v32  ;;  %v3910_v48 = vmax.f32 %v3908_v57, %v3909_v29  ;;  %v3916_v44 = vrot.slane %v3915_v9, 2  ;;  %v7574_v57 = vpop.f32.mrb[21].mxu1 }
 0x249   : > { %v4535_v55 = vmax.f32 %v3779_v7, %v7530_v25  ;;  %v4605_v24 = vadd.f32 %v7381_v16, %v4534_v50  ;;  %v3923_v33 = vrot.slane %v3922_v45, 2  ;;  %v3929_v6 = vmax.f32 %v3927_v34, %v3928_v28 }
 0x24a   : > { %v4537_v41 = vmax.f32 %v3793_v20, %v7536_v60  ;;  %v4607_v39 = vadd.f32 %v7381_v16, %v4536_v8  ;;  %v3911_v37 = vrot.slane %v3910_v48, 1  ;;  %v3917_v13 = vmax.f32 %v3915_v9, %v3916_v44 }
 0x24b   : > { %v4606_v49 = vadd.f32 %v7381_v16, %v4535_v55  ;;  %v4669_v43 = vmax.f32 %v4605_v24, 0.0  ;;  %v3924_v63 = vmax.f32 %v3922_v45, %v3923_v33  ;;  %v3930_v47 = vrot.slane %v3929_v6, 2 }
 0x24c   : > { %v4608_v32 = vadd.f32 %v7381_v16, %v4537_v41  ;;  %v4671_v59 = vmax.f32 %v4607_v39, 0.0  ;;  %v7568_v15 = vmax.f32 %v3910_v48, %v3911_v37  ;;  %v3918_v25 = vrot.slane %v3917_v13, 1 }
 0x24d   : > { %v4670_v60 = vmax.f32 %v4606_v49, 0.0  ;;  %v5548_v0 = vpack.c.bf16 %v4669_v43, %v4669_v43  ;;  %v3925_v36 = vrot.slane %v3924_v63, 1  ;;  %v3931_v18 = vmax.f32 %v3929_v6, %v3930_v47 }
 0x24e   : > { %v4672_v12 = vmax.f32 %v4608_v32, 0.0  ;;  %v5550_v5 = vpack.c.bf16 %v4671_v59, %v4671_v59  ;;  %v7578_v10 = vmax.f32 %v3917_v13, %v3918_v25  ;;  %v3090_v34 = vcombine.high %v7554_v30, %v7554_v30 }
 0x24f   : > { %v5549_v22 = vpack.c.bf16 %v4670_v60, %v4670_v60  ;;  %v4989_v14 = vunpack.c.l.b16 %v5548_v0  ;;  %v7582_v29 = vmax.f32 %v3924_v63, %v3925_v36  ;;  %v3932_v9 = vrot.slane %v3931_v18, 1 }
 0x250   : > { %v5551_v7 = vpack.c.bf16 %v4672_v12, %v4672_v12  ;;  %v4991_v50 = vunpack.c.l.b16 %v5550_v5  ;;  %v3097_v45 = vrot.slane %v7554_v30, %v7346_v62  ;;  %v3104_v28 = vrot.slane %v3090_v34, %v7346_v62 }
 0x251   : > { %v4990_v20 = vunpack.c.l.b16 %v5549_v22  ;;  %v5068_v8 = vrot.slane %v4989_v14, 4  ;;  %v7587_v48 = vmax.f32 %v3931_v18, %v3932_v9  ;;  %v6071_v44 = vadd.f32 %v7385_v35, %v7334_v38 }
 0x252   : > { %v4992_v55 = vunpack.c.l.b16 %v5551_v7  ;;  %v5072_v24 = vrot.slane %v4991_v50, 2  ;;  %v3105_v33 = vcombine.high %v3097_v45, %v3097_v45  ;;  %v3106_v6 = vcombine.high %v3104_v28, %v3104_v28 }
 0x253   : > { %v5069_v41 = vsel %vm5051_vm12, %v5068_v8, %v7548_v56  ;;  %v5070_v39 = vrot.slane %v4990_v20, 3  ;;  %v3850_v37 = vsel %vm726_vm1, %v3097_v45, -inf  ;;  %v3864_v30 = vsel %vm726_vm1, %v3104_v28, -inf }
 0x254   : > { %v5074_v13 = vrot.slane %v4992_v55, 1  ;;  %v3851_v49 = vrot.slane %v3850_v37, 4  ;;  %v3857_v43 = vsel %vm726_vm1, %v3105_v33, -inf  ;;  %v3865_v63 = vrot.slane %v3864_v30, 4 }
 0x255   : > { %v5071_v47 = vsel %vm5054_vm13, %v5070_v39, %v5069_v41  ;;  %v3858_v38 = vrot.slane %v3857_v43, 4  ;;  %v3871_v35 = vsel %vm726_vm1, %v3106_v6, -inf  ;;  %v3141_v32 = vcombine.high %v6071_v44, %v6071_v44 }
 0x256   : > { %v5073_v59 = vsel %vm5057_vm14, %v5072_v24, %v5071_v47  ;;  %v3852_v56 = vmax.f32 %v3850_v37, %v3851_v49  ;;  %v3866_v25 = vmax.f32 %v3864_v30, %v3865_v63  ;;  %v3872_v60 = vrot.slane %v3871_v35, 4  ;;  %v7609_v49 = vpop.f32.mrb[22].mxu0 }
 0x257   : > { %v5075_v0 = vsel %vm5060_vm15, %v5074_v13, %v5073_v59  ;;  %v3859_v36 = vmax.f32 %v3857_v43, %v3858_v38  ;;  %v3148_v18 = vrot.slane %v6071_v44, %v7346_v62  ;;  %v3155_v12 = vrot.slane %v3141_v32, %v7346_v62  ;;  %v7607_v13 = vpop.f32.mrb[22].mxu1 }
 0x258   : > { %v5161_v5 = vpack.c.b16 %v5075_v0, %v5075_v0  ;;  %v3853_v34 = vrot.slane %v3852_v56, 2  ;;  %v3867_v22 = vrot.slane %v3866_v25, 2  ;;  %v3873_v14 = vmax.f32 %v3871_v35, %v3872_v60 }
 0x259   : > { %v3860_v9 = vrot.slane %v3859_v36, 2  ;;  %v3156_v7 = vcombine.high %v3148_v18, %v3148_v18  ;;  %v3157_v50 = vcombine.high %v3155_v12, %v3155_v12  ;;  %v3934_v45 = vsel %vm726_vm1, %v3148_v18, -inf }
 0x25a   : > { %5177 = vst [vmem:[%s7497_s4 + $0x4] sm:$0xf] %v5161_v5  ;;  %v3854_v28 = vmax.f32 %v3852_v56, %v3853_v34  ;;  %v3868_v20 = vmax.f32 %v3866_v25, %v3867_v22  ;;  %v3874_v8 = vrot.slane %v3873_v14, 2  ;;  %v3935_v55 = vrot.slane %v3934_v45, 4 }
 0x25b   : > { %v3861_v24 = vmax.f32 %v3859_v36, %v3860_v9  ;;  %v3941_v33 = vsel %vm726_vm1, %v3156_v7, -inf  ;;  %v3948_v44 = vsel %vm726_vm1, %v3155_v12, -inf  ;;  %v3955_v6 = vsel %vm726_vm1, %v3157_v50, -inf }
 0x25c   : > { %v3855_v41 = vrot.slane %v3854_v28, 1  ;;  %v3869_v39 = vrot.slane %v3868_v20, 1  ;;  %v3875_v37 = vmax.f32 %v3873_v14, %v3874_v8  ;;  %v3936_v30 = vmax.f32 %v3934_v45, %v3935_v55 }
 0x25d   : > { %v3862_v43 = vrot.slane %v3861_v24, 1  ;;  %v3942_v63 = vrot.slane %v3941_v33, 4  ;;  %v3949_v47 = vrot.slane %v3948_v44, 4  ;;  %v3956_v38 = vrot.slane %v3955_v6, 4 }
 0x25e   : > { %v3856_v35 = vmax.f32 %v3854_v28, %v3855_v41  ;;  %v3870_v32 = vmax.f32 %v3868_v20, %v3869_v39  ;;  %v3876_v59 = vrot.slane %v3875_v37, 1  ;;  %v3937_v56 = vrot.slane %v3936_v30, 2 }
 0x25f   : > { %v3863_v25 = vmax.f32 %v3861_v24, %v3862_v43  ;;  %v3943_v60 = vmax.f32 %v3941_v33, %v3942_v63  ;;  %v3950_v0 = vmax.f32 %v3948_v44, %v3949_v47  ;;  %v3957_v36 = vmax.f32 %v3955_v6, %v3956_v38 }
 0x260   : > { %v3877_v18 = vmax.f32 %v3875_v37, %v3876_v59  ;;  %v4538_v12 = vmax.f32 %v3856_v35, %v7568_v15  ;;  %v4540_v5 = vmax.f32 %v3870_v32, %v7582_v29  ;;  %v3938_v34 = vmax.f32 %v3936_v30, %v3937_v56 }
 0x261   : > { %v4539_v22 = vmax.f32 %v3863_v25, %v7578_v10  ;;  %v3944_v14 = vrot.slane %v3943_v60, 2  ;;  %v3951_v9 = vrot.slane %v3950_v0, 2  ;;  %v3958_v7 = vrot.slane %v3957_v36, 2 }
 0x262   : > { %v4541_v50 = vmax.f32 %v3877_v18, %v7587_v48  ;;  %v4609_v45 = vadd.f32 %v7381_v16, %v4538_v12  ;;  %v4611_v28 = vadd.f32 %v7381_v16, %v4540_v5  ;;  %v3939_v20 = vrot.slane %v3938_v34, 1 }
 0x263   : > { %v4610_v8 = vadd.f32 %v7381_v16, %v4539_v22  ;;  %v3945_v55 = vmax.f32 %v3943_v60, %v3944_v14  ;;  %v3952_v24 = vmax.f32 %v3950_v0, %v3951_v9  ;;  %v3959_v15 = vmax.f32 %v3957_v36, %v3958_v7  ;;  %v7629_v60 = vpop.f32.mrb[23].mxu1  ;;  %v7631_v0 = vpop.f32.mrb[23].mxu0 }
 0x264   : > { %v4612_v29 = vadd.f32 %v7381_v16, %v4541_v50  ;;  %v4673_v33 = vmax.f32 %v4609_v45, 0.0  ;;  %v4675_v44 = vmax.f32 %v4611_v28, 0.0  ;;  %v7619_v10 = vmax.f32 %v3938_v34, %v3939_v20 }
 0x265   : > { %v4674_v6 = vmax.f32 %v4610_v8, 0.0  ;;  %v3946_v41 = vrot.slane %v3945_v55, 1  ;;  %v3953_v39 = vrot.slane %v3952_v24, 1  ;;  %v3960_v48 = vrot.slane %v3959_v15, 1 }
 0x266   : > { %v4676_v37 = vmax.f32 %v4612_v29, 0.0  ;;  %v5552_v30 = vpack.c.bf16 %v4673_v33, %v4673_v33  ;;  %v5554_v43 = vpack.c.bf16 %v4675_v44, %v4675_v44  ;;  %v6072_v63 = vadd.f32 %v7387_v3, %v7336_v54 }
 0x267   : > { %v5553_v47 = vpack.c.bf16 %v4674_v6, %v4674_v6  ;;  %v7623_v38 = vmax.f32 %v3945_v55, %v3946_v41  ;;  %v7625_v35 = vmax.f32 %v3952_v24, %v3953_v39  ;;  %v7627_v16 = vmax.f32 %v3959_v15, %v3960_v48 }
 0x268   : > { %v5555_v32 = vpack.c.bf16 %v4676_v37, %v4676_v37  ;;  %v4993_v59 = vunpack.c.l.b16 %v5552_v30  ;;  %v4995_v56 = vunpack.c.l.b16 %v5554_v43  ;;  %v3107_v25 = vcombine.high %v6072_v63, %v6072_v63 }
 0x269   : > { %v4994_v36 = vunpack.c.l.b16 %v5553_v47  ;;  %v3114_v18 = vrot.slane %v6072_v63, %v7346_v62  ;;  %v6073_v54 = vadd.f32 %v7398_v17, %v7338_v21  ;;  %v7638_v3 = vadd.f32 %v7402_v42, %v7340_v4 }
 0x26a   : > { %v4996_v12 = vunpack.c.l.b16 %v5555_v32  ;;  %v5078_v5 = vrot.slane %v4995_v56, 6  ;;  %v3121_v34 = vrot.slane %v3107_v25, %v7346_v62  ;;  %v7643_v22 = vadd.f32 %v7404_v52, %v7342_v61 }
 0x26b   : > { %v5076_v14 = vrot.slane %v4994_v36, 7  ;;  %v3122_v9 = vcombine.high %v3114_v18, %v3114_v18  ;;  %v3878_v7 = vsel %vm726_vm1, %v3114_v18, -inf  ;;  %v3192_v50 = vcombine.high %v6073_v54, %v6073_v54 }
 0x26c   : > { %v5080_v45 = vrot.slane %v4996_v12, 5  ;;  %v3123_v28 = vcombine.high %v3121_v34, %v3121_v34  ;;  %v3879_v21 = vrot.slane %v3878_v7, 4  ;;  %v3892_v17 = vsel %vm726_vm1, %v3121_v34, -inf }
 0x26d   : > { %v5077_v4 = vsel %vm5042_vm9, %v5076_v14, %v4993_v59  ;;  %v3885_v42 = vsel %vm726_vm1, %v3122_v9, -inf  ;;  %v3893_v20 = vrot.slane %v3892_v17, 4  ;;  %v3199_v8 = vrot.slane %v6073_v54, %v7346_v62 }
 0x26e   : > { %v5079_v61 = vsel %vm5045_vm10, %v5078_v5, %v5077_v4  ;;  %v3880_v52 = vmax.f32 %v3878_v7, %v3879_v21  ;;  %v3886_v55 = vrot.slane %v3885_v42, 4  ;;  %v3899_v24 = vsel %vm726_vm1, %v3123_v28, -inf }
 0x26f   : > { %v3894_v15 = vmax.f32 %v3892_v17, %v3893_v20  ;;  %v3900_v29 = vrot.slane %v3899_v24, 4  ;;  %v7653_v33 = vsel %vm5048_vm11, %v5080_v45, %v5079_v61  ;;  %v3206_v44 = vrot.slane %v3192_v50, %v7346_v62 }
 0x270   : > { %v3881_v6 = vrot.slane %v3880_v52, 2  ;;  %v3887_v41 = vmax.f32 %v3885_v42, %v3886_v55  ;;  %v3207_v39 = vcombine.high %v3199_v8, %v3199_v8  ;;  %v4018_v48 = vsel %vm726_vm1, %v3199_v8, -inf }
 0x271   : > { %v3895_v37 = vrot.slane %v3894_v15, 2  ;;  %v3901_v30 = vmax.f32 %v3899_v24, %v3900_v29  ;;  %v3208_v43 = vcombine.high %v3206_v44, %v3206_v44  ;;  %v4019_v63 = vrot.slane %v4018_v48, 4 }
 0x272   : > { %v3882_v47 = vmax.f32 %v3880_v52, %v3881_v6  ;;  %v3888_v32 = vrot.slane %v3887_v41, 2  ;;  %v4025_v59 = vsel %vm726_vm1, %v3207_v39, -inf  ;;  %v4032_v56 = vsel %vm726_vm1, %v3206_v44, -inf }
 0x273   : > { %v3896_v25 = vmax.f32 %v3894_v15, %v3895_v37  ;;  %v3902_v36 = vrot.slane %v3901_v30, 2  ;;  %v4020_v18 = vmax.f32 %v4018_v48, %v4019_v63  ;;  %v4026_v54 = vrot.slane %v4025_v59, 4  ;;  %v7666_v48 = vld [vmem:[%s8122_s2] ss:$0 sm:$0xff]  ;;  %v7669_v63 = vpop.f32.mrb[24].mxu1 }
 0x274   : > { %v3883_v12 = vrot.slane %v3882_v47, 1  ;;  %v3889_v5 = vmax.f32 %v3887_v41, %v3888_v32  ;;  %v4033_v34 = vrot.slane %v4032_v56, 4  ;;  %v4039_v14 = vsel %vm726_vm1, %v3208_v43, -inf }
 0x275   : > { %v3897_v9 = vrot.slane %v3896_v25, 1  ;;  %v3903_v7 = vmax.f32 %v3901_v30, %v3902_v36  ;;  %v4021_v50 = vrot.slane %v4020_v18, 2  ;;  %v4027_v45 = vmax.f32 %v4025_v59, %v4026_v54  ;;  %v7677_v59 = vpop.f32.mrb[25].mxu1 }
 0x276   : > { %v3884_v28 = vmax.f32 %v3882_v47, %v3883_v12  ;;  %v3890_v21 = vrot.slane %v3889_v5, 1  ;;  %v4034_v17 = vmax.f32 %v4032_v56, %v4033_v34  ;;  %v4040_v4 = vrot.slane %v4039_v14, 4 }
 0x277   : > { %v3898_v42 = vmax.f32 %v3896_v25, %v3897_v9  ;;  %v3904_v20 = vrot.slane %v3903_v7, 1  ;;  %v4022_v8 = vmax.f32 %v4020_v18, %v4021_v50  ;;  %v4028_v61 = vrot.slane %v4027_v45, 2 }
 0x278   : > { %v3891_v52 = vmax.f32 %v3889_v5, %v3890_v21  ;;  %v4542_v55 = vmax.f32 %v3884_v28, %v7619_v10  ;;  %v4035_v24 = vrot.slane %v4034_v17, 2  ;;  %v4041_v15 = vmax.f32 %v4039_v14, %v4040_v4  ;;  %v7671_v10 = vpop.f32.mrb[24].mxu0 }
 0x279   : > { %v3905_v29 = vmax.f32 %v3903_v7, %v3904_v20  ;;  %v4544_v44 = vmax.f32 %v3898_v42, %v7625_v35  ;;  %v4023_v6 = vrot.slane %v4022_v8, 1  ;;  %v4029_v41 = vmax.f32 %v4027_v45, %v4028_v61  ;;  %v7679_v56 = vpop.f32.mrb[25].mxu0 }
 0x27a   : > { %v4543_v39 = vmax.f32 %v3891_v52, %v7623_v38  ;;  %v4613_v37 = vadd.f32 %v7666_v48, %v4542_v55  ;;  %v4036_v30 = vmax.f32 %v4034_v17, %v4035_v24  ;;  %v4042_v43 = vrot.slane %v4041_v15, 2 }
 0x27b   : > { %v4545_v47 = vmax.f32 %v3905_v29, %v7627_v16  ;;  %v4615_v35 = vadd.f32 %v7666_v48, %v4544_v44  ;;  %v7675_v32 = vmax.f32 %v4022_v8, %v4023_v6  ;;  %v4030_v38 = vrot.slane %v4029_v41, 1 }
 0x27c   : > { %v4614_v25 = vadd.f32 %v7666_v48, %v4543_v39  ;;  %v4677_v36 = vmax.f32 %v4613_v37, 0.0  ;;  %v4037_v18 = vrot.slane %v4036_v30, 1  ;;  %v4043_v54 = vmax.f32 %v4041_v15, %v4042_v43 }
 0x27d   : > { %v4616_v12 = vadd.f32 %v7666_v48, %v4545_v47  ;;  %v4679_v5 = vmax.f32 %v4615_v35, 0.0  ;;  %v7683_v34 = vmax.f32 %v4029_v41, %v4030_v38  ;;  %v3158_v16 = vcombine.high %v7638_v3, %v7638_v3 }
 0x27e   : > { %v4678_v14 = vmax.f32 %v4614_v25, 0.0  ;;  %v5556_v9 = vpack.c.bf16 %v4677_v36, %v4677_v36  ;;  %v7687_v7 = vmax.f32 %v4036_v30, %v4037_v18  ;;  %v4044_v50 = vrot.slane %v4043_v54, 1 }
 0x27f   : > { %v4680_v45 = vmax.f32 %v4616_v12, 0.0  ;;  %v5558_v28 = vpack.c.bf16 %v4679_v5, %v4679_v5  ;;  %v3165_v21 = vrot.slane %v7638_v3, %v7346_v62  ;;  %v3172_v17 = vrot.slane %v3158_v16, %v7346_v62 }
 0x280   : > { %v5557_v4 = vpack.c.bf16 %v4678_v14, %v4678_v14  ;;  %v4997_v42 = vunpack.c.l.b16 %v5556_v9  ;;  %v7692_v20 = vmax.f32 %v4043_v54, %v4044_v50  ;;  %v3209_v8 = vcombine.high %v7643_v22, %v7643_v22 }
 0x281   : > { %v5559_v61 = vpack.c.bf16 %v4680_v45, %v4680_v45  ;;  %v4999_v52 = vunpack.c.l.b16 %v5558_v28  ;;  %v3173_v55 = vcombine.high %v3165_v21, %v3165_v21  ;;  %v3174_v24 = vcombine.high %v3172_v17, %v3172_v17 }
 0x282   : > { %v4998_v15 = vunpack.c.l.b16 %v5557_v4  ;;  %v5082_v29 = vrot.slane %v4997_v42, 4  ;;  %v3962_v44 = vsel %vm726_vm1, %v3165_v21, -inf  ;;  %v3976_v6 = vsel %vm726_vm1, %v3172_v17, -inf }
 0x283   : > { %v5000_v3 = vunpack.c.l.b16 %v5559_v61  ;;  %v5086_v41 = vrot.slane %v4999_v52, 2  ;;  %v3963_v39 = vrot.slane %v3962_v44, 4  ;;  %v3969_v37 = vsel %vm726_vm1, %v3173_v55, -inf }
 0x284   : > { %v5083_v30 = vsel %vm5051_vm12, %v5082_v29, %v7653_v33  ;;  %v5084_v43 = vrot.slane %v4998_v15, 3  ;;  %v3970_v47 = vrot.slane %v3969_v37, 4  ;;  %v3977_v35 = vrot.slane %v3976_v6, 4 }
 0x285   : > { %v5088_v38 = vrot.slane %v5000_v3, 1  ;;  %v3964_v25 = vmax.f32 %v3962_v44, %v3963_v39  ;;  %v3983_v36 = vsel %vm726_vm1, %v3174_v24, -inf  ;;  %v3216_v18 = vrot.slane %v7643_v22, %v7346_v62 }
 0x286   : > { %v5085_v54 = vsel %vm5054_vm13, %v5084_v43, %v5083_v30  ;;  %v3971_v12 = vmax.f32 %v3969_v37, %v3970_v47  ;;  %v3978_v5 = vmax.f32 %v3976_v6, %v3977_v35  ;;  %v3984_v16 = vrot.slane %v3983_v36, 4 }
 0x287   : > { %v5087_v14 = vsel %vm5057_vm14, %v5086_v41, %v5085_v54  ;;  %v3965_v9 = vrot.slane %v3964_v25, 2  ;;  %v3223_v33 = vrot.slane %v3209_v8, %v7346_v62  ;;  %v3224_v50 = vcombine.high %v3216_v18, %v3216_v18 }
 0x288   : > { %v5089_v45 = vsel %vm5060_vm15, %v5088_v38, %v5087_v14  ;;  %v3972_v28 = vrot.slane %v3971_v12, 2  ;;  %v3979_v21 = vrot.slane %v3978_v5, 2  ;;  %v3985_v17 = vmax.f32 %v3983_v36, %v3984_v16  ;;  %v7713_v38 = vpop.f32.mrb[26].mxu1 }
 0x289   : > { %v5162_v4 = vpack.c.b16 %v5089_v45, %v5089_v45  ;;  %v3966_v42 = vmax.f32 %v3964_v25, %v3965_v9  ;;  %v3225_v22 = vcombine.high %v3223_v33, %v3223_v33  ;;  %v4046_v61 = vsel %vm726_vm1, %v3216_v18, -inf  ;;  %v7715_v25 = vpop.f32.mrb[26].mxu0 }
 0x28a   : > { %v3973_v52 = vmax.f32 %v3971_v12, %v3972_v28  ;;  %v3980_v55 = vmax.f32 %v3978_v5, %v3979_v21  ;;  %v3986_v24 = vrot.slane %v3985_v17, 2  ;;  %v4047_v15 = vrot.slane %v4046_v61, 4 }
 0x28b   : > { %5178 = vst [vmem:[%s7497_s4 + $0x8] sm:$0xf] %v5162_v4  ;;  %v3967_v29 = vrot.slane %v3966_v42, 1  ;;  %v4053_v44 = vsel %vm726_vm1, %v3224_v50, -inf  ;;  %v4060_v8 = vsel %vm726_vm1, %v3223_v33, -inf  ;;  %v4067_v6 = vsel %vm726_vm1, %v3225_v22, -inf }
 0x28c   : > { %v3974_v3 = vrot.slane %v3973_v52, 1  ;;  %v3981_v41 = vrot.slane %v3980_v55, 1  ;;  %v3987_v39 = vmax.f32 %v3985_v17, %v3986_v24  ;;  %v4048_v37 = vmax.f32 %v4046_v61, %v4047_v15 }
 0x28d   : > { %v3968_v30 = vmax.f32 %v3966_v42, %v3967_v29  ;;  %v4054_v43 = vrot.slane %v4053_v44, 4  ;;  %v4061_v47 = vrot.slane %v4060_v8, 4  ;;  %v4068_v35 = vrot.slane %v4067_v6, 4 }
 0x28e   : > { %v3975_v36 = vmax.f32 %v3973_v52, %v3974_v3  ;;  %v3982_v18 = vmax.f32 %v3980_v55, %v3981_v41  ;;  %v3988_v54 = vrot.slane %v3987_v39, 1  ;;  %v4049_v12 = vrot.slane %v4048_v37, 2 }
 0x28f   : > { %v4546_v5 = vmax.f32 %v3968_v30, %v7675_v32  ;;  %v4055_v16 = vmax.f32 %v4053_v44, %v4054_v43  ;;  %v4062_v14 = vmax.f32 %v4060_v8, %v4061_v47  ;;  %v4069_v9 = vmax.f32 %v4067_v6, %v4068_v35  ;;  %v7729_v47 = vpop.f32.mrb[27].mxu1  ;;  %v7731_v35 = vpop.f32.mrb[27].mxu0 }
 0x290   : > { %v3989_v33 = vmax.f32 %v3987_v39, %v3988_v54  ;;  %v4547_v50 = vmax.f32 %v3975_v36, %v7683_v34  ;;  %v4548_v45 = vmax.f32 %v3982_v18, %v7687_v7  ;;  %v4050_v28 = vmax.f32 %v4048_v37, %v4049_v12 }
 0x291   : > { %v4617_v21 = vadd.f32 %v7666_v48, %v4546_v5  ;;  %v4056_v17 = vrot.slane %v4055_v16, 2  ;;  %v4063_v4 = vrot.slane %v4062_v14, 2  ;;  %v4070_v42 = vrot.slane %v4069_v9, 2 }
 0x292   : > { %v4549_v22 = vmax.f32 %v3989_v33, %v7692_v20  ;;  %v4618_v61 = vadd.f32 %v7666_v48, %v4547_v50  ;;  %v4619_v32 = vadd.f32 %v7666_v48, %v4548_v45  ;;  %v4051_v52 = vrot.slane %v4050_v28, 1 }
 0x293   : > { %v4681_v55 = vmax.f32 %v4617_v21, 0.0  ;;  %v4057_v24 = vmax.f32 %v4055_v16, %v4056_v17  ;;  %v4064_v15 = vmax.f32 %v4062_v14, %v4063_v4  ;;  %v4071_v29 = vmax.f32 %v4069_v9, %v4070_v42 }
 0x294   : > { %v4620_v34 = vadd.f32 %v7666_v48, %v4549_v22  ;;  %v4682_v7 = vmax.f32 %v4618_v61, 0.0  ;;  %v4683_v44 = vmax.f32 %v4619_v32, 0.0  ;;  %v7725_v8 = vmax.f32 %v4050_v28, %v4051_v52 }
 0x295   : > { %v5560_v6 = vpack.c.bf16 %v4681_v55, %v4681_v55  ;;  %v4058_v3 = vrot.slane %v4057_v24, 1  ;;  %v4065_v41 = vrot.slane %v4064_v15, 1  ;;  %v4072_v39 = vrot.slane %v4071_v29, 1 }
 0x296   : > { %v4684_v20 = vmax.f32 %v4620_v34, 0.0  ;;  %v5561_v37 = vpack.c.bf16 %v4682_v7, %v4682_v7  ;;  %v5562_v30 = vpack.c.bf16 %v4683_v44, %v4683_v44  ;;  %v6076_v43 = vadd.f32 %v7409_v46, %v7344_v53 }
 0x297   : > { %v5001_v36 = vunpack.c.l.b16 %v5560_v6  ;;  %v7733_v18 = vmax.f32 %v4057_v24, %v4058_v3  ;;  %v7735_v54 = vmax.f32 %v4064_v15, %v4065_v41  ;;  %v7737_v12 = vmax.f32 %v4071_v29, %v4072_v39 }
 0x298   : > { %v5563_v5 = vpack.c.bf16 %v4684_v20, %v4684_v20  ;;  %v5002_v16 = vunpack.c.l.b16 %v5561_v37  ;;  %v5003_v14 = vunpack.c.l.b16 %v5562_v30  ;;  %v3175_v9 = vcombine.high %v6076_v43, %v6076_v43 }
 0x299   : > { %v3182_v33 = vrot.slane %v6076_v43, %v7346_v62  ;;  %v6077_v53 = vadd.f32 %v7463_v23, %v7461_v58  ;;  %v7744_v46 = vadd.f32 %v7469_v51, %v7467_v27  ;;  %v7748_v50 = vadd.f32 %v7512_v1, %v7510_v2 }
 0x29a   : > { %v5004_v45 = vunpack.c.l.b16 %v5563_v5  ;;  %v5090_v28 = vrot.slane %v5002_v16, 7  ;;  %v5092_v21 = vrot.slane %v5003_v14, 6  ;;  %v3189_v17 = vrot.slane %v3175_v9, %v7346_v62 }
 0x29b   : > { %v3190_v4 = vcombine.high %v3182_v33, %v3182_v33  ;;  %v3990_v42 = vsel %vm726_vm1, %v3182_v33, -inf  ;;  %v3260_v22 = vcombine.high %v6077_v53, %v6077_v53  ;;  %v3267_v61 = vrot.slane %v6077_v53, %v7346_v62 }
 0x29c   : > { %v5091_v58 = vsel %vm5042_vm9, %v5090_v28, %v5001_v36  ;;  %v5094_v23 = vrot.slane %v5004_v45, 5  ;;  %v3191_v27 = vcombine.high %v3189_v17, %v3189_v17  ;;  %v3991_v51 = vrot.slane %v3990_v42, 4 }
 0x29d   : > { %v5093_v32 = vsel %vm5045_vm10, %v5092_v21, %v5091_v58  ;;  %v3997_v2 = vsel %vm726_vm1, %v3190_v4, -inf  ;;  %v4004_v1 = vsel %vm726_vm1, %v3189_v17, -inf  ;;  %v3274_v52 = vrot.slane %v3260_v22, %v7346_v62 }
 0x29e   : > { %v3992_v55 = vmax.f32 %v3990_v42, %v3991_v51  ;;  %v3998_v24 = vrot.slane %v3997_v2, 4  ;;  %v4005_v15 = vrot.slane %v4004_v1, 4  ;;  %v4011_v29 = vsel %vm726_vm1, %v3191_v27, -inf }
 0x29f   : > { %v4012_v34 = vrot.slane %v4011_v29, 4  ;;  %v7760_v7 = vsel %vm5048_vm11, %v5094_v23, %v5093_v32  ;;  %v3275_v44 = vcombine.high %v3267_v61, %v3267_v61  ;;  %v3276_v6 = vcombine.high %v3274_v52, %v3274_v52 }
 0x2a0   : > { %v3993_v3 = vrot.slane %v3992_v55, 2  ;;  %v3999_v41 = vmax.f32 %v3997_v2, %v3998_v24  ;;  %v4006_v39 = vmax.f32 %v4004_v1, %v4005_v15  ;;  %v4130_v20 = vsel %vm726_vm1, %v3267_v61, -inf }
 0x2a1   : > { %v4013_v37 = vmax.f32 %v4011_v29, %v4012_v34  ;;  %v4131_v30 = vrot.slane %v4130_v20, 4  ;;  %v4137_v43 = vsel %vm726_vm1, %v3275_v44, -inf  ;;  %v4144_v36 = vsel %vm726_vm1, %v3274_v52, -inf }
 0x2a2   : > { %v3994_v5 = vmax.f32 %v3992_v55, %v3993_v3  ;;  %v4000_v16 = vrot.slane %v3999_v41, 2  ;;  %v4007_v14 = vrot.slane %v4006_v39, 2  ;;  %v4138_v9 = vrot.slane %v4137_v43, 4 }
 0x2a3   : > { %v4014_v33 = vrot.slane %v4013_v37, 2  ;;  %v4132_v53 = vmax.f32 %v4130_v20, %v4131_v30  ;;  %v4145_v45 = vrot.slane %v4144_v36, 4  ;;  %v4151_v28 = vsel %vm726_vm1, %v3276_v6, -inf }
 0x2a4   : > { %v3995_v21 = vrot.slane %v3994_v5, 1  ;;  %v4001_v17 = vmax.f32 %v3999_v41, %v4000_v16  ;;  %v4008_v4 = vmax.f32 %v4006_v39, %v4007_v14  ;;  %v4139_v42 = vmax.f32 %v4137_v43, %v4138_v9 }
 0x2a5   : > { %v4015_v22 = vmax.f32 %v4013_v37, %v4014_v33  ;;  %v4133_v61 = vrot.slane %v4132_v53, 2  ;;  %v4146_v58 = vmax.f32 %v4144_v36, %v4145_v45  ;;  %v4152_v23 = vrot.slane %v4151_v28, 4  ;;  %v7770_v36 = vpop.f32.mrb[28].mxu1 }
 0x2a6   : > { %v3996_v27 = vmax.f32 %v3994_v5, %v3995_v21  ;;  %v4002_v51 = vrot.slane %v4001_v17, 1  ;;  %v4009_v32 = vrot.slane %v4008_v4, 1  ;;  %v4140_v2 = vrot.slane %v4139_v42, 2  ;;  %v7772_v5 = vpop.f32.mrb[28].mxu0  ;;  %v7777_v33 = vpop.f32.mrb[29].mxu1 }
 0x2a7   : > { %v4016_v1 = vrot.slane %v4015_v22, 1  ;;  %v4134_v52 = vmax.f32 %v4132_v53, %v4133_v61  ;;  %v4147_v55 = vrot.slane %v4146_v58, 2  ;;  %v4153_v24 = vmax.f32 %v4151_v28, %v4152_v23  ;;  %v7779_v53 = vpop.f32.mrb[29].mxu0 }
 0x2a8   : > { %v4003_v15 = vmax.f32 %v4001_v17, %v4002_v51  ;;  %v4010_v29 = vmax.f32 %v4008_v4, %v4009_v32  ;;  %v4550_v34 = vmax.f32 %v3996_v27, %v7725_v8  ;;  %v4141_v44 = vmax.f32 %v4139_v42, %v4140_v2 }
 0x2a9   : > { %v4017_v6 = vmax.f32 %v4015_v22, %v4016_v1  ;;  %v4135_v3 = vrot.slane %v4134_v52, 1  ;;  %v4148_v41 = vmax.f32 %v4146_v58, %v4147_v55  ;;  %v4154_v39 = vrot.slane %v4153_v24, 2 }
 0x2aa   : > { %v4551_v20 = vmax.f32 %v4003_v15, %v7733_v18  ;;  %v4552_v37 = vmax.f32 %v4010_v29, %v7735_v54  ;;  %v4621_v30 = vadd.f32 %v7666_v48, %v4550_v34  ;;  %v4142_v43 = vrot.slane %v4141_v44, 1 }
 0x2ab   : > { %v4553_v16 = vmax.f32 %v4017_v6, %v7737_v12  ;;  %v7775_v14 = vmax.f32 %v4134_v52, %v4135_v3  ;;  %v4149_v8 = vrot.slane %v4148_v41, 1  ;;  %v4155_v9 = vmax.f32 %v4153_v24, %v4154_v39 }
 0x2ac   : > { %v4622_v18 = vadd.f32 %v7666_v48, %v4551_v20  ;;  %v4623_v54 = vadd.f32 %v7666_v48, %v4552_v37  ;;  %v4685_v45 = vmax.f32 %v4621_v30, 0.0  ;;  %v7783_v28 = vmax.f32 %v4141_v44, %v4142_v43 }
 0x2ad   : > { %v4624_v21 = vadd.f32 %v7666_v48, %v4553_v16  ;;  %v7786_v17 = vmax.f32 %v4148_v41, %v4149_v8  ;;  %v4156_v12 = vrot.slane %v4155_v9, 1  ;;  %v3226_v4 = vcombine.high %v7744_v46, %v7744_v46 }
 0x2ae   : > { %v4686_v42 = vmax.f32 %v4622_v18, 0.0  ;;  %v4687_v22 = vmax.f32 %v4623_v54, 0.0  ;;  %v5564_v61 = vpack.c.bf16 %v4685_v45, %v4685_v45  ;;  %v3233_v58 = vrot.slane %v7744_v46, %v7346_v62 }
 0x2af   : > { %v4688_v23 = vmax.f32 %v4624_v21, 0.0  ;;  %v7792_v27 = vmax.f32 %v4155_v9, %v4156_v12  ;;  %v3240_v51 = vrot.slane %v3226_v4, %v7346_v62  ;;  %v3277_v32 = vcombine.high %v7748_v50, %v7748_v50 }
 0x2b0   : > { %v5565_v2 = vpack.c.bf16 %v4686_v42, %v4686_v42  ;;  %v5566_v1 = vpack.c.bf16 %v4687_v22, %v4687_v22  ;;  %v5005_v52 = vunpack.c.l.b16 %v5564_v61  ;;  %v3241_v55 = vcombine.high %v3233_v58, %v3233_v58 }
 0x2b1   : > { %v5567_v24 = vpack.c.bf16 %v4688_v23, %v4688_v23  ;;  %v3242_v15 = vcombine.high %v3240_v51, %v3240_v51  ;;  %v4074_v29 = vsel %vm726_vm1, %v3233_v58, -inf  ;;  %v4088_v34 = vsel %vm726_vm1, %v3240_v51, -inf }
 0x2b2   : > { %v5006_v44 = vunpack.c.l.b16 %v5565_v2  ;;  %v5007_v46 = vunpack.c.l.b16 %v5566_v1  ;;  %v5096_v6 = vrot.slane %v5005_v52, 4  ;;  %v4075_v3 = vrot.slane %v4074_v29, 4 }
 0x2b3   : > { %v5008_v41 = vunpack.c.l.b16 %v5567_v24  ;;  %v4081_v39 = vsel %vm726_vm1, %v3241_v55, -inf  ;;  %v4089_v20 = vrot.slane %v4088_v34, 4  ;;  %v4095_v37 = vsel %vm726_vm1, %v3242_v15, -inf }
 0x2b4   : > { %v5097_v30 = vsel %vm5051_vm12, %v5096_v6, %v7760_v7  ;;  %v5098_v43 = vrot.slane %v5006_v44, 3  ;;  %v5100_v16 = vrot.slane %v5007_v46, 2  ;;  %v4076_v8 = vmax.f32 %v4074_v29, %v4075_v3 }
 0x2b5   : > { %v5102_v9 = vrot.slane %v5008_v41, 1  ;;  %v4082_v18 = vrot.slane %v4081_v39, 4  ;;  %v4090_v54 = vmax.f32 %v4088_v34, %v4089_v20  ;;  %v4096_v45 = vrot.slane %v4095_v37, 4 }
 0x2b6   : > { %v5099_v21 = vsel %vm5054_vm13, %v5098_v43, %v5097_v30  ;;  %v4077_v12 = vrot.slane %v4076_v8, 2  ;;  %v3284_v4 = vrot.slane %v7748_v50, %v7346_v62  ;;  %v3291_v42 = vrot.slane %v3277_v32, %v7346_v62 }
 0x2b7   : > { %v5101_v22 = vsel %vm5057_vm14, %v5100_v16, %v5099_v21  ;;  %v4083_v61 = vmax.f32 %v4081_v39, %v4082_v18  ;;  %v4091_v7 = vrot.slane %v4090_v54, 2  ;;  %v4097_v58 = vmax.f32 %v4095_v37, %v4096_v45  ;;  %v7816_v18 = vpop.f32.mrb[30].mxu0 }
 0x2b8   : > { %v5103_v23 = vsel %vm5060_vm15, %v5102_v9, %v5101_v22  ;;  %v4078_v51 = vmax.f32 %v4076_v8, %v4077_v12  ;;  %v3292_v2 = vcombine.high %v3284_v4, %v3284_v4  ;;  %v3293_v1 = vcombine.high %v3291_v42, %v3291_v42  ;;  %v7814_v9 = vpop.f32.mrb[30].mxu1 }
 0x2b9   : > { %v5163_v52 = vpack.c.b16 %v5103_v23, %v5103_v23  ;;  %v4084_v55 = vrot.slane %v4083_v61, 2  ;;  %v4092_v24 = vmax.f32 %v4090_v54, %v4091_v7  ;;  %v4098_v15 = vrot.slane %v4097_v58, 2 }
 0x2ba   : > { %v4079_v29 = vrot.slane %v4078_v51, 1  ;;  %v4158_v50 = vsel %vm726_vm1, %v3284_v4, -inf  ;;  %v4165_v32 = vsel %vm726_vm1, %v3292_v2, -inf  ;;  %v4172_v34 = vsel %vm726_vm1, %v3291_v42, -inf }
 0x2bb   : > { %5179 = vst [vmem:[%s7497_s4 + $0xc] sm:$0xf] %v5163_v52  ;;  %v4085_v44 = vmax.f32 %v4083_v61, %v4084_v55  ;;  %v4093_v46 = vrot.slane %v4092_v24, 1  ;;  %v4099_v6 = vmax.f32 %v4097_v58, %v4098_v15  ;;  %v4159_v3 = vrot.slane %v4158_v50, 4 }
 0x2bc   : > { %v4080_v41 = vmax.f32 %v4078_v51, %v4079_v29  ;;  %v4166_v39 = vrot.slane %v4165_v32, 4  ;;  %v4173_v20 = vrot.slane %v4172_v34, 4  ;;  %v4179_v37 = vsel %vm726_vm1, %v3293_v1, -inf }
 0x2bd   : > { %v4086_v30 = vrot.slane %v4085_v44, 1  ;;  %v4094_v43 = vmax.f32 %v4092_v24, %v4093_v46  ;;  %v4100_v16 = vrot.slane %v4099_v6, 1  ;;  %v4160_v8 = vmax.f32 %v4158_v50, %v4159_v3 }
 0x2be   : > { %v4554_v54 = vmax.f32 %v4080_v41, %v7775_v14  ;;  %v4167_v45 = vmax.f32 %v4165_v32, %v4166_v39  ;;  %v4174_v21 = vmax.f32 %v4172_v34, %v4173_v20  ;;  %v4180_v12 = vrot.slane %v4179_v37, 4 }
 0x2bf   : > { %v4087_v4 = vmax.f32 %v4085_v44, %v4086_v30  ;;  %v4101_v42 = vmax.f32 %v4099_v6, %v4100_v16  ;;  %v4556_v22 = vmax.f32 %v4094_v43, %v7786_v17  ;;  %v4161_v61 = vrot.slane %v4160_v8, 2  ;;  %v7832_v16 = vpop.f32.mrb[31].mxu1 }
 0x2c0   : > { %v4625_v7 = vadd.f32 %v7666_v48, %v4554_v54  ;;  %v4168_v58 = vrot.slane %v4167_v45, 2  ;;  %v4175_v23 = vrot.slane %v4174_v21, 2  ;;  %v4181_v51 = vmax.f32 %v4179_v37, %v4180_v12 }
 0x2c1   : > { %v4555_v2 = vmax.f32 %v4087_v4, %v7783_v28  ;;  %v4557_v1 = vmax.f32 %v4101_v42, %v7792_v27  ;;  %v4627_v52 = vadd.f32 %v7666_v48, %v4556_v22  ;;  %v4162_v14 = vmax.f32 %v4160_v8, %v4161_v61  ;;  %v7834_v8 = vpop.f32.mrb[31].mxu0 }
 0x2c2   : > { %v4689_v55 = vmax.f32 %v4625_v7, 0.0  ;;  %v4169_v24 = vmax.f32 %v4167_v45, %v4168_v58  ;;  %v4176_v15 = vmax.f32 %v4174_v21, %v4175_v23  ;;  %v4182_v29 = vrot.slane %v4181_v51, 2 }
 0x2c3   : > { %v4626_v50 = vadd.f32 %v7666_v48, %v4555_v2  ;;  %v4628_v17 = vadd.f32 %v7666_v48, %v4557_v1  ;;  %v4691_v32 = vmax.f32 %v4627_v52, 0.0  ;;  %v4163_v34 = vrot.slane %v4162_v14, 1 }
 0x2c4   : > { %v5568_v44 = vpack.c.bf16 %v4689_v55, %v4689_v55  ;;  %v4170_v46 = vrot.slane %v4169_v24, 1  ;;  %v4177_v6 = vrot.slane %v4176_v15, 1  ;;  %v4183_v3 = vmax.f32 %v4181_v51, %v4182_v29 }
 0x2c5   : > { %v4690_v28 = vmax.f32 %v4626_v50, 0.0  ;;  %v4692_v41 = vmax.f32 %v4628_v17, 0.0  ;;  %v5570_v27 = vpack.c.bf16 %v4691_v32, %v4691_v32  ;;  %v7826_v39 = vmax.f32 %v4162_v14, %v4163_v34 }
 0x2c6   : > { %v5009_v20 = vunpack.c.l.b16 %v5568_v44  ;;  %v7828_v37 = vmax.f32 %v4169_v24, %v4170_v46  ;;  %v7830_v30 = vmax.f32 %v4176_v15, %v4177_v6  ;;  %v4184_v43 = vrot.slane %v4183_v3, 1 }
 0x2c7   : > { %v5569_v54 = vpack.c.bf16 %v4690_v28, %v4690_v28  ;;  %v5571_v45 = vpack.c.bf16 %v4692_v41, %v4692_v41  ;;  %v5011_v21 = vunpack.c.l.b16 %v5570_v27  ;;  %v6080_v12 = vadd.f32 %v7528_v11, %v7526_v40 }
 0x2c8   : > { %v7838_v4 = vmax.f32 %v4183_v3, %v4184_v43  ;;  %v6081_v42 = vadd.f32 %v7572_v26, %v7570_v31  ;;  %v7844_v22 = vadd.f32 %v7576_v19, %v7574_v57  ;;  %v7848_v61 = vadd.f32 %v7609_v49, %v7607_v13 }
 0x2c9   : > { %v5010_v7 = vunpack.c.l.b16 %v5569_v54  ;;  %v5012_v58 = vunpack.c.l.b16 %v5571_v45  ;;  %v5106_v23 = vrot.slane %v5011_v21, 6  ;;  %v3243_v51 = vcombine.high %v6080_v12, %v6080_v12 }
 0x2ca   : > { %v3250_v2 = vrot.slane %v6080_v12, %v7346_v62  ;;  %v3328_v40 = vcombine.high %v6081_v42, %v6081_v42  ;;  %v3335_v11 = vrot.slane %v6081_v42, %v7346_v62  ;;  %v3294_v31 = vcombine.high %v7844_v22, %v7844_v22 }
 0x2cb   : > { %v5104_v26 = vrot.slane %v5010_v7, 7  ;;  %v5108_v1 = vrot.slane %v5012_v58, 5  ;;  %v3257_v57 = vrot.slane %v3243_v51, %v7346_v62  ;;  %v7857_v19 = vrot.slane %v7844_v22, %v7346_v62 }
 0x2cc   : > { %v3258_v13 = vcombine.high %v3250_v2, %v3250_v2  ;;  %v4102_v49 = vsel %vm726_vm1, %v3250_v2, -inf  ;;  %v3342_v52 = vrot.slane %v3328_v40, %v7346_v62  ;;  %v3343_v14 = vcombine.high %v3335_v11, %v3335_v11 }
 0x2cd   : > { %v5105_v55 = vsel %vm5042_vm9, %v5104_v26, %v5009_v20  ;;  %v3259_v24 = vcombine.high %v3257_v57, %v3257_v57  ;;  %v4103_v15 = vrot.slane %v4102_v49, 4  ;;  %v4116_v29 = vsel %vm726_vm1, %v3257_v57, -inf }
 0x2ce   : > { %v5107_v50 = vsel %vm5045_vm10, %v5106_v23, %v5105_v55  ;;  %v4109_v17 = vsel %vm726_vm1, %v3258_v13, -inf  ;;  %v4117_v32 = vrot.slane %v4116_v29, 4  ;;  %v3344_v34 = vcombine.high %v3342_v52, %v3342_v52 }
 0x2cf   : > { %v4104_v44 = vmax.f32 %v4102_v49, %v4103_v15  ;;  %v4110_v46 = vrot.slane %v4109_v17, 4  ;;  %v4123_v6 = vsel %vm726_vm1, %v3259_v24, -inf  ;;  %v7867_v3 = vsel %vm5048_vm11, %v5108_v1, %v5107_v50 }
 0x2d0   : > { %v4118_v28 = vmax.f32 %v4116_v29, %v4117_v32  ;;  %v4124_v41 = vrot.slane %v4123_v6, 4  ;;  %v4242_v27 = vsel %vm726_vm1, %v3335_v11, -inf  ;;  %v4249_v20 = vsel %vm726_vm1, %v3343_v14, -inf }
 0x2d1   : > { %v4105_v43 = vrot.slane %v4104_v44, 2  ;;  %v4111_v54 = vmax.f32 %v4109_v17, %v4110_v46  ;;  %v4243_v45 = vrot.slane %v4242_v27, 4  ;;  %v4250_v21 = vrot.slane %v4249_v20, 4 }
 0x2d2   : > { %v4119_v12 = vrot.slane %v4118_v28, 2  ;;  %v4125_v42 = vmax.f32 %v4123_v6, %v4124_v41  ;;  %v4256_v7 = vsel %vm726_vm1, %v3342_v52, -inf  ;;  %v4263_v58 = vsel %vm726_vm1, %v3344_v34, -inf }
 0x2d3   : > { %v4106_v23 = vmax.f32 %v4104_v44, %v4105_v43  ;;  %v4112_v51 = vrot.slane %v4111_v54, 2  ;;  %v4244_v2 = vmax.f32 %v4242_v27, %v4243_v45  ;;  %v4251_v40 = vmax.f32 %v4249_v20, %v4250_v21 }
 0x2d4   : > { %v4120_v26 = vmax.f32 %v4118_v28, %v4119_v12  ;;  %v4126_v1 = vrot.slane %v4125_v42, 2  ;;  %v4257_v57 = vrot.slane %v4256_v7, 4  ;;  %v4264_v11 = vrot.slane %v4263_v58, 4 }
 0x2d5   : > { %v4107_v13 = vrot.slane %v4106_v23, 1  ;;  %v4113_v49 = vmax.f32 %v4111_v54, %v4112_v51  ;;  %v4245_v14 = vrot.slane %v4244_v2, 2  ;;  %v4252_v55 = vrot.slane %v4251_v40, 2 }
 0x2d6   : > { %v4121_v24 = vrot.slane %v4120_v26, 1  ;;  %v4127_v15 = vmax.f32 %v4125_v42, %v4126_v1  ;;  %v4258_v29 = vmax.f32 %v4256_v7, %v4257_v57  ;;  %v4265_v50 = vmax.f32 %v4263_v58, %v4264_v11 }
 0x2d7   : > { %v4108_v17 = vmax.f32 %v4106_v23, %v4107_v13  ;;  %v4114_v52 = vrot.slane %v4113_v49, 1  ;;  %v4246_v32 = vmax.f32 %v4244_v2, %v4245_v14  ;;  %v4253_v34 = vmax.f32 %v4251_v40, %v4252_v55 }
 0x2d8   : > { %v4122_v44 = vmax.f32 %v4120_v26, %v4121_v24  ;;  %v4128_v46 = vrot.slane %v4127_v15, 1  ;;  %v4259_v6 = vrot.slane %v4258_v29, 2  ;;  %v4266_v41 = vrot.slane %v4265_v50, 2 }
 0x2d9   : > { %v4115_v28 = vmax.f32 %v4113_v49, %v4114_v52  ;;  %v4558_v27 = vmax.f32 %v4108_v17, %v7826_v39  ;;  %v4247_v20 = vrot.slane %v4246_v32, 1  ;;  %v4254_v43 = vrot.slane %v4253_v34, 1 }
 0x2da   : > { %v4129_v54 = vmax.f32 %v4127_v15, %v4128_v46  ;;  %v4560_v45 = vmax.f32 %v4122_v44, %v7830_v30  ;;  %v4260_v21 = vmax.f32 %v4258_v29, %v4259_v6  ;;  %v4267_v12 = vmax.f32 %v4265_v50, %v4266_v41 }
 0x2db   : > { %v4559_v42 = vmax.f32 %v4115_v28, %v7828_v37  ;;  %v4629_v7 = vadd.f32 %v7666_v48, %v4558_v27  ;;  %v7877_v58 = vmax.f32 %v4246_v32, %v4247_v20  ;;  %v7879_v23 = vmax.f32 %v4253_v34, %v4254_v43 }
 0x2dc   : > { %v4561_v51 = vmax.f32 %v4129_v54, %v7838_v4  ;;  %v4631_v2 = vadd.f32 %v7666_v48, %v4560_v45  ;;  %v4261_v39 = vrot.slane %v4260_v21, 1  ;;  %v4268_v40 = vrot.slane %v4267_v12, 1 }
 0x2dd   : > { %v4630_v26 = vadd.f32 %v7666_v48, %v4559_v42  ;;  %v4693_v1 = vmax.f32 %v4629_v7, 0.0  ;;  %v3308_v37 = vrot.slane %v3294_v31, %v7346_v62  ;;  %v3309_v30 = vcombine.high %v7857_v19, %v7857_v19 }
 0x2de   : > { %v4632_v57 = vadd.f32 %v7666_v48, %v4561_v51  ;;  %v4695_v11 = vmax.f32 %v4631_v2, 0.0  ;;  %v7891_v13 = vmax.f32 %v4260_v21, %v4261_v39  ;;  %v7893_v4 = vmax.f32 %v4267_v12, %v4268_v40 }
 0x2df   : > { %v4694_v49 = vmax.f32 %v4630_v26, 0.0  ;;  %v5572_v14 = vpack.c.bf16 %v4693_v1, %v4693_v1  ;;  %v3310_v55 = vcombine.high %v3308_v37, %v3308_v37  ;;  %v4186_v24 = vsel %vm726_vm1, %v7857_v19, -inf }
 0x2e0   : > { %v4696_v15 = vmax.f32 %v4632_v57, 0.0  ;;  %v5574_v29 = vpack.c.bf16 %v4695_v11, %v4695_v11  ;;  %v4187_v22 = vrot.slane %v4186_v24, 4  ;;  %v4193_v31 = vsel %vm726_vm1, %v3309_v30, -inf }
 0x2e1   : > { %v5573_v50 = vpack.c.bf16 %v4694_v49, %v4694_v49  ;;  %v5013_v17 = vunpack.c.l.b16 %v5572_v14  ;;  %v4194_v52 = vrot.slane %v4193_v31, 4  ;;  %v4200_v32 = vsel %vm726_vm1, %v3308_v37, -inf }
 0x2e2   : > { %v5575_v34 = vpack.c.bf16 %v4696_v15, %v4696_v15  ;;  %v5015_v44 = vunpack.c.l.b16 %v5574_v29  ;;  %v4188_v46 = vmax.f32 %v4186_v24, %v4187_v22  ;;  %v4201_v6 = vrot.slane %v4200_v32, 4 }
 0x2e3   : > { %v5014_v41 = vunpack.c.l.b16 %v5573_v50  ;;  %v5110_v28 = vrot.slane %v5013_v17, 4  ;;  %v4195_v27 = vmax.f32 %v4193_v31, %v4194_v52  ;;  %v4207_v20 = vsel %vm726_vm1, %v3310_v55, -inf }
 0x2e4   : > { %v5016_v19 = vunpack.c.l.b16 %v5575_v34  ;;  %v5114_v43 = vrot.slane %v5015_v44, 2  ;;  %v4189_v54 = vrot.slane %v4188_v46, 2  ;;  %v4202_v45 = vmax.f32 %v4200_v32, %v4201_v6 }
 0x2e5   : > { %v5111_v21 = vsel %vm5051_vm12, %v5110_v28, %v7867_v3  ;;  %v5112_v12 = vrot.slane %v5014_v41, 3  ;;  %v4196_v42 = vrot.slane %v4195_v27, 2  ;;  %v4208_v7 = vrot.slane %v4207_v20, 4 }
 0x2e6   : > { %v5116_v51 = vrot.slane %v5016_v19, 1  ;;  %v4190_v2 = vmax.f32 %v4188_v46, %v4189_v54  ;;  %v4203_v39 = vrot.slane %v4202_v45, 2  ;;  %v3345_v40 = vcombine.high %v7848_v61, %v7848_v61 }
 0x2e7   : > { %v5113_v26 = vsel %vm5054_vm13, %v5112_v12, %v5111_v21  ;;  %v4197_v1 = vmax.f32 %v4195_v27, %v4196_v42  ;;  %v4209_v37 = vmax.f32 %v4207_v20, %v4208_v7  ;;  %v3352_v30 = vrot.slane %v7848_v61, %v7346_v62 }
 0x2e8   : > { %v5115_v57 = vsel %vm5057_vm14, %v5114_v43, %v5113_v26  ;;  %v4191_v3 = vrot.slane %v4190_v2, 1  ;;  %v4204_v11 = vmax.f32 %v4202_v45, %v4203_v39  ;;  %v3359_v49 = vrot.slane %v3345_v40, %v7346_v62 }
 0x2e9   : > { %v5117_v14 = vsel %vm5060_vm15, %v5116_v51, %v5115_v57  ;;  %v4198_v55 = vrot.slane %v4197_v1, 1  ;;  %v4210_v24 = vrot.slane %v4209_v37, 2  ;;  %v3360_v15 = vcombine.high %v3352_v30, %v3352_v30 }
 0x2ea   : > { %v5164_v29 = vpack.c.b16 %v5117_v14, %v5117_v14  ;;  %v4192_v22 = vmax.f32 %v4190_v2, %v4191_v3  ;;  %v4205_v31 = vrot.slane %v4204_v11, 1  ;;  %v3361_v50 = vcombine.high %v3359_v49, %v3359_v49 }
 0x2eb   : > { %v4199_v17 = vmax.f32 %v4197_v1, %v4198_v55  ;;  %v4211_v52 = vmax.f32 %v4209_v37, %v4210_v24  ;;  %v4270_v61 = vsel %vm726_vm1, %v3352_v30, -inf  ;;  %v4277_v32 = vsel %vm726_vm1, %v3360_v15, -inf }
 0x2ec   : > { %5180 = vst [vmem:[%s7497_s4 + $0x10] sm:$0xf] %v5164_v29  ;;  %v4206_v34 = vmax.f32 %v4204_v11, %v4205_v31  ;;  %v4562_v44 = vmax.f32 %v4192_v22, %v7877_v58  ;;  %v4271_v46 = vrot.slane %v4270_v61, 4  ;;  %v4278_v6 = vrot.slane %v4277_v32, 4 }
 0x2ed   : > { %v4212_v41 = vrot.slane %v4211_v52, 1  ;;  %v4563_v28 = vmax.f32 %v4199_v17, %v7879_v23  ;;  %v4284_v27 = vsel %vm726_vm1, %v3359_v49, -inf  ;;  %v4291_v20 = vsel %vm726_vm1, %v3361_v50, -inf }
 0x2ee   : > { %v4564_v19 = vmax.f32 %v4206_v34, %v7891_v13  ;;  %v4633_v43 = vadd.f32 %v7666_v48, %v4562_v44  ;;  %v4272_v54 = vmax.f32 %v4270_v61, %v4271_v46  ;;  %v4279_v45 = vmax.f32 %v4277_v32, %v4278_v6 }
 0x2ef   : > { %v4213_v21 = vmax.f32 %v4211_v52, %v4212_v41  ;;  %v4634_v12 = vadd.f32 %v7666_v48, %v4563_v28  ;;  %v4285_v42 = vrot.slane %v4284_v27, 4  ;;  %v4292_v58 = vrot.slane %v4291_v20, 4 }
 0x2f0   : > { %v4635_v7 = vadd.f32 %v7666_v48, %v4564_v19  ;;  %v4697_v51 = vmax.f32 %v4633_v43, 0.0  ;;  %v4273_v2 = vrot.slane %v4272_v54, 2  ;;  %v4280_v23 = vrot.slane %v4279_v45, 2 }
 0x2f1   : > { %v4565_v39 = vmax.f32 %v4213_v21, %v7893_v4  ;;  %v4698_v40 = vmax.f32 %v4634_v12, 0.0  ;;  %v4286_v26 = vmax.f32 %v4284_v27, %v4285_v42  ;;  %v4293_v1 = vmax.f32 %v4291_v20, %v4292_v58 }
 0x2f2   : > { %v4699_v13 = vmax.f32 %v4635_v7, 0.0  ;;  %v5576_v37 = vpack.c.bf16 %v4697_v51, %v4697_v51  ;;  %v4274_v30 = vmax.f32 %v4272_v54, %v4273_v2  ;;  %v4281_v57 = vmax.f32 %v4279_v45, %v4280_v23 }
 0x2f3   : > { %v4636_v3 = vadd.f32 %v7666_v48, %v4565_v39  ;;  %v5577_v11 = vpack.c.bf16 %v4698_v40, %v4698_v40  ;;  %v4287_v49 = vrot.slane %v4286_v26, 2  ;;  %v4294_v14 = vrot.slane %v4293_v1, 2 }
 0x2f4   : > { %v5578_v55 = vpack.c.bf16 %v4699_v13, %v4699_v13  ;;  %v5017_v24 = vunpack.c.l.b16 %v5576_v37  ;;  %v4275_v15 = vrot.slane %v4274_v30, 1  ;;  %v4282_v29 = vrot.slane %v4281_v57, 1 }
 0x2f5   : > { %v4700_v22 = vmax.f32 %v4636_v3, 0.0  ;;  %v5018_v31 = vunpack.c.l.b16 %v5577_v11  ;;  %v4288_v50 = vmax.f32 %v4286_v26, %v4287_v49  ;;  %v4295_v4 = vmax.f32 %v4293_v1, %v4294_v14 }
 0x2f6   : > { %v5019_v17 = vunpack.c.l.b16 %v5578_v55  ;;  %v7923_v52 = vmax.f32 %v4274_v30, %v4275_v15  ;;  %v7925_v61 = vmax.f32 %v4281_v57, %v4282_v29  ;;  %v6084_v32 = vadd.f32 %v7631_v0, %v7629_v60 }
 0x2f7   : > { %v5579_v48 = vpack.c.bf16 %v4700_v22, %v4700_v22  ;;  %v5118_v34 = vrot.slane %v5018_v31, 7  ;;  %v4289_v44 = vrot.slane %v4288_v50, 1  ;;  %v4296_v46 = vrot.slane %v4295_v4, 1 }
 0x2f8   : > { %v5120_v6 = vrot.slane %v5019_v17, 6  ;;  %v3311_v41 = vcombine.high %v6084_v32, %v6084_v32  ;;  %v3318_v28 = vrot.slane %v6084_v32, %v7346_v62  ;;  %v6085_v27 = vadd.f32 %v7671_v10, %v7669_v63 }
 0x2f9   : > { %v5020_v20 = vunpack.c.l.b16 %v5579_v48  ;;  %v5119_v19 = vsel %vm5042_vm9, %v5118_v34, %v5017_v24  ;;  %v7933_v43 = vmax.f32 %v4288_v50, %v4289_v44  ;;  %v7935_v54 = vmax.f32 %v4295_v4, %v4296_v46 }
 0x2fa   : > { %v5121_v60 = vsel %vm5045_vm10, %v5120_v6, %v5119_v19  ;;  %v3325_v0 = vrot.slane %v3311_v41, %v7346_v62  ;;  %v3326_v45 = vcombine.high %v3318_v28, %v3318_v28  ;;  %v4214_v21 = vsel %vm726_vm1, %v3318_v28, -inf }
 0x2fb   : > { %v5122_v12 = vrot.slane %v5020_v20, 5  ;;  %v4215_v42 = vrot.slane %v4214_v21, 4  ;;  %v3396_v58 = vcombine.high %v6085_v27, %v6085_v27  ;;  %v3403_v7 = vrot.slane %v6085_v27, %v7346_v62 }
 0x2fc   : > { %v3327_v63 = vcombine.high %v3325_v0, %v3325_v0  ;;  %v4221_v10 = vsel %vm726_vm1, %v3326_v45, -inf  ;;  %v4228_v51 = vsel %vm726_vm1, %v3325_v0, -inf  ;;  %v7945_v2 = vadd.f32 %v7679_v56, %v7677_v59 }
 0x2fd   : > { %v4216_v23 = vmax.f32 %v4214_v21, %v4215_v42  ;;  %v4222_v39 = vrot.slane %v4221_v10, 4  ;;  %v4229_v40 = vrot.slane %v4228_v51, 4  ;;  %v7948_v26 = vsel %vm5048_vm11, %v5122_v12, %v5121_v60 }
 0x2fe   : > { %v4235_v1 = vsel %vm726_vm1, %v3327_v63, -inf  ;;  %v3410_v13 = vrot.slane %v3396_v58, %v7346_v62  ;;  %v3411_v37 = vcombine.high %v3403_v7, %v3403_v7  ;;  %v4354_v30 = vsel %vm726_vm1, %v3403_v7, -inf }
 0x2ff   : > { %v4217_v57 = vrot.slane %v4216_v23, 2  ;;  %v4223_v3 = vmax.f32 %v4221_v10, %v4222_v39  ;;  %v4230_v11 = vmax.f32 %v4228_v51, %v4229_v40  ;;  %v4236_v49 = vrot.slane %v4235_v1, 4 }
 0x300   : > { %v3412_v14 = vcombine.high %v3410_v13, %v3410_v13  ;;  %v4355_v59 = vrot.slane %v4354_v30, 4  ;;  %v4361_v56 = vsel %vm726_vm1, %v3411_v37, -inf  ;;  %v4368_v55 = vsel %vm726_vm1, %v3410_v13, -inf  ;;  %v7962_v37 = vld [vmem:[%s8122_s2] ss:$0 sm:$0xff] }
 0x301   : > { %v4218_v24 = vmax.f32 %v4216_v23, %v4217_v57  ;;  %v4224_v15 = vrot.slane %v4223_v3, 2  ;;  %v4231_v29 = vrot.slane %v4230_v11, 2  ;;  %v4237_v22 = vmax.f32 %v4235_v1, %v4236_v49 }
 0x302   : > { %v4356_v31 = vmax.f32 %v4354_v30, %v4355_v59  ;;  %v4362_v50 = vrot.slane %v4361_v56, 4  ;;  %v4369_v4 = vrot.slane %v4368_v55, 4  ;;  %v4375_v17 = vsel %vm726_vm1, %v3412_v14, -inf }
 0x303   : > { %v4219_v32 = vrot.slane %v4218_v24, 1  ;;  %v4225_v48 = vmax.f32 %v4223_v3, %v4224_v15  ;;  %v4232_v34 = vmax.f32 %v4230_v11, %v4231_v29  ;;  %v4238_v44 = vrot.slane %v4237_v22, 2 }
 0x304   : > { %v4357_v46 = vrot.slane %v4356_v31, 2  ;;  %v4363_v6 = vmax.f32 %v4361_v56, %v4362_v50  ;;  %v4370_v41 = vmax.f32 %v4368_v55, %v4369_v4  ;;  %v4376_v28 = vrot.slane %v4375_v17, 4 }
 0x305   : > { %v4220_v27 = vmax.f32 %v4218_v24, %v4219_v32  ;;  %v4226_v20 = vrot.slane %v4225_v48, 1  ;;  %v4233_v19 = vrot.slane %v4232_v34, 1  ;;  %v4239_v60 = vmax.f32 %v4237_v22, %v4238_v44 }
 0x306   : > { %v4358_v0 = vmax.f32 %v4356_v31, %v4357_v46  ;;  %v4364_v45 = vrot.slane %v4363_v6, 2  ;;  %v4371_v21 = vrot.slane %v4370_v41, 2  ;;  %v4377_v12 = vmax.f32 %v4375_v17, %v4376_v28 }
 0x307   : > { %v4227_v42 = vmax.f32 %v4225_v48, %v4226_v20  ;;  %v4234_v58 = vmax.f32 %v4232_v34, %v4233_v19  ;;  %v4240_v7 = vrot.slane %v4239_v60, 1  ;;  %v4566_v63 = vmax.f32 %v4220_v27, %v7923_v52 }
 0x308   : > { %v4359_v10 = vrot.slane %v4358_v0, 1  ;;  %v4365_v51 = vmax.f32 %v4363_v6, %v4364_v45  ;;  %v4372_v23 = vmax.f32 %v4370_v41, %v4371_v21  ;;  %v4378_v39 = vrot.slane %v4377_v12, 2 }
 0x309   : > { %v4241_v40 = vmax.f32 %v4239_v60, %v4240_v7  ;;  %v4567_v1 = vmax.f32 %v4227_v42, %v7925_v61  ;;  %v4568_v13 = vmax.f32 %v4234_v58, %v7933_v43  ;;  %v4637_v30 = vadd.f32 %v7962_v37, %v4566_v63 }
 0x30a   : > { %v7965_v57 = vmax.f32 %v4358_v0, %v4359_v10  ;;  %v4366_v3 = vrot.slane %v4365_v51, 1  ;;  %v4373_v52 = vrot.slane %v4372_v23, 1  ;;  %v4379_v11 = vmax.f32 %v4377_v12, %v4378_v39 }
 0x30b   : > { %v4569_v49 = vmax.f32 %v4241_v40, %v7935_v54  ;;  %v4638_v14 = vadd.f32 %v7962_v37, %v4567_v1  ;;  %v4639_v61 = vadd.f32 %v7962_v37, %v4568_v13  ;;  %v4701_v59 = vmax.f32 %v4637_v30, 0.0 }
 0x30c   : > { %v7970_v43 = vmax.f32 %v4365_v51, %v4366_v3  ;;  %v7972_v56 = vmax.f32 %v4372_v23, %v4373_v52  ;;  %v4380_v55 = vrot.slane %v4379_v11, 1  ;;  %v3362_v24 = vcombine.high %v7945_v2, %v7945_v2 }
 0x30d   : > { %v4640_v15 = vadd.f32 %v7962_v37, %v4569_v49  ;;  %v4702_v29 = vmax.f32 %v4638_v14, 0.0  ;;  %v4703_v22 = vmax.f32 %v4639_v61, 0.0  ;;  %v5580_v31 = vpack.c.bf16 %v4701_v59, %v4701_v59 }
 0x30e   : > { %v7977_v50 = vmax.f32 %v4379_v11, %v4380_v55  ;;  %v3369_v54 = vrot.slane %v7945_v2, %v7346_v62  ;;  %v3376_v4 = vrot.slane %v3362_v24, %v7346_v62  ;;  %v6087_v17 = vadd.f32 %v7715_v25, %v7713_v38 }
 0x30f   : > { %v4704_v32 = vmax.f32 %v4640_v15, 0.0  ;;  %v5581_v48 = vpack.c.bf16 %v4702_v29, %v4702_v29  ;;  %v5582_v34 = vpack.c.bf16 %v4703_v22, %v4703_v22  ;;  %v5021_v44 = vunpack.c.l.b16 %v5580_v31 }
 0x310   : > { %v3377_v46 = vcombine.high %v3369_v54, %v3369_v54  ;;  %v3378_v6 = vcombine.high %v3376_v4, %v3376_v4  ;;  %v4298_v41 = vsel %vm726_vm1, %v3369_v54, -inf  ;;  %v4312_v28 = vsel %vm726_vm1, %v3376_v4, -inf }
 0x311   : > { %v5583_v27 = vpack.c.bf16 %v4704_v32, %v4704_v32  ;;  %v5022_v20 = vunpack.c.l.b16 %v5581_v48  ;;  %v5023_v19 = vunpack.c.l.b16 %v5582_v34  ;;  %v5124_v60 = vrot.slane %v5021_v44, 4 }
 0x312   : > { %v4299_v2 = vrot.slane %v4298_v41, 4  ;;  %v4305_v0 = vsel %vm726_vm1, %v3377_v46, -inf  ;;  %v4313_v45 = vrot.slane %v4312_v28, 4  ;;  %v4319_v38 = vsel %vm726_vm1, %v3378_v6, -inf }
 0x313   : > { %v5024_v25 = vunpack.c.l.b16 %v5583_v27  ;;  %v5125_v21 = vsel %vm5051_vm12, %v5124_v60, %v7948_v26  ;;  %v5126_v12 = vrot.slane %v5022_v20, 3  ;;  %v5128_v42 = vrot.slane %v5023_v19, 2 }
 0x314   : > { %v4300_v58 = vmax.f32 %v4298_v41, %v4299_v2  ;;  %v4306_v7 = vrot.slane %v4305_v0, 4  ;;  %v4314_v63 = vmax.f32 %v4312_v28, %v4313_v45  ;;  %v4320_v10 = vrot.slane %v4319_v38, 4 }
 0x315   : > { %v5127_v51 = vsel %vm5054_vm13, %v5126_v12, %v5125_v21  ;;  %v5130_v23 = vrot.slane %v5024_v25, 1  ;;  %v3413_v39 = vcombine.high %v6087_v17, %v6087_v17  ;;  %v3420_v40 = vrot.slane %v6087_v17, %v7346_v62 }
 0x316   : > { %v5129_v1 = vsel %vm5057_vm14, %v5128_v42, %v5127_v51  ;;  %v4301_v13 = vrot.slane %v4300_v58, 2  ;;  %v4307_v30 = vmax.f32 %v4305_v0, %v4306_v7  ;;  %v4315_v3 = vrot.slane %v4314_v63, 2 }
 0x317   : > { %v5131_v26 = vsel %vm5060_vm15, %v5130_v23, %v5129_v1  ;;  %v4321_v52 = vmax.f32 %v4319_v38, %v4320_v10  ;;  %v3427_v11 = vrot.slane %v3413_v39, %v7346_v62  ;;  %v3428_v49 = vcombine.high %v3420_v40, %v3420_v40 }
 0x318   : > { %v5165_v14 = vpack.c.b16 %v5131_v26, %v5131_v26  ;;  %v4302_v61 = vmax.f32 %v4300_v58, %v4301_v13  ;;  %v4308_v59 = vrot.slane %v4307_v30, 2  ;;  %v4316_v55 = vmax.f32 %v4314_v63, %v4315_v3 }
 0x319   : > { %v4322_v24 = vrot.slane %v4321_v52, 2  ;;  %v3429_v15 = vcombine.high %v3427_v11, %v3427_v11  ;;  %v4382_v29 = vsel %vm726_vm1, %v3420_v40, -inf  ;;  %v4389_v22 = vsel %vm726_vm1, %v3428_v49, -inf }
 0x31a   : > { %5181 = vst [vmem:[%s7497_s4 + $0x14] sm:$0xf] %v5165_v14  ;;  %v4303_v31 = vrot.slane %v4302_v61, 1  ;;  %v4309_v54 = vmax.f32 %v4307_v30, %v4308_v59  ;;  %v4317_v4 = vrot.slane %v4316_v55, 1  ;;  %v4383_v17 = vrot.slane %v4382_v29, 4 }
 0x31b   : > { %v4323_v32 = vmax.f32 %v4321_v52, %v4322_v24  ;;  %v4390_v48 = vrot.slane %v4389_v22, 4  ;;  %v4396_v34 = vsel %vm726_vm1, %v3427_v11, -inf  ;;  %v4403_v44 = vsel %vm726_vm1, %v3429_v15, -inf }
 0x31c   : > { %v4304_v46 = vmax.f32 %v4302_v61, %v4303_v31  ;;  %v4310_v6 = vrot.slane %v4309_v54, 1  ;;  %v4318_v41 = vmax.f32 %v4316_v55, %v4317_v4  ;;  %v4384_v28 = vmax.f32 %v4382_v29, %v4383_v17 }
 0x31d   : > { %v4324_v27 = vrot.slane %v4323_v32, 1  ;;  %v4391_v20 = vmax.f32 %v4389_v22, %v4390_v48  ;;  %v4397_v19 = vrot.slane %v4396_v34, 4  ;;  %v4404_v60 = vrot.slane %v4403_v44, 4 }
 0x31e   : > { %v4311_v2 = vmax.f32 %v4309_v54, %v4310_v6  ;;  %v4570_v0 = vmax.f32 %v4304_v46, %v7965_v57  ;;  %v4572_v45 = vmax.f32 %v4318_v41, %v7972_v56  ;;  %v4385_v38 = vrot.slane %v4384_v28, 2 }
 0x31f   : > { %v4325_v25 = vmax.f32 %v4323_v32, %v4324_v27  ;;  %v4392_v21 = vrot.slane %v4391_v20, 2  ;;  %v4398_v12 = vmax.f32 %v4396_v34, %v4397_v19  ;;  %v4405_v42 = vmax.f32 %v4403_v44, %v4404_v60 }
 0x320   : > { %v4571_v58 = vmax.f32 %v4311_v2, %v7970_v43  ;;  %v4641_v7 = vadd.f32 %v7962_v37, %v4570_v0  ;;  %v4643_v63 = vadd.f32 %v7962_v37, %v4572_v45  ;;  %v4386_v10 = vmax.f32 %v4384_v28, %v4385_v38 }
 0x321   : > { %v4573_v51 = vmax.f32 %v4325_v25, %v7977_v50  ;;  %v4393_v23 = vmax.f32 %v4391_v20, %v4392_v21  ;;  %v4399_v39 = vrot.slane %v4398_v12, 2  ;;  %v4406_v40 = vrot.slane %v4405_v42, 2 }
 0x322   : > { %v4642_v57 = vadd.f32 %v7962_v37, %v4571_v58  ;;  %v4705_v56 = vmax.f32 %v4641_v7, 0.0  ;;  %v4707_v1 = vmax.f32 %v4643_v63, 0.0  ;;  %v4387_v13 = vrot.slane %v4386_v10, 1 }
 0x323   : > { %v4644_v30 = vadd.f32 %v7962_v37, %v4573_v51  ;;  %v4394_v3 = vrot.slane %v4393_v23, 1  ;;  %v4400_v26 = vmax.f32 %v4398_v12, %v4399_v39  ;;  %v4407_v43 = vmax.f32 %v4405_v42, %v4406_v40 }
 0x324   : > { %v4706_v52 = vmax.f32 %v4642_v57, 0.0  ;;  %v5584_v11 = vpack.c.bf16 %v4705_v56, %v4705_v56  ;;  %v5586_v49 = vpack.c.bf16 %v4707_v1, %v4707_v1  ;;  %v8008_v14 = vmax.f32 %v4386_v10, %v4387_v13 }
 0x325   : > { %v4708_v61 = vmax.f32 %v4644_v30, 0.0  ;;  %v8010_v50 = vmax.f32 %v4393_v23, %v4394_v3  ;;  %v4401_v59 = vrot.slane %v4400_v26, 1  ;;  %v4408_v55 = vrot.slane %v4407_v43, 1 }
 0x326   : > { %v5585_v24 = vpack.c.bf16 %v4706_v52, %v4706_v52  ;;  %v5025_v15 = vunpack.c.l.b16 %v5584_v11  ;;  %v5027_v29 = vunpack.c.l.b16 %v5586_v49  ;;  %v6088_v22 = vadd.f32 %v7731_v35, %v7729_v47 }
 0x327   : > { %v5587_v31 = vpack.c.bf16 %v4708_v61, %v4708_v61  ;;  %v8014_v54 = vmax.f32 %v4400_v26, %v4401_v59  ;;  %v8016_v4 = vmax.f32 %v4407_v43, %v4408_v55  ;;  %v6089_v17 = vadd.f32 %v7772_v5, %v7770_v36 }
 0x328   : > { %v5026_v32 = vunpack.c.l.b16 %v5585_v24  ;;  %v5134_v48 = vrot.slane %v5027_v29, 6  ;;  %v3379_v34 = vcombine.high %v6088_v22, %v6088_v22  ;;  %v3386_v44 = vrot.slane %v6088_v22, %v7346_v62 }
 0x329   : > { %v5028_v46 = vunpack.c.l.b16 %v5587_v31  ;;  %v3464_v6 = vcombine.high %v6089_v17, %v6089_v17  ;;  %v3471_v41 = vrot.slane %v6089_v17, %v7346_v62  ;;  %v8024_v47 = vadd.f32 %v7779_v53, %v7777_v33 }
 0x32a   : > { %v5132_v35 = vrot.slane %v5026_v32, 7  ;;  %v3393_v28 = vrot.slane %v3379_v34, %v7346_v62  ;;  %v3394_v27 = vcombine.high %v3386_v44, %v3386_v44  ;;  %v4326_v20 = vsel %vm726_vm1, %v3386_v44, -inf }
 0x32b   : > { %v5136_v36 = vrot.slane %v5028_v46, 5  ;;  %v4327_v5 = vrot.slane %v4326_v20, 4  ;;  %v3478_v19 = vrot.slane %v3464_v6, %v7346_v62  ;;  %v3479_v60 = vcombine.high %v3471_v41, %v3471_v41 }
 0x32c   : > { %v5133_v2 = vsel %vm5042_vm9, %v5132_v35, %v5025_v15  ;;  %v3395_v0 = vcombine.high %v3393_v28, %v3393_v28  ;;  %v4333_v45 = vsel %vm726_vm1, %v3394_v27, -inf  ;;  %v4340_v38 = vsel %vm726_vm1, %v3393_v28, -inf }
 0x32d   : > { %v5135_v33 = vsel %vm5045_vm10, %v5134_v48, %v5133_v2  ;;  %v4328_v53 = vmax.f32 %v4326_v20, %v4327_v5  ;;  %v4334_v25 = vrot.slane %v4333_v45, 4  ;;  %v4341_v21 = vrot.slane %v4340_v38, 4 }
 0x32e   : > { %v4347_v12 = vsel %vm726_vm1, %v3395_v0, -inf  ;;  %v8035_v42 = vsel %vm5048_vm11, %v5136_v36, %v5135_v33  ;;  %v3480_v58 = vcombine.high %v3478_v19, %v3478_v19  ;;  %v4466_v7 = vsel %vm726_vm1, %v3471_v41, -inf }
 0x32f   : > { %v4329_v63 = vrot.slane %v4328_v53, 2  ;;  %v4335_v10 = vmax.f32 %v4333_v45, %v4334_v25  ;;  %v4342_v51 = vmax.f32 %v4340_v38, %v4341_v21  ;;  %v4348_v23 = vrot.slane %v4347_v12, 4 }
 0x330   : > { %v4467_v39 = vrot.slane %v4466_v7, 4  ;;  %v4473_v40 = vsel %vm726_vm1, %v3479_v60, -inf  ;;  %v4480_v57 = vsel %vm726_vm1, %v3478_v19, -inf  ;;  %v4487_v56 = vsel %vm726_vm1, %v3480_v58, -inf }
 0x331   : > { %v4330_v1 = vmax.f32 %v4328_v53, %v4329_v63  ;;  %v4336_v13 = vrot.slane %v4335_v10, 2  ;;  %v4343_v30 = vrot.slane %v4342_v51, 2  ;;  %v4349_v3 = vmax.f32 %v4347_v12, %v4348_v23 }
 0x332   : > { %v4468_v26 = vmax.f32 %v4466_v7, %v4467_v39  ;;  %v4474_v43 = vrot.slane %v4473_v40, 4  ;;  %v4481_v52 = vrot.slane %v4480_v57, 4  ;;  %v4488_v11 = vrot.slane %v4487_v56, 4 }
 0x333   : > { %v4331_v49 = vrot.slane %v4330_v1, 1  ;;  %v4337_v61 = vmax.f32 %v4335_v10, %v4336_v13  ;;  %v4344_v59 = vmax.f32 %v4342_v51, %v4343_v30  ;;  %v4350_v55 = vrot.slane %v4349_v3, 2 }
 0x334   : > { %v4469_v24 = vrot.slane %v4468_v26, 2  ;;  %v4475_v15 = vmax.f32 %v4473_v40, %v4474_v43  ;;  %v4482_v29 = vmax.f32 %v4480_v57, %v4481_v52  ;;  %v4489_v22 = vmax.f32 %v4487_v56, %v4488_v11 }
 0x335   : > { %v4332_v31 = vmax.f32 %v4330_v1, %v4331_v49  ;;  %v4338_v17 = vrot.slane %v4337_v61, 1  ;;  %v4345_v32 = vrot.slane %v4344_v59, 1  ;;  %v4351_v48 = vmax.f32 %v4349_v3, %v4350_v55 }
 0x336   : > { %v4470_v34 = vmax.f32 %v4468_v26, %v4469_v24  ;;  %v4476_v44 = vrot.slane %v4475_v15, 2  ;;  %v4483_v46 = vrot.slane %v4482_v29, 2  ;;  %v4490_v6 = vrot.slane %v4489_v22, 2 }
 0x337   : > { %v4339_v41 = vmax.f32 %v4337_v61, %v4338_v17  ;;  %v4346_v35 = vmax.f32 %v4344_v59, %v4345_v32  ;;  %v4352_v28 = vrot.slane %v4351_v48, 1  ;;  %v4574_v27 = vmax.f32 %v4332_v31, %v8008_v14 }
 0x338   : > { %v4471_v20 = vrot.slane %v4470_v34, 1  ;;  %v8042_v36 = vmax.f32 %v4475_v15, %v4476_v44  ;;  %v4484_v5 = vmax.f32 %v4482_v29, %v4483_v46  ;;  %v8044_v19 = vmax.f32 %v4489_v22, %v4490_v6 }
 0x339   : > { %v4353_v60 = vmax.f32 %v4351_v48, %v4352_v28  ;;  %v4575_v2 = vmax.f32 %v4339_v41, %v8010_v50  ;;  %v4576_v0 = vmax.f32 %v4346_v35, %v8014_v54  ;;  %v4645_v45 = vadd.f32 %v7962_v37, %v4574_v27 }
 0x33a   : > { %v8049_v38 = vmax.f32 %v4470_v34, %v4471_v20  ;;  %v4485_v33 = vrot.slane %v4484_v5, 1  ;;  %v4478_v12 = vrot.slane %v8042_v36, 1  ;;  %v4492_v50 = vrot.slane %v8044_v19, 1 }
 0x33b   : > { %v4577_v53 = vmax.f32 %v4353_v60, %v8016_v4  ;;  %v4646_v14 = vadd.f32 %v7962_v37, %v4575_v2  ;;  %v4647_v25 = vadd.f32 %v7962_v37, %v4576_v0  ;;  %v4709_v21 = vmax.f32 %v4645_v45, 0.0 }
 0x33c   : > { %v8055_v58 = vmax.f32 %v4484_v5, %v4485_v33  ;;  %v3430_v54 = vcombine.high %v8024_v47, %v8024_v47  ;;  %v3437_v4 = vrot.slane %v8024_v47, %v7346_v62  ;;  %v6091_v39 = vadd.f32 %v7816_v18, %v7814_v9 }
 0x33d   : > { %v4648_v7 = vadd.f32 %v7962_v37, %v4577_v53  ;;  %v4710_v63 = vmax.f32 %v4646_v14, 0.0  ;;  %v4711_v10 = vmax.f32 %v4647_v25, 0.0  ;;  %v5588_v51 = vpack.c.bf16 %v4709_v21, %v4709_v21 }
 0x33e   : > { %v3444_v23 = vrot.slane %v3430_v54, %v7346_v62  ;;  %v8068_v40 = vadd.f32 %v7834_v8, %v7832_v16  ;;  %v3445_v30 = vcombine.high %v3437_v4, %v3437_v4  ;;  %v4410_v26 = vsel %vm726_vm1, %v3437_v4, -inf }
 0x33f   : > { %v4712_v57 = vmax.f32 %v4648_v7, 0.0  ;;  %v5589_v56 = vpack.c.bf16 %v4710_v63, %v4710_v63  ;;  %v5590_v1 = vpack.c.bf16 %v4711_v10, %v4711_v10  ;;  %v5029_v13 = vunpack.c.l.b16 %v5588_v51 }
 0x340   : > { %v3446_v3 = vcombine.high %v3444_v23, %v3444_v23  ;;  %v4424_v43 = vsel %vm726_vm1, %v3444_v23, -inf  ;;  %v4411_v61 = vrot.slane %v4410_v26, 4  ;;  %v4417_v9 = vsel %vm726_vm1, %v3445_v30, -inf }
 0x341   : > { %v5591_v47 = vpack.c.bf16 %v4712_v57, %v4712_v57  ;;  %v5030_v52 = vunpack.c.l.b16 %v5589_v56  ;;  %v5031_v11 = vunpack.c.l.b16 %v5590_v1  ;;  %v5138_v49 = vrot.slane %v5029_v13, 4 }
 0x342   : > { %v4425_v18 = vrot.slane %v4424_v43, 4  ;;  %v4431_v16 = vsel %vm726_vm1, %v3446_v3, -inf  ;;  %v4412_v15 = vmax.f32 %v4410_v26, %v4411_v61  ;;  %v4418_v29 = vrot.slane %v4417_v9, 4 }
 0x343   : > { %v5032_v8 = vunpack.c.l.b16 %v5591_v47  ;;  %v5139_v59 = vsel %vm5051_vm12, %v5138_v49, %v8035_v42  ;;  %v5140_v55 = vrot.slane %v5030_v52, 3  ;;  %v5142_v24 = vrot.slane %v5031_v11, 2 }
 0x344   : > { %v4426_v22 = vmax.f32 %v4424_v43, %v4425_v18  ;;  %v4432_v31 = vrot.slane %v4431_v16, 4  ;;  %v3481_v48 = vcombine.high %v6091_v39, %v6091_v39  ;;  %v3488_v34 = vrot.slane %v6091_v39, %v7346_v62 }
 0x345   : > { %v5141_v17 = vsel %vm5054_vm13, %v5140_v55, %v5139_v59  ;;  %v5144_v32 = vrot.slane %v5032_v8, 1  ;;  %v4413_v46 = vrot.slane %v4412_v15, 2  ;;  %v4419_v6 = vmax.f32 %v4417_v9, %v4418_v29 }
 0x346   : > { %v5143_v44 = vsel %vm5057_vm14, %v5142_v24, %v5141_v17  ;;  %v4427_v41 = vrot.slane %v4426_v22, 2  ;;  %v4433_v35 = vmax.f32 %v4431_v16, %v4432_v31  ;;  %v3495_v28 = vrot.slane %v3481_v48, %v7346_v62 }
 0x347   : > { %v5145_v42 = vsel %vm5060_vm15, %v5144_v32, %v5143_v44  ;;  %v3496_v27 = vcombine.high %v3488_v34, %v3488_v34  ;;  %v4414_v5 = vmax.f32 %v4412_v15, %v4413_v46  ;;  %v4420_v60 = vrot.slane %v4419_v6, 2 }
 0x348   : > { %v5166_v20 = vpack.c.b16 %v5145_v42, %v5145_v42  ;;  %v4428_v2 = vmax.f32 %v4426_v22, %v4427_v41  ;;  %v4434_v0 = vrot.slane %v4433_v35, 2  ;;  %v3497_v45 = vcombine.high %v3495_v28, %v3495_v28 }
 0x349   : > { %v4494_v33 = vsel %vm726_vm1, %v3488_v34, -inf  ;;  %v4501_v53 = vsel %vm726_vm1, %v3496_v27, -inf  ;;  %v4415_v14 = vrot.slane %v4414_v5, 1  ;;  %v4421_v25 = vmax.f32 %v4419_v6, %v4420_v60 }
 0x34a   : > { %5182 = vst [vmem:[%s7497_s4 + $0x18] sm:$0xf] %v5166_v20  ;;  %v4429_v21 = vrot.slane %v4428_v2, 1  ;;  %v4495_v54 = vrot.slane %v4494_v33, 4  ;;  %v4479_v7 = vmax.f32 %v8042_v36, %v4478_v12  ;;  %v4435_v63 = vmax.f32 %v4433_v35, %v4434_v0 }
 0x34b   : > { %v4502_v10 = vrot.slane %v4501_v53, 4  ;;  %v4416_v51 = vmax.f32 %v4414_v5, %v4415_v14  ;;  %v4422_v4 = vrot.slane %v4421_v25, 1  ;;  %v4508_v39 = vsel %vm726_vm1, %v3495_v28, -inf }
 0x34c   : > { %v4430_v23 = vmax.f32 %v4428_v2, %v4429_v21  ;;  %v4493_v57 = vmax.f32 %v8044_v19, %v4492_v50  ;;  %v4436_v56 = vrot.slane %v4435_v63, 1  ;;  %v4515_v1 = vsel %vm726_vm1, %v3497_v45, -inf }
 0x34d   : > { %v4423_v13 = vmax.f32 %v4421_v25, %v4422_v4  ;;  %v4578_v30 = vmax.f32 %v4416_v51, %v8049_v38  ;;  %v4496_v36 = vmax.f32 %v4494_v33, %v4495_v54  ;;  %v4503_v26 = vmax.f32 %v4501_v53, %v4502_v10 }
 0x34e   : > { %v4580_v3 = vmax.f32 %v4430_v23, %v8055_v58  ;;  %v4437_v12 = vmax.f32 %v4435_v63, %v4436_v56  ;;  %v4509_v43 = vrot.slane %v4508_v39, 4  ;;  %v4516_v49 = vrot.slane %v4515_v1, 4 }
 0x34f   : > { %v4579_v47 = vmax.f32 %v4423_v13, %v4479_v7  ;;  %v4649_v52 = vadd.f32 %v7962_v37, %v4578_v30  ;;  %v4497_v18 = vrot.slane %v4496_v36, 2  ;;  %v4504_v16 = vrot.slane %v4503_v26, 2 }
 0x350   : > { %v4651_v11 = vadd.f32 %v7962_v37, %v4580_v3  ;;  %v4581_v61 = vmax.f32 %v4437_v12, %v4493_v57  ;;  %v4510_v58 = vmax.f32 %v4508_v39, %v4509_v43  ;;  %v4517_v24 = vmax.f32 %v4515_v1, %v4516_v49 }
 0x351   : > { %v4650_v19 = vadd.f32 %v7962_v37, %v4579_v47  ;;  %v4713_v50 = vmax.f32 %v4649_v52, 0.0  ;;  %v4498_v31 = vmax.f32 %v4496_v36, %v4497_v18  ;;  %v3447_v17 = vcombine.high %v8068_v40, %v8068_v40 }
 0x352   : > { %v4715_v9 = vmax.f32 %v4651_v11, 0.0  ;;  %v4652_v38 = vadd.f32 %v7962_v37, %v4581_v61  ;;  %v4505_v48 = vmax.f32 %v4503_v26, %v4504_v16  ;;  %v4511_v34 = vrot.slane %v4510_v58, 2 }
 0x353   : > { %v4714_v8 = vmax.f32 %v4650_v19, 0.0  ;;  %v5592_v59 = vpack.c.bf16 %v4713_v50, %v4713_v50  ;;  %v3454_v44 = vrot.slane %v8068_v40, %v7346_v62  ;;  %v4518_v41 = vrot.slane %v4517_v24, 2 }
 0x354   : > { %v5594_v55 = vpack.c.bf16 %v4715_v9, %v4715_v9  ;;  %v4716_v15 = vmax.f32 %v4652_v38, 0.0  ;;  %v3461_v42 = vrot.slane %v3447_v17, %v7346_v62  ;;  %v4512_v33 = vmax.f32 %v4510_v58, %v4511_v34 }
 0x355   : > { %v5593_v29 = vpack.c.bf16 %v4714_v8, %v4714_v8  ;;  %v5033_v46 = vunpack.c.l.b16 %v5592_v59  ;;  %v3462_v27 = vcombine.high %v3454_v44, %v3454_v44  ;;  %v4438_v20 = vsel %vm726_vm1, %v3454_v44, -inf }
 0x356   : > { %v5035_v22 = vunpack.c.l.b16 %v5594_v55  ;;  %v5595_v32 = vpack.c.bf16 %v4716_v15, %v4716_v15  ;;  %v3463_v60 = vcombine.high %v3461_v42, %v3461_v42  ;;  %v4439_v2 = vrot.slane %v4438_v20, 4 }
 0x357   : > { %v5034_v6 = vunpack.c.l.b16 %v5593_v29  ;;  %v4452_v0 = vsel %vm726_vm1, %v3461_v42, -inf  ;;  %v4445_v53 = vsel %vm726_vm1, %v3462_v27, -inf  ;;  %v4519_v7 = vmax.f32 %v4517_v24, %v4518_v41 }
 0x358   : > { %v5036_v35 = vunpack.c.l.b16 %v5595_v32  ;;  %v5148_v28 = vrot.slane %v5035_v22, 6  ;;  %v4453_v40 = vrot.slane %v4452_v0, 4  ;;  %v4440_v25 = vmax.f32 %v4438_v20, %v4439_v2 }
 0x359   : > { %v5146_v5 = vrot.slane %v5034_v6, 7  ;;  %v4446_v21 = vrot.slane %v4445_v53, 4  ;;  %v4459_v62 = vsel %vm726_vm1, %v3463_v60, -inf  ;;  %v4499_v51 = vrot.slane %v4498_v31, 1 }
 0x35a   : > { %v5150_v45 = vrot.slane %v5036_v35, 5  ;;  %v4454_v63 = vmax.f32 %v4452_v0, %v4453_v40  ;;  %v4460_v10 = vrot.slane %v4459_v62, 4  ;;  %v4441_v4 = vrot.slane %v4440_v25, 2 }
 0x35b   : > { %v5147_v14 = vsel %vm5042_vm9, %v5146_v5, %v5033_v46  ;;  %v4447_v23 = vmax.f32 %v4445_v53, %v4446_v21  ;;  %v4513_v57 = vrot.slane %v4512_v33, 1  ;;  %v4506_v13 = vrot.slane %v4505_v48, 1 }
 0x35c   : > { %v5149_v54 = vsel %vm5045_vm10, %v5148_v28, %v5147_v14  ;;  %v4455_v56 = vrot.slane %v4454_v63, 2  ;;  %v4461_v1 = vmax.f32 %v4459_v62, %v4460_v10  ;;  %v4442_v30 = vmax.f32 %v4440_v25, %v4441_v4 }
 0x35d   : > { %v5151_v39 = vsel %vm5048_vm11, %v5150_v45, %v5149_v54  ;;  %v4448_v3 = vrot.slane %v4447_v23, 2  ;;  %v4520_v36 = vrot.slane %v4519_v7, 1  ;;  %v4500_v43 = vmax.f32 %v4498_v31, %v4499_v51 }
 0x35e   : > { %v4456_v12 = vmax.f32 %v4454_v63, %v4455_v56  ;;  %v4462_v26 = vrot.slane %v4461_v1, 2  ;;  %v4443_v47 = vrot.slane %v4442_v30, 1  ;;  %v4514_v11 = vmax.f32 %v4512_v33, %v4513_v57 }
 0x35f   : > { %v4449_v52 = vmax.f32 %v4447_v23, %v4448_v3  ;;  %v4507_v19 = vmax.f32 %v4505_v48, %v4506_v13  ;;  %v4521_v18 = vmax.f32 %v4519_v7, %v4520_v36 }
 0x360   : > { %v4457_v49 = vrot.slane %v4456_v12, 1  ;;  %v4463_v61 = vmax.f32 %v4461_v1, %v4462_v26  ;;  %v4444_v50 = vmax.f32 %v4442_v30, %v4443_v47 }
 0x361   : > { %v4450_v9 = vrot.slane %v4449_v52, 1 }
 0x362   : > { %v4458_v38 = vmax.f32 %v4456_v12, %v4457_v49  ;;  %v4464_v16 = vrot.slane %v4463_v61, 1  ;;  %v4582_v8 = vmax.f32 %v4444_v50, %v4500_v43 }
 0x363   : > { %v4451_v58 = vmax.f32 %v4449_v52, %v4450_v9 }
 0x364   : > { %v4465_v59 = vmax.f32 %v4463_v61, %v4464_v16  ;;  %v4584_v55 = vmax.f32 %v4458_v38, %v4514_v11  ;;  %v4653_v15 = vadd.f32 %v7962_v37, %v4582_v8 }
 0x365   : > { %v4583_v24 = vmax.f32 %v4451_v58, %v4507_v19 }
 0x366   : > { %v4585_v29 = vmax.f32 %v4465_v59, %v4521_v18  ;;  %v4655_v22 = vadd.f32 %v7962_v37, %v4584_v55  ;;  %v4717_v17 = vmax.f32 %v4653_v15, 0.0 }
 0x367   : > { %v4654_v31 = vadd.f32 %v7962_v37, %v4583_v24 }
 0x368   : > { %v4656_v32 = vadd.f32 %v7962_v37, %v4585_v29  ;;  %v4719_v48 = vmax.f32 %v4655_v22, 0.0  ;;  %v5596_v44 = vpack.c.bf16 %v4717_v17, %v4717_v17 }
 0x369   : > { %v4718_v34 = vmax.f32 %v4654_v31, 0.0 }
 0x36a   : > { %v4720_v46 = vmax.f32 %v4656_v32, 0.0  ;;  %v5598_v6 = vpack.c.bf16 %v4719_v48, %v4719_v48  ;;  %v5037_v42 = vunpack.c.l.b16 %v5596_v44 }
 0x36b   : > { %v5597_v41 = vpack.c.bf16 %v4718_v34, %v4718_v34 }
 0x36c   : > { %v5599_v35 = vpack.c.bf16 %v4720_v46, %v4720_v46  ;;  %v5039_v28 = vunpack.c.l.b16 %v5598_v6  ;;  %v5152_v20 = vrot.slane %v5037_v42, 4 }
 0x36d   : > { %v5038_v27 = vunpack.c.l.b16 %v5597_v41 }
 0x36e   : > { %v5040_v5 = vunpack.c.l.b16 %v5599_v35  ;;  %v5153_v60 = vsel %vm5051_vm12, %v5152_v20, %v5151_v39  ;;  %v5156_v0 = vrot.slane %v5039_v28, 2 }
 0x36f   : > { %v5154_v2 = vrot.slane %v5038_v27, 3 }
 0x370   : > { %v5158_v37 = vrot.slane %v5040_v5, 1 }
 0x371   : > { %v5155_v45 = vsel %vm5054_vm13, %v5154_v2, %v5153_v60 }
 0x372   : > { %v5157_v33 = vsel %vm5057_vm14, %v5156_v0, %v5155_v45 }
 0x373   : > { %v5159_v53 = vsel %vm5060_vm15, %v5158_v37, %v5157_v33 }
 0x374   : > { %v5167_v40 = vpack.c.b16 %v5159_v53, %v5159_v53 }
 0x376   : > { %5183 = vst [vmem:[%s7497_s4 + $0x1c] sm:$0xf] %v5167_v40 }
 0x377 PF: > { %s13_s12 = sadd.s32 1, %s6362_s12  }
 0x378   : > { %p10_p4 = scmp.ge.s32.totalorder %s13_s12, 4  }
 0x37a   :  { %12 = sbr.rel (!%p10_p4) target bundleno = 1 (0x1), region = 62 }

// kernel: lstm_text_predictor_forward.6
= control target key start
LH: loop header
LB: loop body
LE: loop exit
PB: predicated region body
PF: predicated region fallthrough
CT: control target
= control target key end

     0   :  { %v85_v0 = vlaneseq  ;;  %v3525_v2 = vmov 0   ;;  %v2548_v3 = vmov 1966171168   ;;  %v2549_v8 = vmov 0.0   ;;  %s3515_s2 = inlined_call_operand.vmem [shape: bf16[32,512], index: 2, kind: input, shape index: {}]   ;;  %s3516_s3 = inlined_call_operand.vmem [shape: bf16[32,512], index: 3, kind: input, shape index: {}]   ;;  %s3517_s0 = inlined_call_operand.vmem [shape: bf16[4,2,32], index: 0, kind: input, shape index: {}, may-alias: {0,1}]   ;;  %s3518_s4 = inlined_call_operand.vmem [shape: bf16[128,512], index: 4, kind: input, shape index: {}]   ;;  %s3519_s1 = inlined_call_operand.vmem [shape: bf16[4,2,32], index: 1, kind: input, shape index: {}, may-alias: {0,1}]   ;;  %s3520_s5 = inlined_call_operand.vmem [shape: bf16[128,512], index: 5, kind: input, shape index: {}]   ;;  %s3521_s6 = inlined_call_operand.vmem [shape: f32[1,512], index: 6, kind: input, shape index: {}]   ;;  %s3522_s7 = inlined_call_operand.vmem [shape: f32[1,512], index: 7, kind: input, shape index: {}]   ;;  %s3523_s8 = inlined_call_operand.vmem [shape: bf16[4,2,128], index: 8, kind: output, shape index: {0}]   ;;  %s3524_s9 = inlined_call_operand.vmem [shape: bf16[4,2,128], index: 9, kind: output, shape index: {1}]  }
   0x1   :  { %v2235_v1 = vld [vmem:[%s3515_s2 + $0x4] ss:$16 sps:$4 sm:$0xff]   ;;  %209 = vmatprep.mubr.bf16.mxu0 %v3525_v2  ;;  %250 = vmatprep.mubr.bf16.mxu1 %v3525_v2  ;;  %v112_v4 = vunpack.c.l.s4 %v2548_v3  ;;  %v2237_v5 = vld [vmem:[%s3515_s2 + $0xc] ss:$16 sps:$4 sm:$0xff]   ;;  %v2239_v6 = vld [vmem:[%s3515_s2] ss:$16 sps:$4 sm:$0xff]  }
   0x2   :  { %177 = vmatprep.subr.bf16.mxu0 %v2235_v1  ;;  %v2240_v7 = vld [vmem:[%s3515_s2 + $0x8] ss:$16 sps:$4 sm:$0xff]   ;;  %67 = vst [vmem:[#allocation4] sm:$0x3] %v2549_v8  ;;  %68 = vst [vmem:[#allocation5] sm:$0x3] %v2549_v8  ;;  %218 = vmatprep.subr.bf16.mxu1 %v2237_v5 }
   0x3   :  { %69 = vst [vmem:[#allocation6] sm:$0x3] %v2549_v8  ;;  %70 = vst [vmem:[#allocation7] sm:$0x3] %v2549_v8  ;;  %v2241_v9 = vld [vmem:[%s3515_s2 + $0x24] ss:$16 sps:$4 sm:$0xff]   ;;  %v113_v11 = vunpack.c.0.s8 %v112_v4  ;;  %178 = vmatpush1.bf16.msra.mxu0 %v2239_v6  ;;  %219 = vmatpush1.bf16.msra.mxu1 %v2240_v7 }
   0x4   :  { %v2618_v10 = vshrl.u32 %v85_v0, 7  ;;  %v2243_v12 = vld [vmem:[%s3515_s2 + $0x2c] ss:$16 sps:$4 sm:$0xff]   ;;  %v2245_v13 = vld [vmem:[%s3515_s2 + $0x20] ss:$16 sps:$4 sm:$0xff]   ;;  %179 = vmatprep.subr.bf16.mxu0 %v2241_v9  ;;  %vm173_vm0 = vcmask 261120  }
   0x5   :  { %v2246_v14 = vld [vmem:[%s3515_s2 + $0x28] ss:$16 sps:$4 sm:$0xff]   ;;  %220 = vmatprep.subr.bf16.mxu1 %v2243_v12  ;;  %v2249_v15 = vld [vmem:[%s3516_s3 + $0x4] ss:$16 sps:$4 sm:$0xff]   ;;  %v2252_v16 = vld [vmem:[%s3516_s3 + $0xc] ss:$16 sps:$4 sm:$0xff]  }
   0x6   :  { %v116_v17 = vsub.s32 %v113_v11, %v2618_v10  ;;  %v71_v18 = vld [vmem:[%s3517_s0] sm:$0x1]  ;;  %v72_v19 = vld [vmem:[%s3517_s0 + $0x1] sm:$0x1]  ;;  %v73_v20 = vld [vmem:[%s3517_s0 + $0x2] sm:$0x1] }
   0x7   :  { %180 = vmatpush1.bf16.msra.mxu0 %v2245_v13  ;;  %221 = vmatpush1.bf16.msra.mxu1 %v2246_v14  ;;  %v74_v21 = vld [vmem:[%s3517_s0 + $0x3] sm:$0x1]  ;;  %v109_v22 = vcombine.low %v71_v18, %v72_v19  ;;  %v307_v28 = vld [vmem:[%s3519_s1] sm:$0x1]  ;;  %v308_v29 = vld [vmem:[%s3519_s1 + $0x1] sm:$0x1] }
   0x8   :  { %412 = vmatprep.subr.bf16.mxu0 %v2249_v15  ;;  %453 = vmatprep.subr.bf16.mxu1 %v2252_v16  ;;  %v110_v23 = vcombine.low %v73_v20, %v74_v21  ;;  %v2247_v26 = vld [vmem:[%s3516_s3] ss:$16 sps:$4 sm:$0xff]   ;;  %v2250_v31 = vld [vmem:[%s3516_s3 + $0x8] ss:$16 sps:$4 sm:$0xff]   ;;  %v2255_v32 = vld [vmem:[%s3516_s3 + $0x24] ss:$16 sps:$4 sm:$0xff]   ;;  %v345_v34 = vcombine.low %v307_v28, %v308_v29 }
   0x9   :  { %v117_v24 = vrot.slane %v109_v22, %v116_v17  ;;  %v309_v30 = vld [vmem:[%s3519_s1 + $0x2] sm:$0x1]  ;;  %v310_v33 = vld [vmem:[%s3519_s1 + $0x3] sm:$0x1]  ;;  %v2258_v36 = vld [vmem:[%s3516_s3 + $0x2c] ss:$16 sps:$4 sm:$0xff]  }
   0xa   :  { %v124_v25 = vrot.slane %v110_v23, %v116_v17  ;;  %v346_v37 = vcombine.low %v309_v30, %v310_v33  ;;  %v353_v38 = vrot.slane %v345_v34, %v116_v17  ;;  %v2253_v39 = vld [vmem:[%s3516_s3 + $0x20] ss:$16 sps:$4 sm:$0xff]   ;;  %v2256_v41 = vld [vmem:[%s3516_s3 + $0x28] ss:$16 sps:$4 sm:$0xff]   ;;  %v2683_v42 = vld [vmem:[%s3518_s4 + $0x4] ss:$16 sps:$4 sm:$0xff]  }
   0xb   :  { %v2688_v43 = vld [vmem:[%s3518_s4 + $0xc] ss:$16 sps:$4 sm:$0xff]   ;;  %v2695_v46 = vld [vmem:[%s3518_s4] ss:$16 sps:$4 sm:$0xff]   ;;  %v2700_v47 = vld [vmem:[%s3518_s4 + $0x8] ss:$16 sps:$4 sm:$0xff]  }
   0xc   :  { %v125_v27 = vcombine.low %v117_v24, %v124_v25  ;;  %v360_v40 = vrot.slane %v346_v37, %v116_v17  ;;  %v2705_v48 = vld [vmem:[%s3518_s4 + $0x24] ss:$16 sps:$4 sm:$0xff]   ;;  %v2712_v49 = vld [vmem:[%s3518_s4 + $0x2c] ss:$16 sps:$4 sm:$0xff]   ;;  %v2719_v50 = vld [vmem:[%s3518_s4 + $0x20] ss:$16 sps:$4 sm:$0xff]  }
   0xd   :  { %v2726_v51 = vld [vmem:[%s3518_s4 + $0x28] ss:$16 sps:$4 sm:$0xff]   ;;  %v2733_v52 = vld [vmem:[%s3518_s4 + $0x44] ss:$16 sps:$4 sm:$0xff]   ;;  %v2738_v53 = vld [vmem:[%s3518_s4 + $0x4c] ss:$16 sps:$4 sm:$0xff]  }
   0xe   :  { %v132_v35 = vrot.slane %v125_v27, %v116_v17  ;;  %v361_v44 = vcombine.low %v353_v38, %v360_v40  ;;  %3569 = vst [vmem:[#allocation8_spill] sm:$0xff] %v2738_v53  ;;  %v2747_v54 = vld [vmem:[%s3518_s4 + $0x40] ss:$16 sps:$4 sm:$0xff]   ;;  %v2752_v55 = vld [vmem:[%s3518_s4 + $0x48] ss:$16 sps:$4 sm:$0xff]  }
   0xf   :  { %3570 = vst [vmem:[#allocation9_spill] sm:$0xff] %v2747_v54  ;;  %3571 = vst [vmem:[#allocation10_spill] sm:$0xff] %v2752_v55  ;;  %v2757_v56 = vld [vmem:[%s3518_s4 + $0x64] ss:$16 sps:$4 sm:$0xff]   ;;  %v2764_v57 = vld [vmem:[%s3518_s4 + $0x6c] ss:$16 sps:$4 sm:$0xff]  }
  0x10   :  { %2125 = vmatmul.mubr.msk.bf16.vlgmr.msra.gmra.mrb[0].mxu0 %vm173_vm0, %v132_v35  ;;  %2126 = vmatmul.mubr.msk.bf16.vlgmr.msra.gmra.mrb[0].mxu1 %vm173_vm0, %v132_v35  ;;  %v368_v45 = vrot.slane %v361_v44, %v116_v17  ;;  %3572 = vst [vmem:[#allocation11_spill] sm:$0xff] %v2757_v56  ;;  %3573 = vst [vmem:[#allocation12_spill] sm:$0xff] %v2764_v57  ;;  %v2769_v58 = vld [vmem:[%s3518_s4 + $0x60] ss:$16 sps:$4 sm:$0xff]   ;;  %v2774_v59 = vld [vmem:[%s3518_s4 + $0x68] ss:$16 sps:$4 sm:$0xff]  }
  0x11   :  { %413 = vmatpush1.bf16.msra.mxu0 %v2247_v26  ;;  %454 = vmatpush1.bf16.msra.mxu1 %v2250_v31  ;;  %3574 = vst [vmem:[#allocation13_spill] sm:$0xff] %v2769_v58  ;;  %3575 = vst [vmem:[#allocation14_spill] sm:$0xff] %v2774_v59  ;;  %v2781_v60 = vld [vmem:[%s3518_s4 + $0x84] ss:$16 sps:$4 sm:$0xff]   ;;  %v2788_v61 = vld [vmem:[%s3518_s4 + $0x8c] ss:$16 sps:$4 sm:$0xff]  }
  0x12   :  { %414 = vmatprep.subr.bf16.mxu0 %v2255_v32  ;;  %455 = vmatprep.subr.bf16.mxu1 %v2258_v36  ;;  %3576 = vst [vmem:[#allocation15_spill] sm:$0xff] %v2781_v60  ;;  %3577 = vst [vmem:[#allocation16_spill] sm:$0xff] %v2788_v61  ;;  %v2793_v62 = vld [vmem:[%s3518_s4 + $0x80] ss:$16 sps:$4 sm:$0xff]   ;;  %v2800_v63 = vld [vmem:[%s3518_s4 + $0x88] ss:$16 sps:$4 sm:$0xff]  }
  0x13   :  { %444 = vmatprep.mubr.bf16.mxu0 %v3525_v2  ;;  %485 = vmatprep.mubr.bf16.mxu1 %v3525_v2  ;;  %3578 = vst [vmem:[#allocation17_spill] sm:$0xff] %v2793_v62  ;;  %3579 = vst [vmem:[#allocation18_spill] sm:$0xff] %v2800_v63  ;;  %v2805_v0 = vld [vmem:[%s3518_s4 + $0xa4] ss:$16 sps:$4 sm:$0xff]   ;;  %v2812_v1 = vld [vmem:[%s3518_s4 + $0xac] ss:$16 sps:$4 sm:$0xff]  }
  0x14   :  { %3580 = vst [vmem:[#allocation19_spill] sm:$0xff] %v2805_v0  ;;  %3581 = vst [vmem:[#allocation20_spill] sm:$0xff] %v2812_v1  ;;  %v2817_v3 = vld [vmem:[%s3518_s4 + $0xa0] ss:$16 sps:$4 sm:$0xff]   ;;  %v2822_v4 = vld [vmem:[%s3518_s4 + $0xa8] ss:$16 sps:$4 sm:$0xff]  }
  0x15   :  { %415 = vmatpush1.bf16.msra.mxu0 %v2253_v39  ;;  %456 = vmatpush1.bf16.msra.mxu1 %v2256_v41  ;;  %3582 = vst [vmem:[#allocation21_spill] sm:$0xff] %v2817_v3  ;;  %3583 = vst [vmem:[#allocation22_spill] sm:$0xff] %v2822_v4  ;;  %v2829_v5 = vld [vmem:[%s3518_s4 + $0xc4] ss:$16 sps:$4 sm:$0xff]   ;;  %v2836_v6 = vld [vmem:[%s3518_s4 + $0xcc] ss:$16 sps:$4 sm:$0xff]  }
  0x16   :  { %768 = vmatprep.subr.bf16.mxu0 %v2683_v42  ;;  %809 = vmatprep.subr.bf16.mxu1 %v2688_v43  ;;  %3584 = vst [vmem:[#allocation23_spill] sm:$0xff] %v2829_v5  ;;  %3585 = vst [vmem:[#allocation24_spill] sm:$0xff] %v2836_v6  ;;  %v2841_v7 = vld [vmem:[%s3518_s4 + $0xc0] ss:$16 sps:$4 sm:$0xff]   ;;  %v2848_v8 = vld [vmem:[%s3518_s4 + $0xc8] ss:$16 sps:$4 sm:$0xff]  }
  0x17   :  { %3586 = vst [vmem:[#allocation25_spill] sm:$0xff] %v2841_v7  ;;  %3587 = vst [vmem:[#allocation26_spill] sm:$0xff] %v2848_v8  ;;  %v2853_v9 = vld [vmem:[%s3518_s4 + $0xe4] ss:$16 sps:$4 sm:$0xff]   ;;  %v2860_v11 = vld [vmem:[%s3518_s4 + $0xec] ss:$16 sps:$4 sm:$0xff]  }
  0x18   :  { %2135 = vmatmul.mubr.msk.bf16.vlgmr.msra.gmra.mrb[4].mxu0 %vm173_vm0, %v368_v45  ;;  %2136 = vmatmul.mubr.msk.bf16.vlgmr.msra.gmra.mrb[4].mxu1 %vm173_vm0, %v368_v45  ;;  %3588 = vst [vmem:[#allocation27_spill] sm:$0xff] %v2853_v9  ;;  %3589 = vst [vmem:[#allocation28_spill] sm:$0xff] %v2860_v11  ;;  %v2865_v12 = vld [vmem:[%s3518_s4 + $0xe0] ss:$16 sps:$4 sm:$0xff]   ;;  %v2870_v13 = vld [vmem:[%s3518_s4 + $0xe8] ss:$16 sps:$4 sm:$0xff]  }
  0x19   :  { %769 = vmatpush1.bf16.msra.mxu0 %v2695_v46  ;;  %810 = vmatpush1.bf16.msra.mxu1 %v2700_v47  ;;  %3590 = vst [vmem:[#allocation29_spill] sm:$0xff] %v2865_v12  ;;  %3591 = vst [vmem:[#allocation30_spill] sm:$0xff] %v2870_v13  ;;  %v606_v14 = vld [vmem:[#allocation4] sm:$0x3]  ;;  %v2877_v15 = vld [vmem:[%s3520_s5 + $0x4] ss:$16 sps:$4 sm:$0xff]  }
  0x1a   :  { %770 = vmatprep.subr.bf16.mxu0 %v2705_v48  ;;  %811 = vmatprep.subr.bf16.mxu1 %v2712_v49  ;;  %3592 = vst [vmem:[#allocation31_spill] sm:$0xff] %v2877_v15  ;;  %v2884_v16 = vld [vmem:[%s3520_s5 + $0xc] ss:$16 sps:$4 sm:$0xff]   ;;  %v607_v17 = vpack.c.bf16 %v606_v14, %v606_v14  ;;  %v2891_v18 = vld [vmem:[%s3520_s5] ss:$16 sps:$4 sm:$0xff]  }
  0x1b   :  { %800 = vmatprep.mubr.bf16.mxu0 %v3525_v2  ;;  %841 = vmatprep.mubr.bf16.mxu1 %v3525_v2  ;;  %3593 = vst [vmem:[#allocation32_spill] sm:$0xff] %v2884_v16  ;;  %v2896_v19 = vld [vmem:[%s3520_s5 + $0x8] ss:$16 sps:$4 sm:$0xff]   ;;  %v2903_v20 = vld [vmem:[%s3520_s5 + $0x24] ss:$16 sps:$4 sm:$0xff]  }
  0x1c   :  { %v2908_v21 = vld [vmem:[%s3520_s5 + $0x2c] ss:$16 sps:$4 sm:$0xff]   ;;  %v2915_v22 = vld [vmem:[%s3520_s5 + $0x20] ss:$16 sps:$4 sm:$0xff]   ;;  %v2920_v23 = vld [vmem:[%s3520_s5 + $0x28] ss:$16 sps:$4 sm:$0xff]  }
  0x1d   :  { %771 = vmatpush1.bf16.msra.mxu0 %v2719_v50  ;;  %812 = vmatpush1.bf16.msra.mxu1 %v2726_v51  ;;  %v2927_v24 = vld [vmem:[%s3520_s5 + $0x44] ss:$16 sps:$4 sm:$0xff]   ;;  %v2932_v25 = vld [vmem:[%s3520_s5 + $0x4c] ss:$16 sps:$4 sm:$0xff]   ;;  %v2941_v26 = vld [vmem:[%s3520_s5 + $0x40] ss:$16 sps:$4 sm:$0xff]  }
  0x1e   :  { %772 = vmatprep.subr.bf16.mxu0 %v2733_v52  ;;  %813 = vmatprep.subr.bf16.mxu1 %v2738_v53  ;;  %v2946_v27 = vld [vmem:[%s3520_s5 + $0x48] ss:$16 sps:$4 sm:$0xff]   ;;  %v2953_v28 = vld [vmem:[%s3520_s5 + $0x64] ss:$16 sps:$4 sm:$0xff]   ;;  %v2958_v29 = vld [vmem:[%s3520_s5 + $0x6c] ss:$16 sps:$4 sm:$0xff]  }
  0x1f   :  { %v2965_v30 = vld [vmem:[%s3520_s5 + $0x60] ss:$16 sps:$4 sm:$0xff]   ;;  %v2970_v31 = vld [vmem:[%s3520_s5 + $0x68] ss:$16 sps:$4 sm:$0xff]   ;;  %v2977_v32 = vld [vmem:[%s3520_s5 + $0x84] ss:$16 sps:$4 sm:$0xff]  }
  0x20   :  { %v2982_v33 = vld [vmem:[%s3520_s5 + $0x8c] ss:$16 sps:$4 sm:$0xff]   ;;  %v2989_v34 = vld [vmem:[%s3520_s5 + $0x80] ss:$16 sps:$4 sm:$0xff]   ;;  %v2994_v35 = vld [vmem:[%s3520_s5 + $0x88] ss:$16 sps:$4 sm:$0xff]  }
  0x21   :  { %773 = vmatpush1.bf16.msra.mxu0 %v2747_v54  ;;  %814 = vmatpush1.bf16.msra.mxu1 %v2752_v55  ;;  %v3001_v36 = vld [vmem:[%s3520_s5 + $0xa4] ss:$16 sps:$4 sm:$0xff]   ;;  %v3006_v37 = vld [vmem:[%s3520_s5 + $0xac] ss:$16 sps:$4 sm:$0xff]   ;;  %v3013_v38 = vld [vmem:[%s3520_s5 + $0xa0] ss:$16 sps:$4 sm:$0xff]  }
  0x22   :  { %774 = vmatprep.subr.bf16.mxu0 %v2757_v56  ;;  %815 = vmatprep.subr.bf16.mxu1 %v2764_v57  ;;  %v3018_v39 = vld [vmem:[%s3520_s5 + $0xa8] ss:$16 sps:$4 sm:$0xff]   ;;  %v3025_v40 = vld [vmem:[%s3520_s5 + $0xc4] ss:$16 sps:$4 sm:$0xff]   ;;  %v3030_v41 = vld [vmem:[%s3520_s5 + $0xcc] ss:$16 sps:$4 sm:$0xff]  }
  0x23   :  { %3594 = vst [vmem:[#allocation33_spill] sm:$0xff] %v3018_v39  ;;  %3595 = vst [vmem:[#allocation34_spill] sm:$0xff] %v3025_v40  ;;  %v3037_v44 = vld [vmem:[%s3520_s5 + $0xc0] ss:$16 sps:$4 sm:$0xff]   ;;  %v3042_v45 = vld [vmem:[%s3520_s5 + $0xc8] ss:$16 sps:$4 sm:$0xff]  }
  0x24   :  { %3596 = vst [vmem:[#allocation35_spill] sm:$0xff] %v3030_v41  ;;  %v3049_v14 = vld [vmem:[%s3520_s5 + $0xe4] ss:$16 sps:$4 sm:$0xff]  }
  0x25   :  { %775 = vmatpush1.bf16.msra.mxu0 %v2769_v58  ;;  %816 = vmatpush1.bf16.msra.mxu1 %v2774_v59 }
  0x26   :  { %776 = vmatprep.subr.bf16.mxu0 %v2781_v60  ;;  %817 = vmatprep.subr.bf16.mxu1 %v2788_v61 }
  0x29   :  { %777 = vmatpush1.bf16.msra.mxu0 %v2793_v62  ;;  %818 = vmatpush1.bf16.msra.mxu1 %v2800_v63 }
  0x2a   :  { %778 = vmatprep.subr.bf16.mxu0 %v2805_v0  ;;  %819 = vmatprep.subr.bf16.mxu1 %v2812_v1 }
  0x2d   :  { %779 = vmatpush1.bf16.msra.mxu0 %v2817_v3  ;;  %820 = vmatpush1.bf16.msra.mxu1 %v2822_v4 }
  0x2e   :  { %780 = vmatprep.subr.bf16.mxu0 %v2829_v5  ;;  %821 = vmatprep.subr.bf16.mxu1 %v2836_v6 }
  0x31   :  { %781 = vmatpush1.bf16.msra.mxu0 %v2841_v7  ;;  %822 = vmatpush1.bf16.msra.mxu1 %v2848_v8 }
  0x32   :  { %782 = vmatprep.subr.bf16.mxu0 %v2853_v9  ;;  %823 = vmatprep.subr.bf16.mxu1 %v2860_v11 }
  0x35   :  { %783 = vmatpush1.bf16.msra.mxu0 %v2865_v12  ;;  %824 = vmatpush1.bf16.msra.mxu1 %v2870_v13 }
  0x36   :  { %1012 = vmatprep.subr.bf16.mxu0 %v2877_v15  ;;  %1053 = vmatprep.subr.bf16.mxu1 %v2884_v16 }
  0x38   :  { %801 = vmatmul.mubr.bf16.vlgmr.msra.gmra.mrb[8].mxu0 %v607_v17  ;;  %842 = vmatmul.mubr.bf16.vlgmr.msra.gmra.mrb[8].mxu1 %v607_v17  ;;  %v3054_v17 = vld [vmem:[%s3520_s5 + $0xec] ss:$16 sps:$4 sm:$0xff]  }
  0x39   :  { %1013 = vmatpush1.bf16.msra.mxu0 %v2891_v18  ;;  %1054 = vmatpush1.bf16.msra.mxu1 %v2896_v19  ;;  %3597 = vst [vmem:[#allocation36_spill] sm:$0xff] %v3054_v17 }
  0x3a   :  { %1014 = vmatprep.subr.bf16.mxu0 %v2903_v20  ;;  %1055 = vmatprep.subr.bf16.mxu1 %v2908_v21 }
  0x3b   :  { %1044 = vmatprep.mubr.bf16.mxu0 %v3525_v2  ;;  %1085 = vmatprep.mubr.bf16.mxu1 %v3525_v2  ;;  %v3061_v2 = vld [vmem:[%s3520_s5 + $0xe0] ss:$16 sps:$4 sm:$0xff]  }
  0x3d   :  { %1015 = vmatpush1.bf16.msra.mxu0 %v2915_v22  ;;  %1056 = vmatpush1.bf16.msra.mxu1 %v2920_v23 }
  0x3e   :  { %1016 = vmatprep.subr.bf16.mxu0 %v2927_v24  ;;  %1057 = vmatprep.subr.bf16.mxu1 %v2932_v25 }
  0x41   :  { %1017 = vmatpush1.bf16.msra.mxu0 %v2941_v26  ;;  %1058 = vmatpush1.bf16.msra.mxu1 %v2946_v27 }
  0x42   :  { %1018 = vmatprep.subr.bf16.mxu0 %v2953_v28  ;;  %1059 = vmatprep.subr.bf16.mxu1 %v2958_v29 }
  0x45   :  { %1019 = vmatpush1.bf16.msra.mxu0 %v2965_v30  ;;  %1060 = vmatpush1.bf16.msra.mxu1 %v2970_v31 }
  0x46   :  { %1020 = vmatprep.subr.bf16.mxu0 %v2977_v32  ;;  %1061 = vmatprep.subr.bf16.mxu1 %v2982_v33 }
  0x49   :  { %1021 = vmatpush1.bf16.msra.mxu0 %v2989_v34  ;;  %1062 = vmatpush1.bf16.msra.mxu1 %v2994_v35 }
  0x4a   :  { %1022 = vmatprep.subr.bf16.mxu0 %v3001_v36  ;;  %1063 = vmatprep.subr.bf16.mxu1 %v3006_v37 }
  0x4d   :  { %1023 = vmatpush1.bf16.msra.mxu0 %v3013_v38  ;;  %1064 = vmatpush1.bf16.msra.mxu1 %v3018_v39 }
  0x4e   :  { %1024 = vmatprep.subr.bf16.mxu0 %v3025_v40  ;;  %1065 = vmatprep.subr.bf16.mxu1 %v3030_v41  ;;  %v3066_v41 = vld [vmem:[%s3520_s5 + $0xe8] ss:$16 sps:$4 sm:$0xff]   ;;  %v850_v40 = vld [vmem:[#allocation6] sm:$0x3] }
  0x4f   :  { %v851_v39 = vpack.c.bf16 %v850_v40, %v850_v40  ;;  %v95_v40 = vsub.s32 2, %v2618_v10 }
  0x51   :  { %1025 = vmatpush1.bf16.msra.mxu0 %v3037_v44  ;;  %1066 = vmatpush1.bf16.msra.mxu1 %v3042_v45 }
  0x52   :  { %1026 = vmatprep.subr.bf16.mxu0 %v3049_v14  ;;  %1067 = vmatprep.subr.bf16.mxu1 %v3054_v17  ;;  %v3598_v17 = vmov 0  }
  0x55   :  { %1027 = vmatpush1.bf16.msra.mxu0 %v3061_v2  ;;  %1068 = vmatpush1.bf16.msra.mxu1 %v3066_v41 }
  0x56   :  { %1218 = vmatprep.subr.bf16.mxu0 %v2683_v42  ;;  %1259 = vmatprep.subr.bf16.mxu1 %v2688_v43 }
  0x58   :  { %1045 = vmatmul.mubr.bf16.vlgmr.msra.gmra.mrb[12].mxu0 %v851_v39  ;;  %1086 = vmatmul.mubr.bf16.vlgmr.msra.gmra.mrb[12].mxu1 %v851_v39  ;;  %v87_v39 = vsub.s32 0, %v2618_v10 }
  0x59   :  { %1219 = vmatpush1.bf16.msra.mxu0 %v2695_v46  ;;  %1260 = vmatpush1.bf16.msra.mxu1 %v2700_v47 }
  0x5a   :  { %1220 = vmatprep.subr.bf16.mxu0 %v2705_v48  ;;  %1261 = vmatprep.subr.bf16.mxu1 %v2712_v49 }
  0x5b   :  { %1250 = vmatprep.mubr.bf16.mxu0 %v3598_v17  ;;  %1291 = vmatprep.mubr.bf16.mxu1 %v3598_v17 }
  0x5d   :  { %1221 = vmatpush1.bf16.msra.mxu0 %v2719_v50  ;;  %1262 = vmatpush1.bf16.msra.mxu1 %v2726_v51 }
  0x5e   :  { %1222 = vmatprep.subr.bf16.mxu0 %v2733_v52  ;;  %1263 = vmatprep.subr.bf16.mxu1 %v2738_v53 }
  0x61   :  { %1223 = vmatpush1.bf16.msra.mxu0 %v2747_v54  ;;  %1264 = vmatpush1.bf16.msra.mxu1 %v2752_v55 }
  0x62   :  { %1224 = vmatprep.subr.bf16.mxu0 %v2757_v56  ;;  %1265 = vmatprep.subr.bf16.mxu1 %v2764_v57  ;;  %v319_v57 = vld [vmem:[%s3522_s7] sm:$0xf] }
  0x65   :  { %1225 = vmatpush1.bf16.msra.mxu0 %v2769_v58  ;;  %1266 = vmatpush1.bf16.msra.mxu1 %v2774_v59 }
  0x66   :  { %1226 = vmatprep.subr.bf16.mxu0 %v2781_v60  ;;  %1267 = vmatprep.subr.bf16.mxu1 %v2788_v61 }
  0x69   :  { %1227 = vmatpush1.bf16.msra.mxu0 %v2793_v62  ;;  %1268 = vmatpush1.bf16.msra.mxu1 %v2800_v63 }
  0x6a   :  { %1228 = vmatprep.subr.bf16.mxu0 %v2805_v0  ;;  %1269 = vmatprep.subr.bf16.mxu1 %v2812_v1 }
  0x6d   :  { %1229 = vmatpush1.bf16.msra.mxu0 %v2817_v3  ;;  %1270 = vmatpush1.bf16.msra.mxu1 %v2822_v4 }
  0x6e   :  { %1230 = vmatprep.subr.bf16.mxu0 %v2829_v5  ;;  %1271 = vmatprep.subr.bf16.mxu1 %v2836_v6  ;;  %v2550_v6 = vmov 1983009808  }
  0x71   :  { %1231 = vmatpush1.bf16.msra.mxu0 %v2841_v7  ;;  %1272 = vmatpush1.bf16.msra.mxu1 %v2848_v8  ;;  %v268_v7 = vunpack.c.l.s4 %v2550_v6 }
  0x72   :  { %1232 = vmatprep.subr.bf16.mxu0 %v2853_v9  ;;  %1273 = vmatprep.subr.bf16.mxu1 %v2860_v11  ;;  %v83_v9 = vld [vmem:[%s3521_s6] sm:$0xf]  ;;  %v91_v11 = vsub.s32 1, %v2618_v10 }
  0x73   :  { %v88_v8 = vrot.slane %v83_v9, %v87_v39  ;;  %v269_v5 = vunpack.c.0.s8 %v268_v7 }
  0x75   :  { %1233 = vmatpush1.bf16.msra.mxu0 %v2865_v12  ;;  %1274 = vmatpush1.bf16.msra.mxu1 %v2870_v13  ;;  %v99_v12 = vsub.s32 3, %v2618_v10  ;;  %v96_v13 = vrot.slane %v83_v9, %v95_v40  ;;  %v3116_v6 = vsub.s32 %v269_v5, %v2618_v10 }
  0x76   :  { %1302 = vmatprep.subr.bf16.mxu0 %v2877_v15  ;;  %1343 = vmatprep.subr.bf16.mxu1 %v2884_v16  ;;  %v92_v15 = vrot.slane %v83_v9, %v91_v11 }
  0x77   :  { %v100_v4 = vrot.slane %v83_v9, %v99_v12  ;;  %v336_v53 = vrot.slane %v319_v57, %v99_v12 }
  0xe3   :  { %v211_v16 = vpop.f32.mrb[0].mxu0  ;;  %v252_v3 = vpop.f32.mrb[0].mxu1 }
  0xe4   :  { %v212_v1 = vadd.f32 %v211_v16, %v88_v8  ;;  %v253_v0 = vadd.f32 %v252_v3, %v96_v13  ;;  %v213_v63 = vpop.f32.mrb[1].mxu0  ;;  %v254_v62 = vpop.f32.mrb[1].mxu1  ;;  %v324_v3 = vrot.slane %v319_v57, %v87_v39  ;;  %v332_v13 = vrot.slane %v319_v57, %v95_v40 }
  0xe5   :  { %v214_v61 = vadd.f32 %v213_v63, %v92_v15  ;;  %v255_v60 = vadd.f32 %v254_v62, %v100_v4  ;;  %v215_v59 = vpop.f32.mrb[2].mxu0  ;;  %v256_v58 = vpop.f32.mrb[2].mxu1  ;;  %v328_v16 = vrot.slane %v319_v57, %v91_v11 }
  0xe6   :  { %v216_v7 = vpop.f32.mrb[3].mxu0  ;;  %v257_v56 = vpop.f32.mrb[3].mxu1 }
  0xe7   :  { %v263_v9 = vcombine.low %v212_v1, %v214_v61  ;;  %v264_v55 = vcombine.high %v212_v1, %v214_v61  ;;  %v265_v54 = vcombine.low %v253_v0, %v255_v60  ;;  %v266_v8 = vcombine.high %v253_v0, %v255_v60 }
  0xe9   :  { %v3122_v10 = vrot.slane %v263_v9, %v3116_v6  ;;  %v3125_v59 = vrot.slane %v264_v55, %v3116_v6  ;;  %v3128_v58 = vrot.slane %v265_v54, %v3116_v6  ;;  %v3131_v62 = vrot.slane %v266_v8, %v3116_v6 }
  0xeb   :  { %3599 = vst [vmem:[#allocation37_spill] sm:$0xff] %v3125_v59  ;;  %3600 = vst [vmem:[#allocation38_spill] sm:$0xff] %v3131_v62  ;;  %v295_v56 = vcombine.low %v3122_v10, %v3128_v58  ;;  %v446_v55 = vpop.f32.mrb[4].mxu0  ;;  %v487_v63 = vpop.f32.mrb[4].mxu1 }
  0xec   :  { %v447_v0 = vadd.f32 %v446_v55, %v324_v3  ;;  %v488_v54 = vadd.f32 %v487_v63, %v332_v13  ;;  %v448_v1 = vpop.f32.mrb[5].mxu0  ;;  %v489_v4 = vpop.f32.mrb[5].mxu1 }
  0xed   :  { %v449_v5 = vadd.f32 %v448_v1, %v328_v16  ;;  %v490_v11 = vadd.f32 %v489_v4, %v336_v53  ;;  %v450_v12 = vpop.f32.mrb[6].mxu0  ;;  %v491_v15 = vpop.f32.mrb[6].mxu1 }
  0xee   :  { %v451_v39 = vpop.f32.mrb[7].mxu0  ;;  %v492_v40 = vpop.f32.mrb[7].mxu1 }
  0xef   :  { %v498_v7 = vcombine.low %v447_v0, %v449_v5  ;;  %v499_v9 = vcombine.high %v447_v0, %v449_v5  ;;  %v500_v8 = vcombine.low %v488_v54, %v490_v11  ;;  %v501_v60 = vcombine.high %v488_v54, %v490_v11 }
  0xf1   :  { %v3142_v57 = vrot.slane %v498_v7, %v3116_v6  ;;  %v3145_v61 = vrot.slane %v499_v9, %v3116_v6  ;;  %v3148_v3 = vrot.slane %v500_v8, %v3116_v6  ;;  %v3151_v13 = vrot.slane %v501_v60, %v3116_v6 }
  0xf3   :  { %3601 = vst [vmem:[#allocation39_spill] sm:$0xff] %v3142_v57  ;;  %3602 = vst [vmem:[#allocation40_spill] sm:$0xff] %v3148_v3  ;;  %v533_v63 = vcombine.high %v3145_v61, %v3151_v13 }
  0xf4   :  { %3603 = vst [vmem:[#allocation41_spill] sm:$0xff] %v3151_v13 }
 0x10b   :  { %v802_v0 = vpop.f32.mrb[8].mxu0  ;;  %v843_v54 = vpop.f32.mrb[8].mxu1 }
 0x10c   :  { %v804_v1 = vpop.f32.mrb[9].mxu0  ;;  %v845_v4 = vpop.f32.mrb[9].mxu1 }
 0x10d   :  { %v1099_v5 = vcombine.low %v802_v0, %v804_v1  ;;  %v1100_v11 = vcombine.low %v843_v54, %v845_v4  ;;  %v806_v60 = vpop.f32.mrb[10].mxu0  ;;  %v847_v12 = vpop.f32.mrb[10].mxu1 }
 0x10e   :  { %v807_v15 = vpop.f32.mrb[11].mxu0  ;;  %v848_v39 = vpop.f32.mrb[11].mxu1 }
 0x10f   :  { %v1107_v40 = vrot.slane %v1099_v5, %v3116_v6  ;;  %v1114_v7 = vrot.slane %v1100_v11, %v3116_v6 }
 0x111   :  { %v1115_v9 = vcombine.low %v1107_v40, %v1114_v7 }
 0x113   :  { %v1117_v8 = vadd.f32 %v1115_v9, %v295_v56 }
 0x115   :  { %v2201_v53 = vmul.f32 -1.442695, %v1117_v8  ;;  %v1126_v16 = vrot.slane %v1117_v8, 2  ;;  %v1137_v3 = vrot.slane %v1117_v8, 6  ;;  %v1134_v0 = vrot.slane %v1117_v8, 4 }
 0x117   :  { %2355 = vpow2.f32 %v2201_v53  ;;  %v2202_v55 = vmul.f32 -1.442695, %v1126_v16  ;;  %v2203_v57 = vmul.f32 -1.442695, %v1137_v3  ;;  %v1118_v3 = vld [vmem:[#allocation5] sm:$0x3] }
 0x119   :  { %2357 = vpow2.f32 %v2202_v55 }
 0x11a   :  { %2359 = vpow2.f32 %v2203_v57 }
 0x121   :  { %v2356_v62 = vpop.eup %2355 }
 0x122   :  { %v1122_v54 = vadd.f32 1.0, %v2356_v62 }
 0x123   :  { %v2358_v1 = vpop.eup %2357 }
 0x124   :  { %2361 = vrcp.f32 %v1122_v54  ;;  %v1131_v4 = vadd.f32 1.0, %v2358_v1  ;;  %v2360_v12 = vpop.eup %2359 }
 0x125   :  { %2363 = vtanh.f32 %v1134_v0  ;;  %v1142_v0 = vadd.f32 1.0, %v2360_v12 }
 0x126   :  { %2365 = vrcp.f32 %v1131_v4 }
 0x127   :  { %2367 = vrcp.f32 %v1142_v0 }
 0x12b   :  { %v1046_v5 = vpop.f32.mrb[12].mxu0  ;;  %v1087_v11 = vpop.f32.mrb[12].mxu1 }
 0x12c   :  { %v1048_v60 = vpop.f32.mrb[13].mxu0  ;;  %v1089_v56 = vpop.f32.mrb[13].mxu1 }
 0x12d   :  { %v1156_v15 = vcombine.low %v1046_v5, %v1048_v60  ;;  %v1157_v53 = vcombine.low %v1087_v11, %v1089_v56  ;;  %v1050_v16 = vpop.f32.mrb[14].mxu0  ;;  %v1091_v55 = vpop.f32.mrb[14].mxu1 }
 0x12e   :  { %v2362_v39 = vpop.eup %2361  ;;  %v1051_v40 = vpop.f32.mrb[15].mxu0 }
 0x12f   :  { %v1092_v7 = vpop.f32.mrb[15].mxu1  ;;  %v2364_v62 = vpop.eup %2363  ;;  %v1164_v57 = vrot.slane %v1156_v15, %v3116_v6  ;;  %v1171_v9 = vrot.slane %v1157_v53, %v3116_v6 }
 0x130   :  { %v2366_v8 = vpop.eup %2365  ;;  %v1146_v1 = vmul.f32 %v2364_v62, %v2362_v39 }
 0x131   :  { %v1145_v54 = vmul.f32 %v2366_v8, %v1118_v3  ;;  %v1172_v4 = vcombine.low %v1164_v57, %v1171_v9  ;;  %v2368_v16 = vpop.eup %2367  ;;  %v1175_v9 = vld [vmem:[#allocation7] sm:$0x3] }
 0x133   :  { %v1147_v59 = vadd.f32 %v1146_v1, %v1145_v54  ;;  %v1174_v13 = vadd.f32 %v1172_v4, %v533_v63 }
 0x135   :  { %2369 = vtanh.f32 %v1147_v59  ;;  %1208 = vst [vmem:[#allocation5] sm:$0x3] %v1147_v59  ;;  %v2204_v5 = vmul.f32 -1.442695, %v1174_v13  ;;  %v1183_v11 = vrot.slane %v1174_v13, 2  ;;  %v1194_v56 = vrot.slane %v1174_v13, 6 }
 0x136   :  { %v1191_v12 = vrot.slane %v1174_v13, 4 }
 0x137   :  { %2371 = vpow2.f32 %v2204_v5  ;;  %v2205_v60 = vmul.f32 -1.442695, %v1183_v11  ;;  %v2206_v55 = vmul.f32 -1.442695, %v1194_v56 }
 0x139   :  { %2373 = vpow2.f32 %v2205_v60 }
 0x13a   :  { %2375 = vpow2.f32 %v2206_v55  ;;  %v3605_v55 = vld [vmem:[#allocation34_spill] sm:$0xff] }
 0x13f   :  { %v2370_v15 = vpop.eup %2369 }
 0x140   :  { %v1149_v53 = vmul.f32 %v2370_v15, %v2368_v16  ;;  %v3604_v16 = vld [vmem:[#allocation33_spill] sm:$0xff] }
 0x141   :  { %v2372_v40 = vpop.eup %2371 }
 0x142   :  { %1207 = vst [vmem:[#allocation4] sm:$0x3] %v1149_v53  ;;  %v1211_v39 = vpack.c.bf16 %v1149_v53, %v1149_v53  ;;  %v1179_v3 = vadd.f32 1.0, %v2372_v40  ;;  %v3606_v53 = vld [vmem:[#allocation35_spill] sm:$0xff]  ;;  %v3607_v40 = vld [vmem:[#allocation36_spill] sm:$0xff] }
 0x143   :  { %v2374_v7 = vpop.eup %2373 }
 0x144   :  { %1212 = vst [vmem:[%s3523_s8] sm:$0x1] %v1211_v39  ;;  %2377 = vrcp.f32 %v1179_v3  ;;  %v1188_v59 = vadd.f32 1.0, %v2374_v7  ;;  %v2376_v57 = vpop.eup %2375  ;;  %v3614_v3 = vld [vmem:[#allocation14_spill] sm:$0xff]  ;;  %v3615_v7 = vld [vmem:[#allocation15_spill] sm:$0xff] }
 0x145   :  { %2379 = vtanh.f32 %v1191_v12  ;;  %v1199_v54 = vadd.f32 1.0, %v2376_v57  ;;  %v3622_v57 = vld [vmem:[#allocation22_spill] sm:$0xff] }
 0x146   :  { %2381 = vrcp.f32 %v1188_v59  ;;  %v3619_v59 = vld [vmem:[#allocation19_spill] sm:$0xff] }
 0x147   :  { %2383 = vrcp.f32 %v1199_v54  ;;  %v3627_v54 = vld [vmem:[#allocation27_spill] sm:$0xff] }
 0x149   :  { %v1216_v63 = vld [vmem:[#allocation4] sm:$0x3] }
 0x14a   :  { %v1217_v62 = vpack.c.bf16 %v1216_v63, %v1216_v63  ;;  %v3620_v63 = vld [vmem:[#allocation20_spill] sm:$0xff] }
 0x14c   :  { %1251 = vmatmul.mubr.bf16.vlgmr.msra.gmra.mrb[16].mxu0 %v1217_v62  ;;  %1292 = vmatmul.mubr.bf16.vlgmr.msra.gmra.mrb[16].mxu1 %v1217_v62  ;;  %v3621_v62 = vld [vmem:[#allocation21_spill] sm:$0xff] }
 0x14d   :  { %1303 = vmatpush1.bf16.msra.mxu0 %v2891_v18  ;;  %1344 = vmatpush1.bf16.msra.mxu1 %v2896_v19 }
 0x14e   :  { %v2378_v13 = vpop.eup %2377  ;;  %1304 = vmatprep.subr.bf16.mxu0 %v2903_v20  ;;  %1345 = vmatprep.subr.bf16.mxu1 %v2908_v21 }
 0x14f   :  { %v2380_v8 = vpop.eup %2379  ;;  %1334 = vmatprep.mubr.bf16.mxu0 %v3598_v17  ;;  %1375 = vmatprep.mubr.bf16.mxu1 %v3598_v17 }
 0x150   :  { %v2382_v0 = vpop.eup %2381  ;;  %v1203_v4 = vmul.f32 %v2380_v8, %v2378_v13  ;;  %v3623_v13 = vld [vmem:[#allocation23_spill] sm:$0xff]  ;;  %v3625_v8 = vld [vmem:[#allocation25_spill] sm:$0xff] }
 0x151   :  { %v1202_v1 = vmul.f32 %v2382_v0, %v1175_v9  ;;  %1305 = vmatpush1.bf16.msra.mxu0 %v2915_v22  ;;  %1346 = vmatpush1.bf16.msra.mxu1 %v2920_v23  ;;  %v2384_v11 = vpop.eup %2383  ;;  %v3624_v9 = vld [vmem:[#allocation24_spill] sm:$0xff]  ;;  %v3626_v0 = vld [vmem:[#allocation26_spill] sm:$0xff] }
 0x152   :  { %1306 = vmatprep.subr.bf16.mxu0 %v2927_v24  ;;  %1347 = vmatprep.subr.bf16.mxu1 %v2932_v25 }
 0x153   :  { %v1204_v5 = vadd.f32 %v1203_v4, %v1202_v1  ;;  %v3628_v1 = vld [vmem:[#allocation28_spill] sm:$0xff]  ;;  %v3629_v4 = vld [vmem:[#allocation29_spill] sm:$0xff] }
 0x155   :  { %2385 = vtanh.f32 %v1204_v5  ;;  %1210 = vst [vmem:[#allocation7] sm:$0x3] %v1204_v5  ;;  %1307 = vmatpush1.bf16.msra.mxu0 %v2941_v26  ;;  %1348 = vmatpush1.bf16.msra.mxu1 %v2946_v27  ;;  %v3630_v5 = vld [vmem:[#allocation30_spill] sm:$0xff] }
 0x156   :  { %1308 = vmatprep.subr.bf16.mxu0 %v2953_v28  ;;  %1349 = vmatprep.subr.bf16.mxu1 %v2958_v29 }
 0x159   :  { %1309 = vmatpush1.bf16.msra.mxu0 %v2965_v30  ;;  %1350 = vmatpush1.bf16.msra.mxu1 %v2970_v31 }
 0x15a   :  { %1310 = vmatprep.subr.bf16.mxu0 %v2977_v32  ;;  %1351 = vmatprep.subr.bf16.mxu1 %v2982_v33 }
 0x15d   :  { %1311 = vmatpush1.bf16.msra.mxu0 %v2989_v34  ;;  %1352 = vmatpush1.bf16.msra.mxu1 %v2994_v35 }
 0x15e   :  { %1312 = vmatprep.subr.bf16.mxu0 %v3001_v36  ;;  %1353 = vmatprep.subr.bf16.mxu1 %v3006_v37 }
 0x15f   :  { %v2386_v60 = vpop.eup %2385 }
 0x160   :  { %v1206_v56 = vmul.f32 %v2386_v60, %v2384_v11  ;;  %v3631_v11 = vld [vmem:[#allocation31_spill] sm:$0xff]  ;;  %v3632_v60 = vld [vmem:[#allocation32_spill] sm:$0xff] }
 0x161   :  { %1313 = vmatpush1.bf16.msra.mxu0 %v3013_v38  ;;  %1354 = vmatpush1.bf16.msra.mxu1 %v3604_v16 }
 0x162   :  { %1209 = vst [vmem:[#allocation6] sm:$0x3] %v1206_v56  ;;  %v1213_v15 = vpack.c.bf16 %v1206_v56, %v1206_v56  ;;  %1314 = vmatprep.subr.bf16.mxu0 %v3605_v55  ;;  %1355 = vmatprep.subr.bf16.mxu1 %v3606_v53 }
 0x164   :  { %2207 = vst [vmem:[%s3524_s9 + $0x3] sm:$0x1] %v1213_v15 }
 0x165   :  { %1315 = vmatpush1.bf16.msra.mxu0 %v3037_v44  ;;  %1356 = vmatpush1.bf16.msra.mxu1 %v3042_v45 }
 0x166   :  { %1316 = vmatprep.subr.bf16.mxu0 %v3049_v14  ;;  %1357 = vmatprep.subr.bf16.mxu1 %v3607_v40 }
 0x169   :  { %1317 = vmatpush1.bf16.msra.mxu0 %v3061_v2  ;;  %1358 = vmatpush1.bf16.msra.mxu1 %v3066_v41  ;;  %v1300_v12 = vld [vmem:[#allocation6] sm:$0x3] }
 0x16a   :  { %v1301_v39 = vpack.c.bf16 %v1300_v12, %v1300_v12  ;;  %1510 = vmatprep.subr.bf16.mxu0 %v2683_v42  ;;  %1551 = vmatprep.subr.bf16.mxu1 %v2688_v43  ;;  %v3608_v42 = vld [vmem:[#allocation8_spill] sm:$0xff]  ;;  %v3609_v43 = vld [vmem:[#allocation9_spill] sm:$0xff] }
 0x16c   :  { %1335 = vmatmul.mubr.bf16.vlgmr.msra.gmra.mrb[20].mxu0 %v1301_v39  ;;  %1376 = vmatmul.mubr.bf16.vlgmr.msra.gmra.mrb[20].mxu1 %v1301_v39 }
 0x16d   :  { %1511 = vmatpush1.bf16.msra.mxu0 %v2695_v46  ;;  %1552 = vmatpush1.bf16.msra.mxu1 %v2700_v47  ;;  %v3610_v46 = vld [vmem:[#allocation10_spill] sm:$0xff]  ;;  %v3611_v47 = vld [vmem:[#allocation11_spill] sm:$0xff] }
 0x16e   :  { %1512 = vmatprep.subr.bf16.mxu0 %v2705_v48  ;;  %1553 = vmatprep.subr.bf16.mxu1 %v2712_v49  ;;  %v3612_v48 = vld [vmem:[#allocation12_spill] sm:$0xff]  ;;  %v3613_v49 = vld [vmem:[#allocation13_spill] sm:$0xff] }
 0x16f   :  { %1542 = vmatprep.mubr.bf16.mxu0 %v3598_v17  ;;  %1583 = vmatprep.mubr.bf16.mxu1 %v3598_v17 }
 0x171   :  { %1513 = vmatpush1.bf16.msra.mxu0 %v2719_v50  ;;  %1554 = vmatpush1.bf16.msra.mxu1 %v2726_v51  ;;  %v3616_v50 = vld [vmem:[#allocation16_spill] sm:$0xff]  ;;  %v3617_v51 = vld [vmem:[#allocation17_spill] sm:$0xff] }
 0x172   :  { %1514 = vmatprep.subr.bf16.mxu0 %v2733_v52  ;;  %1555 = vmatprep.subr.bf16.mxu1 %v3608_v42  ;;  %v3618_v52 = vld [vmem:[#allocation18_spill] sm:$0xff] }
 0x175   :  { %1515 = vmatpush1.bf16.msra.mxu0 %v3609_v43  ;;  %1556 = vmatpush1.bf16.msra.mxu1 %v3610_v46 }
 0x176   :  { %1516 = vmatprep.subr.bf16.mxu0 %v3611_v47  ;;  %1557 = vmatprep.subr.bf16.mxu1 %v3612_v48 }
 0x179   :  { %1517 = vmatpush1.bf16.msra.mxu0 %v3613_v49  ;;  %1558 = vmatpush1.bf16.msra.mxu1 %v3614_v3 }
 0x17a   :  { %1518 = vmatprep.subr.bf16.mxu0 %v3615_v7  ;;  %1559 = vmatprep.subr.bf16.mxu1 %v3616_v50 }
 0x17d   :  { %1519 = vmatpush1.bf16.msra.mxu0 %v3617_v51  ;;  %1560 = vmatpush1.bf16.msra.mxu1 %v3618_v52  ;;  %v3633_v51 = vcombine.high %v3122_v10, %v3128_v58 }
 0x17e   :  { %1520 = vmatprep.subr.bf16.mxu0 %v3619_v59  ;;  %1561 = vmatprep.subr.bf16.mxu1 %v3620_v63 }
 0x181   :  { %1521 = vmatpush1.bf16.msra.mxu0 %v3621_v62  ;;  %1562 = vmatpush1.bf16.msra.mxu1 %v3622_v57 }
 0x182   :  { %1522 = vmatprep.subr.bf16.mxu0 %v3623_v13  ;;  %1563 = vmatprep.subr.bf16.mxu1 %v3624_v9 }
 0x185   :  { %1523 = vmatpush1.bf16.msra.mxu0 %v3625_v8  ;;  %1564 = vmatpush1.bf16.msra.mxu1 %v3626_v0 }
 0x186   :  { %1524 = vmatprep.subr.bf16.mxu0 %v3627_v54  ;;  %1565 = vmatprep.subr.bf16.mxu1 %v3628_v1 }
 0x189   :  { %1525 = vmatpush1.bf16.msra.mxu0 %v3629_v4  ;;  %1566 = vmatpush1.bf16.msra.mxu1 %v3630_v5 }
 0x18a   :  { %1594 = vmatprep.subr.bf16.mxu0 %v3631_v11  ;;  %1635 = vmatprep.subr.bf16.mxu1 %v3632_v60 }
 0x21f   :  { %v1252_v56 = vpop.f32.mrb[16].mxu0  ;;  %v1293_v15 = vpop.f32.mrb[16].mxu1 }
 0x220   :  { %v1254_v12 = vpop.f32.mrb[17].mxu0  ;;  %v1295_v39 = vpop.f32.mrb[17].mxu1 }
 0x221   :  { %v1390_v42 = vcombine.low %v1252_v56, %v1254_v12  ;;  %v1391_v43 = vcombine.low %v1293_v15, %v1295_v39  ;;  %v1256_v46 = vpop.f32.mrb[18].mxu0  ;;  %v1297_v47 = vpop.f32.mrb[18].mxu1 }
 0x222   :  { %v1257_v48 = vpop.f32.mrb[19].mxu0  ;;  %v1298_v49 = vpop.f32.mrb[19].mxu1 }
 0x223   :  { %v1398_v3 = vrot.slane %v1390_v42, %v3116_v6  ;;  %v1405_v7 = vrot.slane %v1391_v43, %v3116_v6 }
 0x225   :  { %v1406_v50 = vcombine.low %v1398_v3, %v1405_v7  ;;  %v1409_v3 = vld [vmem:[#allocation5] sm:$0x3] }
 0x227   :  { %v1408_v52 = vadd.f32 %v1406_v50, %v3633_v51 }
 0x229   :  { %v2208_v59 = vmul.f32 -1.442695, %v1408_v52  ;;  %v1417_v63 = vrot.slane %v1408_v52, 2  ;;  %v1428_v57 = vrot.slane %v1408_v52, 6  ;;  %v1425_v8 = vrot.slane %v1408_v52, 4 }
 0x22b   :  { %2387 = vpow2.f32 %v2208_v59  ;;  %v2209_v62 = vmul.f32 -1.442695, %v1417_v63  ;;  %v2210_v13 = vmul.f32 -1.442695, %v1428_v57  ;;  %v3634_v63 = vld [vmem:[#allocation41_spill] sm:$0xff] }
 0x22d   :  { %2389 = vpow2.f32 %v2209_v62  ;;  %v3635_v62 = vcombine.low %v3145_v61, %v3634_v63  ;;  %v2511_v63 = vld [vmem:[%s3518_s4 + $0xe4] ss:$16 sps:$4 sm:$0xff]  }
 0x22e   :  { %2391 = vpow2.f32 %v2210_v13 }
 0x235   :  { %v2388_v9 = vpop.eup %2387 }
 0x236   :  { %v1413_v0 = vadd.f32 1.0, %v2388_v9 }
 0x237   :  { %v2390_v54 = vpop.eup %2389 }
 0x238   :  { %2393 = vrcp.f32 %v1413_v0  ;;  %v1422_v1 = vadd.f32 1.0, %v2390_v54  ;;  %v2392_v11 = vpop.eup %2391 }
 0x239   :  { %2395 = vtanh.f32 %v1425_v8  ;;  %v1433_v7 = vadd.f32 1.0, %v2392_v11 }
 0x23a   :  { %2397 = vrcp.f32 %v1422_v1 }
 0x23b   :  { %2399 = vrcp.f32 %v1433_v7  ;;  %v2506_v7 = vld [vmem:[%s3518_s4 + $0xa8] ss:$16 sps:$4 sm:$0xff]  }
 0x23f   :  { %v1336_v4 = vpop.f32.mrb[20].mxu0  ;;  %v1377_v5 = vpop.f32.mrb[20].mxu1 }
 0x240   :  { %v1338_v10 = vpop.f32.mrb[21].mxu0  ;;  %v1379_v58 = vpop.f32.mrb[21].mxu1 }
 0x241   :  { %v1447_v60 = vcombine.low %v1336_v4, %v1338_v10  ;;  %v1448_v56 = vcombine.low %v1377_v5, %v1379_v58  ;;  %v1340_v15 = vpop.f32.mrb[22].mxu0  ;;  %v1381_v12 = vpop.f32.mrb[22].mxu1 }
 0x242   :  { %v2394_v39 = vpop.eup %2393  ;;  %v1341_v42 = vpop.f32.mrb[23].mxu0 }
 0x243   :  { %v1382_v43 = vpop.f32.mrb[23].mxu1  ;;  %v2396_v46 = vpop.eup %2395  ;;  %v1455_v47 = vrot.slane %v1447_v60, %v3116_v6  ;;  %v1462_v48 = vrot.slane %v1448_v56, %v3116_v6 }
 0x244   :  { %v2398_v49 = vpop.eup %2397  ;;  %v1437_v51 = vmul.f32 %v2396_v46, %v2394_v39 }
 0x245   :  { %v1436_v50 = vmul.f32 %v2398_v49, %v1409_v3  ;;  %v1463_v52 = vcombine.low %v1455_v47, %v1462_v48  ;;  %v2400_v54 = vpop.eup %2399  ;;  %v1466_v47 = vld [vmem:[#allocation7] sm:$0x3] }
 0x247   :  { %v1438_v59 = vadd.f32 %v1437_v51, %v1436_v50  ;;  %v1465_v57 = vadd.f32 %v1463_v52, %v3635_v62  ;;  %v2507_v50 = vld [vmem:[%s3518_s4 + $0xc4] ss:$16 sps:$4 sm:$0xff]   ;;  %v2508_v51 = vld [vmem:[%s3518_s4 + $0xcc] ss:$16 sps:$4 sm:$0xff]   ;;  %v2509_v52 = vld [vmem:[%s3518_s4 + $0xc0] ss:$16 sps:$4 sm:$0xff]  }
 0x248   :  { %v2512_v62 = vld [vmem:[%s3518_s4 + $0xec] ss:$16 sps:$4 sm:$0xff]  }
 0x249   :  { %2401 = vtanh.f32 %v1438_v59  ;;  %1499 = vst [vmem:[#allocation5] sm:$0x3] %v1438_v59  ;;  %v2211_v13 = vmul.f32 -1.442695, %v1465_v57  ;;  %v1474_v9 = vrot.slane %v1465_v57, 2  ;;  %v1485_v0 = vrot.slane %v1465_v57, 6 }
 0x24a   :  { %v1482_v58 = vrot.slane %v1465_v57, 4  ;;  %v2510_v59 = vld [vmem:[%s3518_s4 + $0xc8] ss:$16 sps:$4 sm:$0xff]   ;;  %v2513_v57 = vld [vmem:[%s3518_s4 + $0xe0] ss:$16 sps:$4 sm:$0xff]  }
 0x24b   :  { %2403 = vpow2.f32 %v2211_v13  ;;  %v2212_v8 = vmul.f32 -1.442695, %v1474_v9  ;;  %v2213_v4 = vmul.f32 -1.442695, %v1485_v0  ;;  %v2514_v13 = vld [vmem:[%s3518_s4 + $0xe8] ss:$16 sps:$4 sm:$0xff]  }
 0x24c   :  { %v2515_v9 = vld [vmem:[%s3520_s5 + $0x4] ss:$16 sps:$4 sm:$0xff]  }
 0x24d   :  { %2405 = vpow2.f32 %v2212_v8  ;;  %v2516_v8 = vld [vmem:[%s3520_s5 + $0xc] ss:$16 sps:$4 sm:$0xff]  }
 0x24e   :  { %2407 = vpow2.f32 %v2213_v4 }
 0x253   :  { %v2402_v1 = vpop.eup %2401 }
 0x254   :  { %v1440_v5 = vmul.f32 %v2402_v1, %v2400_v54 }
 0x255   :  { %v2404_v10 = vpop.eup %2403 }
 0x256   :  { %1498 = vst [vmem:[#allocation4] sm:$0x3] %v1440_v5  ;;  %v1502_v11 = vpack.c.bf16 %v1440_v5, %v1440_v5  ;;  %v1470_v60 = vadd.f32 1.0, %v2404_v10 }
 0x257   :  { %v2406_v61 = vpop.eup %2405 }
 0x258   :  { %2214 = vst [vmem:[%s3523_s8 + $0x1] sm:$0x1] %v1502_v11  ;;  %2409 = vrcp.f32 %v1470_v60  ;;  %v1479_v56 = vadd.f32 1.0, %v2406_v61  ;;  %v2408_v39 = vpop.eup %2407 }
 0x259   :  { %2411 = vtanh.f32 %v1482_v58  ;;  %v1490_v48 = vadd.f32 1.0, %v2408_v39  ;;  %v3636_v39 = vld [vmem:[#allocation37_spill] sm:$0xff] }
 0x25a   :  { %2413 = vrcp.f32 %v1479_v56 }
 0x25b   :  { %2415 = vrcp.f32 %v1490_v48 }
 0x25d   :  { %v1508_v15 = vld [vmem:[#allocation4] sm:$0x3] }
 0x25e   :  { %v1509_v12 = vpack.c.bf16 %v1508_v15, %v1508_v15 }
 0x260   :  { %1543 = vmatmul.mubr.bf16.vlgmr.msra.gmra.mrb[24].mxu0 %v1509_v12  ;;  %1584 = vmatmul.mubr.bf16.vlgmr.msra.gmra.mrb[24].mxu1 %v1509_v12 }
 0x261   :  { %1595 = vmatpush1.bf16.msra.mxu0 %v2891_v18  ;;  %1636 = vmatpush1.bf16.msra.mxu1 %v2896_v19 }
 0x262   :  { %v2410_v42 = vpop.eup %2409  ;;  %1596 = vmatprep.subr.bf16.mxu0 %v2903_v20  ;;  %1637 = vmatprep.subr.bf16.mxu1 %v2908_v21 }
 0x263   :  { %v2412_v43 = vpop.eup %2411  ;;  %1626 = vmatprep.mubr.bf16.mxu0 %v3598_v17  ;;  %1667 = vmatprep.mubr.bf16.mxu1 %v3598_v17 }
 0x264   :  { %v2414_v46 = vpop.eup %2413  ;;  %v1494_v3 = vmul.f32 %v2412_v43, %v2410_v42  ;;  %v3637_v42 = vld [vmem:[#allocation38_spill] sm:$0xff] }
 0x265   :  { %v1493_v49 = vmul.f32 %v2414_v46, %v1466_v47  ;;  %1597 = vmatpush1.bf16.msra.mxu0 %v2915_v22  ;;  %1638 = vmatpush1.bf16.msra.mxu1 %v2920_v23  ;;  %v2416_v19 = vpop.eup %2415  ;;  %v3638_v43 = vcombine.low %v3636_v39, %v3637_v42 }
 0x266   :  { %1598 = vmatprep.subr.bf16.mxu0 %v2927_v24  ;;  %1639 = vmatprep.subr.bf16.mxu1 %v2932_v25  ;;  %v2483_v25 = vld [vmem:[%s3518_s4 + $0x4] ss:$16 sps:$4 sm:$0xff]  }
 0x267   :  { %v1495_v18 = vadd.f32 %v1494_v3, %v1493_v49 }
 0x269   :  { %2417 = vtanh.f32 %v1495_v18  ;;  %1501 = vst [vmem:[#allocation7] sm:$0x3] %v1495_v18  ;;  %1599 = vmatpush1.bf16.msra.mxu0 %v2941_v26  ;;  %1640 = vmatpush1.bf16.msra.mxu1 %v2946_v27  ;;  %v2484_v26 = vld [vmem:[%s3518_s4 + $0xc] ss:$16 sps:$4 sm:$0xff]   ;;  %v2486_v27 = vld [vmem:[%s3518_s4 + $0x8] ss:$16 sps:$4 sm:$0xff]  }
 0x26a   :  { %1600 = vmatprep.subr.bf16.mxu0 %v2953_v28  ;;  %1641 = vmatprep.subr.bf16.mxu1 %v2958_v29  ;;  %v2487_v28 = vld [vmem:[%s3518_s4 + $0x24] ss:$16 sps:$4 sm:$0xff]   ;;  %v2488_v29 = vld [vmem:[%s3518_s4 + $0x2c] ss:$16 sps:$4 sm:$0xff]  }
 0x26d   :  { %1601 = vmatpush1.bf16.msra.mxu0 %v2965_v30  ;;  %1642 = vmatpush1.bf16.msra.mxu1 %v2970_v31  ;;  %v2489_v30 = vld [vmem:[%s3518_s4 + $0x20] ss:$16 sps:$4 sm:$0xff]   ;;  %v2490_v31 = vld [vmem:[%s3518_s4 + $0x28] ss:$16 sps:$4 sm:$0xff]  }
 0x26e   :  { %1602 = vmatprep.subr.bf16.mxu0 %v2977_v32  ;;  %1643 = vmatprep.subr.bf16.mxu1 %v2982_v33  ;;  %v2491_v32 = vld [vmem:[%s3518_s4 + $0x44] ss:$16 sps:$4 sm:$0xff]   ;;  %v2492_v33 = vld [vmem:[%s3518_s4 + $0x4c] ss:$16 sps:$4 sm:$0xff]  }
 0x271   :  { %1603 = vmatpush1.bf16.msra.mxu0 %v2989_v34  ;;  %1644 = vmatpush1.bf16.msra.mxu1 %v2994_v35  ;;  %v2493_v34 = vld [vmem:[%s3518_s4 + $0x40] ss:$16 sps:$4 sm:$0xff]   ;;  %v2494_v35 = vld [vmem:[%s3518_s4 + $0x48] ss:$16 sps:$4 sm:$0xff]  }
 0x272   :  { %1604 = vmatprep.subr.bf16.mxu0 %v3001_v36  ;;  %1645 = vmatprep.subr.bf16.mxu1 %v3006_v37  ;;  %v2495_v36 = vld [vmem:[%s3518_s4 + $0x64] ss:$16 sps:$4 sm:$0xff]   ;;  %v2496_v37 = vld [vmem:[%s3518_s4 + $0x6c] ss:$16 sps:$4 sm:$0xff]  }
 0x273   :  { %v2418_v20 = vpop.eup %2417 }
 0x274   :  { %v1497_v21 = vmul.f32 %v2418_v20, %v2416_v19 }
 0x275   :  { %1605 = vmatpush1.bf16.msra.mxu0 %v3013_v38  ;;  %1646 = vmatpush1.bf16.msra.mxu1 %v3604_v16  ;;  %v2497_v38 = vld [vmem:[%s3518_s4 + $0x60] ss:$16 sps:$4 sm:$0xff]   ;;  %v2502_v16 = vld [vmem:[%s3518_s4 + $0x88] ss:$16 sps:$4 sm:$0xff]  }
 0x276   :  { %1500 = vst [vmem:[#allocation6] sm:$0x3] %v1497_v21  ;;  %v1505_v22 = vpack.c.bf16 %v1497_v21, %v1497_v21  ;;  %1606 = vmatprep.subr.bf16.mxu0 %v3605_v55  ;;  %1647 = vmatprep.subr.bf16.mxu1 %v3606_v53  ;;  %v2503_v55 = vld [vmem:[%s3518_s4 + $0xa4] ss:$16 sps:$4 sm:$0xff]   ;;  %v2504_v53 = vld [vmem:[%s3518_s4 + $0xac] ss:$16 sps:$4 sm:$0xff]  }
 0x278   :  { %2215 = vst [vmem:[%s3524_s9 + $0x2] sm:$0x1] %v1505_v22 }
 0x279   :  { %1607 = vmatpush1.bf16.msra.mxu0 %v3037_v44  ;;  %1648 = vmatpush1.bf16.msra.mxu1 %v3042_v45  ;;  %v2499_v44 = vld [vmem:[%s3518_s4 + $0x84] ss:$16 sps:$4 sm:$0xff]   ;;  %v2500_v45 = vld [vmem:[%s3518_s4 + $0x8c] ss:$16 sps:$4 sm:$0xff]  }
 0x27a   :  { %1608 = vmatprep.subr.bf16.mxu0 %v3049_v14  ;;  %1649 = vmatprep.subr.bf16.mxu1 %v3607_v40  ;;  %v2501_v14 = vld [vmem:[%s3518_s4 + $0x80] ss:$16 sps:$4 sm:$0xff]  }
 0x27b   :  { %v2505_v40 = vld [vmem:[%s3518_s4 + $0xa0] ss:$16 sps:$4 sm:$0xff]  }
 0x27d   :  { %1609 = vmatpush1.bf16.msra.mxu0 %v3061_v2  ;;  %1650 = vmatpush1.bf16.msra.mxu1 %v3066_v41  ;;  %v1592_v23 = vld [vmem:[#allocation6] sm:$0x3]  ;;  %v2485_v2 = vld [vmem:[%s3518_s4] ss:$16 sps:$4 sm:$0xff]   ;;  %v2498_v41 = vld [vmem:[%s3518_s4 + $0x68] ss:$16 sps:$4 sm:$0xff]  }
 0x27e   :  { %v1593_v24 = vpack.c.bf16 %v1592_v23, %v1592_v23  ;;  %1802 = vmatprep.subr.bf16.mxu0 %v2483_v25  ;;  %1843 = vmatprep.subr.bf16.mxu1 %v2484_v26 }
 0x280   :  { %1627 = vmatmul.mubr.bf16.vlgmr.msra.gmra.mrb[28].mxu0 %v1593_v24  ;;  %1668 = vmatmul.mubr.bf16.vlgmr.msra.gmra.mrb[28].mxu1 %v1593_v24 }
 0x281   :  { %1803 = vmatpush1.bf16.msra.mxu0 %v2485_v2  ;;  %1844 = vmatpush1.bf16.msra.mxu1 %v2486_v27 }
 0x282   :  { %1804 = vmatprep.subr.bf16.mxu0 %v2487_v28  ;;  %1845 = vmatprep.subr.bf16.mxu1 %v2488_v29 }
 0x283   :  { %1834 = vmatprep.mubr.bf16.mxu0 %v3598_v17  ;;  %1875 = vmatprep.mubr.bf16.mxu1 %v3598_v17 }
 0x285   :  { %1805 = vmatpush1.bf16.msra.mxu0 %v2489_v30  ;;  %1846 = vmatpush1.bf16.msra.mxu1 %v2490_v31 }
 0x286   :  { %1806 = vmatprep.subr.bf16.mxu0 %v2491_v32  ;;  %1847 = vmatprep.subr.bf16.mxu1 %v2492_v33 }
 0x289   :  { %1807 = vmatpush1.bf16.msra.mxu0 %v2493_v34  ;;  %1848 = vmatpush1.bf16.msra.mxu1 %v2494_v35 }
 0x28a   :  { %1808 = vmatprep.subr.bf16.mxu0 %v2495_v36  ;;  %1849 = vmatprep.subr.bf16.mxu1 %v2496_v37 }
 0x28d   :  { %1809 = vmatpush1.bf16.msra.mxu0 %v2497_v38  ;;  %1850 = vmatpush1.bf16.msra.mxu1 %v2498_v41  ;;  %v1701_v41 = vld [vmem:[#allocation5] sm:$0x3] }
 0x28e   :  { %1810 = vmatprep.subr.bf16.mxu0 %v2499_v44  ;;  %1851 = vmatprep.subr.bf16.mxu1 %v2500_v45 }
 0x291   :  { %1811 = vmatpush1.bf16.msra.mxu0 %v2501_v14  ;;  %1852 = vmatpush1.bf16.msra.mxu1 %v2502_v16 }
 0x292   :  { %1812 = vmatprep.subr.bf16.mxu0 %v2503_v55  ;;  %1853 = vmatprep.subr.bf16.mxu1 %v2504_v53  ;;  %v3639_v53 = vld [vmem:[#allocation39_spill] sm:$0xff] }
 0x295   :  { %1813 = vmatpush1.bf16.msra.mxu0 %v2505_v40  ;;  %1854 = vmatpush1.bf16.msra.mxu1 %v2506_v7  ;;  %v3640_v40 = vld [vmem:[#allocation40_spill] sm:$0xff] }
 0x296   :  { %1814 = vmatprep.subr.bf16.mxu0 %v2507_v50  ;;  %1855 = vmatprep.subr.bf16.mxu1 %v2508_v51  ;;  %v3641_v7 = vcombine.high %v3639_v53, %v3640_v40 }
 0x299   :  { %1815 = vmatpush1.bf16.msra.mxu0 %v2509_v52  ;;  %1856 = vmatpush1.bf16.msra.mxu1 %v2510_v59 }
 0x29a   :  { %1816 = vmatprep.subr.bf16.mxu0 %v2511_v63  ;;  %1857 = vmatprep.subr.bf16.mxu1 %v2512_v62 }
 0x29d   :  { %1817 = vmatpush1.bf16.msra.mxu0 %v2513_v57  ;;  %1858 = vmatpush1.bf16.msra.mxu1 %v2514_v13 }
 0x29e   :  { %1886 = vmatprep.subr.bf16.mxu0 %v2515_v9  ;;  %1927 = vmatprep.subr.bf16.mxu1 %v2516_v8 }
 0x333   :  { %v1544_v0 = vpop.f32.mrb[24].mxu0  ;;  %v1585_v54 = vpop.f32.mrb[24].mxu1 }
 0x334   :  { %v1546_v1 = vpop.f32.mrb[25].mxu0  ;;  %v1587_v4 = vpop.f32.mrb[25].mxu1 }
 0x335   :  { %v1682_v5 = vcombine.low %v1544_v0, %v1546_v1  ;;  %v1683_v10 = vcombine.low %v1585_v54, %v1587_v4  ;;  %v1548_v58 = vpop.f32.mrb[26].mxu0  ;;  %v1589_v11 = vpop.f32.mrb[26].mxu1 }
 0x336   :  { %v1549_v60 = vpop.f32.mrb[27].mxu0  ;;  %v1590_v61 = vpop.f32.mrb[27].mxu1 }
 0x337   :  { %v1690_v56 = vrot.slane %v1682_v5, %v3116_v6  ;;  %v1697_v15 = vrot.slane %v1683_v10, %v3116_v6  ;;  %v2517_v60 = vld [vmem:[%s3520_s5] ss:$16 sps:$4 sm:$0xff]   ;;  %v2518_v61 = vld [vmem:[%s3520_s5 + $0x8] ss:$16 sps:$4 sm:$0xff]  }
 0x339   :  { %v1698_v12 = vcombine.low %v1690_v56, %v1697_v15  ;;  %v2519_v15 = vld [vmem:[%s3520_s5 + $0x24] ss:$16 sps:$4 sm:$0xff]  }
 0x33b   :  { %v1700_v46 = vadd.f32 %v1698_v12, %v3638_v43  ;;  %v2520_v12 = vld [vmem:[%s3520_s5 + $0x2c] ss:$16 sps:$4 sm:$0xff]  }
 0x33d   :  { %v2216_v47 = vmul.f32 -1.442695, %v1700_v46  ;;  %v1709_v48 = vrot.slane %v1700_v46, 2  ;;  %v1720_v3 = vrot.slane %v1700_v46, 6  ;;  %v1717_v20 = vrot.slane %v1700_v46, 4 }
 0x33f   :  { %2419 = vpow2.f32 %v2216_v47  ;;  %v2217_v49 = vmul.f32 -1.442695, %v1709_v48  ;;  %v2218_v18 = vmul.f32 -1.442695, %v1720_v3  ;;  %v1758_v47 = vld [vmem:[#allocation7] sm:$0x3] }
 0x341   :  { %2421 = vpow2.f32 %v2217_v49 }
 0x342   :  { %2423 = vpow2.f32 %v2218_v18  ;;  %v2521_v18 = vld [vmem:[%s3520_s5 + $0x20] ss:$16 sps:$4 sm:$0xff]  }
 0x349   :  { %v2420_v19 = vpop.eup %2419 }
 0x34a   :  { %v1705_v21 = vadd.f32 1.0, %v2420_v19  ;;  %v2522_v19 = vld [vmem:[%s3520_s5 + $0x28] ss:$16 sps:$4 sm:$0xff]  }
 0x34b   :  { %v2422_v22 = vpop.eup %2421 }
 0x34c   :  { %2425 = vrcp.f32 %v1705_v21  ;;  %v1714_v23 = vadd.f32 1.0, %v2422_v22  ;;  %v2424_v27 = vpop.eup %2423  ;;  %v2525_v22 = vld [vmem:[%s3520_s5 + $0x40] ss:$16 sps:$4 sm:$0xff]  }
 0x34d   :  { %2427 = vtanh.f32 %v1717_v20  ;;  %v1725_v44 = vadd.f32 1.0, %v2424_v27  ;;  %v2523_v20 = vld [vmem:[%s3520_s5 + $0x44] ss:$16 sps:$4 sm:$0xff]  }
 0x34e   :  { %2429 = vrcp.f32 %v1714_v23  ;;  %v2526_v23 = vld [vmem:[%s3520_s5 + $0x48] ss:$16 sps:$4 sm:$0xff]   ;;  %v2531_v27 = vld [vmem:[%s3520_s5 + $0x84] ss:$16 sps:$4 sm:$0xff]  }
 0x34f   :  { %2431 = vrcp.f32 %v1725_v44  ;;  %v2540_v44 = vld [vmem:[%s3520_s5 + $0xcc] ss:$16 sps:$4 sm:$0xff]  }
 0x353   :  { %v1628_v24 = vpop.f32.mrb[28].mxu0  ;;  %v1669_v25 = vpop.f32.mrb[28].mxu1 }
 0x354   :  { %v1630_v26 = vpop.f32.mrb[29].mxu0  ;;  %v1671_v2 = vpop.f32.mrb[29].mxu1 }
 0x355   :  { %v1739_v28 = vcombine.low %v1628_v24, %v1630_v26  ;;  %v1740_v29 = vcombine.low %v1669_v25, %v1671_v2  ;;  %v1632_v30 = vpop.f32.mrb[30].mxu0  ;;  %v1673_v31 = vpop.f32.mrb[30].mxu1  ;;  %v2527_v24 = vld [vmem:[%s3520_s5 + $0x64] ss:$16 sps:$4 sm:$0xff]   ;;  %v2528_v25 = vld [vmem:[%s3520_s5 + $0x6c] ss:$16 sps:$4 sm:$0xff]  }
 0x356   :  { %v2426_v32 = vpop.eup %2425  ;;  %v1633_v33 = vpop.f32.mrb[31].mxu0  ;;  %v2529_v26 = vld [vmem:[%s3520_s5 + $0x60] ss:$16 sps:$4 sm:$0xff]   ;;  %v2530_v2 = vld [vmem:[%s3520_s5 + $0x68] ss:$16 sps:$4 sm:$0xff]  }
 0x357   :  { %v1674_v34 = vpop.f32.mrb[31].mxu1  ;;  %v2428_v35 = vpop.eup %2427  ;;  %v1747_v36 = vrot.slane %v1739_v28, %v3116_v6  ;;  %v1754_v37 = vrot.slane %v1740_v29, %v3116_v6  ;;  %v2532_v28 = vld [vmem:[%s3520_s5 + $0x8c] ss:$16 sps:$4 sm:$0xff]   ;;  %v2533_v29 = vld [vmem:[%s3520_s5 + $0x80] ss:$16 sps:$4 sm:$0xff]  }
 0x358   :  { %v2430_v38 = vpop.eup %2429  ;;  %v1729_v14 = vmul.f32 %v2428_v35, %v2426_v32  ;;  %v2534_v30 = vld [vmem:[%s3520_s5 + $0x88] ss:$16 sps:$4 sm:$0xff]   ;;  %v2535_v32 = vld [vmem:[%s3520_s5 + $0xa4] ss:$16 sps:$4 sm:$0xff]   ;;  %v2536_v33 = vld [vmem:[%s3520_s5 + $0xac] ss:$16 sps:$4 sm:$0xff]  }
 0x359   :  { %v1728_v45 = vmul.f32 %v2430_v38, %v1701_v41  ;;  %v1755_v16 = vcombine.low %v1747_v36, %v1754_v37  ;;  %v2432_v62 = vpop.eup %2431  ;;  %v2537_v36 = vld [vmem:[%s3520_s5 + $0xa0] ss:$16 sps:$4 sm:$0xff]   ;;  %v2538_v37 = vld [vmem:[%s3520_s5 + $0xa8] ss:$16 sps:$4 sm:$0xff]   ;;  %v2539_v41 = vld [vmem:[%s3520_s5 + $0xc4] ss:$16 sps:$4 sm:$0xff]  }
 0x35b   :  { %v1730_v55 = vadd.f32 %v1729_v14, %v1728_v45  ;;  %v1757_v50 = vadd.f32 %v1755_v16, %v3641_v7  ;;  %v2541_v45 = vld [vmem:[%s3520_s5 + $0xc0] ss:$16 sps:$4 sm:$0xff]   ;;  %v2542_v14 = vld [vmem:[%s3520_s5 + $0xc8] ss:$16 sps:$4 sm:$0xff]   ;;  %v2543_v16 = vld [vmem:[%s3520_s5 + $0xe4] ss:$16 sps:$4 sm:$0xff]  }
 0x35c   :  { %v2545_v7 = vld [vmem:[%s3520_s5 + $0xe0] ss:$16 sps:$4 sm:$0xff]  }
 0x35d   :  { %2433 = vtanh.f32 %v1730_v55  ;;  %1791 = vst [vmem:[#allocation5] sm:$0x3] %v1730_v55  ;;  %v2219_v51 = vmul.f32 -1.442695, %v1757_v50  ;;  %v1766_v52 = vrot.slane %v1757_v50, 2  ;;  %v1777_v63 = vrot.slane %v1757_v50, 6 }
 0x35e   :  { %v1774_v0 = vrot.slane %v1757_v50, 4  ;;  %v2544_v55 = vld [vmem:[%s3520_s5 + $0xec] ss:$16 sps:$4 sm:$0xff]   ;;  %v2546_v50 = vld [vmem:[%s3520_s5 + $0xe8] ss:$16 sps:$4 sm:$0xff]  }
 0x35f   :  { %2435 = vpow2.f32 %v2219_v51  ;;  %v2220_v59 = vmul.f32 -1.442695, %v1766_v52  ;;  %v2221_v13 = vmul.f32 -1.442695, %v1777_v63 }
 0x361   :  { %2437 = vpow2.f32 %v2220_v59 }
 0x362   :  { %2439 = vpow2.f32 %v2221_v13 }
 0x367   :  { %v2434_v57 = vpop.eup %2433 }
 0x368   :  { %v1732_v9 = vmul.f32 %v2434_v57, %v2432_v62 }
 0x369   :  { %v2436_v8 = vpop.eup %2435 }
 0x36a   :  { %v1794_v54 = vpack.c.bf16 %v1732_v9, %v1732_v9  ;;  %1790 = vst [vmem:[#allocation4] sm:$0x3] %v1732_v9  ;;  %v1762_v1 = vadd.f32 1.0, %v2436_v8 }
 0x36b   :  { %v2438_v4 = vpop.eup %2437 }
 0x36c   :  { %2222 = vst [vmem:[%s3523_s8 + $0x2] sm:$0x1] %v1794_v54  ;;  %2441 = vrcp.f32 %v1762_v1  ;;  %v1771_v5 = vadd.f32 1.0, %v2438_v4  ;;  %v2440_v11 = vpop.eup %2439 }
 0x36d   :  { %2443 = vtanh.f32 %v1774_v0  ;;  %v1782_v48 = vadd.f32 1.0, %v2440_v11 }
 0x36e   :  { %2445 = vrcp.f32 %v1771_v5 }
 0x36f   :  { %2447 = vrcp.f32 %v1782_v48 }
 0x371   :  { %v1800_v10 = vld [vmem:[#allocation4] sm:$0x3] }
 0x372   :  { %v1801_v58 = vpack.c.bf16 %v1800_v10, %v1800_v10 }
 0x374   :  { %1835 = vmatmul.mubr.bf16.vlgmr.msra.gmra.mrb[32].mxu0 %v1801_v58  ;;  %1876 = vmatmul.mubr.bf16.vlgmr.msra.gmra.mrb[32].mxu1 %v1801_v58  ;;  %v3642_v58 = vcombine.high %v3636_v39, %v3637_v42 }
 0x375   :  { %1887 = vmatpush1.bf16.msra.mxu0 %v2517_v60  ;;  %1928 = vmatpush1.bf16.msra.mxu1 %v2518_v61 }
 0x376   :  { %v2442_v56 = vpop.eup %2441  ;;  %1888 = vmatprep.subr.bf16.mxu0 %v2519_v15  ;;  %1929 = vmatprep.subr.bf16.mxu1 %v2520_v12 }
 0x377   :  { %v2444_v43 = vpop.eup %2443  ;;  %1918 = vmatprep.mubr.bf16.mxu0 %v3598_v17  ;;  %1959 = vmatprep.mubr.bf16.mxu1 %v3598_v17  ;;  %v2524_v17 = vld [vmem:[%s3520_s5 + $0x4c] ss:$16 sps:$4 sm:$0xff]  }
 0x378   :  { %v2446_v46 = vpop.eup %2445  ;;  %v1786_v3 = vmul.f32 %v2444_v43, %v2442_v56 }
 0x379   :  { %v1785_v49 = vmul.f32 %v2446_v46, %v1758_v47  ;;  %1889 = vmatpush1.bf16.msra.mxu0 %v2521_v18  ;;  %1930 = vmatpush1.bf16.msra.mxu1 %v2522_v19  ;;  %v2448_v31 = vpop.eup %2447 }
 0x37a   :  { %1890 = vmatprep.subr.bf16.mxu0 %v2523_v20  ;;  %1931 = vmatprep.subr.bf16.mxu1 %v2524_v17 }
 0x37b   :  { %v1787_v21 = vadd.f32 %v1786_v3, %v1785_v49 }
 0x37d   :  { %2449 = vtanh.f32 %v1787_v21  ;;  %1793 = vst [vmem:[#allocation7] sm:$0x3] %v1787_v21  ;;  %1891 = vmatpush1.bf16.msra.mxu0 %v2525_v22  ;;  %1932 = vmatpush1.bf16.msra.mxu1 %v2526_v23 }
 0x37e   :  { %1892 = vmatprep.subr.bf16.mxu0 %v2527_v24  ;;  %1933 = vmatprep.subr.bf16.mxu1 %v2528_v25 }
 0x381   :  { %1893 = vmatpush1.bf16.msra.mxu0 %v2529_v26  ;;  %1934 = vmatpush1.bf16.msra.mxu1 %v2530_v2 }
 0x382   :  { %1894 = vmatprep.subr.bf16.mxu0 %v2531_v27  ;;  %1935 = vmatprep.subr.bf16.mxu1 %v2532_v28 }
 0x385   :  { %1895 = vmatpush1.bf16.msra.mxu0 %v2533_v29  ;;  %1936 = vmatpush1.bf16.msra.mxu1 %v2534_v30  ;;  %v1993_v29 = vld [vmem:[#allocation5] sm:$0x3] }
 0x386   :  { %1896 = vmatprep.subr.bf16.mxu0 %v2535_v32  ;;  %1937 = vmatprep.subr.bf16.mxu1 %v2536_v33 }
 0x387   :  { %v2450_v34 = vpop.eup %2449 }
 0x388   :  { %v1789_v35 = vmul.f32 %v2450_v34, %v2448_v31 }
 0x389   :  { %1897 = vmatpush1.bf16.msra.mxu0 %v2537_v36  ;;  %1938 = vmatpush1.bf16.msra.mxu1 %v2538_v37 }
 0x38a   :  { %v1797_v38 = vpack.c.bf16 %v1789_v35, %v1789_v35  ;;  %1792 = vst [vmem:[#allocation6] sm:$0x3] %v1789_v35  ;;  %1898 = vmatprep.subr.bf16.mxu0 %v2539_v41  ;;  %1939 = vmatprep.subr.bf16.mxu1 %v2540_v44  ;;  %v3643_v35 = vcombine.low %v3639_v53, %v3640_v40 }
 0x38c   :  { %2223 = vst [vmem:[%s3524_s9 + $0x1] sm:$0x1] %v1797_v38 }
 0x38d   :  { %1899 = vmatpush1.bf16.msra.mxu0 %v2541_v45  ;;  %1940 = vmatpush1.bf16.msra.mxu1 %v2542_v14 }
 0x38e   :  { %1900 = vmatprep.subr.bf16.mxu0 %v2543_v16  ;;  %1941 = vmatprep.subr.bf16.mxu1 %v2544_v55 }
 0x391   :  { %1901 = vmatpush1.bf16.msra.mxu0 %v2545_v7  ;;  %1942 = vmatpush1.bf16.msra.mxu1 %v2546_v50  ;;  %v1884_v51 = vld [vmem:[#allocation6] sm:$0x3] }
 0x392   :  { %v1885_v52 = vpack.c.bf16 %v1884_v51, %v1884_v51 }
 0x394   :  { %1919 = vmatmul.mubr.bf16.vlgmr.msra.gmra.mrb[36].mxu0 %v1885_v52  ;;  %1960 = vmatmul.mubr.bf16.vlgmr.msra.gmra.mrb[36].mxu1 %v1885_v52 }
 0x447   :  { %v1836_v59 = vpop.f32.mrb[32].mxu0  ;;  %v1877_v63 = vpop.f32.mrb[32].mxu1 }
 0x448   :  { %v1838_v62 = vpop.f32.mrb[33].mxu0  ;;  %v1879_v57 = vpop.f32.mrb[33].mxu1 }
 0x449   :  { %v1974_v13 = vcombine.low %v1836_v59, %v1838_v62  ;;  %v1975_v9 = vcombine.low %v1877_v63, %v1879_v57  ;;  %v1840_v8 = vpop.f32.mrb[34].mxu0  ;;  %v1881_v0 = vpop.f32.mrb[34].mxu1  ;;  %v2049_v57 = vld [vmem:[#allocation7] sm:$0x3] }
 0x44a   :  { %v1841_v54 = vpop.f32.mrb[35].mxu0  ;;  %v1882_v1 = vpop.f32.mrb[35].mxu1 }
 0x44b   :  { %v1982_v4 = vrot.slane %v1974_v13, %v3116_v6  ;;  %v1989_v5 = vrot.slane %v1975_v9, %v3116_v6 }
 0x44d   :  { %v1990_v10 = vcombine.low %v1982_v4, %v1989_v5 }
 0x44f   :  { %v1992_v11 = vadd.f32 %v1990_v10, %v3642_v58 }
 0x451   :  { %v2224_v60 = vmul.f32 -1.442695, %v1992_v11  ;;  %v2001_v61 = vrot.slane %v1992_v11, 2  ;;  %v2012_v15 = vrot.slane %v1992_v11, 6  ;;  %v2009_v46 = vrot.slane %v1992_v11, 4 }
 0x453   :  { %2451 = vpow2.f32 %v2224_v60  ;;  %v2225_v56 = vmul.f32 -1.442695, %v2001_v61  ;;  %v2226_v12 = vmul.f32 -1.442695, %v2012_v15 }
 0x455   :  { %2453 = vpow2.f32 %v2225_v56 }
 0x456   :  { %2455 = vpow2.f32 %v2226_v12 }
 0x45d   :  { %v2452_v43 = vpop.eup %2451 }
 0x45e   :  { %v1997_v47 = vadd.f32 1.0, %v2452_v43 }
 0x45f   :  { %v2454_v48 = vpop.eup %2453 }
 0x460   :  { %2457 = vrcp.f32 %v1997_v47  ;;  %v2006_v49 = vadd.f32 1.0, %v2454_v48  ;;  %v2456_v19 = vpop.eup %2455 }
 0x461   :  { %2459 = vtanh.f32 %v2009_v46  ;;  %v2017_v30 = vadd.f32 1.0, %v2456_v19 }
 0x462   :  { %2461 = vrcp.f32 %v2006_v49 }
 0x463   :  { %2463 = vrcp.f32 %v2017_v30 }
 0x467   :  { %v1920_v3 = vpop.f32.mrb[36].mxu0  ;;  %v1961_v18 = vpop.f32.mrb[36].mxu1 }
 0x468   :  { %v1922_v39 = vpop.f32.mrb[37].mxu0  ;;  %v1963_v42 = vpop.f32.mrb[37].mxu1 }
 0x469   :  { %v2030_v20 = vcombine.low %v1920_v3, %v1922_v39  ;;  %v2031_v17 = vcombine.low %v1961_v18, %v1963_v42  ;;  %v1924_v21 = vpop.f32.mrb[38].mxu0  ;;  %v1965_v22 = vpop.f32.mrb[38].mxu1 }
 0x46a   :  { %v2458_v23 = vpop.eup %2457  ;;  %v1925_v24 = vpop.f32.mrb[39].mxu0 }
 0x46b   :  { %v1966_v25 = vpop.f32.mrb[39].mxu1  ;;  %v2460_v26 = vpop.eup %2459  ;;  %v2038_v2 = vrot.slane %v2030_v20, %v3116_v6  ;;  %v2045_v27 = vrot.slane %v2031_v17, %v3116_v6 }
 0x46c   :  { %v2462_v28 = vpop.eup %2461  ;;  %v2021_v32 = vmul.f32 %v2460_v26, %v2458_v23 }
 0x46d   :  { %v2020_v31 = vmul.f32 %v2462_v28, %v1993_v29  ;;  %v2046_v33 = vcombine.low %v2038_v2, %v2045_v27  ;;  %v2464_v44 = vpop.eup %2463 }
 0x46f   :  { %v2022_v34 = vadd.f32 %v2021_v32, %v2020_v31  ;;  %v2048_v36 = vadd.f32 %v2046_v33, %v3643_v35 }
 0x471   :  { %2465 = vtanh.f32 %v2022_v34  ;;  %2082 = vst [vmem:[#allocation5] sm:$0x3] %v2022_v34  ;;  %v2227_v37 = vmul.f32 -1.442695, %v2048_v36  ;;  %v2057_v38 = vrot.slane %v2048_v36, 2  ;;  %v2068_v6 = vrot.slane %v2048_v36, 6 }
 0x472   :  { %v2065_v7 = vrot.slane %v2048_v36, 4 }
 0x473   :  { %2467 = vpow2.f32 %v2227_v37  ;;  %v2228_v41 = vmul.f32 -1.442695, %v2057_v38  ;;  %v2229_v14 = vmul.f32 -1.442695, %v2068_v6 }
 0x475   :  { %2469 = vpow2.f32 %v2228_v41 }
 0x476   :  { %2471 = vpow2.f32 %v2229_v14 }
 0x47b   :  { %v2466_v45 = vpop.eup %2465 }
 0x47c   :  { %v2024_v16 = vmul.f32 %v2466_v45, %v2464_v44 }
 0x47d   :  { %v2468_v55 = vpop.eup %2467 }
 0x47e   :  { %2081 = vst [vmem:[#allocation4] sm:$0x3] %v2024_v16  ;;  %v2085_v50 = vpack.c.bf16 %v2024_v16, %v2024_v16  ;;  %v2053_v51 = vadd.f32 1.0, %v2468_v55 }
 0x47f   :  { %v2470_v53 = vpop.eup %2469 }
 0x480   :  { %2230 = vst [vmem:[%s3523_s8 + $0x3] sm:$0x1] %v2085_v50  ;;  %2473 = vrcp.f32 %v2053_v51  ;;  %v2062_v40 = vadd.f32 1.0, %v2470_v53  ;;  %v2472_v52 = vpop.eup %2471 }
 0x481   :  { %2475 = vtanh.f32 %v2065_v7  ;;  %v2073_v13 = vadd.f32 1.0, %v2472_v52 }
 0x482   :  { %2477 = vrcp.f32 %v2062_v40 }
 0x483   :  { %2479 = vrcp.f32 %v2073_v13 }
 0x48a   :  { %v2474_v59 = vpop.eup %2473 }
 0x48b   :  { %v2476_v63 = vpop.eup %2475 }
 0x48c   :  { %v2478_v62 = vpop.eup %2477  ;;  %v2077_v8 = vmul.f32 %v2476_v63, %v2474_v59 }
 0x48d   :  { %v2076_v9 = vmul.f32 %v2478_v62, %v2049_v57  ;;  %v2480_v54 = vpop.eup %2479 }
 0x48f   :  { %v2078_v0 = vadd.f32 %v2077_v8, %v2076_v9 }
 0x491   :  { %2481 = vtanh.f32 %v2078_v0  ;;  %2084 = vst [vmem:[#allocation7] sm:$0x3] %v2078_v0 }
 0x49b   :  { %v2482_v1 = vpop.eup %2481 }
 0x49c   :  { %v2080_v4 = vmul.f32 %v2482_v1, %v2480_v54 }
 0x49e   :  { %2083 = vst [vmem:[#allocation6] sm:$0x3] %v2080_v4  ;;  %v2088_v5 = vpack.c.bf16 %v2080_v4, %v2080_v4 }
 0x4a0   :  { %2089 = vst [vmem:[%s3524_s9] sm:$0x1] %v2088_v5 }

</bundles_post_ra>
